<compile_context>
chip_gen: v5e
topology: v5e:2x2
jax: 0.10.0
libtpu: 0.0.40
codegen_flags: <defaults>
</compile_context>

<pallas_src>
import jax
import jax.numpy as jnp
from jax import lax
from jax.experimental import pallas as pl
from jax.experimental.pallas import tpu as pltpu


# ---------------------------------------------------------------------------
# Fused kernel.
#   x3:   (K, P, C) f32   K = pixels per pooling bin, P = 16*N rows ordered
#                         [spatial-bin s][sample n] (row = s*N + n)
#   wct:  (C, 128)  bf16  1x1 conv weight transposed
#   gamma, beta: (1, 128) f32
#   w1r:  (16, 128, 1024) bf16  fc1 weight regrouped per spatial bin so the
#                               channel-major flatten needs no transpose
#   b1:   (1, 1024) f32
#   u:    (N, 1024) f32   U[0,1) dropout uniforms (host-side RNG)
#   w2t:  (1024, 128) bf16  fc2 weight transposed, zero-padded to 128 classes
#   b2:   (1, 128) f32      zero-padded
#   out:  (N, 128)  f32     lane-dense; wrapper slices [:, :num_class]
# ---------------------------------------------------------------------------
def _inception_aux_kernel(x_ref, wct_ref, gamma_ref, beta_ref,
                          w1r_ref, b1_ref, u_ref, w2t_ref, b2_ref, o_ref):
    K = x_ref.shape[0]
    P = x_ref.shape[1]
    N = o_ref.shape[0]

    # ---- adaptive avg pool (4,4): mean over the K intra-bin pixels (VPU adds) --
    pooled = jnp.sum(x_ref[...], axis=0) * (1.0 / K)                 # (P, C) f32

    # ---- 1x1 conv (bias-free) == channel matmul on the MXU (bf16 operands) ----
    conv = jnp.dot(pooled.astype(jnp.bfloat16), wct_ref[...],
                   preferred_element_type=jnp.float32)               # (P, 128)

    # ---- BatchNorm2d, training mode: one-pass batch stats over all P rows -----
    s1 = jnp.sum(conv, axis=0, keepdims=True)                        # (1, 128)
    s2 = jnp.sum(conv * conv, axis=0, keepdims=True)                 # (1, 128)
    mu = s1 * (1.0 / P)
    var = s2 * (1.0 / P) - mu * mu                                   # biased var
    y = gamma_ref[...] * ((conv - mu) * lax.rsqrt(var + 1e-5)) + beta_ref[...]
    y = jnp.maximum(y, 0.0)                                          # ReLU (P,128)

    # ---- fc1: PyTorch x.view(N, -1) (feature = c*16 + s) folded into w1r ------
    # h[n, :] = sum_s y[s*N + n, :] @ w1r[s]   (16 static MXU matmuls)
    h = jnp.zeros((N, 1024), jnp.float32)
    for s in range(16):
        ys = y[s * N:(s + 1) * N, :].astype(jnp.bfloat16)            # (N, 128)
        h = h + jnp.dot(ys, w1r_ref[s], preferred_element_type=jnp.float32)
    h = jnp.maximum(h + b1_ref[...], 0.0)                            # bias + ReLU

    # ---- dropout(p=0.7), training mode ----------------------------------------
    # TODO(synk): use pltpu.prng_seed/prng_random_bits for in-kernel RNG on real
    # TPU; host-side uniforms are used because those primitives do not lower on
    # the CPU/interpret path.
    keep = u_ref[...] >= 0.7
    h = jnp.where(keep, h * (1.0 / 0.3), 0.0)

    # ---- fc2 (lane-dense 128-wide output; wrapper slices num_class) -----------
    o_ref[...] = jnp.dot(h.astype(jnp.bfloat16), w2t_ref[...],
                         preferred_element_type=jnp.float32) + b2_ref[...]


# ---------------------------------------------------------------------------
# Wrapper
# ---------------------------------------------------------------------------
def inception_aux_forward(x, params, *, dropout_seed=0):
    """x: (N, C, H, W) float32, NCHW like PyTorch."""
    N, C, H, W = x.shape
    # TODO(synk): general adaptive_avg_pool2d (e.g. 14x14 input) needs uneven,
    # possibly overlapping bins; only the exact divisible case is implemented.
    assert H % 4 == 0 and W % 4 == 0, "exact adaptive pooling needs H,W % 4 == 0"
    hs, ws = H // 4, W // 4
    K = hs * ws          # pixels per pooling bin
    P = 16 * N           # (spatial-bin, sample) rows

    conv_w = params["conv_w"]      # (128, C)
    gamma = params["bn_gamma"]     # (128,)
    beta = params["bn_beta"]       # (128,)
    w1 = params["fc1_w"]           # (1024, 2048)
    b1 = params["fc1_b"]           # (1024,)
    w2 = params["fc2_w"]           # (NC, 1024)
    b2 = params["fc2_b"]           # (NC,)
    num_class = w2.shape[0]
    assert num_class <= 128, "kernel pads the class dim to one 128-lane tile"

    # --- layout: (N,C,H,W) -> (K, P, C); k = ih*ws + jw, row = (i*4+j)*N + n ---
    x6 = x.reshape(N, C, 4, hs, 4, ws)                       # (n, c, i, ih, j, jw)
    x3 = jnp.transpose(x6, (3, 5, 2, 4, 0, 1)).reshape(K, P, C).astype(jnp.float32)

    wct = conv_w.T.astype(jnp.bfloat16)                      # (C, 128)
    gamma2d = gamma.reshape(1, 128).astype(jnp.float32)
    beta2d = beta.reshape(1, 128).astype(jnp.float32)

    # fc1 weight: input feature f = c*16 + s  ->  regroup to (s, c, out)
    w1r = jnp.transpose(w1.reshape(1024, 128, 16), (2, 1, 0)).astype(jnp.bfloat16)
    b1_2d = b1.reshape(1, 1024).astype(jnp.float32)

    # fc2: transpose and zero-pad the class dim to a full 128-lane tile.
    w2t = jnp.zeros((1024, 128), jnp.float32).at[:, :num_class].set(
        w2.T.astype(jnp.float32)).astype(jnp.bfloat16)
    b2_2d = jnp.zeros((1, 128), jnp.float32).at[:, :num_class].set(
        b2.astype(jnp.float32))

    # dropout uniforms (host-side RNG; distribution matches F.dropout p=0.7)
    u = jax.random.uniform(jax.random.PRNGKey(dropout_seed), (N, 1024), jnp.float32)

    vmem = pl.BlockSpec(memory_space=pltpu.MemorySpace.VMEM)

    out_pad = pl.pallas_call(
        _inception_aux_kernel,
        out_shape=jax.ShapeDtypeStruct((N, 128), jnp.float32),
        in_specs=[vmem] * 9,
        out_specs=vmem,
        compiler_params=pltpu.CompilerParams(vmem_limit_bytes=32 * 1024 * 1024),
    )(x3, wct, gamma2d, beta2d, w1r, b1_2d, u, w2t, b2_2d)

    return out_pad[:, :num_class]


def init_params(key, in_channels, num_class):
    k1, k2, k3, k4, k5 = jax.random.split(key, 5)
    return {
        "conv_w": 0.1 * jax.random.normal(k1, (128, in_channels), jnp.float32),
        "bn_gamma": jnp.ones((128,), jnp.float32),
        "bn_beta": jnp.zeros((128,), jnp.float32),
        "fc1_w": 0.02 * jax.random.normal(k2, (1024, 2048), jnp.float32),
        "fc1_b": 0.01 * jax.random.normal(k3, (1024,), jnp.float32),
        "fc2_w": 0.02 * jax.random.normal(k4, (num_class, 1024), jnp.float32),
        "fc2_b": 0.01 * jax.random.normal(k5, (num_class,), jnp.float32),
    }


if __name__ == "__main__":
    key = jax.random.PRNGKey(0)
    kx, kp = jax.random.split(key)

    N, C, H, W = 2, 4, 16, 16
    num_class = 10

    x = jax.random.normal(kx, (N, C, H, W), jnp.float32)
    params = init_params(kp, C, num_class)

    out = inception_aux_forward(x, params, dropout_seed=0)
    out = jax.block_until_ready(out)

    assert out.shape == (N, num_class), out.shape
    assert bool(jnp.all(jnp.isfinite(out)))
    print("KERNEL_OK")
</pallas_src>

<mosaic_0001>
module attributes {stable_mosaic.version = 11 : i64} {
  func.func @_inception_aux_kernel(%arg0: memref<16x32x4xf32, #tpu.memory_space<vmem>>, %arg1: memref<4x128xbf16, #tpu.memory_space<vmem>>, %arg2: memref<1x128xf32, #tpu.memory_space<vmem>>, %arg3: memref<1x128xf32, #tpu.memory_space<vmem>>, %arg4: memref<16x128x1024xbf16, #tpu.memory_space<vmem>>, %arg5: memref<1x1024xf32, #tpu.memory_space<vmem>>, %arg6: memref<2x1024xf32, #tpu.memory_space<vmem>>, %arg7: memref<1024x128xbf16, #tpu.memory_space<vmem>>, %arg8: memref<1x128xf32, #tpu.memory_space<vmem>>, %arg9: memref<2x128xf32, #tpu.memory_space<vmem>>) attributes {dimension_semantics = [], scalar_prefetch = 0 : i64, scratch_operands = 0 : i64, tpu.core_type = #tpu.core_type<tc>} {
    %c0 = arith.constant 0 : index
    %c0_0 = arith.constant 0 : index
    %c0_1 = arith.constant 0 : index
    %0 = vector.load %arg0[%c0, %c0_0, %c0_1] : memref<16x32x4xf32, #tpu.memory_space<vmem>>, vector<16x32x4xf32>
    %cst = arith.constant dense<0.000000e+00> : vector<32x4xf32>
    %1 = vector.multi_reduction <add>, %0, %cst [0] : vector<16x32x4xf32> to vector<32x4xf32>
    %cst_2 = arith.constant 6.250000e-02 : f32
    %2 = vector.broadcast %cst_2 : f32 to vector<32x4xf32>
    %3 = arith.mulf %1, %2 : vector<32x4xf32>
    %4 = arith.truncf %3 : vector<32x4xf32> to vector<32x4xbf16>
    %c0_3 = arith.constant 0 : index
    %c0_4 = arith.constant 0 : index
    %5 = vector.load %arg1[%c0_3, %c0_4] : memref<4x128xbf16, #tpu.memory_space<vmem>>, vector<4x128xbf16>
    %cst_5 = arith.constant dense<0.000000e+00> : vector<32x128xf32>
    %6 = tpu.matmul %4, %5, %cst_5 {dimension_numbers = #tpu.dot_dimension_numbers<[1], [0], [0], [1], [0, 0, 1, 1], [], []>} : vector<32x4xbf16>, vector<4x128xbf16>, vector<32x128xf32> -> vector<32x128xf32>
    %cst_6 = arith.constant dense<0.000000e+00> : vector<128xf32>
    %7 = vector.multi_reduction <add>, %6, %cst_6 [0] : vector<32x128xf32> to vector<128xf32>
    %8 = vector.shape_cast %7 : vector<128xf32> to vector<1x128xf32>
    %9 = arith.mulf %6, %6 : vector<32x128xf32>
    %cst_7 = arith.constant dense<0.000000e+00> : vector<128xf32>
    %10 = vector.multi_reduction <add>, %9, %cst_7 [0] : vector<32x128xf32> to vector<128xf32>
    %11 = vector.shape_cast %10 : vector<128xf32> to vector<1x128xf32>
    %cst_8 = arith.constant 3.125000e-02 : f32
    %12 = vector.broadcast %cst_8 : f32 to vector<1x128xf32>
    %13 = arith.mulf %8, %12 : vector<1x128xf32>
    %cst_9 = arith.constant 3.125000e-02 : f32
    %14 = vector.broadcast %cst_9 : f32 to vector<1x128xf32>
    %15 = arith.mulf %11, %14 : vector<1x128xf32>
    %16 = arith.mulf %13, %13 : vector<1x128xf32>
    %17 = arith.subf %15, %16 : vector<1x128xf32>
    %c0_10 = arith.constant 0 : index
    %c0_11 = arith.constant 0 : index
    %18 = vector.load %arg2[%c0_10, %c0_11] : memref<1x128xf32, #tpu.memory_space<vmem>>, vector<1x128xf32>
    %19 = vector.broadcast %13 : vector<1x128xf32> to vector<32x128xf32>
    %20 = arith.subf %6, %19 : vector<32x128xf32>
    %cst_12 = arith.constant 9.99999974E-6 : f32
    %21 = vector.broadcast %cst_12 : f32 to vector<1x128xf32>
    %22 = arith.addf %17, %21 : vector<1x128xf32>
    %23 = math.rsqrt %22 : vector<1x128xf32>
    %24 = vector.broadcast %23 : vector<1x128xf32> to vector<32x128xf32>
    %25 = arith.mulf %20, %24 : vector<32x128xf32>
    %26 = vector.broadcast %18 : vector<1x128xf32> to vector<32x128xf32>
    %27 = arith.mulf %26, %25 : vector<32x128xf32>
    %c0_13 = arith.constant 0 : index
    %c0_14 = arith.constant 0 : index
    %28 = vector.load %arg3[%c0_13, %c0_14] : memref<1x128xf32, #tpu.memory_space<vmem>>, vector<1x128xf32>
    %29 = vector.broadcast %28 : vector<1x128xf32> to vector<32x128xf32>
    %30 = arith.addf %27, %29 : vector<32x128xf32>
    %cst_15 = arith.constant 0.000000e+00 : f32
    %31 = vector.broadcast %cst_15 : f32 to vector<32x128xf32>
    %32 = arith.maximumf %30, %31 : vector<32x128xf32>
    %cst_16 = arith.constant 0.000000e+00 : f32
    %33 = vector.broadcast %cst_16 : f32 to vector<2x1024xf32>
    %34 = vector.extract_strided_slice %32 {offsets = [0, 0], sizes = [2, 128], strides = [1, 1]} : vector<32x128xf32> to vector<2x128xf32>
    %35 = arith.truncf %34 : vector<2x128xf32> to vector<2x128xbf16>
    %c0_17 = arith.constant 0 : index
    %c0_18 = arith.constant 0 : index
    %c0_19 = arith.constant 0 : index
    %36 = vector.load %arg4[%c0_17, %c0_18, %c0_19] : memref<16x128x1024xbf16, #tpu.memory_space<vmem>>, vector<1x128x1024xbf16>
    %37 = vector.shape_cast %36 : vector<1x128x1024xbf16> to vector<128x1024xbf16>
    %cst_20 = arith.constant dense<0.000000e+00> : vector<2x1024xf32>
    %38 = tpu.matmul %35, %37, %cst_20 {dimension_numbers = #tpu.dot_dimension_numbers<[1], [0], [0], [1], [0, 0, 1, 1], [], []>} : vector<2x128xbf16>, vector<128x1024xbf16>, vector<2x1024xf32> -> vector<2x1024xf32>
    %39 = arith.addf %33, %38 : vector<2x1024xf32>
    %40 = vector.extract_strided_slice %32 {offsets = [2, 0], sizes = [2, 128], strides = [1, 1]} : vector<32x128xf32> to vector<2x128xf32>
    %41 = arith.truncf %40 : vector<2x128xf32> to vector<2x128xbf16>
    %c1 = arith.constant 1 : index
    %c0_21 = arith.constant 0 : index
    %c0_22 = arith.constant 0 : index
    %42 = vector.load %arg4[%c1, %c0_21, %c0_22] : memref<16x128x1024xbf16, #tpu.memory_space<vmem>>, vector<1x128x1024xbf16>
    %43 = vector.shape_cast %42 : vector<1x128x1024xbf16> to vector<128x1024xbf16>
    %cst_23 = arith.constant dense<0.000000e+00> : vector<2x1024xf32>
    %44 = tpu.matmul %41, %43, %cst_23 {dimension_numbers = #tpu.dot_dimension_numbers<[1], [0], [0], [1], [0, 0, 1, 1], [], []>} : vector<2x128xbf16>, vector<128x1024xbf16>, vector<2x1024xf32> -> vector<2x1024xf32>
    %45 = arith.addf %39, %44 : vector<2x1024xf32>
    %46 = vector.extract_strided_slice %32 {offsets = [4, 0], sizes = [2, 128], strides = [1, 1]} : vector<32x128xf32> to vector<2x128xf32>
    %47 = arith.truncf %46 : vector<2x128xf32> to vector<2x128xbf16>
    %c2 = arith.constant 2 : index
    %c0_24 = arith.constant 0 : index
    %c0_25 = arith.constant 0 : index
    %48 = vector.load %arg4[%c2, %c0_24, %c0_25] : memref<16x128x1024xbf16, #tpu.memory_space<vmem>>, vector<1x128x1024xbf16>
    %49 = vector.shape_cast %48 : vector<1x128x1024xbf16> to vector<128x1024xbf16>
    %cst_26 = arith.constant dense<0.000000e+00> : vector<2x1024xf32>
    %50 = tpu.matmul %47, %49, %cst_26 {dimension_numbers = #tpu.dot_dimension_numbers<[1], [0], [0], [1], [0, 0, 1, 1], [], []>} : vector<2x128xbf16>, vector<128x1024xbf16>, vector<2x1024xf32> -> vector<2x1024xf32>
    %51 = arith.addf %45, %50 : vector<2x1024xf32>
    %52 = vector.extract_strided_slice %32 {offsets = [6, 0], sizes = [2, 128], strides = [1, 1]} : vector<32x128xf32> to vector<2x128xf32>
    %53 = arith.truncf %52 : vector<2x128xf32> to vector<2x128xbf16>
    %c3 = arith.constant 3 : index
    %c0_27 = arith.constant 0 : index
    %c0_28 = arith.constant 0 : index
    %54 = vector.load %arg4[%c3, %c0_27, %c0_28] : memref<16x128x1024xbf16, #tpu.memory_space<vmem>>, vector<1x128x1024xbf16>
    %55 = vector.shape_cast %54 : vector<1x128x1024xbf16> to vector<128x1024xbf16>
    %cst_29 = arith.constant dense<0.000000e+00> : vector<2x1024xf32>
    %56 = tpu.matmul %53, %55, %cst_29 {dimension_numbers = #tpu.dot_dimension_numbers<[1], [0], [0], [1], [0, 0, 1, 1], [], []>} : vector<2x128xbf16>, vector<128x1024xbf16>, vector<2x1024xf32> -> vector<2x1024xf32>
    %57 = arith.addf %51, %56 : vector<2x1024xf32>
    %58 = vector.extract_strided_slice %32 {offsets = [8, 0], sizes = [2, 128], strides = [1, 1]} : vector<32x128xf32> to vector<2x128xf32>
    %59 = arith.truncf %58 : vector<2x128xf32> to vector<2x128xbf16>
    %c4 = arith.constant 4 : index
    %c0_30 = arith.constant 0 : index
    %c0_31 = arith.constant 0 : index
    %60 = vector.load %arg4[%c4, %c0_30, %c0_31] : memref<16x128x1024xbf16, #tpu.memory_space<vmem>>, vector<1x128x1024xbf16>
    %61 = vector.shape_cast %60 : vector<1x128x1024xbf16> to vector<128x1024xbf16>
    %cst_32 = arith.constant dense<0.000000e+00> : vector<2x1024xf32>
    %62 = tpu.matmul %59, %61, %cst_32 {dimension_numbers = #tpu.dot_dimension_numbers<[1], [0], [0], [1], [0, 0, 1, 1], [], []>} : vector<2x128xbf16>, vector<128x1024xbf16>, vector<2x1024xf32> -> vector<2x1024xf32>
    %63 = arith.addf %57, %62 : vector<2x1024xf32>
    %64 = vector.extract_strided_slice %32 {offsets = [10, 0], sizes = [2, 128], strides = [1, 1]} : vector<32x128xf32> to vector<2x128xf32>
    %65 = arith.truncf %64 : vector<2x128xf32> to vector<2x128xbf16>
    %c5 = arith.constant 5 : index
    %c0_33 = arith.constant 0 : index
    %c0_34 = arith.constant 0 : index
    %66 = vector.load %arg4[%c5, %c0_33, %c0_34] : memref<16x128x1024xbf16, #tpu.memory_space<vmem>>, vector<1x128x1024xbf16>
    %67 = vector.shape_cast %66 : vector<1x128x1024xbf16> to vector<128x1024xbf16>
    %cst_35 = arith.constant dense<0.000000e+00> : vector<2x1024xf32>
    %68 = tpu.matmul %65, %67, %cst_35 {dimension_numbers = #tpu.dot_dimension_numbers<[1], [0], [0], [1], [0, 0, 1, 1], [], []>} : vector<2x128xbf16>, vector<128x1024xbf16>, vector<2x1024xf32> -> vector<2x1024xf32>
    %69 = arith.addf %63, %68 : vector<2x1024xf32>
    %70 = vector.extract_strided_slice %32 {offsets = [12, 0], sizes = [2, 128], strides = [1, 1]} : vector<32x128xf32> to vector<2x128xf32>
    %71 = arith.truncf %70 : vector<2x128xf32> to vector<2x128xbf16>
    %c6 = arith.constant 6 : index
    %c0_36 = arith.constant 0 : index
    %c0_37 = arith.constant 0 : index
    %72 = vector.load %arg4[%c6, %c0_36, %c0_37] : memref<16x128x1024xbf16, #tpu.memory_space<vmem>>, vector<1x128x1024xbf16>
    %73 = vector.shape_cast %72 : vector<1x128x1024xbf16> to vector<128x1024xbf16>
    %cst_38 = arith.constant dense<0.000000e+00> : vector<2x1024xf32>
    %74 = tpu.matmul %71, %73, %cst_38 {dimension_numbers = #tpu.dot_dimension_numbers<[1], [0], [0], [1], [0, 0, 1, 1], [], []>} : vector<2x128xbf16>, vector<128x1024xbf16>, vector<2x1024xf32> -> vector<2x1024xf32>
    %75 = arith.addf %69, %74 : vector<2x1024xf32>
    %76 = vector.extract_strided_slice %32 {offsets = [14, 0], sizes = [2, 128], strides = [1, 1]} : vector<32x128xf32> to vector<2x128xf32>
    %77 = arith.truncf %76 : vector<2x128xf32> to vector<2x128xbf16>
    %c7 = arith.constant 7 : index
    %c0_39 = arith.constant 0 : index
    %c0_40 = arith.constant 0 : index
    %78 = vector.load %arg4[%c7, %c0_39, %c0_40] : memref<16x128x1024xbf16, #tpu.memory_space<vmem>>, vector<1x128x1024xbf16>
    %79 = vector.shape_cast %78 : vector<1x128x1024xbf16> to vector<128x1024xbf16>
    %cst_41 = arith.constant dense<0.000000e+00> : vector<2x1024xf32>
    %80 = tpu.matmul %77, %79, %cst_41 {dimension_numbers = #tpu.dot_dimension_numbers<[1], [0], [0], [1], [0, 0, 1, 1], [], []>} : vector<2x128xbf16>, vector<128x1024xbf16>, vector<2x1024xf32> -> vector<2x1024xf32>
    %81 = arith.addf %75, %80 : vector<2x1024xf32>
    %82 = vector.extract_strided_slice %32 {offsets = [16, 0], sizes = [2, 128], strides = [1, 1]} : vector<32x128xf32> to vector<2x128xf32>
    %83 = arith.truncf %82 : vector<2x128xf32> to vector<2x128xbf16>
    %c8 = arith.constant 8 : index
    %c0_42 = arith.constant 0 : index
    %c0_43 = arith.constant 0 : index
    %84 = vector.load %arg4[%c8, %c0_42, %c0_43] : memref<16x128x1024xbf16, #tpu.memory_space<vmem>>, vector<1x128x1024xbf16>
    %85 = vector.shape_cast %84 : vector<1x128x1024xbf16> to vector<128x1024xbf16>
    %cst_44 = arith.constant dense<0.000000e+00> : vector<2x1024xf32>
    %86 = tpu.matmul %83, %85, %cst_44 {dimension_numbers = #tpu.dot_dimension_numbers<[1], [0], [0], [1], [0, 0, 1, 1], [], []>} : vector<2x128xbf16>, vector<128x1024xbf16>, vector<2x1024xf32> -> vector<2x1024xf32>
    %87 = arith.addf %81, %86 : vector<2x1024xf32>
    %88 = vector.extract_strided_slice %32 {offsets = [18, 0], sizes = [2, 128], strides = [1, 1]} : vector<32x128xf32> to vector<2x128xf32>
    %89 = arith.truncf %88 : vector<2x128xf32> to vector<2x128xbf16>
    %c9 = arith.constant 9 : index
    %c0_45 = arith.constant 0 : index
    %c0_46 = arith.constant 0 : index
    %90 = vector.load %arg4[%c9, %c0_45, %c0_46] : memref<16x128x1024xbf16, #tpu.memory_space<vmem>>, vector<1x128x1024xbf16>
    %91 = vector.shape_cast %90 : vector<1x128x1024xbf16> to vector<128x1024xbf16>
    %cst_47 = arith.constant dense<0.000000e+00> : vector<2x1024xf32>
    %92 = tpu.matmul %89, %91, %cst_47 {dimension_numbers = #tpu.dot_dimension_numbers<[1], [0], [0], [1], [0, 0, 1, 1], [], []>} : vector<2x128xbf16>, vector<128x1024xbf16>, vector<2x1024xf32> -> vector<2x1024xf32>
    %93 = arith.addf %87, %92 : vector<2x1024xf32>
    %94 = vector.extract_strided_slice %32 {offsets = [20, 0], sizes = [2, 128], strides = [1, 1]} : vector<32x128xf32> to vector<2x128xf32>
    %95 = arith.truncf %94 : vector<2x128xf32> to vector<2x128xbf16>
    %c10 = arith.constant 10 : index
    %c0_48 = arith.constant 0 : index
    %c0_49 = arith.constant 0 : index
    %96 = vector.load %arg4[%c10, %c0_48, %c0_49] : memref<16x128x1024xbf16, #tpu.memory_space<vmem>>, vector<1x128x1024xbf16>
    %97 = vector.shape_cast %96 : vector<1x128x1024xbf16> to vector<128x1024xbf16>
    %cst_50 = arith.constant dense<0.000000e+00> : vector<2x1024xf32>
    %98 = tpu.matmul %95, %97, %cst_50 {dimension_numbers = #tpu.dot_dimension_numbers<[1], [0], [0], [1], [0, 0, 1, 1], [], []>} : vector<2x128xbf16>, vector<128x1024xbf16>, vector<2x1024xf32> -> vector<2x1024xf32>
    %99 = arith.addf %93, %98 : vector<2x1024xf32>
    %100 = vector.extract_strided_slice %32 {offsets = [22, 0], sizes = [2, 128], strides = [1, 1]} : vector<32x128xf32> to vector<2x128xf32>
    %101 = arith.truncf %100 : vector<2x128xf32> to vector<2x128xbf16>
    %c11 = arith.constant 11 : index
    %c0_51 = arith.constant 0 : index
    %c0_52 = arith.constant 0 : index
    %102 = vector.load %arg4[%c11, %c0_51, %c0_52] : memref<16x128x1024xbf16, #tpu.memory_space<vmem>>, vector<1x128x1024xbf16>
    %103 = vector.shape_cast %102 : vector<1x128x1024xbf16> to vector<128x1024xbf16>
    %cst_53 = arith.constant dense<0.000000e+00> : vector<2x1024xf32>
    %104 = tpu.matmul %101, %103, %cst_53 {dimension_numbers = #tpu.dot_dimension_numbers<[1], [0], [0], [1], [0, 0, 1, 1], [], []>} : vector<2x128xbf16>, vector<128x1024xbf16>, vector<2x1024xf32> -> vector<2x1024xf32>
    %105 = arith.addf %99, %104 : vector<2x1024xf32>
    %106 = vector.extract_strided_slice %32 {offsets = [24, 0], sizes = [2, 128], strides = [1, 1]} : vector<32x128xf32> to vector<2x128xf32>
    %107 = arith.truncf %106 : vector<2x128xf32> to vector<2x128xbf16>
    %c12 = arith.constant 12 : index
    %c0_54 = arith.constant 0 : index
    %c0_55 = arith.constant 0 : index
    %108 = vector.load %arg4[%c12, %c0_54, %c0_55] : memref<16x128x1024xbf16, #tpu.memory_space<vmem>>, vector<1x128x1024xbf16>
    %109 = vector.shape_cast %108 : vector<1x128x1024xbf16> to vector<128x1024xbf16>
    %cst_56 = arith.constant dense<0.000000e+00> : vector<2x1024xf32>
    %110 = tpu.matmul %107, %109, %cst_56 {dimension_numbers = #tpu.dot_dimension_numbers<[1], [0], [0], [1], [0, 0, 1, 1], [], []>} : vector<2x128xbf16>, vector<128x1024xbf16>, vector<2x1024xf32> -> vector<2x1024xf32>
    %111 = arith.addf %105, %110 : vector<2x1024xf32>
    %112 = vector.extract_strided_slice %32 {offsets = [26, 0], sizes = [2, 128], strides = [1, 1]} : vector<32x128xf32> to vector<2x128xf32>
    %113 = arith.truncf %112 : vector<2x128xf32> to vector<2x128xbf16>
    %c13 = arith.constant 13 : index
    %c0_57 = arith.constant 0 : index
    %c0_58 = arith.constant 0 : index
    %114 = vector.load %arg4[%c13, %c0_57, %c0_58] : memref<16x128x1024xbf16, #tpu.memory_space<vmem>>, vector<1x128x1024xbf16>
    %115 = vector.shape_cast %114 : vector<1x128x1024xbf16> to vector<128x1024xbf16>
    %cst_59 = arith.constant dense<0.000000e+00> : vector<2x1024xf32>
    %116 = tpu.matmul %113, %115, %cst_59 {dimension_numbers = #tpu.dot_dimension_numbers<[1], [0], [0], [1], [0, 0, 1, 1], [], []>} : vector<2x128xbf16>, vector<128x1024xbf16>, vector<2x1024xf32> -> vector<2x1024xf32>
    %117 = arith.addf %111, %116 : vector<2x1024xf32>
    %118 = vector.extract_strided_slice %32 {offsets = [28, 0], sizes = [2, 128], strides = [1, 1]} : vector<32x128xf32> to vector<2x128xf32>
    %119 = arith.truncf %118 : vector<2x128xf32> to vector<2x128xbf16>
    %c14 = arith.constant 14 : index
    %c0_60 = arith.constant 0 : index
    %c0_61 = arith.constant 0 : index
    %120 = vector.load %arg4[%c14, %c0_60, %c0_61] : memref<16x128x1024xbf16, #tpu.memory_space<vmem>>, vector<1x128x1024xbf16>
    %121 = vector.shape_cast %120 : vector<1x128x1024xbf16> to vector<128x1024xbf16>
    %cst_62 = arith.constant dense<0.000000e+00> : vector<2x1024xf32>
    %122 = tpu.matmul %119, %121, %cst_62 {dimension_numbers = #tpu.dot_dimension_numbers<[1], [0], [0], [1], [0, 0, 1, 1], [], []>} : vector<2x128xbf16>, vector<128x1024xbf16>, vector<2x1024xf32> -> vector<2x1024xf32>
    %123 = arith.addf %117, %122 : vector<2x1024xf32>
    %124 = vector.extract_strided_slice %32 {offsets = [30, 0], sizes = [2, 128], strides = [1, 1]} : vector<32x128xf32> to vector<2x128xf32>
    %125 = arith.truncf %124 : vector<2x128xf32> to vector<2x128xbf16>
    %c15 = arith.constant 15 : index
    %c0_63 = arith.constant 0 : index
    %c0_64 = arith.constant 0 : index
    %126 = vector.load %arg4[%c15, %c0_63, %c0_64] : memref<16x128x1024xbf16, #tpu.memory_space<vmem>>, vector<1x128x1024xbf16>
    %127 = vector.shape_cast %126 : vector<1x128x1024xbf16> to vector<128x1024xbf16>
    %cst_65 = arith.constant dense<0.000000e+00> : vector<2x1024xf32>
    %128 = tpu.matmul %125, %127, %cst_65 {dimension_numbers = #tpu.dot_dimension_numbers<[1], [0], [0], [1], [0, 0, 1, 1], [], []>} : vector<2x128xbf16>, vector<128x1024xbf16>, vector<2x1024xf32> -> vector<2x1024xf32>
    %129 = arith.addf %123, %128 : vector<2x1024xf32>
    %c0_66 = arith.constant 0 : index
    %c0_67 = arith.constant 0 : index
    %130 = vector.load %arg5[%c0_66, %c0_67] : memref<1x1024xf32, #tpu.memory_space<vmem>>, vector<1x1024xf32>
    %131 = vector.broadcast %130 : vector<1x1024xf32> to vector<2x1024xf32>
    %132 = arith.addf %129, %131 : vector<2x1024xf32>
    %cst_68 = arith.constant 0.000000e+00 : f32
    %133 = vector.broadcast %cst_68 : f32 to vector<2x1024xf32>
    %134 = arith.maximumf %132, %133 : vector<2x1024xf32>
    %c0_69 = arith.constant 0 : index
    %c0_70 = arith.constant 0 : index
    %135 = vector.load %arg6[%c0_69, %c0_70] : memref<2x1024xf32, #tpu.memory_space<vmem>>, vector<2x1024xf32>
    %cst_71 = arith.constant 0.699999988 : f32
    %136 = vector.broadcast %cst_71 : f32 to vector<2x1024xf32>
    %137 = arith.cmpf oge, %135, %136 : vector<2x1024xf32>
    %cst_72 = arith.constant 3.33333325 : f32
    %138 = vector.broadcast %cst_72 : f32 to vector<2x1024xf32>
    %139 = arith.mulf %134, %138 : vector<2x1024xf32>
    %cst_73 = arith.constant 0.000000e+00 : f32
    %140 = vector.broadcast %cst_73 : f32 to vector<2x1024xf32>
    %141 = arith.select %137, %139, %140 : vector<2x1024xi1>, vector<2x1024xf32>
    %142 = arith.truncf %141 : vector<2x1024xf32> to vector<2x1024xbf16>
    %c0_74 = arith.constant 0 : index
    %c0_75 = arith.constant 0 : index
    %143 = vector.load %arg7[%c0_74, %c0_75] : memref<1024x128xbf16, #tpu.memory_space<vmem>>, vector<1024x128xbf16>
    %cst_76 = arith.constant dense<0.000000e+00> : vector<2x128xf32>
    %144 = tpu.matmul %142, %143, %cst_76 {dimension_numbers = #tpu.dot_dimension_numbers<[1], [0], [0], [1], [0, 0, 1, 1], [], []>} : vector<2x1024xbf16>, vector<1024x128xbf16>, vector<2x128xf32> -> vector<2x128xf32>
    %c0_77 = arith.constant 0 : index
    %c0_78 = arith.constant 0 : index
    %145 = vector.load %arg8[%c0_77, %c0_78] : memref<1x128xf32, #tpu.memory_space<vmem>>, vector<1x128xf32>
    %146 = vector.broadcast %145 : vector<1x128xf32> to vector<2x128xf32>
    %147 = arith.addf %144, %146 : vector<2x128xf32>
    %c0_79 = arith.constant 0 : index
    %c0_80 = arith.constant 0 : index
    %148 = vector.load %arg9[%c0_79, %c0_80] : memref<2x128xf32, #tpu.memory_space<vmem>>, vector<2x128xf32>
    tpu.vector_store %arg9[%c0_79, %c0_80], %147 {strides = array<i32>} : memref<2x128xf32, #tpu.memory_space<vmem>>, vector<2x128xf32>,
    return
  }
}

</mosaic_0001>

<bundles_post_ra>
// kernel: tpu_custom_call.1
= control target key start
LH: loop header
LB: loop body
LE: loop exit
PB: predicated region body
PF: predicated region fallthrough
CT: control target
= control target key end

     0   :  { %14 = vsyncpa [#allocation3], 0  ;;  %s15762_s0 = inlined_call_operand.vmem [shape: f32[16,32,4], index: 0, kind: input, shape index: {}]   ;;  %s15763_s1 = inlined_call_operand.hbm [shape: bf16[4,128], index: 1, kind: input, shape index: {}]   ;;  %s15764_s2 = inlined_call_operand.hbm [shape: f32[1,128], index: 2, kind: input, shape index: {}]   ;;  %s15765_s3 = inlined_call_operand.hbm [shape: f32[1,128], index: 3, kind: input, shape index: {}]   ;;  %s15766_s4 = inlined_call_operand.hbm [shape: bf16[16,128,1024], index: 4, kind: input, shape index: {}]   ;;  %s15767_s5 = inlined_call_operand.hbm [shape: f32[1,1024], index: 5, kind: input, shape index: {}]   ;;  %s15768_s6 = inlined_call_operand.hbm [shape: f32[2,1024], index: 6, kind: input, shape index: {}]   ;;  %s15769_s7 = inlined_call_operand.hbm [shape: bf16[1024,128], index: 7, kind: input, shape index: {}]   ;;  %s15770_s8 = inlined_call_operand.hbm [shape: f32[1,128], index: 8, kind: input, shape index: {}]   ;;  %s15771_s9 = inlined_call_operand.hbm [shape: f32[2,128], index: 9, kind: output, shape index: {}]  }
   0x1   :  { %15 = vsyncpa [#allocation6], 0 }
   0x2   :  { %16 = vsyncpa [#allocation9], 0 }
   0x3   :  { %17 = vsyncpa [#allocation12], 0 }
   0x4   :  { %18 = vsyncpa [#allocation15], 0  ;;  %s38_s11 = sshll.u32 %s15764_s2, 4  ;;  %s39_s11 = int_to_ptr.hbm [resolvable:$true] %s38_s11 }
   0x5   :  { %19 = vsyncpa [#allocation4], 0  ;;  %s14835_s12 = smov [#allocation5]   ;;  %s59_s16 = sshll.u32 %s15766_s4, 4  ;;  %s60_s16 = int_to_ptr.hbm [resolvable:$true] %s59_s16 }
   0x6   :  { %s40_s13 = sshll.u32 %s14835_s12, 4  ;;  %s14836_s17 = smov [#allocation8]   ;;  %s41_s13 = int_to_ptr.vmem [resolvable:$true] %s40_s13 }
   0x7   :  { %43 = dma.hbm_to_vmem [thread:$0]  %s39_s11, 16, %s41_s13, [#allocation6]  }
   0x8   :  { %s61_s18 = sshll.u32 %s14836_s17, 4  ;;  %s14837_s19 = smov 512   ;;  %s62_s18 = int_to_ptr.vmem [resolvable:$true] %s61_s18 }
   0x9   :  { %s14838_s20 = smov 32   ;;  %s84_s2 = sshll.u32 %s15768_s6, 4  ;;  %s85_s2 = int_to_ptr.hbm [resolvable:$true] %s84_s2 }
   0xa   :  { %67 = dma.hbm_to_vmem [thread:$0]  %s60_s16, 131072, %s62_s18, [#allocation9], %s14837_s19, %s14837_s19, %s14838_s20  }
   0xb   :  { %s14839_s23 = smov [#allocation11]   ;;  %s27_s4 = sshll.u32 %s15763_s1, 4  ;;  %s28_s4 = int_to_ptr.hbm [resolvable:$true] %s27_s4 }
   0xc   :  { %s86_s24 = sshll.u32 %s14839_s23, 4  ;;  %s14840_s27 = smov [#allocation2]   ;;  %s87_s24 = int_to_ptr.vmem [resolvable:$true] %s86_s24 }
   0xd   :  { %89 = dma.hbm_to_vmem [thread:$0]  %s85_s2, 256, %s87_s24, [#allocation12]  }
   0xe   :  { %s29_s28 = sshll.u32 %s14840_s27, 4  ;;  %s49_s10 = sshll.u32 %s15765_s3, 4  ;;  %s30_s28 = int_to_ptr.vmem [resolvable:$true] %s29_s28  ;;  %s50_s10 = int_to_ptr.hbm [resolvable:$true] %s49_s10 }
   0xf   :  { %32 = dma.hbm_to_vmem [thread:$0]  %s28_s4, 32, %s30_s28, [#allocation3]  }
  0x10   :  { %s73_s12 = sshll.u32 %s15767_s5, 4  ;;  %s14841_s13 = smov [#allocation7]   ;;  %s74_s12 = int_to_ptr.hbm [resolvable:$true] %s73_s12 }
  0x11   :  { %s51_s14 = sshll.u32 %s14841_s13, 4  ;;  %s14842_s1 = smov [#allocation10]   ;;  %s52_s14 = int_to_ptr.vmem [resolvable:$true] %s51_s14 }
  0x12   :  { %54 = dma.hbm_to_vmem [thread:$0]  %s50_s10, 16, %s52_s14, [#allocation6]  }
  0x13   :  { %s75_s15 = sshll.u32 %s14842_s1, 4  ;;  %s94_s18 = sshll.u32 %s15769_s7, 4  ;;  %s76_s15 = int_to_ptr.vmem [resolvable:$true] %s75_s15  ;;  %s95_s18 = int_to_ptr.hbm [resolvable:$true] %s94_s18 }
  0x14   :  { %78 = dma.hbm_to_vmem [thread:$0]  %s74_s12, 128, %s76_s15, [#allocation9]  }
  0x15   :  { %s14843_s3 = smov [#allocation13]   ;;  %s108_s5 = sshll.u32 %s15770_s8, 4  ;;  %s109_s5 = int_to_ptr.hbm [resolvable:$true] %s108_s5 }
  0x16   :  { %s96_s19 = sshll.u32 %s14843_s3, 4  ;;  %s14844_s22 = smov 64   ;;  %s97_s19 = int_to_ptr.vmem [resolvable:$true] %s96_s19 }
  0x17   :  { %s14845_s2 = smov 4   ;;  %s14846_s23 = smov [#allocation14]  }
  0x18   :  { %102 = dma.hbm_to_vmem [thread:$0]  %s95_s18, 8192, %s97_s19, [#allocation12], %s14844_s22, %s14844_s22, %s14845_s2  }
  0x19   :  { %s110_s24 = sshll.u32 %s14846_s23, 4  ;;  %s111_s24 = int_to_ptr.vmem [resolvable:$true] %s110_s24 }
  0x1a   :  { %113 = dma.hbm_to_vmem [thread:$0]  %s109_s5, 16, %s111_s24, [#allocation15]  }
  0x1b   :  { %14823 = dma.done.wait [#allocation3], 32  }
  0x1c   :  { %14824 = vsyncadd [#allocation3], 4294967264 }
  0x1d   :  { %14825 = dma.done.wait [#allocation6], 32  }
  0x1e   :  { %14826 = vsyncadd [#allocation6], 4294967264 }
  0x1f   :  { %14827 = dma.done.wait [#allocation9], 131200  }
  0x20   :  { %14828 = vsyncadd [#allocation9], 4294836096 }
  0x21   :  { %14829 = dma.done.wait [#allocation12], 8448  }
  0x22   :  { %14830 = vsyncadd [#allocation12], 4294958848 }
  0x23   :  { %14831 = dma.done.wait [#allocation15], 16  }
  0x24   :  { %14832 = vsyncadd [#allocation15], 4294967280  ;;  %vm349_vm0 = vcmask 1041408   ;;  %vm211_vm1 = vcmask 31744   ;;  %v342_v0 = vld [vmem:[#allocation2] sm:$0x3] }
  0x25   :  { %v147_v1 = vld [vmem:[%s15762_s0] sm:$0xff]  ;;  %v148_v2 = vld [vmem:[%s15762_s0 + $0x8] sm:$0xff]  ;;  %v351_v3 = vsel %vm349_vm0, %v342_v0, 0  ;;  %v149_v44 = vld [vmem:[%s15762_s0 + $0x10] sm:$0xff]  ;;  %vm8465_vm5 = vcmask 1045508   ;;  %vm8467_vm6 = vcmask 1043456  }
  0x26   :  { %v151_v4 = vld [vmem:[%s15762_s0 + $0x20] sm:$0xff]  ;;  %v152_v5 = vld [vmem:[%s15762_s0 + $0x28] sm:$0xff]  ;;  %v212_v7 = vsel %vm211_vm1, %v147_v1, 0.0  ;;  %v243_v8 = vsel %vm211_vm1, %v148_v2, 0.0  ;;  %360 = vmatpush.bf16.msra.mxu0 %v351_v3  ;;  %v153_v45 = vld [vmem:[%s15762_s0 + $0x30] sm:$0xff]  ;;  %v274_v54 = vsel %vm211_vm1, %v149_v44, 0.0 }
  0x27   :  { %v155_v6 = vld [vmem:[%s15762_s0 + $0x40] sm:$0xff]  ;;  %v156_v9 = vld [vmem:[%s15762_s0 + $0x48] sm:$0xff]  ;;  %v213_v12 = vsel %vm211_vm1, %v151_v4, 0.0  ;;  %v244_v14 = vsel %vm211_vm1, %v152_v5, 0.0  ;;  %v157_v48 = vld [vmem:[%s15762_s0 + $0x50] sm:$0xff]  ;;  %v275_v59 = vsel %vm211_vm1, %v153_v45, 0.0 }
  0x28   :  { %v159_v10 = vld [vmem:[%s15762_s0 + $0x60] sm:$0xff]  ;;  %v160_v11 = vld [vmem:[%s15762_s0 + $0x68] sm:$0xff]  ;;  %v215_v13 = vsel %vm211_vm1, %v155_v6, 0.0  ;;  %v214_v17 = vadd.f32 %v213_v12, %v212_v7  ;;  %v245_v18 = vadd.f32 %v244_v14, %v243_v8  ;;  %v246_v19 = vsel %vm211_vm1, %v156_v9, 0.0  ;;  %v161_v53 = vld [vmem:[%s15762_s0 + $0x70] sm:$0xff]  ;;  %s9133_s1 = sshll.u32 %s15771_s9, 4  ;;  %s9134_s1 = int_to_ptr.hbm [resolvable:$true] %s9133_s1 }
  0x29   :  { %v163_v15 = vld [vmem:[%s15762_s0 + $0x80] sm:$0xff]  ;;  %v164_v16 = vld [vmem:[%s15762_s0 + $0x88] sm:$0xff]  ;;  %v217_v20 = vsel %vm211_vm1, %v159_v10, 0.0  ;;  %v248_v21 = vsel %vm211_vm1, %v160_v11, 0.0  ;;  %v150_v58 = vld [vmem:[%s15762_s0 + $0x18] sm:$0xff]  ;;  %v277_v60 = vsel %vm211_vm1, %v157_v48, 0.0  ;;  %v276_v2 = vadd.f32 %v275_v59, %v274_v54 }
  0x2a   :  { %v167_v22 = vld [vmem:[%s15762_s0 + $0xa0] sm:$0xff]  ;;  %v168_v23 = vld [vmem:[%s15762_s0 + $0xa8] sm:$0xff]  ;;  %v216_v24 = vadd.f32 %v215_v13, %v214_v17  ;;  %v247_v25 = vadd.f32 %v246_v19, %v245_v18  ;;  %v219_v26 = vsel %vm211_vm1, %v163_v15, 0.0  ;;  %v250_v27 = vsel %vm211_vm1, %v164_v16, 0.0  ;;  %v154_v0 = vld [vmem:[%s15762_s0 + $0x38] sm:$0xff] }
  0x2b   :  { %v171_v28 = vld [vmem:[%s15762_s0 + $0xc0] sm:$0xff]  ;;  %v172_v29 = vld [vmem:[%s15762_s0 + $0xc8] sm:$0xff]  ;;  %v221_v32 = vsel %vm211_vm1, %v167_v22, 0.0  ;;  %v252_v33 = vsel %vm211_vm1, %v168_v23, 0.0  ;;  %v165_v1 = vld [vmem:[%s15762_s0 + $0x90] sm:$0xff]  ;;  %v279_v6 = vsel %vm211_vm1, %v161_v53, 0.0  ;;  %v278_v12 = vadd.f32 %v277_v60, %v276_v2 }
  0x2c   :  { %v218_v30 = vadd.f32 %v217_v20, %v216_v24  ;;  %v249_v31 = vadd.f32 %v248_v21, %v247_v25  ;;  %v175_v34 = vld [vmem:[%s15762_s0 + $0xe0] sm:$0xff]  ;;  %v176_v35 = vld [vmem:[%s15762_s0 + $0xe8] sm:$0xff]  ;;  %v223_v39 = vsel %vm211_vm1, %v171_v28, 0.0  ;;  %v254_v40 = vsel %vm211_vm1, %v172_v29, 0.0  ;;  %v158_v10 = vld [vmem:[%s15762_s0 + $0x58] sm:$0xff] }
  0x2d   :  { %v179_v38 = vld [vmem:[%s15762_s0 + $0x100] sm:$0xff]  ;;  %v180_v41 = vld [vmem:[%s15762_s0 + $0x108] sm:$0xff]  ;;  %v225_v46 = vsel %vm211_vm1, %v175_v34, 0.0  ;;  %v256_v47 = vsel %vm211_vm1, %v176_v35, 0.0  ;;  %v169_v11 = vld [vmem:[%s15762_s0 + $0xb0] sm:$0xff]  ;;  %v305_v13 = vsel %vm211_vm1, %v150_v58, 0.0  ;;  %v280_v25 = vadd.f32 %v279_v6, %v278_v12 }
  0x2e   :  { %v220_v36 = vadd.f32 %v219_v26, %v218_v30  ;;  %v251_v37 = vadd.f32 %v250_v27, %v249_v31  ;;  %v183_v49 = vld [vmem:[%s15762_s0 + $0x120] sm:$0xff]  ;;  %v184_v50 = vld [vmem:[%s15762_s0 + $0x128] sm:$0xff]  ;;  %v227_v56 = vsel %vm211_vm1, %v179_v38, 0.0  ;;  %v258_v57 = vsel %vm211_vm1, %v180_v41, 0.0  ;;  %v162_v23 = vld [vmem:[%s15762_s0 + $0x78] sm:$0xff] }
  0x2f   :  { %v187_v55 = vld [vmem:[%s15762_s0 + $0x140] sm:$0xff]  ;;  %v188_v61 = vld [vmem:[%s15762_s0 + $0x148] sm:$0xff]  ;;  %v229_v4 = vsel %vm211_vm1, %v183_v49, 0.0  ;;  %v260_v5 = vsel %vm211_vm1, %v184_v50, 0.0  ;;  %v281_v17 = vsel %vm211_vm1, %v165_v1, 0.0  ;;  %v306_v18 = vsel %vm211_vm1, %v154_v0, 0.0 }
  0x30   :  { %v222_v42 = vadd.f32 %v221_v32, %v220_v36  ;;  %v253_v43 = vadd.f32 %v252_v33, %v251_v37  ;;  %v191_v3 = vld [vmem:[%s15762_s0 + $0x160] sm:$0xff]  ;;  %v192_v7 = vld [vmem:[%s15762_s0 + $0x168] sm:$0xff]  ;;  %v231_v15 = vsel %vm211_vm1, %v187_v55, 0.0  ;;  %v262_v16 = vsel %vm211_vm1, %v188_v61, 0.0  ;;  %v173_v24 = vld [vmem:[%s15762_s0 + $0xd0] sm:$0xff] }
  0x31   :  { %v195_v14 = vld [vmem:[%s15762_s0 + $0x180] sm:$0xff]  ;;  %v196_v19 = vld [vmem:[%s15762_s0 + $0x188] sm:$0xff]  ;;  %v233_v21 = vsel %vm211_vm1, %v191_v3, 0.0  ;;  %v264_v28 = vsel %vm211_vm1, %v192_v7, 0.0  ;;  %v166_v29 = vld [vmem:[%s15762_s0 + $0x98] sm:$0xff]  ;;  %v283_v30 = vsel %vm211_vm1, %v169_v11, 0.0  ;;  %v307_v31 = vadd.f32 %v306_v18, %v305_v13 }
  0x32   :  { %v224_v51 = vadd.f32 %v223_v39, %v222_v42  ;;  %v255_v52 = vadd.f32 %v254_v40, %v253_v43  ;;  %v199_v26 = vld [vmem:[%s15762_s0 + $0x1a0] sm:$0xff]  ;;  %v200_v27 = vld [vmem:[%s15762_s0 + $0x1a8] sm:$0xff]  ;;  %v308_v32 = vsel %vm211_vm1, %v158_v10, 0.0  ;;  %v235_v36 = vsel %vm211_vm1, %v195_v14, 0.0  ;;  %v177_v38 = vld [vmem:[%s15762_s0 + $0xf0] sm:$0xff] }
  0x33   :  { %v203_v33 = vld [vmem:[%s15762_s0 + $0x1c0] sm:$0xff]  ;;  %v204_v34 = vld [vmem:[%s15762_s0 + $0x1c8] sm:$0xff]  ;;  %v282_v39 = vadd.f32 %v281_v17, %v280_v25  ;;  %v266_v40 = vsel %vm211_vm1, %v196_v19, 0.0  ;;  %v170_v41 = vld [vmem:[%s15762_s0 + $0xb8] sm:$0xff]  ;;  %v285_v42 = vsel %vm211_vm1, %v173_v24, 0.0  ;;  %v309_v43 = vadd.f32 %v308_v32, %v307_v31 }
  0x34   :  { %v226_v62 = vadd.f32 %v225_v46, %v224_v51  ;;  %v257_v63 = vadd.f32 %v256_v47, %v255_v52  ;;  %v310_v44 = vsel %vm211_vm1, %v162_v23, 0.0  ;;  %v181_v47 = vld [vmem:[%s15762_s0 + $0x110] sm:$0xff]  ;;  %v312_v49 = vsel %vm211_vm1, %v166_v29, 0.0  ;;  %v174_v52 = vld [vmem:[%s15762_s0 + $0xd8] sm:$0xff]  ;;  %v207_v55 = vld [vmem:[%s15762_s0 + $0x1e0] sm:$0xff] }
  0x35   :  { %v284_v48 = vadd.f32 %v283_v30, %v282_v39  ;;  %v237_v50 = vsel %vm211_vm1, %v199_v26, 0.0  ;;  %v268_v51 = vsel %vm211_vm1, %v200_v27, 0.0  ;;  %v287_v53 = vsel %vm211_vm1, %v177_v38, 0.0  ;;  %v185_v59 = vld [vmem:[%s15762_s0 + $0x130] sm:$0xff]  ;;  %v178_v0 = vld [vmem:[%s15762_s0 + $0xf8] sm:$0xff] }
  0x36   :  { %v228_v8 = vadd.f32 %v227_v56, %v226_v62  ;;  %v259_v9 = vadd.f32 %v258_v57, %v257_v63  ;;  %v311_v54 = vadd.f32 %v310_v44, %v309_v43  ;;  %v208_v56 = vld [vmem:[%s15762_s0 + $0x1e8] sm:$0xff]  ;;  %v314_v61 = vsel %vm211_vm1, %v170_v41, 0.0  ;;  %v182_v10 = vld [vmem:[%s15762_s0 + $0x118] sm:$0xff]  ;;  %v197_v23 = vld [vmem:[%s15762_s0 + $0x190] sm:$0xff] }
  0x37   :  { %v286_v60 = vadd.f32 %v285_v42, %v284_v48  ;;  %v239_v62 = vsel %vm211_vm1, %v203_v33, 0.0  ;;  %v270_v63 = vsel %vm211_vm1, %v204_v34, 0.0  ;;  %v289_v1 = vsel %vm211_vm1, %v181_v47, 0.0  ;;  %v186_v18 = vld [vmem:[%s15762_s0 + $0x138] sm:$0xff]  ;;  %v201_v31 = vld [vmem:[%s15762_s0 + $0x1b0] sm:$0xff] }
  0x38   :  { %v230_v20 = vadd.f32 %v229_v4, %v228_v8  ;;  %v261_v22 = vadd.f32 %v260_v5, %v259_v9  ;;  %v313_v2 = vadd.f32 %v312_v49, %v311_v54  ;;  %v189_v5 = vld [vmem:[%s15762_s0 + $0x150] sm:$0xff]  ;;  %v316_v7 = vsel %vm211_vm1, %v174_v52, 0.0  ;;  %v190_v26 = vld [vmem:[%s15762_s0 + $0x158] sm:$0xff] }
  0x39   :  { %v288_v6 = vadd.f32 %v287_v53, %v286_v60  ;;  %v241_v8 = vsel %vm211_vm1, %v207_v55, 0.0  ;;  %v272_v9 = vsel %vm211_vm1, %v208_v56, 0.0  ;;  %v291_v11 = vsel %vm211_vm1, %v185_v59, 0.0  ;;  %v194_v34 = vld [vmem:[%s15762_s0 + $0x178] sm:$0xff]  ;;  %v205_v38 = vld [vmem:[%s15762_s0 + $0x1d0] sm:$0xff] }
  0x3a   :  { %v232_v35 = vadd.f32 %v231_v15, %v230_v20  ;;  %v263_v37 = vadd.f32 %v262_v16, %v261_v22  ;;  %v315_v12 = vadd.f32 %v314_v61, %v313_v2  ;;  %v193_v15 = vld [vmem:[%s15762_s0 + $0x170] sm:$0xff]  ;;  %v318_v17 = vsel %vm211_vm1, %v178_v0, 0.0  ;;  %v198_v41 = vld [vmem:[%s15762_s0 + $0x198] sm:$0xff] }
  0x3b   :  { %v290_v16 = vadd.f32 %v289_v1, %v288_v6  ;;  %v293_v19 = vsel %vm211_vm1, %v189_v5, 0.0  ;;  %v320_v25 = vsel %vm211_vm1, %v182_v10, 0.0  ;;  %v295_v27 = vsel %vm211_vm1, %v193_v15, 0.0  ;;  %v209_v47 = vld [vmem:[%s15762_s0 + $0x1f0] sm:$0xff]  ;;  %v206_v52 = vld [vmem:[%s15762_s0 + $0x1d8] sm:$0xff] }
  0x3c   :  { %v234_v45 = vadd.f32 %v233_v21, %v232_v35  ;;  %v265_v46 = vadd.f32 %v264_v28, %v263_v37  ;;  %v317_v20 = vadd.f32 %v316_v7, %v315_v12  ;;  %v322_v33 = vsel %vm211_vm1, %v186_v18, 0.0  ;;  %v13625_v5 = vld [vmem:[#allocation8 + $0x3dc] sm:$0xf0]  ;;  %v13621_v6 = vld [vmem:[#allocation8 + $0x3c4] sm:$0xf] }
  0x3d   :  { %v292_v24 = vadd.f32 %v291_v11, %v290_v16  ;;  %v297_v35 = vsel %vm211_vm1, %v197_v23, 0.0  ;;  %v299_v42 = vsel %vm211_vm1, %v201_v31, 0.0  ;;  %v301_v48 = vsel %vm211_vm1, %v205_v38, 0.0  ;;  %v13626_v10 = vld [vmem:[#allocation8 + $0x3e4] sm:$0xf0] }
  0x3e   :  { %v236_v57 = vadd.f32 %v235_v36, %v234_v45  ;;  %v267_v58 = vadd.f32 %v266_v40, %v265_v46  ;;  %v319_v28 = vadd.f32 %v318_v17, %v317_v20  ;;  %v324_v40 = vsel %vm211_vm1, %v190_v26, 0.0  ;;  %v202_v46 = vld [vmem:[%s15762_s0 + $0x1b8] sm:$0xff]  ;;  %v9343_v16 = vld [vmem:[#allocation8 + $0x380] sm:$0xf]  ;;  %v13613_v18 = vld [vmem:[#allocation8 + $0x384] sm:$0xf] }
  0x3f   :  { %v294_v32 = vadd.f32 %v293_v19, %v292_v24  ;;  %v326_v45 = vsel %vm211_vm1, %v194_v34, 0.0  ;;  %v303_v55 = vsel %vm211_vm1, %v209_v47, 0.0  ;;  %v330_v56 = vsel %vm211_vm1, %v202_v46, 0.0  ;;  %v13617_v17 = vld [vmem:[#allocation8 + $0x39c] sm:$0xf0] }
  0x40   :  { %v238_v3 = vadd.f32 %v237_v50, %v236_v57  ;;  %v269_v4 = vadd.f32 %v268_v51, %v267_v58  ;;  %v321_v36 = vadd.f32 %v320_v25, %v319_v28  ;;  %v328_v51 = vsel %vm211_vm1, %v198_v41, 0.0  ;;  %v210_v57 = vld [vmem:[%s15762_s0 + $0x1f8] sm:$0xff]  ;;  %v9345_v20 = vld [vmem:[#allocation8 + $0x3a0] sm:$0xf0]  ;;  %v9311_v28 = vld [vmem:[#allocation8 + $0x340] sm:$0xf] }
  0x41   :  { %v296_v39 = vadd.f32 %v295_v27, %v294_v32  ;;  %v332_v59 = vsel %vm211_vm1, %v206_v52, 0.0  ;;  %v9344_v19 = vor.u32 %v13617_v17, %v9343_v16  ;;  %v9348_v23 = vor.u32 %v13613_v18, %v9345_v20  ;;  %v13614_v25 = vld [vmem:[#allocation8 + $0x38c] sm:$0xf]  ;;  %v9313_v32 = vld [vmem:[#allocation8 + $0x360] sm:$0xf0]  ;;  %s14847_s0 = smov [#allocation16]  }
  0x42   :  { %v240_v13 = vadd.f32 %v239_v62, %v238_v3  ;;  %v271_v14 = vadd.f32 %v270_v63, %v269_v4  ;;  %v323_v43 = vadd.f32 %v322_v33, %v321_v36  ;;  %v334_v62 = vsel %vm211_vm1, %v210_v57, 0.0  ;;  %v9375_v4 = vld [vmem:[#allocation8 + $0x3c0] sm:$0xf]  ;;  %v9353_v26 = vld [vmem:[#allocation8 + $0x3a8] sm:$0xf0]  ;;  %s9131_s12 = sshll.u32 %s14847_s0, 4  ;;  %s9132_s12 = int_to_ptr.vmem [resolvable:$true] %s9131_s12 }
  0x43   :  { %v298_v44 = vadd.f32 %v297_v35, %v296_v39  ;;  %v9376_v7 = vor.u32 %v13625_v5, %v9375_v4  ;;  %v9356_v27 = vor.u32 %v13614_v25, %v9353_v26  ;;  %v9319_v33 = vld [vmem:[#allocation8 + $0x348] sm:$0xf]  ;;  %v9321_v38 = vld [vmem:[#allocation8 + $0x368] sm:$0xf0]  ;;  %v13601_v41 = vld [vmem:[#allocation8 + $0x31c] sm:$0xf0] }
  0x44   :  { %v242_v21 = vadd.f32 %v241_v8, %v240_v13  ;;  %v273_v22 = vadd.f32 %v272_v9, %v271_v14  ;;  %v325_v49 = vadd.f32 %v324_v40, %v323_v43  ;;  %v9377_v8 = vld [vmem:[#allocation8 + $0x3e0] sm:$0xf0]  ;;  %v9383_v9 = vld [vmem:[#allocation8 + $0x3c8] sm:$0xf]  ;;  %v13622_v13 = vld [vmem:[#allocation8 + $0x3cc] sm:$0xf] }
  0x45   :  { %v300_v50 = vadd.f32 %v299_v42, %v298_v44  ;;  %v9380_v11 = vor.u32 %v13621_v6, %v9377_v8  ;;  %v9384_v12 = vor.u32 %v13626_v10, %v9383_v9  ;;  %v9385_v14 = vld [vmem:[#allocation8 + $0x3e8] sm:$0xf0]  ;;  %890 = vmatpush.bf16.msra.mxu1 %v9376_v7  ;;  %v13610_v34 = vld [vmem:[#allocation8 + $0x364] sm:$0xf0]  ;;  %v9279_v40 = vld [vmem:[#allocation8 + $0x300] sm:$0xf] }
  0x46   :  { %v336_v29 = vmul.f32 0.0625, %v242_v21  ;;  %v337_v30 = vmul.f32 0.0625, %v273_v22  ;;  %v327_v53 = vadd.f32 %v326_v45, %v325_v49  ;;  %v9388_v15 = vor.u32 %v13622_v13, %v9385_v14  ;;  %v9351_v21 = vld [vmem:[#allocation8 + $0x388] sm:$0xf]  ;;  %v13597_v42 = vld [vmem:[#allocation8 + $0x304] sm:$0xf] }
  0x47   :  { %v302_v54 = vadd.f32 %v301_v48, %v300_v50  ;;  %903 = vmatpush.bf16.msra.mxu2 %v9380_v11  ;;  %916 = vmatpush.bf16.msra.mxu3 %v9384_v12  ;;  %v13618_v22 = vld [vmem:[#allocation8 + $0x3a4] sm:$0xf0]  ;;  %v9320_v36 = vor.u32 %v13610_v34, %v9319_v33  ;;  %v9280_v43 = vor.u32 %v13601_v41, %v9279_v40  ;;  %v9281_v44 = vld [vmem:[#allocation8 + $0x320] sm:$0xf0]  ;;  %v13598_v50 = vld [vmem:[#allocation8 + $0x30c] sm:$0xf] }
  0x48   :  { %v340_v37 = vpack.c.bf16 %v337_v30, %v336_v29  ;;  %v329_v58 = vadd.f32 %v328_v51, %v327_v53  ;;  %929 = vmatpush.bf16.msrb.mxu0 %v9388_v15  ;;  %v9352_v24 = vor.u32 %v13618_v22, %v9351_v21  ;;  %v13609_v29 = vld [vmem:[#allocation8 + $0x35c] sm:$0xf0]  ;;  %v13605_v30 = vld [vmem:[#allocation8 + $0x344] sm:$0xf]  ;;  %v9287_v45 = vld [vmem:[#allocation8 + $0x308] sm:$0xf]  ;;  %v9284_v48 = vor.u32 %v13597_v42, %v9281_v44 }
  0x49   :  { %v304_v60 = vadd.f32 %v303_v55, %v302_v54  ;;  %891 = vmatpush.bf16.msra.mxu1 %v9344_v19  ;;  %v9312_v31 = vor.u32 %v13609_v29, %v9311_v28  ;;  %v9316_v35 = vor.u32 %v13605_v30, %v9313_v32  ;;  %v13602_v46 = vld [vmem:[#allocation8 + $0x324] sm:$0xf0]  ;;  %v9289_v51 = vld [vmem:[#allocation8 + $0x328] sm:$0xf0]  ;;  %v9247_v53 = vld [vmem:[#allocation8 + $0x2c0] sm:$0xf] }
  0x4a   :  { %9147 = vmatmul.msk.bf16.vlgmr.msra.gmra.mxu0 %vm211_vm1, %v340_v37  ;;  %v331_v61 = vadd.f32 %v330_v56, %v329_v58  ;;  %v13606_v37 = vld [vmem:[#allocation8 + $0x34c] sm:$0xf]  ;;  %v9288_v49 = vor.u32 %v13602_v46, %v9287_v45  ;;  %v9292_v52 = vor.u32 %v13598_v50, %v9289_v51  ;;  %v13593_v54 = vld [vmem:[#allocation8 + $0x2dc] sm:$0xf0]  ;;  %v13589_v55 = vld [vmem:[#allocation8 + $0x2c4] sm:$0xf] }
  0x4b   :  { %v338_v1 = vmul.f32 0.0625, %v304_v60  ;;  %904 = vmatpush.bf16.msra.mxu2 %v9348_v23  ;;  %917 = vmatpush.bf16.msra.mxu3 %v9352_v24  ;;  %v9324_v39 = vor.u32 %v13606_v37, %v9321_v38  ;;  %v9248_v56 = vor.u32 %v13593_v54, %v9247_v53  ;;  %v9249_v57 = vld [vmem:[#allocation8 + $0x2e0] sm:$0xf0]  ;;  %v9255_v58 = vld [vmem:[#allocation8 + $0x2c8] sm:$0xf] }
  0x4c   :  { %v333_v63 = vadd.f32 %v332_v59, %v331_v61  ;;  %930 = vmatpush.bf16.msrb.mxu0 %v9356_v27  ;;  %v13594_v59 = vld [vmem:[#allocation8 + $0x2e4] sm:$0xf0]  ;;  %v9252_v60 = vor.u32 %v13589_v55, %v9249_v57  ;;  %v9217_v5 = vld [vmem:[#allocation8 + $0x2a0] sm:$0xf0]  ;;  %v13582_v11 = vld [vmem:[#allocation8 + $0x28c] sm:$0xf] }
  0x4d   :  { %892 = vmatpush.bf16.msra.mxu1 %v9312_v31  ;;  %v9256_v61 = vor.u32 %v13594_v59, %v9255_v58  ;;  %v9223_v6 = vld [vmem:[#allocation8 + $0x288] sm:$0xf]  ;;  %v9225_v12 = vld [vmem:[#allocation8 + $0x2a8] sm:$0xf0]  ;;  %v9183_v14 = vld [vmem:[#allocation8 + $0x240] sm:$0xf] }
  0x4e   :  { %v335_v0 = vadd.f32 %v334_v62, %v333_v63  ;;  %v13590_v62 = vld [vmem:[#allocation8 + $0x2cc] sm:$0xf]  ;;  %v13586_v7 = vld [vmem:[#allocation8 + $0x2a4] sm:$0xf0]  ;;  %v9228_v13 = vor.u32 %v13582_v11, %v9225_v12  ;;  %v13577_v15 = vld [vmem:[#allocation8 + $0x25c] sm:$0xf0] }
  0x4f   :  { %905 = vmatpush.bf16.msra.mxu2 %v9316_v35  ;;  %918 = vmatpush.bf16.msra.mxu3 %v9320_v36  ;;  %v9257_v63 = vld [vmem:[#allocation8 + $0x2e8] sm:$0xf0]  ;;  %v9224_v10 = vor.u32 %v13586_v7, %v9223_v6  ;;  %v13573_v16 = vld [vmem:[#allocation8 + $0x244] sm:$0xf]  ;;  %v9184_v17 = vor.u32 %v13577_v15, %v9183_v14  ;;  %v9191_v19 = vld [vmem:[#allocation8 + $0x248] sm:$0xf] }
  0x50   :  { %v339_v2 = vmul.f32 0.0625, %v335_v0  ;;  %931 = vmatpush.bf16.msrb.mxu0 %v9324_v39  ;;  %v9260_v0 = vor.u32 %v13590_v62, %v9257_v63  ;;  %v9185_v18 = vld [vmem:[#allocation8 + $0x260] sm:$0xf0]  ;;  %v13578_v20 = vld [vmem:[#allocation8 + $0x264] sm:$0xf0] }
  0x51   :  { %893 = vmatpush.bf16.msra.mxu1 %v9280_v43  ;;  %v9188_v21 = vor.u32 %v13573_v16, %v9185_v18  ;;  %v9192_v22 = vor.u32 %v13578_v20, %v9191_v19  ;;  %v13574_v23 = vld [vmem:[#allocation8 + $0x24c] sm:$0xf]  ;;  %v9151_v26 = vld [vmem:[#allocation8 + $0x200] sm:$0xf]  ;;  %v13565_v28 = vld [vmem:[#allocation8 + $0x204] sm:$0xf] }
  0x52   :  { %v341_v3 = vpack.c.bf16 %v339_v2, %v338_v1  ;;  %v9215_v1 = vld [vmem:[#allocation8 + $0x280] sm:$0xf]  ;;  %v9193_v24 = vld [vmem:[#allocation8 + $0x268] sm:$0xf0]  ;;  %v9153_v30 = vld [vmem:[#allocation8 + $0x220] sm:$0xf0] }
  0x53   :  { %906 = vmatpush.bf16.msra.mxu2 %v9284_v48  ;;  %919 = vmatpush.bf16.msra.mxu3 %v9288_v49  ;;  %v13585_v2 = vld [vmem:[#allocation8 + $0x29c] sm:$0xf0]  ;;  %v9196_v25 = vor.u32 %v13574_v23, %v9193_v24  ;;  %v9159_v31 = vld [vmem:[#allocation8 + $0x208] sm:$0xf]  ;;  %v9156_v33 = vor.u32 %v13565_v28, %v9153_v30  ;;  %v13566_v35 = vld [vmem:[#allocation8 + $0x20c] sm:$0xf] }
  0x54   :  { %932 = vmatpush.bf16.msrb.mxu0 %v9292_v52  ;;  %v9216_v4 = vor.u32 %v13585_v2, %v9215_v1  ;;  %v13569_v27 = vld [vmem:[#allocation8 + $0x21c] sm:$0xf0]  ;;  %v13570_v32 = vld [vmem:[#allocation8 + $0x224] sm:$0xf0]  ;;  %v9161_v36 = vld [vmem:[#allocation8 + $0x228] sm:$0xf0] }
  0x55   :  { %894 = vmatpush.bf16.msra.mxu1 %v9248_v56  ;;  %v9152_v29 = vor.u32 %v13569_v27, %v9151_v26  ;;  %v9160_v34 = vor.u32 %v13570_v32, %v9159_v31  ;;  %v9391_v37 = vld [vmem:[#allocation8 + $0x3d0] sm:$0xf]  ;;  %v9164_v39 = vor.u32 %v13566_v35, %v9161_v36  ;;  %v13623_v41 = vld [vmem:[#allocation8 + $0x3d4] sm:$0xf]  ;;  %v9399_v44 = vld [vmem:[#allocation8 + $0x3d8] sm:$0xf] }
  0x56   :  { %v13627_v40 = vld [vmem:[#allocation8 + $0x3ec] sm:$0xf0]  ;;  %v9393_v42 = vld [vmem:[#allocation8 + $0x3f0] sm:$0xf0]  ;;  %v13628_v45 = vld [vmem:[#allocation8 + $0x3f4] sm:$0xf0] }
  0x57   :  { %907 = vmatpush.bf16.msra.mxu2 %v9252_v60  ;;  %920 = vmatpush.bf16.msra.mxu3 %v9256_v61  ;;  %v9392_v43 = vor.u32 %v13627_v40, %v9391_v37  ;;  %v13624_v46 = vld [vmem:[#allocation8 + $0x3dc] sm:$0xf]  ;;  %v9396_v48 = vor.u32 %v13623_v41, %v9393_v42  ;;  %v9400_v49 = vor.u32 %v13628_v45, %v9399_v44  ;;  %v9359_v51 = vld [vmem:[#allocation8 + $0x390] sm:$0xf]  ;;  %v13615_v56 = vld [vmem:[#allocation8 + $0x394] sm:$0xf] }
  0x58   :  { %933 = vmatpush.bf16.msrb.mxu0 %v9260_v0  ;;  %v9401_v50 = vld [vmem:[#allocation8 + $0x3f8] sm:$0xf0]  ;;  %v13619_v52 = vld [vmem:[#allocation8 + $0x3ac] sm:$0xf0]  ;;  %v9361_v57 = vld [vmem:[#allocation8 + $0x3b0] sm:$0xf0] }
  0x59   :  { %895 = vmatpush.bf16.msra.mxu1 %v9216_v4  ;;  %v9404_v54 = vor.u32 %v13624_v46, %v9401_v50  ;;  %v9360_v55 = vor.u32 %v13619_v52, %v9359_v51  ;;  %v9367_v58 = vld [vmem:[#allocation8 + $0x398] sm:$0xf]  ;;  %v9364_v60 = vor.u32 %v13615_v56, %v9361_v57  ;;  %v13616_v62 = vld [vmem:[#allocation8 + $0x39c] sm:$0xf]  ;;  %v9327_v4 = vld [vmem:[#allocation8 + $0x350] sm:$0xf] }
  0x5a   :  { %9148 = vmatmul.msk.bf16.gmra.mxu0 %vm211_vm1, %v341_v3  ;;  %v13581_v3 = vld [vmem:[#allocation8 + $0x284] sm:$0xf]  ;;  %v13620_v61 = vld [vmem:[#allocation8 + $0x3b4] sm:$0xf0]  ;;  %v9369_v63 = vld [vmem:[#allocation8 + $0x3b8] sm:$0xf0] }
  0x5b   :  { %v9220_v9 = vor.u32 %v13581_v3, %v9217_v5  ;;  %921 = vmatpush.bf16.msra.mxu3 %v9224_v10  ;;  %v9368_v2 = vor.u32 %v13620_v61, %v9367_v58  ;;  %v9372_v3 = vor.u32 %v13616_v62, %v9369_v63  ;;  %v13611_v5 = vld [vmem:[#allocation8 + $0x36c] sm:$0xf0]  ;;  %v13607_v6 = vld [vmem:[#allocation8 + $0x354] sm:$0xf]  ;;  %v9335_v12 = vld [vmem:[#allocation8 + $0x358] sm:$0xf] }
  0x5c   :  { %934 = vmatpush.bf16.msrb.mxu0 %v9228_v13  ;;  %v9328_v10 = vor.u32 %v13611_v5, %v9327_v4  ;;  %v9329_v11 = vld [vmem:[#allocation8 + $0x370] sm:$0xf0]  ;;  %v13612_v13 = vld [vmem:[#allocation8 + $0x374] sm:$0xf0]  ;;  %v9337_v18 = vld [vmem:[#allocation8 + $0x378] sm:$0xf0] }
  0x5d   :  { %908 = vmatpush.bf16.msra.mxu2 %v9220_v9  ;;  %896 = vmatpush.bf16.msra.mxu1 %v9184_v17  ;;  %v9332_v15 = vor.u32 %v13607_v6, %v9329_v11  ;;  %v9336_v16 = vor.u32 %v13612_v13, %v9335_v12  ;;  %v13608_v17 = vld [vmem:[#allocation8 + $0x35c] sm:$0xf]  ;;  %v9295_v23 = vld [vmem:[#allocation8 + $0x310] sm:$0xf]  ;;  %v9303_v30 = vld [vmem:[#allocation8 + $0x318] sm:$0xf] }
  0x5e   :  { %v13603_v24 = vld [vmem:[#allocation8 + $0x32c] sm:$0xf0]  ;;  %v13604_v32 = vld [vmem:[#allocation8 + $0x334] sm:$0xf0]  ;;  %v13591_v42 = vld [vmem:[#allocation8 + $0x2d4] sm:$0xf] }
  0x5f   :  { %922 = vmatpush.bf16.msra.mxu3 %v9192_v22  ;;  %v9340_v22 = vor.u32 %v13608_v17, %v9337_v18  ;;  %v9296_v28 = vor.u32 %v13603_v24, %v9295_v23  ;;  %v9304_v37 = vor.u32 %v13604_v32, %v9303_v30  ;;  %v9263_v40 = vld [vmem:[#allocation8 + $0x2d0] sm:$0xf]  ;;  %v9265_v46 = vld [vmem:[#allocation8 + $0x2f0] sm:$0xf0]  ;;  %v13596_v50 = vld [vmem:[#allocation8 + $0x2f4] sm:$0xf0] }
  0x60   :  { %935 = vmatpush.bf16.msrb.mxu0 %v9196_v25  ;;  %v13599_v25 = vld [vmem:[#allocation8 + $0x314] sm:$0xf]  ;;  %v13595_v41 = vld [vmem:[#allocation8 + $0x2ec] sm:$0xf0]  ;;  %v13592_v51 = vld [vmem:[#allocation8 + $0x2dc] sm:$0xf] }
  0x61   :  { %909 = vmatpush.bf16.msra.mxu2 %v9188_v21  ;;  %897 = vmatpush.bf16.msra.mxu1 %v9152_v29  ;;  %v9297_v29 = vld [vmem:[#allocation8 + $0x330] sm:$0xf0]  ;;  %v9264_v45 = vor.u32 %v13595_v41, %v9263_v40  ;;  %v9273_v52 = vld [vmem:[#allocation8 + $0x2f8] sm:$0xf0]  ;;  %v9231_v57 = vld [vmem:[#allocation8 + $0x290] sm:$0xf] }
  0x62   :  { %v9300_v31 = vor.u32 %v13599_v25, %v9297_v29  ;;  %v9276_v56 = vor.u32 %v13592_v51, %v9273_v52  ;;  %v13587_v58 = vld [vmem:[#allocation8 + $0x2ac] sm:$0xf0]  ;;  %v9233_v63 = vld [vmem:[#allocation8 + $0x2b0] sm:$0xf0]  ;;  %v9207_v18 = vld [vmem:[#allocation8 + $0x258] sm:$0xf] }
  0x63   :  { %923 = vmatpush.bf16.msra.mxu3 %v9160_v34  ;;  %v9305_v34 = vld [vmem:[#allocation8 + $0x338] sm:$0xf0]  ;;  %v9232_v62 = vor.u32 %v13587_v58, %v9231_v57  ;;  %v13579_v11 = vld [vmem:[#allocation8 + $0x26c] sm:$0xf0]  ;;  %v13575_v12 = vld [vmem:[#allocation8 + $0x254] sm:$0xf] }
  0x64   :  { %936 = vmatpush.bf16.msrb.mxu0 %v9164_v39  ;;  %v9201_v17 = vld [vmem:[#allocation8 + $0x270] sm:$0xf0]  ;;  %v9167_v25 = vld [vmem:[#allocation8 + $0x210] sm:$0xf]  ;;  %v9175_v32 = vld [vmem:[#allocation8 + $0x218] sm:$0xf] }
  0x65   :  { %910 = vmatpush.bf16.msra.mxu2 %v9156_v33  ;;  %942 = vmatpush.bf16.msrb.mxu1 %v9392_v43  ;;  %v13600_v33 = vld [vmem:[#allocation8 + $0x31c] sm:$0xf]  ;;  %v13567_v30 = vld [vmem:[#allocation8 + $0x214] sm:$0xf] }
  0x66   :  { %v9308_v39 = vor.u32 %v13600_v33, %v9305_v34  ;;  %v14602_v52 = vld [vmem:[#allocation5] ss:$0 sm:$0xff]  ;;  %v14603_v58 = vld [vmem:[#allocation7] ss:$0 sm:$0xff] }
  0x67   :  { %968 = vmatpush.bf16.msrb.mxu3 %v9400_v49  ;;  %v9268_v49 = vor.u32 %v13591_v42, %v9265_v46 }
  0x68   :  { %981 = vmatpush.bf16.msra.mxu0 %v9404_v54 }
  0x69   :  { %955 = vmatpush.bf16.msrb.mxu2 %v9396_v48  ;;  %943 = vmatpush.bf16.msrb.mxu1 %v9360_v55  ;;  %v9271_v48 = vld [vmem:[#allocation8 + $0x2d8] sm:$0xf] }
  0x6a   :  { %v9272_v55 = vor.u32 %v13596_v50, %v9271_v48 }
  0x6b   :  { %969 = vmatpush.bf16.msrb.mxu3 %v9368_v2  ;;  %v13588_v2 = vld [vmem:[#allocation8 + $0x2b4] sm:$0xf0] }
  0x6c   :  { %982 = vmatpush.bf16.msra.mxu0 %v9372_v3  ;;  %v13584_v3 = vld [vmem:[#allocation8 + $0x29c] sm:$0xf] }
  0x6d   :  { %956 = vmatpush.bf16.msrb.mxu2 %v9364_v60  ;;  %944 = vmatpush.bf16.msrb.mxu1 %v9328_v10  ;;  %v9199_v10 = vld [vmem:[#allocation8 + $0x250] sm:$0xf] }
  0x6f   :  { %970 = vmatpush.bf16.msrb.mxu3 %v9336_v16  ;;  %v9200_v16 = vor.u32 %v13579_v11, %v9199_v10  ;;  %v9641_v10 = vld [vmem:[#allocation8 + $0x1e8] sm:$0xf0] }
  0x70   :  { %983 = vmatpush.bf16.msra.mxu0 %v9340_v22  ;;  %v9209_v22 = vld [vmem:[#allocation8 + $0x278] sm:$0xf0] }
  0x71   :  { %957 = vmatpush.bf16.msrb.mxu2 %v9332_v15  ;;  %945 = vmatpush.bf16.msrb.mxu1 %v9296_v28 }
  0x73   :  { %971 = vmatpush.bf16.msrb.mxu3 %v9304_v37  ;;  %v9177_v37 = vld [vmem:[#allocation8 + $0x238] sm:$0xf0] }
  0x74   :  { %984 = vmatpush.bf16.msra.mxu0 %v9308_v39 }
  0x75   :  { %958 = vmatpush.bf16.msrb.mxu2 %v9300_v31  ;;  %946 = vmatpush.bf16.msrb.mxu1 %v9264_v45  ;;  %v9169_v31 = vld [vmem:[#allocation8 + $0x230] sm:$0xf0] }
  0x76   :  { %v9172_v39 = vor.u32 %v13567_v30, %v9169_v31  ;;  %v13541_v31 = vld [vmem:[#allocation8 + $0x144] sm:$0xf] }
  0x77   :  { %972 = vmatpush.bf16.msrb.mxu3 %v9272_v55 }
  0x78   :  { %985 = vmatpush.bf16.msra.mxu0 %v9276_v56 }
  0x79   :  { %959 = vmatpush.bf16.msrb.mxu2 %v9268_v49  ;;  %947 = vmatpush.bf16.msrb.mxu1 %v9232_v62 }
  0x7d   :  { %948 = vmatpush.bf16.msrb.mxu1 %v9200_v16  ;;  %v13553_v16 = vld [vmem:[#allocation8 + $0x19c] sm:$0xf0] }
  0xc7   :  { %v15181_v47 = vpop.f32.mrf.mxu0 }
  0xc8   :  { %v381_v59 = vmul.f32 %v15181_v47, %v15181_v47 }
  0xcf   :  { %v15183_v8 = vpop.f32.mrf.mxu0 }
  0xd0   :  { %v382_v53 = vmul.f32 %v15183_v8, %v15183_v8  ;;  %v372_v0 = vadd.f32 %v15183_v8, %v15181_v47 }
  0xd2   :  { %v385_v9 = vadd.f32 %v382_v53, %v381_v59  ;;  %v13583_v59 = vld [vmem:[#allocation8 + $0x294] sm:$0xf] }
  0xd7   :  { %v15185_v38 = vpop.f32.mrf.mxu0 }
  0xd8   :  { %v383_v1 = vmul.f32 %v15185_v38, %v15185_v38  ;;  %v373_v7 = vadd.f32 %v372_v0, %v15185_v38  ;;  %v9236_v0 = vor.u32 %v13583_v59, %v9233_v63 }
  0xda   :  { %v386_v19 = vadd.f32 %v385_v9, %v383_v1  ;;  %v9239_v1 = vld [vmem:[#allocation8 + $0x298] sm:$0xf]  ;;  %960 = vmatpush.bf16.msrb.mxu2 %v9236_v0 }
  0xdb   :  { %v9240_v6 = vor.u32 %v13588_v2, %v9239_v1  ;;  %v9631_v1 = vld [vmem:[#allocation8 + $0x1c0] sm:$0xf] }
  0xdc   :  { %v13561_v2 = vld [vmem:[#allocation8 + $0x1dc] sm:$0xf0] }
  0xdd   :  { %973 = vmatpush.bf16.msrb.mxu3 %v9240_v6 }
  0xdf   :  { %v15196_v14 = vpop.f32.mrf.mxu0 }
  0xe0   :  { %v374_v20 = vadd.f32 %v373_v7, %v15196_v14  ;;  %v384_v21 = vmul.f32 %v15196_v14, %v15196_v14  ;;  %v9241_v7 = vld [vmem:[#allocation8 + $0x2b8] sm:$0xf0] }
  0xe1   :  { %v9244_v9 = vor.u32 %v13584_v3, %v9241_v7  ;;  %v13557_v3 = vld [vmem:[#allocation8 + $0x1c4] sm:$0xf]  ;;  %v13562_v7 = vld [vmem:[#allocation8 + $0x1e4] sm:$0xf0] }
  0xe2   :  { %v375_v26 = vrot.slane %v374_v20, 4  ;;  %v387_v27 = vadd.f32 %v386_v19, %v384_v21  ;;  %v9204_v19 = vor.u32 %v13575_v12, %v9201_v17  ;;  %v13576_v21 = vld [vmem:[#allocation8 + $0x25c] sm:$0xf]  ;;  %v9632_v12 = vor.u32 %v13561_v2, %v9631_v1  ;;  %v13521_v1 = vld [vmem:[#allocation8 + $0x9c] sm:$0xf0] }
  0xe3   :  { %986 = vmatpush.bf16.msra.mxu0 %v9244_v9  ;;  %v9212_v29 = vor.u32 %v13576_v21, %v9209_v22  ;;  %v13558_v9 = vld [vmem:[#allocation8 + $0x1cc] sm:$0xf]  ;;  %v9607_v21 = vld [vmem:[#allocation8 + $0x188] sm:$0xf] }
  0xe4   :  { %v376_v35 = vadd.f32 %v375_v26, %v374_v20  ;;  %v388_v36 = vrot.slane %v387_v27, 4  ;;  %v13580_v20 = vld [vmem:[#allocation8 + $0x274] sm:$0xf0]  ;;  %v13571_v26 = vld [vmem:[#allocation8 + $0x22c] sm:$0xf0]  ;;  %961 = vmatpush.bf16.msrb.mxu2 %v9204_v19 }
  0xe5   :  { %v9208_v28 = vor.u32 %v13580_v20, %v9207_v18  ;;  %v9168_v34 = vor.u32 %v13571_v26, %v9167_v25  ;;  %v9644_v18 = vor.u32 %v13558_v9, %v9641_v10  ;;  %v13549_v19 = vld [vmem:[#allocation8 + $0x184] sm:$0xf]  ;;  %v13554_v22 = vld [vmem:[#allocation8 + $0x1a4] sm:$0xf0]  ;;  %v13518_v10 = vld [vmem:[#allocation8 + $0x8c] sm:$0xf] }
  0xe6   :  { %v377_v43 = vrot.slane %v376_v35, 2  ;;  %v389_v44 = vadd.f32 %v388_v36, %v387_v27  ;;  %v13568_v36 = vld [vmem:[#allocation8 + $0x21c] sm:$0xf]  ;;  %v9601_v20 = vld [vmem:[#allocation8 + $0x1a0] sm:$0xf0] }
  0xe7   :  { %974 = vmatpush.bf16.msrb.mxu3 %v9208_v28  ;;  %987 = vmatpush.bf16.msra.mxu0 %v9212_v29  ;;  %v9180_v42 = vor.u32 %v13568_v36, %v9177_v37  ;;  %v9604_v26 = vor.u32 %v13549_v19, %v9601_v20  ;;  %v13545_v28 = vld [vmem:[#allocation8 + $0x15c] sm:$0xf0]  ;;  %v9608_v29 = vor.u32 %v13554_v22, %v9607_v21  ;;  %v9577_v36 = vld [vmem:[#allocation8 + $0x168] sm:$0xf0]  ;;  %v13522_v9 = vld [vmem:[#allocation8 + $0xa4] sm:$0xf0] }
  0xe8   :  { %v378_v53 = vadd.f32 %v377_v43, %v376_v35  ;;  %v390_v54 = vrot.slane %v389_v44, 2  ;;  %v13572_v35 = vld [vmem:[#allocation8 + $0x234] sm:$0xf0]  ;;  %949 = vmatpush.bf16.msrb.mxu1 %v9168_v34  ;;  %962 = vmatpush.bf16.msrb.mxu2 %v9172_v39  ;;  %v13546_v34 = vld [vmem:[#allocation8 + $0x164] sm:$0xf0] }
  0xe9   :  { %v9176_v40 = vor.u32 %v13572_v35, %v9175_v32  ;;  %v9569_v32 = vld [vmem:[#allocation8 + $0x160] sm:$0xf0]  ;;  %v13542_v35 = vld [vmem:[#allocation8 + $0x14c] sm:$0xf]  ;;  %v9447_v22 = vld [vmem:[#allocation8 + $0x48] sm:$0xf] }
  0xea   :  { %v379_v60 = vrot.slane %v378_v53, 1  ;;  %v391_v61 = vadd.f32 %v390_v54, %v389_v44  ;;  %v9572_v39 = vor.u32 %v13541_v31, %v9569_v32  ;;  %v13509_v20 = vld [vmem:[#allocation8 + $0x44] sm:$0xf] }
  0xeb   :  { %975 = vmatpush.bf16.msrb.mxu3 %v9176_v40  ;;  %988 = vmatpush.bf16.msra.mxu0 %v9180_v42  ;;  %v9535_v40 = vld [vmem:[#allocation8 + $0x100] sm:$0xf]  ;;  %v9441_v21 = vld [vmem:[#allocation8 + $0x60] sm:$0xf0] }
  0xec   :  { %v380_v4 = vadd.f32 %v379_v60, %v378_v53  ;;  %v392_v5 = vrot.slane %v391_v61, 1 }
  0xee   :  { %v393_v13 = vadd.f32 %v392_v5, %v391_v61  ;;  %v394_v15 = vmul.f32 0.03125, %v380_v4  ;;  %v9633_v4 = vld [vmem:[#allocation8 + $0x1e0] sm:$0xf0]  ;;  %v9639_v5 = vld [vmem:[#allocation8 + $0x1c8] sm:$0xf] }
  0xef   :  { %v9640_v17 = vor.u32 %v13562_v7, %v9639_v5  ;;  %v9473_v5 = vld [vmem:[#allocation8 + $0xa0] sm:$0xf0]  ;;  %v9479_v7 = vld [vmem:[#allocation8 + $0x88] sm:$0xf] }
  0xf0   :  { %v395_v23 = vmul.f32 0.03125, %v393_v13  ;;  %v396_v24 = vmul.f32 %v394_v15, %v394_v15  ;;  %v401_v27 = vsub.f32 %v15185_v38, %v394_v15  ;;  %v399_v49 = vsub.f32 %v15181_v47, %v394_v15 }
  0xf1   :  { %v400_v50 = vsub.f32 %v15183_v8, %v394_v15  ;;  %v402_v51 = vsub.f32 %v15196_v14, %v394_v15  ;;  %v9636_v13 = vor.u32 %v13557_v3, %v9633_v4  ;;  %v9599_v15 = vld [vmem:[#allocation8 + $0x180] sm:$0xf]  ;;  %v13517_v4 = vld [vmem:[#allocation8 + $0x84] sm:$0xf] }
  0xf2   :  { %v397_v33 = vsub.f32 %v395_v23, %v396_v24  ;;  %v13550_v23 = vld [vmem:[#allocation8 + $0x18c] sm:$0xf]  ;;  %v9600_v25 = vor.u32 %v13553_v16, %v9599_v15  ;;  %v9476_v15 = vor.u32 %v13517_v4, %v9473_v5  ;;  %v9439_v16 = vld [vmem:[#allocation8 + $0x40] sm:$0xf]  ;;  %v13543_v4 = vld [vmem:[#allocation8 + $0x154] sm:$0xf] }
  0xf3   :  { %v9609_v24 = vld [vmem:[#allocation8 + $0x1a8] sm:$0xf0]  ;;  %v9585_v5 = vld [vmem:[#allocation8 + $0x170] sm:$0xf0] }
  0xf4   :  { %v403_v41 = vadd.f32 1e-05, %v397_v33  ;;  %v9612_v30 = vor.u32 %v13550_v23, %v9609_v24  ;;  %v9575_v33 = vld [vmem:[#allocation8 + $0x148] sm:$0xf]  ;;  %v13510_v24 = vld [vmem:[#allocation8 + $0x4c] sm:$0xf] }
  0xf5   :  { %v9576_v42 = vor.u32 %v13546_v34, %v9575_v33  ;;  %v13514_v23 = vld [vmem:[#allocation8 + $0x64] sm:$0xf0] }
  0xf6   :  { %14605 = vrsqrt.f32 %v403_v41  ;;  %vm410_vm3 = vweird.f32 %v403_v41  ;;  %v9448_v31 = vor.u32 %v13514_v23, %v9447_v22  ;;  %v9415_v33 = vld [vmem:[#allocation8 + $0x8] sm:$0xf]  ;;  %v9559_v22 = vld [vmem:[#allocation8 + $0x118] sm:$0xf] }
  0xf7   :  { %v13506_v34 = vld [vmem:[#allocation8 + $0x24] sm:$0xf0]  ;;  %v13540_v23 = vld [vmem:[#allocation8 + $0x134] sm:$0xf0] }
  0xfc   :  { %v14606_v38 = vpop.eup %14605 }
  0xfd   :  { %v405_v43 = vmul.f32 %v14606_v38, %v403_v41  ;;  %vm411_vm2 = vweird.f32 %v14606_v38  ;;  %v13537_v41 = vld [vmem:[#allocation8 + $0x11c] sm:$0xf0] }
  0xfe   :  { %vm412_vm4 = vmor %vm410_vm3, %vm411_vm2 }
  0xff   :  { %v406_v44 = vmul.f32 %v14606_v38, %v405_v43  ;;  %v13533_v43 = vld [vmem:[#allocation8 + $0x104] sm:$0xf] }
 0x101   :  { %v407_v45 = vmul.f32 0.5, %v406_v44  ;;  %v9537_v44 = vld [vmem:[#allocation8 + $0x120] sm:$0xf0] }
 0x103   :  { %v408_v46 = vsub.f32 1.5, %v407_v45  ;;  %v9543_v45 = vld [vmem:[#allocation8 + $0x108] sm:$0xf] }
 0x105   :  { %v409_v48 = vmul.f32 %v14606_v38, %v408_v46  ;;  %v13538_v46 = vld [vmem:[#allocation8 + $0x124] sm:$0xf0] }
 0x107   :  { %v413_v53 = vsel %vm412_vm4, %v14606_v38, %v409_v48  ;;  %v9580_v38 = vor.u32 %v13542_v35, %v9577_v36  ;;  %v13534_v48 = vld [vmem:[#allocation8 + $0x10c] sm:$0xf] }
 0x108   :  { %v414_v54 = vmul.f32 %v413_v53, %v399_v49  ;;  %v415_v55 = vmul.f32 %v413_v53, %v400_v50  ;;  %v416_v56 = vmul.f32 %v413_v53, %v401_v27  ;;  %v417_v57 = vmul.f32 %v413_v53, %v402_v51  ;;  %v9567_v27 = vld [vmem:[#allocation8 + $0x140] sm:$0xf]  ;;  %v9545_v49 = vld [vmem:[#allocation8 + $0x128] sm:$0xf0] }
 0x109   :  { %v9568_v37 = vor.u32 %v13545_v28, %v9567_v27  ;;  %v9536_v50 = vor.u32 %v13537_v41, %v9535_v40  ;;  %v9540_v51 = vor.u32 %v13533_v43, %v9537_v44  ;;  %v13529_v53 = vld [vmem:[#allocation8 + $0xdc] sm:$0xf0]  ;;  %v9444_v27 = vor.u32 %v13509_v20, %v9441_v21  ;;  %v13502_v35 = vld [vmem:[#allocation8 + $0xc] sm:$0xf]  ;;  %v13559_v40 = vld [vmem:[#allocation8 + $0x1d4] sm:$0xf] }
 0x10a   :  { %v421_v59 = vmul.f32 %v14602_v52, %v414_v54  ;;  %v422_v60 = vmul.f32 %v14602_v52, %v415_v55  ;;  %v423_v61 = vmul.f32 %v14602_v52, %v416_v56  ;;  %v424_v62 = vmul.f32 %v14602_v52, %v417_v57  ;;  %v9503_v52 = vld [vmem:[#allocation8 + $0xc0] sm:$0xf]  ;;  %v13525_v56 = vld [vmem:[#allocation8 + $0xc4] sm:$0xf]  ;;  %v9417_v36 = vld [vmem:[#allocation8 + $0x28] sm:$0xf0] }
 0x10b   :  { %v9544_v54 = vor.u32 %v13538_v46, %v9543_v45  ;;  %v9548_v55 = vor.u32 %v13534_v48, %v9545_v49  ;;  %v9505_v57 = vld [vmem:[#allocation8 + $0xe0] sm:$0xf0]  ;;  %v13505_v28 = vld [vmem:[#allocation8 + $0x1c] sm:$0xf0]  ;;  %v9649_v41 = vld [vmem:[#allocation8 + $0x1f0] sm:$0xf0]  ;;  %v9416_v48 = vor.u32 %v13506_v34, %v9415_v33  ;;  %v9420_v49 = vor.u32 %v13502_v35, %v9417_v36 }
 0x10c   :  { %v429_v63 = vadd.f32 %v14603_v58, %v421_v59  ;;  %v15205_v0 = vadd.f32 %v14603_v58, %v422_v60  ;;  %v15207_v47 = vadd.f32 %v14603_v58, %v423_v61  ;;  %v15209_v8 = vadd.f32 %v14603_v58, %v424_v62  ;;  %v9511_v58 = vld [vmem:[#allocation8 + $0xc8] sm:$0xf]  ;;  %v13526_v60 = vld [vmem:[#allocation8 + $0xcc] sm:$0xf]  ;;  %v13564_v44 = vld [vmem:[#allocation8 + $0x1f4] sm:$0xf0] }
 0x10d   :  { %v13530_v59 = vld [vmem:[#allocation8 + $0xe4] sm:$0xf0]  ;;  %v9513_v61 = vld [vmem:[#allocation8 + $0xe8] sm:$0xf0]  ;;  %v9504_v62 = vor.u32 %v13529_v53, %v9503_v52  ;;  %v13560_v45 = vld [vmem:[#allocation8 + $0x1dc] sm:$0xf] }
 0x10e   :  { %v433_v14 = vmax.f32 %v429_v63, 0.0  ;;  %v9508_v63 = vor.u32 %v13525_v56, %v9505_v57  ;;  %v9512_v2 = vor.u32 %v13530_v59, %v9511_v58  ;;  %v9516_v3 = vor.u32 %v13526_v60, %v9513_v61  ;;  %v9657_v46 = vld [vmem:[#allocation8 + $0x1f8] sm:$0xf0]  ;;  %v9615_v52 = vld [vmem:[#allocation8 + $0x190] sm:$0xf] }
 0x10f   :  { %v13555_v53 = vld [vmem:[#allocation8 + $0x1ac] sm:$0xf0]  ;;  %v13551_v56 = vld [vmem:[#allocation8 + $0x194] sm:$0xf]  ;;  %v9623_v58 = vld [vmem:[#allocation8 + $0x198] sm:$0xf] }
 0x110   :  { %v15211_v6 = vpack.c.bf16 %v433_v14, %v433_v14  ;;  %v9471_v14 = vld [vmem:[#allocation8 + $0x80] sm:$0xf]  ;;  %v9617_v57 = vld [vmem:[#allocation8 + $0x1b0] sm:$0xf0]  ;;  %v13556_v59 = vld [vmem:[#allocation8 + $0x1b4] sm:$0xf0] }
 0x111   :  { %v13552_v60 = vld [vmem:[#allocation8 + $0x19c] sm:$0xf]  ;;  %v13535_v20 = vld [vmem:[#allocation8 + $0x114] sm:$0xf]  ;;  %v9527_v33 = vld [vmem:[#allocation8 + $0xd8] sm:$0xf] }
 0x112   :  { %v15214_v11 = vrot.slane %v15211_v6, 1  ;;  %v9625_v61 = vld [vmem:[#allocation8 + $0x1b8] sm:$0xf0]  ;;  %v9553_v21 = vld [vmem:[#allocation8 + $0x130] sm:$0xf0] }
 0x113   :  { %v13532_v34 = vld [vmem:[#allocation8 + $0xf4] sm:$0xf0]  ;;  %v13528_v35 = vld [vmem:[#allocation8 + $0xdc] sm:$0xf] }
 0x114   :  { %898 = vmatmul.bf16.vlgmr.msra.gmra.mxu1 %v15214_v11  ;;  %911 = vmatmul.bf16.vlgmr.msra.gmra.mxu2 %v15214_v11  ;;  %v9529_v36 = vld [vmem:[#allocation8 + $0xf8] sm:$0xf0] }
 0x115   :  { %924 = vmatmul.bf16.vlgmr.msra.gmra.mxu3 %v15214_v11  ;;  %937 = vmatmul.bf16.vlgmr.msrb.gmra.mxu0 %v15214_v11 }
 0x116   :  { %1314 = vmatpush.bf16.msra.mxu1 %v9632_v12  ;;  %1327 = vmatpush.bf16.msra.mxu2 %v9636_v13  ;;  %v9481_v12 = vld [vmem:[#allocation8 + $0xa8] sm:$0xf0]  ;;  %v9472_v13 = vor.u32 %v13521_v1, %v9471_v14  ;;  %v9583_v14 = vld [vmem:[#allocation8 + $0x150] sm:$0xf] }
 0x117   :  { %1340 = vmatpush.bf16.msra.mxu3 %v9640_v17  ;;  %1353 = vmatpush.bf16.msrb.mxu0 %v9644_v18  ;;  %v13513_v17 = vld [vmem:[#allocation8 + $0x5c] sm:$0xf0]  ;;  %v9480_v18 = vor.u32 %v13522_v9, %v9479_v7  ;;  %v9484_v19 = vor.u32 %v13518_v10, %v9481_v12  ;;  %v13547_v1 = vld [vmem:[#allocation8 + $0x16c] sm:$0xf0]  ;;  %v9591_v7 = vld [vmem:[#allocation8 + $0x158] sm:$0xf] }
 0x118   :  { %v13548_v9 = vld [vmem:[#allocation8 + $0x174] sm:$0xf0]  ;;  %v13544_v10 = vld [vmem:[#allocation8 + $0x15c] sm:$0xf] }
 0x119   :  { %v9593_v12 = vld [vmem:[#allocation8 + $0x178] sm:$0xf0] }
 0x11a   :  { %1315 = vmatpush.bf16.msra.mxu1 %v9600_v25  ;;  %1328 = vmatpush.bf16.msra.mxu2 %v9604_v26  ;;  %v9449_v25 = vld [vmem:[#allocation8 + $0x68] sm:$0xf0]  ;;  %v9407_v26 = vld [vmem:[#allocation8] sm:$0xf] }
 0x11b   :  { %1341 = vmatpush.bf16.msra.mxu3 %v9608_v29  ;;  %1354 = vmatpush.bf16.msrb.mxu0 %v9612_v30  ;;  %v13501_v29 = vld [vmem:[#allocation8 + $0x4] sm:$0xf]  ;;  %v9452_v32 = vor.u32 %v13510_v24, %v9449_v25  ;;  %v13536_v24 = vld [vmem:[#allocation8 + $0x11c] sm:$0xf] }
 0x11c   :  { %v9409_v30 = vld [vmem:[#allocation8 + $0x20] sm:$0xf0]  ;;  %v9561_v25 = vld [vmem:[#allocation8 + $0x138] sm:$0xf0] }
 0x11d   :  { %v9412_v43 = vor.u32 %v13501_v29, %v9409_v30  ;;  %v9560_v29 = vor.u32 %v13540_v23, %v9559_v22  ;;  %v9564_v30 = vor.u32 %v13536_v24, %v9561_v25  ;;  %v13686_v22 = vld [vmem:[#allocation8 + $0x5cc] sm:$0xf] }
 0x11e   :  { %1316 = vmatpush.bf16.msra.mxu1 %v9568_v37  ;;  %1329 = vmatpush.bf16.msra.mxu2 %v9572_v39  ;;  %v9647_v37 = vld [vmem:[#allocation8 + $0x1d0] sm:$0xf]  ;;  %v9897_v23 = vld [vmem:[#allocation8 + $0x5e8] sm:$0xf0] }
 0x11f   :  { %1342 = vmatpush.bf16.msra.mxu3 %v9576_v42  ;;  %1355 = vmatpush.bf16.msrb.mxu0 %v9580_v38  ;;  %v13563_v39 = vld [vmem:[#allocation8 + $0x1ec] sm:$0xf0]  ;;  %v9655_v42 = vld [vmem:[#allocation8 + $0x1d8] sm:$0xf]  ;;  %v9408_v38 = vor.u32 %v13505_v28, %v9407_v26 }
 0x120   :  { %v13531_v28 = vld [vmem:[#allocation8 + $0xec] sm:$0xf0] }
 0x122   :  { %1317 = vmatpush.bf16.msra.mxu1 %v9536_v50  ;;  %1330 = vmatpush.bf16.msra.mxu2 %v9540_v51  ;;  %v9648_v50 = vor.u32 %v13563_v39, %v9647_v37  ;;  %v9652_v51 = vor.u32 %v13559_v40, %v9649_v41  ;;  %v9487_v40 = vld [vmem:[#allocation8 + $0x90] sm:$0xf] }
 0x123   :  { %1343 = vmatpush.bf16.msra.mxu3 %v9544_v54  ;;  %1356 = vmatpush.bf16.msrb.mxu0 %v9548_v55  ;;  %v9656_v54 = vor.u32 %v13564_v44, %v9655_v42  ;;  %v9660_v55 = vor.u32 %v13560_v45, %v9657_v46  ;;  %v13523_v41 = vld [vmem:[#allocation8 + $0xac] sm:$0xf0]  ;;  %v9528_v42 = vor.u32 %v13532_v34, %v9527_v33  ;;  %v9489_v44 = vld [vmem:[#allocation8 + $0xb0] sm:$0xf0]  ;;  %v9495_v45 = vld [vmem:[#allocation8 + $0x98] sm:$0xf] }
 0x124   :  { %950 = vmatmul.bf16.vlgmr.msrb.gmra.mxu1 %v15214_v11  ;;  %963 = vmatmul.bf16.vlgmr.msrb.gmra.mxu2 %v15214_v11  ;;  %v13524_v46 = vld [vmem:[#allocation8 + $0xb4] sm:$0xf0]  ;;  %v9863_v33 = vld [vmem:[#allocation8 + $0x588] sm:$0xf] }
 0x125   :  { %976 = vmatmul.bf16.vlgmr.msrb.gmra.mxu3 %v15214_v11  ;;  %989 = vmatmul.bf16.vlgmr.msra.gmra.mxu0 %v15214_v11  ;;  %v9440_v11 = vor.u32 %v13513_v17, %v9439_v16  ;;  %v9551_v16 = vld [vmem:[#allocation8 + $0x110] sm:$0xf]  ;;  %v13682_v34 = vld [vmem:[#allocation8 + $0x5a4] sm:$0xf0] }
 0x126   :  { %1318 = vmatpush.bf16.msra.mxu1 %v9504_v62  ;;  %1331 = vmatpush.bf16.msra.mxu2 %v9508_v63  ;;  %v9616_v62 = vor.u32 %v13555_v53, %v9615_v52  ;;  %v9620_v63 = vor.u32 %v13551_v56, %v9617_v57  ;;  %v13539_v17 = vld [vmem:[#allocation8 + $0x12c] sm:$0xf0]  ;;  %v13511_v56 = vld [vmem:[#allocation8 + $0x54] sm:$0xf] }
 0x127   :  { %1344 = vmatpush.bf16.msra.mxu3 %v9512_v2  ;;  %1357 = vmatpush.bf16.msrb.mxu0 %v9516_v3  ;;  %v9624_v2 = vor.u32 %v13556_v59, %v9623_v58  ;;  %v9628_v3 = vor.u32 %v13552_v60, %v9625_v61  ;;  %v9552_v26 = vor.u32 %v13539_v17, %v9551_v16  ;;  %v9455_v52 = vld [vmem:[#allocation8 + $0x50] sm:$0xf]  ;;  %v9457_v57 = vld [vmem:[#allocation8 + $0x70] sm:$0xf0]  ;;  %v9463_v58 = vld [vmem:[#allocation8 + $0x58] sm:$0xf] }
 0x128   :  { %v13515_v53 = vld [vmem:[#allocation8 + $0x6c] sm:$0xf0]  ;;  %v13516_v59 = vld [vmem:[#allocation8 + $0x74] sm:$0xf0]  ;;  %v13512_v60 = vld [vmem:[#allocation8 + $0x5c] sm:$0xf] }
 0x129   :  { %v9465_v61 = vld [vmem:[#allocation8 + $0x78] sm:$0xf0]  ;;  %v13685_v16 = vld [vmem:[#allocation8 + $0x5c4] sm:$0xf] }
 0x12a   :  { %1319 = vmatpush.bf16.msra.mxu1 %v9472_v13  ;;  %1332 = vmatpush.bf16.msra.mxu2 %v9476_v15  ;;  %v9584_v13 = vor.u32 %v13547_v1, %v9583_v14  ;;  %v9588_v15 = vor.u32 %v13543_v4, %v9585_v5  ;;  %v9460_v14 = vor.u32 %v13511_v56, %v9457_v57  ;;  %v13507_v1 = vld [vmem:[#allocation8 + $0x2c] sm:$0xf0]  ;;  %v9889_v17 = vld [vmem:[#allocation8 + $0x5e0] sm:$0xf0] }
 0x12b   :  { %1345 = vmatpush.bf16.msra.mxu3 %v9480_v18  ;;  %1358 = vmatpush.bf16.msrb.mxu0 %v9484_v19  ;;  %v9592_v18 = vor.u32 %v13548_v9, %v9591_v7  ;;  %v9596_v19 = vor.u32 %v13544_v10, %v9593_v12  ;;  %v9464_v4 = vor.u32 %v13516_v59, %v9463_v58  ;;  %v9431_v7 = vld [vmem:[#allocation8 + $0x18] sm:$0xf]  ;;  %v13504_v10 = vld [vmem:[#allocation8 + $0x1c] sm:$0xf]  ;;  %v13661_v56 = vld [vmem:[#allocation8 + $0x504] sm:$0xf] }
 0x12c   :  { %v9468_v5 = vor.u32 %v13512_v60, %v9465_v61  ;;  %v13508_v9 = vld [vmem:[#allocation8 + $0x34] sm:$0xf0]  ;;  %v9433_v12 = vld [vmem:[#allocation8 + $0x38] sm:$0xf0]  ;;  %v9793_v57 = vld [vmem:[#allocation8 + $0x520] sm:$0xf0] }
 0x12d   :  { %v9432_v24 = vor.u32 %v13508_v9, %v9431_v7  ;;  %v9436_v25 = vor.u32 %v13504_v10, %v9433_v12  ;;  %v9799_v58 = vld [vmem:[#allocation8 + $0x508] sm:$0xf]  ;;  %v13662_v60 = vld [vmem:[#allocation8 + $0x50c] sm:$0xf] }
 0x12e   :  { %1320 = vmatpush.bf16.msra.mxu1 %v9440_v11  ;;  %1333 = vmatpush.bf16.msra.mxu2 %v9444_v27  ;;  %v9556_v11 = vor.u32 %v13535_v20, %v9553_v21  ;;  %v9519_v27 = vld [vmem:[#allocation8 + $0xd0] sm:$0xf]  ;;  %v13690_v21 = vld [vmem:[#allocation8 + $0x5e4] sm:$0xf0]  ;;  %v9801_v61 = vld [vmem:[#allocation8 + $0x528] sm:$0xf0] }
 0x12f   :  { %1346 = vmatpush.bf16.msra.mxu3 %v9448_v31  ;;  %1359 = vmatpush.bf16.msrb.mxu0 %v9452_v32  ;;  %v13527_v31 = vld [vmem:[#allocation8 + $0xd4] sm:$0xf]  ;;  %v9520_v37 = vor.u32 %v13531_v28, %v9519_v27  ;;  %v9855_v27 = vld [vmem:[#allocation8 + $0x580] sm:$0xf]  ;;  %v13666_v59 = vld [vmem:[#allocation8 + $0x524] sm:$0xf0] }
 0x130   :  { %v9521_v32 = vld [vmem:[#allocation8 + $0xf0] sm:$0xf0]  ;;  %v13681_v28 = vld [vmem:[#allocation8 + $0x59c] sm:$0xf0]  ;;  %v9767_v7 = vld [vmem:[#allocation8 + $0x4c8] sm:$0xf] }
 0x131   :  { %v9524_v39 = vor.u32 %v13527_v31, %v9521_v32  ;;  %v13677_v31 = vld [vmem:[#allocation8 + $0x584] sm:$0xf]  ;;  %v13658_v9 = vld [vmem:[#allocation8 + $0x4e4] sm:$0xf0]  ;;  %v13654_v10 = vld [vmem:[#allocation8 + $0x4cc] sm:$0xf] }
 0x132   :  { %1321 = vmatpush.bf16.msra.mxu1 %v9408_v38  ;;  %1334 = vmatpush.bf16.msra.mxu2 %v9412_v43  ;;  %v9532_v38 = vor.u32 %v13528_v35, %v9529_v36  ;;  %v13519_v43 = vld [vmem:[#allocation8 + $0x94] sm:$0xf]  ;;  %v9857_v32 = vld [vmem:[#allocation8 + $0x5a0] sm:$0xf0]  ;;  %v13678_v35 = vld [vmem:[#allocation8 + $0x58c] sm:$0xf] }
 0x133   :  { %1347 = vmatpush.bf16.msra.mxu3 %v9416_v48  ;;  %1360 = vmatpush.bf16.msrb.mxu0 %v9420_v49  ;;  %v13520_v48 = vld [vmem:[#allocation8 + $0x9c] sm:$0xf]  ;;  %v9865_v36 = vld [vmem:[#allocation8 + $0x5a8] sm:$0xf0] }
 0x134   :  { %v9497_v49 = vld [vmem:[#allocation8 + $0xb8] sm:$0xf0]  ;;  %v9769_v12 = vld [vmem:[#allocation8 + $0x4e8] sm:$0xf0] }
 0x135   :  { %1322 = vmatmul.bf16.vlgmr.msra.gmra.mxu1 %v15211_v6  ;;  %1335 = vmatmul.bf16.vlgmr.msra.gmra.mxu2 %v15211_v6 }
 0x136   :  { %1366 = vmatpush.bf16.msrb.mxu1 %v9648_v50  ;;  %1379 = vmatpush.bf16.msrb.mxu2 %v9652_v51  ;;  %v9488_v50 = vor.u32 %v13523_v41, %v9487_v40  ;;  %v9492_v51 = vor.u32 %v13519_v43, %v9489_v44  ;;  %v9823_v40 = vld [vmem:[#allocation8 + $0x540] sm:$0xf]  ;;  %v13669_v43 = vld [vmem:[#allocation8 + $0x544] sm:$0xf] }
 0x137   :  { %1392 = vmatpush.bf16.msrb.mxu3 %v9656_v54  ;;  %1405 = vmatpush.bf16.msra.mxu0 %v9660_v55  ;;  %v9496_v54 = vor.u32 %v13524_v46, %v9495_v45  ;;  %v9500_v55 = vor.u32 %v13520_v48, %v9497_v49  ;;  %v13673_v41 = vld [vmem:[#allocation8 + $0x55c] sm:$0xf0]  ;;  %v9825_v44 = vld [vmem:[#allocation8 + $0x560] sm:$0xf0]  ;;  %v9831_v45 = vld [vmem:[#allocation8 + $0x548] sm:$0xf] }
 0x138   :  { %1348 = vmatmul.bf16.vlgmr.msra.gmra.mxu3 %v15211_v6  ;;  %1361 = vmatmul.bf16.vlgmr.msrb.gmra.mxu0 %v15211_v6  ;;  %v13674_v46 = vld [vmem:[#allocation8 + $0x564] sm:$0xf0]  ;;  %v13670_v48 = vld [vmem:[#allocation8 + $0x54c] sm:$0xf] }
 0x139   :  { %v9833_v49 = vld [vmem:[#allocation8 + $0x568] sm:$0xf0] }
 0x13a   :  { %1367 = vmatpush.bf16.msrb.mxu1 %v9616_v62  ;;  %1380 = vmatpush.bf16.msrb.mxu2 %v9620_v63  ;;  %v9423_v62 = vld [vmem:[#allocation8 + $0x10] sm:$0xf]  ;;  %v9456_v63 = vor.u32 %v13515_v53, %v9455_v52  ;;  %v9791_v52 = vld [vmem:[#allocation8 + $0x500] sm:$0xf] }
 0x13b   :  { %1393 = vmatpush.bf16.msrb.mxu3 %v9624_v2  ;;  %1406 = vmatpush.bf16.msra.mxu0 %v9628_v3  ;;  %v13503_v2 = vld [vmem:[#allocation8 + $0x14] sm:$0xf]  ;;  %v13665_v53 = vld [vmem:[#allocation8 + $0x51c] sm:$0xf0] }
 0x13c   :  { %v9425_v3 = vld [vmem:[#allocation8 + $0x30] sm:$0xf0] }
 0x13d   :  { %v9428_v20 = vor.u32 %v13503_v2, %v9425_v3  ;;  %v9800_v2 = vor.u32 %v13666_v59, %v9799_v58  ;;  %v9804_v3 = vor.u32 %v13662_v60, %v9801_v61  ;;  %v13688_v58 = vld [vmem:[#allocation8 + $0x5dc] sm:$0xf] }
 0x13e   :  { %1368 = vmatpush.bf16.msrb.mxu1 %v9584_v13  ;;  %1381 = vmatpush.bf16.msrb.mxu2 %v9588_v15  ;;  %v9887_v13 = vld [vmem:[#allocation8 + $0x5c0] sm:$0xf]  ;;  %v9913_v59 = vld [vmem:[#allocation8 + $0x5f8] sm:$0xf0] }
 0x13f   :  { %1394 = vmatpush.bf16.msrb.mxu3 %v9592_v18  ;;  %1407 = vmatpush.bf16.msra.mxu0 %v9596_v19  ;;  %v13689_v15 = vld [vmem:[#allocation8 + $0x5dc] sm:$0xf0]  ;;  %v9895_v18 = vld [vmem:[#allocation8 + $0x5c8] sm:$0xf]  ;;  %v9424_v19 = vor.u32 %v13507_v1, %v9423_v62  ;;  %v9792_v62 = vor.u32 %v13665_v53, %v9791_v52  ;;  %v13687_v52 = vld [vmem:[#allocation8 + $0x5d4] sm:$0xf] }
 0x140   :  { %v13657_v1 = vld [vmem:[#allocation8 + $0x4dc] sm:$0xf0]  ;;  %v9905_v53 = vld [vmem:[#allocation8 + $0x5f0] sm:$0xf0] }
 0x142   :  { %1369 = vmatpush.bf16.msrb.mxu1 %v9552_v26  ;;  %1382 = vmatpush.bf16.msrb.mxu2 %v9556_v11  ;;  %v9888_v26 = vor.u32 %v13689_v15, %v9887_v13  ;;  %v9892_v11 = vor.u32 %v13685_v16, %v9889_v17  ;;  %v9727_v16 = vld [vmem:[#allocation8 + $0x480] sm:$0xf] }
 0x143   :  { %1395 = vmatpush.bf16.msrb.mxu3 %v9560_v29  ;;  %1408 = vmatpush.bf16.msra.mxu0 %v9564_v30  ;;  %v9896_v29 = vor.u32 %v13690_v21, %v9895_v18  ;;  %v9900_v30 = vor.u32 %v13686_v22, %v9897_v23  ;;  %v13649_v17 = vld [vmem:[#allocation8 + $0x49c] sm:$0xf0]  ;;  %v9768_v18 = vor.u32 %v13658_v9, %v9767_v7  ;;  %v9729_v21 = vld [vmem:[#allocation8 + $0x4a0] sm:$0xf0]  ;;  %v9735_v22 = vld [vmem:[#allocation8 + $0x488] sm:$0xf] }
 0x144   :  { %v13650_v23 = vld [vmem:[#allocation8 + $0x4a4] sm:$0xf0]  ;;  %v9879_v7 = vld [vmem:[#allocation8 + $0x598] sm:$0xf] }
 0x145   :  { %v13684_v9 = vld [vmem:[#allocation8 + $0x5b4] sm:$0xf0] }
 0x146   :  { %1370 = vmatpush.bf16.msrb.mxu1 %v9520_v37  ;;  %1383 = vmatpush.bf16.msrb.mxu2 %v9524_v39  ;;  %v9856_v37 = vor.u32 %v13681_v28, %v9855_v27  ;;  %v9860_v39 = vor.u32 %v13677_v31, %v9857_v32  ;;  %v9695_v27 = vld [vmem:[#allocation8 + $0x440] sm:$0xf]  ;;  %v13637_v31 = vld [vmem:[#allocation8 + $0x444] sm:$0xf] }
 0x147   :  { %1396 = vmatpush.bf16.msrb.mxu3 %v9528_v42  ;;  %1409 = vmatpush.bf16.msra.mxu0 %v9532_v38  ;;  %v9864_v42 = vor.u32 %v13682_v34, %v9863_v33  ;;  %v9868_v38 = vor.u32 %v13678_v35, %v9865_v36  ;;  %v13641_v28 = vld [vmem:[#allocation8 + $0x45c] sm:$0xf0]  ;;  %v9697_v32 = vld [vmem:[#allocation8 + $0x460] sm:$0xf0]  ;;  %v9703_v33 = vld [vmem:[#allocation8 + $0x448] sm:$0xf] }
 0x148   :  { %v13642_v34 = vld [vmem:[#allocation8 + $0x464] sm:$0xf0]  ;;  %v13638_v35 = vld [vmem:[#allocation8 + $0x44c] sm:$0xf] }
 0x149   :  { %v9705_v36 = vld [vmem:[#allocation8 + $0x468] sm:$0xf0] }
 0x14a   :  { %1371 = vmatpush.bf16.msrb.mxu1 %v9488_v50  ;;  %1384 = vmatpush.bf16.msrb.mxu2 %v9492_v51  ;;  %v9824_v50 = vor.u32 %v13673_v41, %v9823_v40  ;;  %v9828_v51 = vor.u32 %v13669_v43, %v9825_v44  ;;  %v9700_v40 = vor.u32 %v13637_v31, %v9697_v32  ;;  %v13633_v41 = vld [vmem:[#allocation8 + $0x41c] sm:$0xf0]  ;;  %v13663_v32 = vld [vmem:[#allocation8 + $0x514] sm:$0xf] }
 0x14b   :  { %1397 = vmatpush.bf16.msrb.mxu3 %v9496_v54  ;;  %1410 = vmatpush.bf16.msra.mxu0 %v9500_v55  ;;  %v9832_v54 = vor.u32 %v13674_v46, %v9831_v45  ;;  %v9836_v55 = vor.u32 %v13670_v48, %v9833_v49  ;;  %v9704_v43 = vor.u32 %v13642_v34, %v9703_v33  ;;  %v9671_v45 = vld [vmem:[#allocation8 + $0x408] sm:$0xf]  ;;  %v13630_v48 = vld [vmem:[#allocation8 + $0x40c] sm:$0xf]  ;;  %v9809_v33 = vld [vmem:[#allocation8 + $0x530] sm:$0xf0] }
 0x14c   :  { %v9708_v44 = vor.u32 %v13638_v35, %v9705_v36  ;;  %v13634_v46 = vld [vmem:[#allocation8 + $0x424] sm:$0xf0]  ;;  %v9673_v49 = vld [vmem:[#allocation8 + $0x428] sm:$0xf0]  ;;  %v9815_v34 = vld [vmem:[#allocation8 + $0x518] sm:$0xf] }
 0x14d   :  { %v9672_v60 = vor.u32 %v13634_v46, %v9671_v45  ;;  %v9676_v61 = vor.u32 %v13630_v48, %v9673_v49  ;;  %v13668_v35 = vld [vmem:[#allocation8 + $0x534] sm:$0xf0]  ;;  %v13664_v36 = vld [vmem:[#allocation8 + $0x51c] sm:$0xf]  ;;  %v9777_v45 = vld [vmem:[#allocation8 + $0x4f0] sm:$0xf0] }
 0x14e   :  { %1372 = vmatpush.bf16.msrb.mxu1 %v9456_v63  ;;  %1385 = vmatpush.bf16.msrb.mxu2 %v9460_v14  ;;  %v9796_v63 = vor.u32 %v13661_v56, %v9793_v57  ;;  %v9759_v14 = vld [vmem:[#allocation8 + $0x4c0] sm:$0xf]  ;;  %v13692_v57 = vld [vmem:[#allocation8 + $0x5f4] sm:$0xf0]  ;;  %v13656_v49 = vld [vmem:[#allocation8 + $0x4dc] sm:$0xf] }
 0x14f   :  { %1398 = vmatpush.bf16.msrb.mxu3 %v9464_v4  ;;  %1411 = vmatpush.bf16.msra.mxu0 %v9468_v5  ;;  %v13653_v4 = vld [vmem:[#allocation8 + $0x4c4] sm:$0xf]  ;;  %v9760_v13 = vor.u32 %v13657_v1, %v9759_v14  ;;  %v9871_v14 = vld [vmem:[#allocation8 + $0x590] sm:$0xf]  ;;  %v9783_v46 = vld [vmem:[#allocation8 + $0x4d8] sm:$0xf] }
 0x150   :  { %v9761_v5 = vld [vmem:[#allocation8 + $0x4e0] sm:$0xf0]  ;;  %v13683_v1 = vld [vmem:[#allocation8 + $0x5ac] sm:$0xf0]  ;;  %v13660_v48 = vld [vmem:[#allocation8 + $0x4f4] sm:$0xf0] }
 0x151   :  { %v9764_v15 = vor.u32 %v13653_v4, %v9761_v5  ;;  %v13679_v4 = vld [vmem:[#allocation8 + $0x594] sm:$0xf] }
 0x152   :  { %1373 = vmatpush.bf16.msrb.mxu1 %v9424_v19  ;;  %1386 = vmatpush.bf16.msrb.mxu2 %v9428_v20  ;;  %v9772_v19 = vor.u32 %v13654_v10, %v9769_v12  ;;  %v13645_v20 = vld [vmem:[#allocation8 + $0x484] sm:$0xf]  ;;  %v9873_v5 = vld [vmem:[#allocation8 + $0x5b0] sm:$0xf0]  ;;  %v13680_v10 = vld [vmem:[#allocation8 + $0x59c] sm:$0xf] }
 0x153   :  { %1399 = vmatpush.bf16.msrb.mxu3 %v9432_v24  ;;  %1412 = vmatpush.bf16.msra.mxu0 %v9436_v25  ;;  %v13646_v24 = vld [vmem:[#allocation8 + $0x48c] sm:$0xf]  ;;  %v9881_v12 = vld [vmem:[#allocation8 + $0x5b8] sm:$0xf0] }
 0x154   :  { %v9737_v25 = vld [vmem:[#allocation8 + $0x4a8] sm:$0xf0] }
 0x155   :  { %1374 = vmatmul.bf16.vlgmr.msrb.gmra.mxu1 %v15211_v6  ;;  %1387 = vmatmul.bf16.vlgmr.msrb.gmra.mxu2 %v15211_v6 }
 0x156   :  { %1805 = vmatpush.bf16.msra.mxu1 %v9888_v26  ;;  %1818 = vmatpush.bf16.msra.mxu2 %v9892_v11  ;;  %v9728_v26 = vor.u32 %v13649_v17, %v9727_v16  ;;  %v9732_v11 = vor.u32 %v13645_v20, %v9729_v21  ;;  %v9876_v16 = vor.u32 %v13679_v4, %v9873_v5  ;;  %v9839_v17 = vld [vmem:[#allocation8 + $0x550] sm:$0xf]  ;;  %v13671_v21 = vld [vmem:[#allocation8 + $0x554] sm:$0xf] }
 0x157   :  { %1831 = vmatpush.bf16.msra.mxu3 %v9896_v29  ;;  %1844 = vmatpush.bf16.msrb.mxu0 %v9900_v30  ;;  %v9736_v29 = vor.u32 %v13650_v23, %v9735_v22  ;;  %v9740_v30 = vor.u32 %v13646_v24, %v9737_v25  ;;  %v9884_v20 = vor.u32 %v13680_v10, %v9881_v12  ;;  %v9841_v22 = vld [vmem:[#allocation8 + $0x570] sm:$0xf0]  ;;  %v9847_v23 = vld [vmem:[#allocation8 + $0x558] sm:$0xf]  ;;  %v13672_v25 = vld [vmem:[#allocation8 + $0x55c] sm:$0xf] }
 0x158   :  { %1400 = vmatmul.bf16.vlgmr.msrb.gmra.mxu3 %v15211_v6  ;;  %1413 = vmatmul.bf16.vlgmr.msra.gmra.mxu0 %v15211_v6  ;;  %v13676_v24 = vld [vmem:[#allocation8 + $0x574] sm:$0xf0]  ;;  %v13639_v5 = vld [vmem:[#allocation8 + $0x454] sm:$0xf]  ;;  %v13640_v12 = vld [vmem:[#allocation8 + $0x45c] sm:$0xf] }
 0x159   :  { %v13644_v10 = vld [vmem:[#allocation8 + $0x474] sm:$0xf0] }
 0x15a   :  { %1806 = vmatpush.bf16.msra.mxu1 %v9856_v37  ;;  %1819 = vmatpush.bf16.msra.mxu2 %v9860_v39  ;;  %v9663_v37 = vld [vmem:[#allocation8 + $0x400] sm:$0xf]  ;;  %v9696_v39 = vor.u32 %v13641_v28, %v9695_v27  ;;  %v9844_v27 = vor.u32 %v13671_v21, %v9841_v22  ;;  %v9807_v28 = vld [vmem:[#allocation8 + $0x510] sm:$0xf]  ;;  %v9681_v21 = vld [vmem:[#allocation8 + $0x430] sm:$0xf0] }
 0x15b   :  { %1832 = vmatpush.bf16.msra.mxu3 %v9864_v42  ;;  %1845 = vmatpush.bf16.msrb.mxu0 %v9868_v38  ;;  %v13629_v42 = vld [vmem:[#allocation8 + $0x404] sm:$0xf] }
 0x15c   :  { %v9665_v38 = vld [vmem:[#allocation8 + $0x420] sm:$0xf0] }
 0x15d   :  { %v9668_v56 = vor.u32 %v13629_v42, %v9665_v38  ;;  %v13659_v42 = vld [vmem:[#allocation8 + $0x4ec] sm:$0xf0]  ;;  %v9816_v38 = vor.u32 %v13668_v35, %v9815_v34  ;;  %v13754_v34 = vld [vmem:[#allocation8 + $0x7e4] sm:$0xf0]  ;;  %v13750_v35 = vld [vmem:[#allocation8 + $0x7cc] sm:$0xf] }
 0x15e   :  { %1807 = vmatpush.bf16.msra.mxu1 %v9824_v50  ;;  %1820 = vmatpush.bf16.msra.mxu2 %v9828_v51  ;;  %v9903_v50 = vld [vmem:[#allocation8 + $0x5d0] sm:$0xf] }
 0x15f   :  { %1833 = vmatpush.bf16.msra.mxu3 %v9832_v54  ;;  %1846 = vmatpush.bf16.msrb.mxu0 %v9836_v55  ;;  %v13691_v51 = vld [vmem:[#allocation8 + $0x5ec] sm:$0xf0]  ;;  %v9911_v54 = vld [vmem:[#allocation8 + $0x5d8] sm:$0xf]  ;;  %v9664_v55 = vor.u32 %v13633_v41, %v9663_v37  ;;  %v9817_v37 = vld [vmem:[#allocation8 + $0x538] sm:$0xf0] }
 0x160   :  { %v9775_v41 = vld [vmem:[#allocation8 + $0x4d0] sm:$0xf] }
 0x162   :  { %1808 = vmatpush.bf16.msra.mxu1 %v9792_v62  ;;  %1821 = vmatpush.bf16.msra.mxu2 %v9796_v63  ;;  %v9904_v62 = vor.u32 %v13691_v51, %v9903_v50  ;;  %v9908_v63 = vor.u32 %v13687_v52, %v9905_v53  ;;  %v9785_v50 = vld [vmem:[#allocation8 + $0x4f8] sm:$0xf0]  ;;  %v9776_v51 = vor.u32 %v13659_v42, %v9775_v41  ;;  %v9743_v53 = vld [vmem:[#allocation8 + $0x490] sm:$0xf]  ;;  %v10111_v42 = vld [vmem:[#allocation8 + $0x780] sm:$0xf] }
 0x163   :  { %1834 = vmatpush.bf16.msra.mxu3 %v9800_v2  ;;  %1847 = vmatpush.bf16.msrb.mxu0 %v9804_v3  ;;  %v9912_v2 = vor.u32 %v13692_v57, %v9911_v54  ;;  %v9916_v3 = vor.u32 %v13688_v58, %v9913_v59  ;;  %v13651_v54 = vld [vmem:[#allocation8 + $0x4ac] sm:$0xf0]  ;;  %v13647_v57 = vld [vmem:[#allocation8 + $0x494] sm:$0xf]  ;;  %v9751_v59 = vld [vmem:[#allocation8 + $0x498] sm:$0xf] }
 0x164   :  { %v9745_v58 = vld [vmem:[#allocation8 + $0x4b0] sm:$0xf0] }
 0x166   :  { %1809 = vmatpush.bf16.msra.mxu1 %v9760_v13  ;;  %1822 = vmatpush.bf16.msra.mxu2 %v9764_v15  ;;  %v15233_v13 = vrot.slane %v15211_v6, 2  ;;  %v9872_v15 = vor.u32 %v13683_v1, %v9871_v14  ;;  %v9748_v14 = vor.u32 %v13647_v57, %v9745_v58  ;;  %v9711_v1 = vld [vmem:[#allocation8 + $0x450] sm:$0xf]  ;;  %v13733_v58 = vld [vmem:[#allocation8 + $0x744] sm:$0xf] }
 0x167   :  { %1835 = vmatpush.bf16.msra.mxu3 %v9768_v18  ;;  %1848 = vmatpush.bf16.msrb.mxu0 %v9772_v19  ;;  %v13675_v18 = vld [vmem:[#allocation8 + $0x56c] sm:$0xf0]  ;;  %v9880_v19 = vor.u32 %v13684_v9, %v9879_v7  ;;  %v9713_v7 = vld [vmem:[#allocation8 + $0x470] sm:$0xf0]  ;;  %v9719_v9 = vld [vmem:[#allocation8 + $0x458] sm:$0xf] }
 0x168   :  { %v9720_v22 = vor.u32 %v13644_v10, %v9719_v9  ;;  %v13725_v10 = vld [vmem:[#allocation8 + $0x704] sm:$0xf] }
 0x16a   :  { %1810 = vmatpush.bf16.msra.mxu1 %v9728_v26  ;;  %1823 = vmatpush.bf16.msra.mxu2 %v9732_v11  ;;  %v9849_v26 = vld [vmem:[#allocation8 + $0x578] sm:$0xf0]  ;;  %v9840_v11 = vor.u32 %v13675_v18, %v9839_v17  ;;  %v9716_v18 = vor.u32 %v13639_v5, %v9713_v7  ;;  %v13729_v5 = vld [vmem:[#allocation8 + $0x71c] sm:$0xf0] }
 0x16b   :  { %1836 = vmatpush.bf16.msra.mxu3 %v9736_v29  ;;  %1849 = vmatpush.bf16.msrb.mxu0 %v9740_v30  ;;  %v13667_v29 = vld [vmem:[#allocation8 + $0x52c] sm:$0xf0]  ;;  %v9848_v30 = vor.u32 %v13676_v24, %v9847_v23  ;;  %v9852_v31 = vor.u32 %v13672_v25, %v9849_v26  ;;  %v9687_v24 = vld [vmem:[#allocation8 + $0x418] sm:$0xf]  ;;  %v13632_v26 = vld [vmem:[#allocation8 + $0x41c] sm:$0xf] }
 0x16c   :  { %v13636_v25 = vld [vmem:[#allocation8 + $0x434] sm:$0xf0] }
 0x16e   :  { %1811 = vmatpush.bf16.msra.mxu1 %v9696_v39  ;;  %1824 = vmatpush.bf16.msra.mxu2 %v9700_v40  ;;  %v9808_v39 = vor.u32 %v13667_v29, %v9807_v28  ;;  %v9812_v40 = vor.u32 %v13663_v32, %v9809_v33  ;;  %v13753_v28 = vld [vmem:[#allocation8 + $0x7dc] sm:$0xf0]  ;;  %v13749_v29 = vld [vmem:[#allocation8 + $0x7c4] sm:$0xf] }
 0x16f   :  { %1837 = vmatpush.bf16.msra.mxu3 %v9704_v43  ;;  %1850 = vmatpush.bf16.msrb.mxu0 %v9708_v44  ;;  %v9820_v43 = vor.u32 %v13664_v36, %v9817_v37  ;;  %v13655_v44 = vld [vmem:[#allocation8 + $0x4d4] sm:$0xf]  ;;  %v10153_v36 = vld [vmem:[#allocation8 + $0x7e8] sm:$0xf0]  ;;  %v9688_v37 = vor.u32 %v13636_v25, %v9687_v24  ;;  %v13717_v25 = vld [vmem:[#allocation8 + $0x6c4] sm:$0xf] }
 0x170   :  { %v9780_v52 = vor.u32 %v13655_v44, %v9777_v45  ;;  %v10156_v44 = vor.u32 %v13750_v35, %v10153_v36  ;;  %v13741_v45 = vld [vmem:[#allocation8 + $0x784] sm:$0xf]  ;;  %v9983_v35 = vld [vmem:[#allocation8 + $0x680] sm:$0xf] }
 0x171   :  { %v13713_v36 = vld [vmem:[#allocation8 + $0x69c] sm:$0xf0] }
 0x172   :  { %1812 = vmatpush.bf16.msra.mxu1 %v9664_v55  ;;  %1825 = vmatpush.bf16.msra.mxu2 %v9668_v56  ;;  %v9784_v55 = vor.u32 %v13660_v48, %v9783_v46  ;;  %v9788_v56 = vor.u32 %v13656_v49, %v9785_v50  ;;  %v10113_v46 = vld [vmem:[#allocation8 + $0x7a0] sm:$0xf0]  ;;  %v10119_v48 = vld [vmem:[#allocation8 + $0x788] sm:$0xf]  ;;  %v13742_v50 = vld [vmem:[#allocation8 + $0x78c] sm:$0xf] }
 0x173   :  { %1838 = vmatpush.bf16.msra.mxu3 %v9672_v60  ;;  %1851 = vmatpush.bf16.msrb.mxu0 %v9676_v61  ;;  %v13652_v60 = vld [vmem:[#allocation8 + $0x4b4] sm:$0xf0]  ;;  %v13648_v61 = vld [vmem:[#allocation8 + $0x49c] sm:$0xf]  ;;  %v13746_v49 = vld [vmem:[#allocation8 + $0x7a4] sm:$0xf0] }
 0x175   :  { %1813 = vmatmul.bf16.vlgmr.msra.gmra.mxu1 %v15233_v13  ;;  %1826 = vmatmul.bf16.vlgmr.msra.gmra.mxu2 %v15233_v13 }
 0x176   :  { %1857 = vmatpush.bf16.msrb.mxu1 %v9904_v62  ;;  %1870 = vmatpush.bf16.msrb.mxu2 %v9908_v63  ;;  %v9753_v62 = vld [vmem:[#allocation8 + $0x4b8] sm:$0xf0]  ;;  %v9744_v63 = vor.u32 %v13651_v54, %v9743_v53  ;;  %v10116_v53 = vor.u32 %v13741_v45, %v10113_v46  ;;  %v10079_v54 = vld [vmem:[#allocation8 + $0x740] sm:$0xf]  ;;  %v9984_v45 = vor.u32 %v13713_v36, %v9983_v35 }
 0x177   :  { %1883 = vmatpush.bf16.msrb.mxu3 %v9912_v2  ;;  %1896 = vmatpush.bf16.msra.mxu0 %v9916_v3  ;;  %v13643_v2 = vld [vmem:[#allocation8 + $0x46c] sm:$0xf0]  ;;  %v9752_v3 = vor.u32 %v13652_v60, %v9751_v59  ;;  %v9756_v4 = vor.u32 %v13648_v61, %v9753_v62  ;;  %v10081_v59 = vld [vmem:[#allocation8 + $0x760] sm:$0xf0]  ;;  %v10087_v60 = vld [vmem:[#allocation8 + $0x748] sm:$0xf] }
 0x178   :  { %1839 = vmatmul.bf16.vlgmr.msra.gmra.mxu3 %v15233_v13  ;;  %1852 = vmatmul.bf16.vlgmr.msrb.gmra.mxu0 %v15233_v13  ;;  %v9712_v17 = vor.u32 %v13643_v2, %v9711_v1  ;;  %v13738_v61 = vld [vmem:[#allocation8 + $0x764] sm:$0xf0]  ;;  %v13734_v62 = vld [vmem:[#allocation8 + $0x74c] sm:$0xf]  ;;  %v10084_v2 = vor.u32 %v13733_v58, %v10081_v59 }
 0x179   :  { %v10088_v7 = vor.u32 %v13738_v61, %v10087_v60  ;;  %v13702_v58 = vld [vmem:[#allocation8 + $0x64c] sm:$0xf]  ;;  %v9919_v61 = vld [vmem:[#allocation8 + $0x600] sm:$0xf] }
 0x17a   :  { %1858 = vmatpush.bf16.msrb.mxu1 %v9872_v15  ;;  %1871 = vmatpush.bf16.msrb.mxu2 %v9876_v16  ;;  %v9721_v15 = vld [vmem:[#allocation8 + $0x478] sm:$0xf0]  ;;  %v9679_v16 = vld [vmem:[#allocation8 + $0x410] sm:$0xf]  ;;  %v9961_v59 = vld [vmem:[#allocation8 + $0x668] sm:$0xf0] }
 0x17b   :  { %1884 = vmatpush.bf16.msrb.mxu3 %v9880_v19  ;;  %1897 = vmatpush.bf16.msra.mxu0 %v9884_v20  ;;  %v13635_v19 = vld [vmem:[#allocation8 + $0x42c] sm:$0xf0]  ;;  %v13631_v20 = vld [vmem:[#allocation8 + $0x414] sm:$0xf]  ;;  %v9724_v23 = vor.u32 %v13640_v12, %v9721_v15  ;;  %v10049_v12 = vld [vmem:[#allocation8 + $0x720] sm:$0xf0] }
 0x17c   :  { %v9680_v32 = vor.u32 %v13635_v19, %v9679_v16  ;;  %v9684_v33 = vor.u32 %v13631_v20, %v9681_v21  ;;  %v10055_v15 = vld [vmem:[#allocation8 + $0x708] sm:$0xf]  ;;  %v10052_v19 = vor.u32 %v13725_v10, %v10049_v12  ;;  %v10015_v20 = vld [vmem:[#allocation8 + $0x6c0] sm:$0xf] }
 0x17d   :  { %v13730_v16 = vld [vmem:[#allocation8 + $0x724] sm:$0xf0]  ;;  %v13721_v21 = vld [vmem:[#allocation8 + $0x6dc] sm:$0xf0] }
 0x17e   :  { %1859 = vmatpush.bf16.msrb.mxu1 %v9840_v11  ;;  %1872 = vmatpush.bf16.msrb.mxu2 %v9844_v27  ;;  %v9689_v11 = vld [vmem:[#allocation8 + $0x438] sm:$0xf0]  ;;  %v10143_v27 = vld [vmem:[#allocation8 + $0x7c0] sm:$0xf]  ;;  %v9927_v10 = vld [vmem:[#allocation8 + $0x608] sm:$0xf] }
 0x17f   :  { %1885 = vmatpush.bf16.msrb.mxu3 %v9848_v30  ;;  %1898 = vmatpush.bf16.msra.mxu0 %v9852_v31  ;;  %v10145_v30 = vld [vmem:[#allocation8 + $0x7e0] sm:$0xf0]  ;;  %v10151_v31 = vld [vmem:[#allocation8 + $0x7c8] sm:$0xf] }
 0x180   :  { %v10148_v41 = vor.u32 %v13749_v29, %v10145_v30  ;;  %v13718_v29 = vld [vmem:[#allocation8 + $0x6cc] sm:$0xf]  ;;  %v13698_v12 = vld [vmem:[#allocation8 + $0x624] sm:$0xf0] }
 0x181   :  { %v10025_v30 = vld [vmem:[#allocation8 + $0x6e8] sm:$0xf0] }
 0x182   :  { %1860 = vmatpush.bf16.msrb.mxu1 %v9808_v39  ;;  %1873 = vmatpush.bf16.msrb.mxu2 %v9812_v40  ;;  %v9692_v39 = vor.u32 %v13632_v26, %v9689_v11  ;;  %v10144_v40 = vor.u32 %v13753_v28, %v10143_v27  ;;  %v10017_v26 = vld [vmem:[#allocation8 + $0x6e0] sm:$0xf0]  ;;  %v10023_v11 = vld [vmem:[#allocation8 + $0x6c8] sm:$0xf] }
 0x183   :  { %1886 = vmatpush.bf16.msrb.mxu3 %v9816_v38  ;;  %1899 = vmatpush.bf16.msra.mxu0 %v9820_v43  ;;  %v13745_v38 = vld [vmem:[#allocation8 + $0x79c] sm:$0xf0]  ;;  %v10152_v43 = vor.u32 %v13754_v34, %v10151_v31  ;;  %v13722_v28 = vld [vmem:[#allocation8 + $0x6e4] sm:$0xf0] }
 0x186   :  { %1861 = vmatpush.bf16.msrb.mxu1 %v9776_v51  ;;  %1874 = vmatpush.bf16.msrb.mxu2 %v9780_v52  ;;  %v10121_v51 = vld [vmem:[#allocation8 + $0x7a8] sm:$0xf0]  ;;  %v10112_v52 = vor.u32 %v13745_v38, %v10111_v42  ;;  %v9991_v42 = vld [vmem:[#allocation8 + $0x688] sm:$0xf] }
 0x187   :  { %1887 = vmatpush.bf16.msrb.mxu3 %v9784_v55  ;;  %1900 = vmatpush.bf16.msra.mxu0 %v9788_v56  ;;  %v13737_v55 = vld [vmem:[#allocation8 + $0x75c] sm:$0xf0]  ;;  %v10120_v56 = vor.u32 %v13746_v49, %v10119_v48  ;;  %v10124_v57 = vor.u32 %v13742_v50, %v10121_v51  ;;  %v13714_v38 = vld [vmem:[#allocation8 + $0x6a4] sm:$0xf0] }
 0x188   :  { %v10080_v1 = vor.u32 %v13737_v55, %v10079_v54  ;;  %v9951_v48 = vld [vmem:[#allocation8 + $0x640] sm:$0xf]  ;;  %v9992_v50 = vor.u32 %v13714_v38, %v9991_v42  ;;  %v9953_v54 = vld [vmem:[#allocation8 + $0x660] sm:$0xf0]  ;;  %v9959_v55 = vld [vmem:[#allocation8 + $0x648] sm:$0xf] }
 0x189   :  { %v13705_v49 = vld [vmem:[#allocation8 + $0x65c] sm:$0xf0]  ;;  %v13748_v38 = vld [vmem:[#allocation8 + $0x7b4] sm:$0xf0] }
 0x18a   :  { %1862 = vmatpush.bf16.msrb.mxu1 %v9744_v63  ;;  %1875 = vmatpush.bf16.msrb.mxu2 %v9748_v14  ;;  %v10089_v63 = vld [vmem:[#allocation8 + $0x768] sm:$0xf0] }
 0x18b   :  { %1888 = vmatpush.bf16.msrb.mxu3 %v9752_v3  ;;  %1901 = vmatpush.bf16.msra.mxu0 %v9756_v4  ;;  %v10047_v4 = vld [vmem:[#allocation8 + $0x700] sm:$0xf]  ;;  %v10092_v9 = vor.u32 %v13734_v62, %v10089_v63  ;;  %v9952_v62 = vor.u32 %v13705_v49, %v9951_v48  ;;  %v10095_v49 = vld [vmem:[#allocation8 + $0x750] sm:$0xf] }
 0x18e   :  { %1863 = vmatpush.bf16.msrb.mxu1 %v9712_v17  ;;  %1876 = vmatpush.bf16.msrb.mxu2 %v9716_v18  ;;  %v13726_v17 = vld [vmem:[#allocation8 + $0x70c] sm:$0xf]  ;;  %v10048_v18 = vor.u32 %v13729_v5, %v10047_v4  ;;  %v13693_v4 = vld [vmem:[#allocation8 + $0x604] sm:$0xf] }
 0x18f   :  { %1889 = vmatpush.bf16.msrb.mxu3 %v9720_v22  ;;  %1902 = vmatpush.bf16.msra.mxu0 %v9724_v23  ;;  %v10056_v22 = vor.u32 %v13730_v16, %v10055_v15  ;;  %v9921_v5 = vld [vmem:[#allocation8 + $0x620] sm:$0xf0]  ;;  %v13694_v15 = vld [vmem:[#allocation8 + $0x60c] sm:$0xf] }
 0x190   :  { %v9929_v16 = vld [vmem:[#allocation8 + $0x628] sm:$0xf0] }
 0x191   :  { %v15243_v14 = vpop.f32.mrf.mxu1 }
 0x192   :  { %1864 = vmatpush.bf16.msrb.mxu1 %v9680_v32  ;;  %1877 = vmatpush.bf16.msrb.mxu2 %v9684_v33  ;;  %v15245_v3 = vpop.f32.mrf.mxu0  ;;  %v10016_v32 = vor.u32 %v13721_v21, %v10015_v20  ;;  %v10020_v33 = vor.u32 %v13717_v25, %v10017_v26  ;;  %v10167_v20 = vld [vmem:[#allocation8 + $0x7d8] sm:$0xf]  ;;  %v13752_v25 = vld [vmem:[#allocation8 + $0x7dc] sm:$0xf] }
 0x193   :  { %1890 = vmatpush.bf16.msrb.mxu3 %v9688_v37  ;;  %1903 = vmatpush.bf16.msra.mxu0 %v9692_v39  ;;  %v10024_v37 = vor.u32 %v13722_v28, %v10023_v11  ;;  %v10028_v39 = vor.u32 %v13718_v29, %v10025_v30  ;;  %v10169_v26 = vld [vmem:[#allocation8 + $0x7f8] sm:$0xf0]  ;;  %v9928_v11 = vor.u32 %v13698_v12, %v9927_v10  ;;  %v10071_v10 = vld [vmem:[#allocation8 + $0x718] sm:$0xf] }
 0x194   :  { %v9932_v28 = vor.u32 %v13694_v15, %v9929_v16  ;;  %v10172_v36 = vor.u32 %v13752_v25, %v10169_v26  ;;  %v13732_v12 = vld [vmem:[#allocation8 + $0x734] sm:$0xf0]  ;;  %v13728_v15 = vld [vmem:[#allocation8 + $0x71c] sm:$0xf] }
 0x195   :  { %1865 = vmatmul.bf16.vlgmr.msrb.gmra.mxu1 %v15233_v13  ;;  %1878 = vmatmul.bf16.vlgmr.msrb.gmra.mxu2 %v15233_v13  ;;  %v10073_v16 = vld [vmem:[#allocation8 + $0x738] sm:$0xf0]  ;;  %v10072_v25 = vor.u32 %v13732_v12, %v10071_v10 }
 0x196   :  { %2304 = vmatpush.bf16.msra.mxu1 %v10144_v40  ;;  %2317 = vmatpush.bf16.msra.mxu2 %v10148_v41  ;;  %v13709_v40 = vld [vmem:[#allocation8 + $0x684] sm:$0xf]  ;;  %v10076_v26 = vor.u32 %v13728_v15, %v10073_v16  ;;  %v9943_v16 = vld [vmem:[#allocation8 + $0x618] sm:$0xf] }
 0x197   :  { %2330 = vmatpush.bf16.msra.mxu3 %v10152_v43  ;;  %2343 = vmatpush.bf16.msrb.mxu0 %v10156_v44  ;;  %v15247_v24 = vpop.f32.mrf.mxu2  ;;  %v9985_v41 = vld [vmem:[#allocation8 + $0x6a0] sm:$0xf0]  ;;  %v13710_v43 = vld [vmem:[#allocation8 + $0x68c] sm:$0xf] }
 0x198   :  { %1891 = vmatmul.bf16.vlgmr.msrb.gmra.mxu3 %v15233_v13  ;;  %1904 = vmatmul.bf16.vlgmr.msra.gmra.mxu0 %v15233_v13  ;;  %v10057_v13 = vld [vmem:[#allocation8 + $0x728] sm:$0xf0]  ;;  %v15249_v27 = vpop.f32.mrf.mxu3  ;;  %v9988_v46 = vor.u32 %v13709_v40, %v9985_v41  ;;  %v10129_v40 = vld [vmem:[#allocation8 + $0x7b0] sm:$0xf0]  ;;  %v10135_v41 = vld [vmem:[#allocation8 + $0x798] sm:$0xf] }
 0x199   :  { %v10060_v23 = vor.u32 %v13726_v17, %v10057_v13  ;;  %v901_v31 = vpop.f32.mrf.mxu1  ;;  %v9993_v44 = vld [vmem:[#allocation8 + $0x6a8] sm:$0xf0]  ;;  %v10159_v17 = vld [vmem:[#allocation8 + $0x7d0] sm:$0xf] }
 0x19a   :  { %2305 = vmatpush.bf16.msra.mxu1 %v10112_v52  ;;  %2318 = vmatpush.bf16.msra.mxu2 %v10116_v53  ;;  %v940_v34 = vpop.f32.mrf.mxu0  ;;  %v9996_v51 = vor.u32 %v13710_v43, %v9993_v44  ;;  %v13701_v53 = vld [vmem:[#allocation8 + $0x644] sm:$0xf]  ;;  %v13755_v13 = vld [vmem:[#allocation8 + $0x7ec] sm:$0xf0]  ;;  %v13744_v43 = vld [vmem:[#allocation8 + $0x79c] sm:$0xf] }
 0x19b   :  { %2331 = vmatpush.bf16.msra.mxu3 %v10120_v56  ;;  %2344 = vmatpush.bf16.msrb.mxu0 %v10124_v57  ;;  %v13706_v57 = vld [vmem:[#allocation8 + $0x664] sm:$0xf0]  ;;  %v9956_v63 = vor.u32 %v13701_v53, %v9953_v54  ;;  %v10160_v30 = vor.u32 %v13755_v13, %v10159_v17  ;;  %v13747_v34 = vld [vmem:[#allocation8 + $0x7ac] sm:$0xf0]  ;;  %v10137_v44 = vld [vmem:[#allocation8 + $0x7b8] sm:$0xf0] }
 0x19c   :  { %v13735_v53 = vld [vmem:[#allocation8 + $0x754] sm:$0xf] }
 0x19d   :  { %v10097_v54 = vld [vmem:[#allocation8 + $0x770] sm:$0xf0] }
 0x19e   :  { %2306 = vmatpush.bf16.msra.mxu1 %v10080_v1  ;;  %2319 = vmatpush.bf16.msra.mxu2 %v10084_v2  ;;  %v13697_v2 = vld [vmem:[#allocation8 + $0x61c] sm:$0xf0] }
 0x19f   :  { %2332 = vmatpush.bf16.msra.mxu3 %v10088_v7  ;;  %2345 = vmatpush.bf16.msrb.mxu0 %v10092_v9  ;;  %v914_v52 = vpop.f32.mrf.mxu2  ;;  %v9960_v7 = vor.u32 %v13706_v57, %v9959_v55  ;;  %v9964_v9 = vor.u32 %v13702_v58, %v9961_v59  ;;  %v9920_v21 = vor.u32 %v13697_v2, %v9919_v61  ;;  %v10103_v55 = vld [vmem:[#allocation8 + $0x758] sm:$0xf]  ;;  %v13736_v57 = vld [vmem:[#allocation8 + $0x75c] sm:$0xf]  ;;  %v13731_v2 = vld [vmem:[#allocation8 + $0x72c] sm:$0xf0] }
 0x1a0   :  { %v927_v56 = vpop.f32.mrf.mxu3  ;;  %v10140_v52 = vor.u32 %v13744_v43, %v10137_v44  ;;  %v10105_v58 = vld [vmem:[#allocation8 + $0x778] sm:$0xf0]  ;;  %v10100_v61 = vor.u32 %v13735_v53, %v10097_v54 }
 0x1a1   :  { %v15251_v60 = vpop.f32.mrf.mxu1  ;;  %v13740_v56 = vld [vmem:[#allocation8 + $0x774] sm:$0xf0] }
 0x1a2   :  { %2307 = vmatpush.bf16.msra.mxu1 %v10048_v18  ;;  %2320 = vmatpush.bf16.msra.mxu2 %v10052_v19  ;;  %v15253_v1 = vpop.f32.mrf.mxu0  ;;  %v13751_v18 = vld [vmem:[#allocation8 + $0x7d4] sm:$0xf] }
 0x1a3   :  { %2333 = vmatpush.bf16.msra.mxu3 %v10056_v22  ;;  %2346 = vmatpush.bf16.msrb.mxu0 %v10060_v23  ;;  %v10161_v19 = vld [vmem:[#allocation8 + $0x7f0] sm:$0xf0]  ;;  %v9924_v22 = vor.u32 %v13693_v4, %v9921_v5  ;;  %v13756_v23 = vld [vmem:[#allocation8 + $0x7f4] sm:$0xf0]  ;;  %v10104_v4 = vor.u32 %v13740_v56, %v10103_v55  ;;  %v10108_v5 = vor.u32 %v13736_v57, %v10105_v58  ;;  %v9967_v55 = vld [vmem:[#allocation8 + $0x650] sm:$0xf] }
 0x1a4   :  { %v10164_v31 = vor.u32 %v13751_v18, %v10161_v19  ;;  %v10168_v35 = vor.u32 %v13756_v23, %v10167_v20  ;;  %v13707_v56 = vld [vmem:[#allocation8 + $0x66c] sm:$0xf0]  ;;  %v13703_v58 = vld [vmem:[#allocation8 + $0x654] sm:$0xf] }
 0x1a6   :  { %2308 = vmatpush.bf16.msra.mxu1 %v10016_v32  ;;  %2321 = vmatpush.bf16.msra.mxu2 %v10020_v33  ;;  %v10127_v33 = vld [vmem:[#allocation8 + $0x790] sm:$0xf] }
 0x1a7   :  { %2334 = vmatpush.bf16.msra.mxu3 %v10024_v37  ;;  %2347 = vmatpush.bf16.msrb.mxu0 %v10028_v39  ;;  %v15255_v29 = vpop.f32.mrf.mxu2  ;;  %v13743_v39 = vld [vmem:[#allocation8 + $0x794] sm:$0xf] }
 0x1a8   :  { %v15257_v32 = vpop.f32.mrf.mxu3  ;;  %v10132_v48 = vor.u32 %v13743_v39, %v10129_v40 }
 0x1a9   :  { %v953_v37 = vpop.f32.mrf.mxu1 }
 0x1aa   :  { %2309 = vmatpush.bf16.msra.mxu1 %v9984_v45  ;;  %2322 = vmatpush.bf16.msra.mxu2 %v9988_v46  ;;  %v992_v42 = vpop.f32.mrf.mxu0  ;;  %v15260_v45 = vrot.slane %v15211_v6, 3  ;;  %v10128_v46 = vor.u32 %v13747_v34, %v10127_v33  ;;  %v13720_v33 = vld [vmem:[#allocation8 + $0x6dc] sm:$0xf]  ;;  %v13715_v37 = vld [vmem:[#allocation8 + $0x6ac] sm:$0xf0] }
 0x1ab   :  { %2335 = vmatpush.bf16.msra.mxu3 %v9992_v50  ;;  %2348 = vmatpush.bf16.msrb.mxu0 %v9996_v51  ;;  %v13739_v50 = vld [vmem:[#allocation8 + $0x76c] sm:$0xf0]  ;;  %v10136_v51 = vor.u32 %v13748_v38, %v10135_v41  ;;  %v10041_v34 = vld [vmem:[#allocation8 + $0x6f8] sm:$0xf0]  ;;  %v13711_v41 = vld [vmem:[#allocation8 + $0x694] sm:$0xf] }
 0x1ac   :  { %v10096_v59 = vor.u32 %v13739_v50, %v10095_v49  ;;  %v10044_v40 = vor.u32 %v13720_v33, %v10041_v34  ;;  %v10001_v42 = vld [vmem:[#allocation8 + $0x6b0] sm:$0xf0]  ;;  %v10007_v38 = vld [vmem:[#allocation8 + $0x698] sm:$0xf]  ;;  %v10009_v49 = vld [vmem:[#allocation8 + $0x6b8] sm:$0xf0] }
 0x1ad   :  { %v10004_v54 = vor.u32 %v13711_v41, %v10001_v42  ;;  %v13814_v33 = vld [vmem:[#allocation8 + $0x9cc] sm:$0xf]  ;;  %v13805_v42 = vld [vmem:[#allocation8 + $0x984] sm:$0xf] }
 0x1ae   :  { %2310 = vmatpush.bf16.msra.mxu1 %v9952_v62  ;;  %2323 = vmatpush.bf16.msra.mxu2 %v9956_v63  ;;  %v10063_v63 = vld [vmem:[#allocation8 + $0x710] sm:$0xf]  ;;  %v10409_v34 = vld [vmem:[#allocation8 + $0x9e8] sm:$0xf0] }
 0x1af   :  { %2336 = vmatpush.bf16.msra.mxu3 %v9960_v7  ;;  %2349 = vmatpush.bf16.msrb.mxu0 %v9964_v9  ;;  %v966_v6 = vpop.f32.mrf.mxu2  ;;  %v13727_v7 = vld [vmem:[#allocation8 + $0x714] sm:$0xf]  ;;  %v10064_v19 = vor.u32 %v13731_v2, %v10063_v63  ;;  %v9977_v63 = vld [vmem:[#allocation8 + $0x678] sm:$0xf0]  ;;  %v9968_v2 = vor.u32 %v13707_v56, %v9967_v55  ;;  %v10412_v41 = vor.u32 %v13814_v33, %v10409_v34  ;;  %v13786_v33 = vld [vmem:[#allocation8 + $0x8e4] sm:$0xf0] }
 0x1b0   :  { %v979_v62 = vpop.f32.mrf.mxu3  ;;  %v10065_v9 = vld [vmem:[#allocation8 + $0x730] sm:$0xf0]  ;;  %v13782_v34 = vld [vmem:[#allocation8 + $0x8cc] sm:$0xf] }
 0x1b1   :  { %v10068_v20 = vor.u32 %v13727_v7, %v10065_v9  ;;  %v9969_v6 = vld [vmem:[#allocation8 + $0x670] sm:$0xf0]  ;;  %v13704_v62 = vld [vmem:[#allocation8 + $0x65c] sm:$0xf] }
 0x1b2   :  { %2311 = vmatpush.bf16.msra.mxu1 %v9920_v21  ;;  %2324 = vmatpush.bf16.msra.mxu2 %v9924_v22  ;;  %v1323_v17 = vpop.f32.mrf.mxu1  ;;  %v10031_v21 = vld [vmem:[#allocation8 + $0x6d0] sm:$0xf]  ;;  %v13695_v7 = vld [vmem:[#allocation8 + $0x614] sm:$0xf]  ;;  %v9980_v12 = vor.u32 %v13704_v62, %v9977_v63 }
 0x1b3   :  { %2337 = vmatpush.bf16.msra.mxu3 %v9928_v11  ;;  %2350 = vmatpush.bf16.msrb.mxu0 %v9932_v28  ;;  %v15267_v13 = vadd.f32 %v1323_v17, %v15243_v14  ;;  %v13723_v22 = vld [vmem:[#allocation8 + $0x6ec] sm:$0xf0]  ;;  %v13719_v11 = vld [vmem:[#allocation8 + $0x6d4] sm:$0xf]  ;;  %v13700_v17 = vld [vmem:[#allocation8 + $0x634] sm:$0xf0] }
 0x1b4   :  { %v10033_v28 = vld [vmem:[#allocation8 + $0x6f0] sm:$0xf0]  ;;  %v10032_v14 = vor.u32 %v13723_v22, %v10031_v21  ;;  %v10399_v21 = vld [vmem:[#allocation8 + $0x9c0] sm:$0xf] }
 0x1b5   :  { %2312 = vmatmul.bf16.vlgmr.msra.gmra.mxu1 %v15260_v45  ;;  %2325 = vmatmul.bf16.vlgmr.msra.gmra.mxu2 %v15260_v45  ;;  %v1362_v18 = vpop.f32.mrf.mxu0  ;;  %v9937_v9 = vld [vmem:[#allocation8 + $0x630] sm:$0xf0]  ;;  %v13817_v22 = vld [vmem:[#allocation8 + $0x9dc] sm:$0xf0] }
 0x1b6   :  { %2356 = vmatpush.bf16.msrb.mxu1 %v10160_v30  ;;  %2369 = vmatpush.bf16.msrb.mxu2 %v10164_v31  ;;  %v15270_v23 = vadd.f32 %v1362_v18, %v15245_v3  ;;  %v10039_v30 = vld [vmem:[#allocation8 + $0x6d8] sm:$0xf]  ;;  %v13696_v18 = vld [vmem:[#allocation8 + $0x61c] sm:$0xf] }
 0x1b7   :  { %2382 = vmatpush.bf16.msrb.mxu3 %v10168_v35  ;;  %2395 = vmatpush.bf16.msra.mxu0 %v10172_v36  ;;  %v13724_v31 = vld [vmem:[#allocation8 + $0x6f4] sm:$0xf0]  ;;  %v10036_v35 = vor.u32 %v13719_v11, %v10033_v28  ;;  %v9999_v36 = vld [vmem:[#allocation8 + $0x690] sm:$0xf]  ;;  %v10407_v11 = vld [vmem:[#allocation8 + $0x9c8] sm:$0xf] }
 0x1b8   :  { %2338 = vmatmul.bf16.vlgmr.msra.gmra.mxu3 %v15260_v45  ;;  %2351 = vmatmul.bf16.vlgmr.msrb.gmra.mxu0 %v15260_v45  ;;  %v10040_v39 = vor.u32 %v13724_v31, %v10039_v30  ;;  %v1336_v3 = vpop.f32.mrf.mxu2  ;;  %v10000_v53 = vor.u32 %v13715_v37, %v9999_v36  ;;  %v9940_v30 = vor.u32 %v13695_v7, %v9937_v9  ;;  %v13818_v31 = vld [vmem:[#allocation8 + $0x9e4] sm:$0xf0]  ;;  %v13789_v7 = vld [vmem:[#allocation8 + $0x904] sm:$0xf] }
 0x1b9   :  { %v15273_v43 = vadd.f32 %v1336_v3, %v15247_v24  ;;  %v10400_v36 = vor.u32 %v13817_v22, %v10399_v21  ;;  %v10408_v3 = vor.u32 %v13818_v31, %v10407_v11  ;;  %v10305_v9 = vld [vmem:[#allocation8 + $0x920] sm:$0xf0]  ;;  %v10271_v21 = vld [vmem:[#allocation8 + $0x8c0] sm:$0xf]  ;;  %v10279_v31 = vld [vmem:[#allocation8 + $0x8c8] sm:$0xf] }
 0x1ba   :  { %2357 = vmatpush.bf16.msrb.mxu1 %v10128_v46  ;;  %2370 = vmatpush.bf16.msrb.mxu2 %v10132_v48  ;;  %v13716_v46 = vld [vmem:[#allocation8 + $0x6b4] sm:$0xf0]  ;;  %v13712_v48 = vld [vmem:[#allocation8 + $0x69c] sm:$0xf]  ;;  %v13785_v22 = vld [vmem:[#allocation8 + $0x8dc] sm:$0xf0] }
 0x1bb   :  { %2383 = vmatpush.bf16.msrb.mxu3 %v10136_v51  ;;  %2396 = vmatpush.bf16.msra.mxu0 %v10140_v52  ;;  %v1349_v44 = vpop.f32.mrf.mxu3  ;;  %v1325_v51 = vpop.f32.mrf.mxu1  ;;  %v10008_v57 = vor.u32 %v13716_v46, %v10007_v38  ;;  %v10012_v24 = vor.u32 %v13712_v48, %v10009_v49  ;;  %v10369_v38 = vld [vmem:[#allocation8 + $0x9a0] sm:$0xf0]  ;;  %v13810_v46 = vld [vmem:[#allocation8 + $0x9a4] sm:$0xf0]  ;;  %v13806_v48 = vld [vmem:[#allocation8 + $0x98c] sm:$0xf] }
 0x1bc   :  { %v15276_v50 = vadd.f32 %v1349_v44, %v15249_v27  ;;  %v9935_v27 = vld [vmem:[#allocation8 + $0x610] sm:$0xf]  ;;  %v10375_v44 = vld [vmem:[#allocation8 + $0x988] sm:$0xf]  ;;  %v10377_v49 = vld [vmem:[#allocation8 + $0x9a8] sm:$0xf0] }
 0x1bd   :  { %v1364_v52 = vpop.f32.mrf.mxu0  ;;  %v10376_v55 = vor.u32 %v13810_v46, %v10375_v44  ;;  %v10380_v56 = vor.u32 %v13806_v48, %v10377_v49  ;;  %v13778_v46 = vld [vmem:[#allocation8 + $0x8a4] sm:$0xf0]  ;;  %v13774_v48 = vld [vmem:[#allocation8 + $0x88c] sm:$0xf] }
 0x1be   :  { %2358 = vmatpush.bf16.msrb.mxu1 %v10096_v59  ;;  %2371 = vmatpush.bf16.msrb.mxu2 %v10100_v61  ;;  %v9975_v59 = vld [vmem:[#allocation8 + $0x658] sm:$0xf]  ;;  %v10372_v52 = vor.u32 %v13805_v42, %v10369_v38  ;;  %v10247_v42 = vld [vmem:[#allocation8 + $0x888] sm:$0xf]  ;;  %v10249_v49 = vld [vmem:[#allocation8 + $0x8a8] sm:$0xf0] }
 0x1bf   :  { %2384 = vmatpush.bf16.msrb.mxu3 %v10104_v4  ;;  %2397 = vmatpush.bf16.msra.mxu0 %v10108_v5  ;;  %v13708_v61 = vld [vmem:[#allocation8 + $0x674] sm:$0xf0]  ;;  %v9972_v4 = vor.u32 %v13703_v58, %v9969_v6  ;;  %v13699_v5 = vld [vmem:[#allocation8 + $0x62c] sm:$0xf0]  ;;  %v10343_v58 = vld [vmem:[#allocation8 + $0x948] sm:$0xf] }
 0x1c0   :  { %v9976_v10 = vor.u32 %v13708_v61, %v9975_v59  ;;  %v1338_v15 = vpop.f32.mrf.mxu2  ;;  %v9936_v28 = vor.u32 %v13699_v5, %v9935_v27  ;;  %v13802_v6 = vld [vmem:[#allocation8 + $0x964] sm:$0xf0]  ;;  %v13798_v59 = vld [vmem:[#allocation8 + $0x94c] sm:$0xf]  ;;  %v10303_v27 = vld [vmem:[#allocation8 + $0x900] sm:$0xf] }
 0x1c1   :  { %v10345_v61 = vld [vmem:[#allocation8 + $0x968] sm:$0xf0] }
 0x1c2   :  { %2359 = vmatpush.bf16.msrb.mxu1 %v10064_v19  ;;  %2372 = vmatpush.bf16.msrb.mxu2 %v10068_v20  ;;  %v9945_v20 = vld [vmem:[#allocation8 + $0x638] sm:$0xf0]  ;;  %v10348_v5 = vor.u32 %v13798_v59, %v10345_v61  ;;  %v13790_v15 = vld [vmem:[#allocation8 + $0x90c] sm:$0xf]  ;;  %v10215_v59 = vld [vmem:[#allocation8 + $0x848] sm:$0xf] }
 0x1c3   :  { %2385 = vmatpush.bf16.msrb.mxu3 %v10072_v25  ;;  %2398 = vmatpush.bf16.msra.mxu0 %v10076_v26  ;;  %v1351_v19 = vpop.f32.mrf.mxu3  ;;  %v13813_v25 = vld [vmem:[#allocation8 + $0x9c4] sm:$0xf]  ;;  %v13770_v61 = vld [vmem:[#allocation8 + $0x864] sm:$0xf0] }
 0x1c4   :  { %v10401_v26 = vld [vmem:[#allocation8 + $0x9e0] sm:$0xf0] }
 0x1c5   :  { %v10404_v37 = vor.u32 %v13813_v25, %v10401_v26 }
 0x1c6   :  { %2360 = vmatpush.bf16.msrb.mxu1 %v10032_v14  ;;  %2373 = vmatpush.bf16.msrb.mxu2 %v10036_v35  ;;  %v9944_v14 = vor.u32 %v13700_v17, %v9943_v16  ;;  %v9948_v35 = vor.u32 %v13696_v18, %v9945_v20  ;;  %v10313_v16 = vld [vmem:[#allocation8 + $0x928] sm:$0xf0]  ;;  %v10308_v20 = vor.u32 %v13789_v7, %v10305_v9  ;;  %v10177_v7 = vld [vmem:[#allocation8 + $0x820] sm:$0xf0] }
 0x1c7   :  { %2386 = vmatpush.bf16.msrb.mxu3 %v10040_v39  ;;  %2399 = vmatpush.bf16.msra.mxu0 %v10044_v40  ;;  %v10367_v39 = vld [vmem:[#allocation8 + $0x980] sm:$0xf]  ;;  %v10316_v11 = vor.u32 %v13790_v15, %v10313_v16  ;;  %v10216_v9 = vor.u32 %v13770_v61, %v10215_v59  ;;  %v10183_v15 = vld [vmem:[#allocation8 + $0x808] sm:$0xf]  ;;  %v13800_v59 = vld [vmem:[#allocation8 + $0x95c] sm:$0xf] }
 0x1c8   :  { %v13809_v40 = vld [vmem:[#allocation8 + $0x99c] sm:$0xf0]  ;;  %v13762_v16 = vld [vmem:[#allocation8 + $0x824] sm:$0xf0]  ;;  %v10361_v61 = vld [vmem:[#allocation8 + $0x978] sm:$0xf0] }
 0x1c9   :  { %v10368_v51 = vor.u32 %v13809_v40, %v10367_v39  ;;  %v10280_v39 = vor.u32 %v13786_v33, %v10279_v31  ;;  %v13820_v31 = vld [vmem:[#allocation8 + $0x9f4] sm:$0xf0]  ;;  %v13816_v33 = vld [vmem:[#allocation8 + $0x9dc] sm:$0xf] }
 0x1ca   :  { %2361 = vmatpush.bf16.msrb.mxu1 %v10000_v53  ;;  %2374 = vmatpush.bf16.msrb.mxu2 %v10004_v54  ;;  %v10335_v53 = vld [vmem:[#allocation8 + $0x940] sm:$0xf] }
 0x1cb   :  { %2387 = vmatpush.bf16.msrb.mxu3 %v10008_v57  ;;  %2400 = vmatpush.bf16.msra.mxu0 %v10012_v24  ;;  %v13801_v54 = vld [vmem:[#allocation8 + $0x95c] sm:$0xf0]  ;;  %v13797_v57 = vld [vmem:[#allocation8 + $0x944] sm:$0xf] }
 0x1cc   :  { %v10337_v24 = vld [vmem:[#allocation8 + $0x960] sm:$0xf0]  ;;  %v10336_v62 = vor.u32 %v13801_v54, %v10335_v53 }
 0x1cd   :  { %v10340_v63 = vor.u32 %v13797_v57, %v10337_v24  ;;  %v13769_v57 = vld [vmem:[#allocation8 + $0x85c] sm:$0xf0]  ;;  %v10248_v24 = vor.u32 %v13778_v46, %v10247_v42  ;;  %v10385_v42 = vld [vmem:[#allocation8 + $0x9b0] sm:$0xf0]  ;;  %v13812_v46 = vld [vmem:[#allocation8 + $0x9b4] sm:$0xf0] }
 0x1ce   :  { %2362 = vmatpush.bf16.msrb.mxu1 %v9968_v2  ;;  %2375 = vmatpush.bf16.msrb.mxu2 %v9972_v4  ;;  %v13793_v2 = vld [vmem:[#allocation8 + $0x91c] sm:$0xf0]  ;;  %v10344_v4 = vor.u32 %v13802_v6, %v10343_v58  ;;  %v13765_v58 = vld [vmem:[#allocation8 + $0x844] sm:$0xf] }
 0x1cf   :  { %2388 = vmatpush.bf16.msrb.mxu3 %v9976_v10  ;;  %2401 = vmatpush.bf16.msra.mxu0 %v9980_v12  ;;  %v10311_v10 = vld [vmem:[#allocation8 + $0x908] sm:$0xf]  ;;  %v10304_v19 = vor.u32 %v13793_v2, %v10303_v27  ;;  %v10209_v6 = vld [vmem:[#allocation8 + $0x860] sm:$0xf0] }
 0x1d0   :  { %v13794_v12 = vld [vmem:[#allocation8 + $0x924] sm:$0xf0]  ;;  %v10212_v2 = vor.u32 %v13765_v58, %v10209_v6  ;;  %v10359_v58 = vld [vmem:[#allocation8 + $0x958] sm:$0xf] }
 0x1d1   :  { %v10312_v26 = vor.u32 %v13794_v12, %v10311_v10  ;;  %v13804_v6 = vld [vmem:[#allocation8 + $0x974] sm:$0xf0] }
 0x1d2   :  { %2363 = vmatpush.bf16.msrb.mxu1 %v9936_v28  ;;  %2376 = vmatpush.bf16.msrb.mxu2 %v9940_v30  ;;  %v1375_v17 = vpop.f32.mrf.mxu1  ;;  %v13781_v28 = vld [vmem:[#allocation8 + $0x8c4] sm:$0xf] }
 0x1d3   :  { %2389 = vmatpush.bf16.msrb.mxu3 %v9944_v14  ;;  %2402 = vmatpush.bf16.msra.mxu0 %v9948_v35  ;;  %v10273_v30 = vld [vmem:[#allocation8 + $0x8e0] sm:$0xf0]  ;;  %v10281_v14 = vld [vmem:[#allocation8 + $0x8e8] sm:$0xf0] }
 0x1d4   :  { %v10276_v35 = vor.u32 %v13781_v28, %v10273_v30  ;;  %v10284_v40 = vor.u32 %v13782_v34, %v10281_v14  ;;  %v10425_v34 = vld [vmem:[#allocation8 + $0x9f8] sm:$0xf0]  ;;  %v10184_v14 = vor.u32 %v13762_v16, %v10183_v15 }
 0x1d5   :  { %2364 = vmatmul.bf16.vlgmr.msrb.gmra.mxu1 %v15260_v45  ;;  %2377 = vmatmul.bf16.vlgmr.msrb.gmra.mxu2 %v15260_v45  ;;  %v1414_v18 = vpop.f32.mrf.mxu0  ;;  %v10329_v15 = vld [vmem:[#allocation8 + $0x938] sm:$0xf0] }
 0x1d6   :  { %2802 = vmatpush.bf16.msra.mxu1 %v10400_v36  ;;  %2815 = vmatpush.bf16.msra.mxu2 %v10404_v37  ;;  %v15286_v25 = vadd.f32 %v1414_v18, %v15253_v1  ;;  %v10239_v36 = vld [vmem:[#allocation8 + $0x880] sm:$0xf] }
 0x1d7   :  { %2828 = vmatpush.bf16.msra.mxu3 %v10408_v3  ;;  %2841 = vmatpush.bf16.msrb.mxu0 %v10412_v41  ;;  %v13777_v37 = vld [vmem:[#allocation8 + $0x89c] sm:$0xf0]  ;;  %v13773_v3 = vld [vmem:[#allocation8 + $0x884] sm:$0xf] }
 0x1d8   :  { %2390 = vmatmul.bf16.vlgmr.msrb.gmra.mxu3 %v15260_v45  ;;  %2403 = vmatmul.bf16.vlgmr.msra.gmra.mxu0 %v15260_v45  ;;  %v15283_v45 = vadd.f32 %v1375_v17, %v15251_v60  ;;  %v10272_v60 = vor.u32 %v13785_v22, %v10271_v21  ;;  %v1388_v1 = vpop.f32.mrf.mxu2  ;;  %v10241_v41 = vld [vmem:[#allocation8 + $0x8a0] sm:$0xf0]  ;;  %v10240_v54 = vor.u32 %v13777_v37, %v10239_v36  ;;  %v13758_v17 = vld [vmem:[#allocation8 + $0x80c] sm:$0xf]  ;;  %v13819_v21 = vld [vmem:[#allocation8 + $0x9ec] sm:$0xf0] }
 0x1d9   :  { %v15289_v38 = vadd.f32 %v1388_v1, %v15255_v29  ;;  %v10252_v29 = vor.u32 %v13774_v48, %v10249_v49  ;;  %v13815_v22 = vld [vmem:[#allocation8 + $0x9d4] sm:$0xf]  ;;  %v13808_v48 = vld [vmem:[#allocation8 + $0x99c] sm:$0xf] }
 0x1da   :  { %2803 = vmatpush.bf16.msra.mxu1 %v10368_v51  ;;  %2816 = vmatpush.bf16.msra.mxu2 %v10372_v52  ;;  %v1377_v52 = vpop.f32.mrf.mxu1  ;;  %v10393_v49 = vld [vmem:[#allocation8 + $0x9b8] sm:$0xf0] }
 0x1db   :  { %2829 = vmatpush.bf16.msra.mxu3 %v10376_v55  ;;  %2842 = vmatpush.bf16.msrb.mxu0 %v10380_v56  ;;  %v1401_v44 = vpop.f32.mrf.mxu3  ;;  %v10244_v55 = vor.u32 %v13773_v3, %v10241_v41  ;;  %v10207_v56 = vld [vmem:[#allocation8 + $0x840] sm:$0xf]  ;;  %v10428_v3 = vor.u32 %v13816_v33, %v10425_v34  ;;  %v13807_v41 = vld [vmem:[#allocation8 + $0x994] sm:$0xf]  ;;  %v10295_v33 = vld [vmem:[#allocation8 + $0x8d8] sm:$0xf] }
 0x1dc   :  { %v15292_v51 = vadd.f32 %v1401_v44, %v15257_v32  ;;  %v10175_v32 = vld [vmem:[#allocation8 + $0x800] sm:$0xf]  ;;  %v10208_v27 = vor.u32 %v13769_v57, %v10207_v56  ;;  %v10391_v44 = vld [vmem:[#allocation8 + $0x998] sm:$0xf]  ;;  %v10396_v57 = vor.u32 %v13808_v48, %v10393_v49  ;;  %v13776_v48 = vld [vmem:[#allocation8 + $0x89c] sm:$0xf] }
 0x1dd   :  { %v1416_v53 = vpop.f32.mrf.mxu0  ;;  %v10392_v56 = vor.u32 %v13812_v46, %v10391_v44  ;;  %v13788_v34 = vld [vmem:[#allocation8 + $0x8f4] sm:$0xf0]  ;;  %v10265_v49 = vld [vmem:[#allocation8 + $0x8b8] sm:$0xf0] }
 0x1de   :  { %2804 = vmatpush.bf16.msra.mxu1 %v10336_v62  ;;  %2817 = vmatpush.bf16.msra.mxu2 %v10340_v63  ;;  %v13766_v62 = vld [vmem:[#allocation8 + $0x84c] sm:$0xf]  ;;  %v10388_v53 = vor.u32 %v13807_v41, %v10385_v42  ;;  %v10263_v41 = vld [vmem:[#allocation8 + $0x898] sm:$0xf] }
 0x1df   :  { %2830 = vmatpush.bf16.msra.mxu3 %v10344_v4  ;;  %2843 = vmatpush.bf16.msrb.mxu0 %v10348_v5  ;;  %v10217_v63 = vld [vmem:[#allocation8 + $0x868] sm:$0xf0]  ;;  %v13761_v4 = vld [vmem:[#allocation8 + $0x81c] sm:$0xf0]  ;;  %v13757_v5 = vld [vmem:[#allocation8 + $0x804] sm:$0xf] }
 0x1e0   :  { %v10220_v10 = vor.u32 %v13766_v62, %v10217_v63  ;;  %v1390_v12 = vpop.f32.mrf.mxu2  ;;  %v10176_v28 = vor.u32 %v13761_v4, %v10175_v32  ;;  %v10180_v30 = vor.u32 %v13757_v5, %v10177_v7  ;;  %v10319_v32 = vld [vmem:[#allocation8 + $0x910] sm:$0xf]  ;;  %v10364_v4 = vor.u32 %v13800_v59, %v10361_v61  ;;  %v13791_v5 = vld [vmem:[#allocation8 + $0x914] sm:$0xf]  ;;  %v13780_v46 = vld [vmem:[#allocation8 + $0x8b4] sm:$0xf0] }
 0x1e1   :  { %v10321_v7 = vld [vmem:[#allocation8 + $0x930] sm:$0xf0]  ;;  %v13792_v12 = vld [vmem:[#allocation8 + $0x91c] sm:$0xf]  ;;  %v10231_v59 = vld [vmem:[#allocation8 + $0x858] sm:$0xf] }
 0x1e2   :  { %2805 = vmatpush.bf16.msra.mxu1 %v10304_v19  ;;  %2818 = vmatpush.bf16.msra.mxu2 %v10308_v20  ;;  %v10185_v19 = vld [vmem:[#allocation8 + $0x828] sm:$0xf0]  ;;  %v10415_v20 = vld [vmem:[#allocation8 + $0x9d0] sm:$0xf]  ;;  %v13772_v61 = vld [vmem:[#allocation8 + $0x874] sm:$0xf0] }
 0x1e3   :  { %2831 = vmatpush.bf16.msra.mxu3 %v10312_v26  ;;  %2844 = vmatpush.bf16.msrb.mxu0 %v10316_v11  ;;  %v1403_v18 = vpop.f32.mrf.mxu3  ;;  %v10417_v26 = vld [vmem:[#allocation8 + $0x9f0] sm:$0xf0]  ;;  %v10423_v11 = vld [vmem:[#allocation8 + $0x9d8] sm:$0xf]  ;;  %v10416_v36 = vor.u32 %v13819_v21, %v10415_v20  ;;  %v10324_v20 = vor.u32 %v13791_v5, %v10321_v7  ;;  %v10287_v21 = vld [vmem:[#allocation8 + $0x8d0] sm:$0xf]  ;;  %v10232_v7 = vor.u32 %v13772_v61, %v10231_v59 }
 0x1e4   :  { %v10420_v37 = vor.u32 %v13815_v22, %v10417_v26  ;;  %v10424_v1 = vor.u32 %v13820_v31, %v10423_v11  ;;  %v13787_v22 = vld [vmem:[#allocation8 + $0x8ec] sm:$0xf0]  ;;  %v10289_v31 = vld [vmem:[#allocation8 + $0x8f0] sm:$0xf0]  ;;  %v10601_v59 = vld [vmem:[#allocation8 + $0xb68] sm:$0xf0] }
 0x1e5   :  { %v10193_v5 = vld [vmem:[#allocation8 + $0x830] sm:$0xf0] }
 0x1e6   :  { %2806 = vmatpush.bf16.msra.mxu1 %v10272_v60  ;;  %2819 = vmatpush.bf16.msra.mxu2 %v10276_v35  ;;  %v10188_v60 = vor.u32 %v13758_v17, %v10185_v19  ;;  %v434_v35 = vmax.f32 %v15205_v0, 0.0 }
 0x1e7   :  { %2832 = vmatpush.bf16.msra.mxu3 %v10280_v39  ;;  %2845 = vmatpush.bf16.msrb.mxu0 %v10284_v40  ;;  %v10383_v39 = vld [vmem:[#allocation8 + $0x990] sm:$0xf] }
 0x1e8   :  { %v13811_v40 = vld [vmem:[#allocation8 + $0x9ac] sm:$0xf0]  ;;  %v15295_v52 = vpack.c.bf16 %v434_v35, %v434_v35 }
 0x1e9   :  { %v10384_v0 = vor.u32 %v13811_v40, %v10383_v39  ;;  %v10296_v39 = vor.u32 %v13788_v34, %v10295_v33  ;;  %v13882_v33 = vld [vmem:[#allocation8 + $0xbe4] sm:$0xf0]  ;;  %v13878_v34 = vld [vmem:[#allocation8 + $0xbcc] sm:$0xf] }
 0x1ea   :  { %2807 = vmatpush.bf16.msra.mxu1 %v10240_v54  ;;  %2820 = vmatpush.bf16.msra.mxu2 %v10244_v55  ;;  %v10351_v54 = vld [vmem:[#allocation8 + $0x950] sm:$0xf] }
 0x1eb   :  { %2833 = vmatpush.bf16.msra.mxu3 %v10248_v24  ;;  %2846 = vmatpush.bf16.msrb.mxu0 %v10252_v29  ;;  %v13803_v55 = vld [vmem:[#allocation8 + $0x96c] sm:$0xf0]  ;;  %v13799_v24 = vld [vmem:[#allocation8 + $0x954] sm:$0xf] }
 0x1ec   :  { %v10353_v29 = vld [vmem:[#allocation8 + $0x970] sm:$0xf0]  ;;  %v10352_v62 = vor.u32 %v13803_v55, %v10351_v54 }
 0x1ed   :  { %v10356_v63 = vor.u32 %v13799_v24, %v10353_v29  ;;  %v13771_v24 = vld [vmem:[#allocation8 + $0x86c] sm:$0xf0]  ;;  %v10264_v29 = vor.u32 %v13780_v46, %v10263_v41  ;;  %v10631_v41 = vld [vmem:[#allocation8 + $0xb88] sm:$0xf]  ;;  %v13870_v46 = vld [vmem:[#allocation8 + $0xb8c] sm:$0xf] }
 0x1ee   :  { %2808 = vmatpush.bf16.msra.mxu1 %v10208_v27  ;;  %2821 = vmatpush.bf16.msra.mxu2 %v10212_v2  ;;  %v13795_v27 = vld [vmem:[#allocation8 + $0x92c] sm:$0xf0]  ;;  %v10360_v2 = vor.u32 %v13804_v6, %v10359_v58  ;;  %v13767_v58 = vld [vmem:[#allocation8 + $0x854] sm:$0xf] }
 0x1ef   :  { %2834 = vmatpush.bf16.msra.mxu3 %v10216_v9  ;;  %2847 = vmatpush.bf16.msrb.mxu0 %v10220_v10  ;;  %v10327_v9 = vld [vmem:[#allocation8 + $0x918] sm:$0xf]  ;;  %v10320_v19 = vor.u32 %v13795_v27, %v10319_v32  ;;  %v10225_v6 = vld [vmem:[#allocation8 + $0x870] sm:$0xf0] }
 0x1f0   :  { %v13796_v10 = vld [vmem:[#allocation8 + $0x934] sm:$0xf0]  ;;  %v10228_v27 = vor.u32 %v13767_v58, %v10225_v6  ;;  %v13866_v58 = vld [vmem:[#allocation8 + $0xb64] sm:$0xf0]  ;;  %v13862_v6 = vld [vmem:[#allocation8 + $0xb4c] sm:$0xf] }
 0x1f1   :  { %v10328_v11 = vor.u32 %v13796_v10, %v10327_v9 }
 0x1f2   :  { %2809 = vmatpush.bf16.msra.mxu1 %v10176_v28  ;;  %2822 = vmatpush.bf16.msra.mxu2 %v10180_v30  ;;  %v1814_v16 = vpop.f32.mrf.mxu1  ;;  %v10332_v28 = vor.u32 %v13792_v12, %v10329_v15  ;;  %v13783_v30 = vld [vmem:[#allocation8 + $0x8d4] sm:$0xf]  ;;  %v10199_v12 = vld [vmem:[#allocation8 + $0x818] sm:$0xf] }
 0x1f3   :  { %2835 = vmatpush.bf16.msra.mxu3 %v10184_v14  ;;  %2848 = vmatpush.bf16.msrb.mxu0 %v10188_v60  ;;  %v15302_v17 = vadd.f32 %v1814_v16, %v15267_v13  ;;  %v13784_v14 = vld [vmem:[#allocation8 + $0x8dc] sm:$0xf]  ;;  %v10288_v13 = vor.u32 %v13787_v22, %v10287_v21  ;;  %v10292_v35 = vor.u32 %v13783_v30, %v10289_v31  ;;  %v13764_v15 = vld [vmem:[#allocation8 + $0x834] sm:$0xf0]  ;;  %v13881_v21 = vld [vmem:[#allocation8 + $0xbdc] sm:$0xf0] }
 0x1f4   :  { %v10297_v60 = vld [vmem:[#allocation8 + $0x8f8] sm:$0xf0]  ;;  %v13877_v22 = vld [vmem:[#allocation8 + $0xbc4] sm:$0xf] }
 0x1f5   :  { %2810 = vmatmul.bf16.vlgmr.msra.gmra.mxu1 %v15295_v52  ;;  %2823 = vmatmul.bf16.vlgmr.msra.gmra.mxu2 %v15295_v52  ;;  %v1853_v18 = vpop.f32.mrf.mxu0  ;;  %v10300_v40 = vor.u32 %v13784_v14, %v10297_v60  ;;  %v13760_v16 = vld [vmem:[#allocation8 + $0x81c] sm:$0xf]  ;;  %v10665_v14 = vld [vmem:[#allocation8 + $0xbe8] sm:$0xf0]  ;;  %v10200_v60 = vor.u32 %v13764_v15, %v10199_v12 }
 0x1f6   :  { %2854 = vmatpush.bf16.msrb.mxu1 %v10416_v36  ;;  %2867 = vmatpush.bf16.msrb.mxu2 %v10420_v37  ;;  %v15305_v26 = vadd.f32 %v1853_v18, %v15270_v23  ;;  %v10255_v36 = vld [vmem:[#allocation8 + $0x890] sm:$0xf] }
 0x1f7   :  { %2880 = vmatpush.bf16.msrb.mxu3 %v10424_v1  ;;  %2893 = vmatpush.bf16.msra.mxu0 %v10428_v3  ;;  %v13779_v37 = vld [vmem:[#allocation8 + $0x8ac] sm:$0xf0]  ;;  %v13775_v1 = vld [vmem:[#allocation8 + $0x894] sm:$0xf] }
 0x1f8   :  { %2836 = vmatmul.bf16.vlgmr.msra.gmra.mxu3 %v15295_v52  ;;  %2849 = vmatmul.bf16.vlgmr.msrb.gmra.mxu0 %v15295_v52  ;;  %v1827_v23 = vpop.f32.mrf.mxu2  ;;  %v10257_v3 = vld [vmem:[#allocation8 + $0x8b0] sm:$0xf0]  ;;  %v10256_v55 = vor.u32 %v13779_v37, %v10255_v36  ;;  %v10623_v37 = vld [vmem:[#allocation8 + $0xb80] sm:$0xf] }
 0x1f9   :  { %v15308_v42 = vadd.f32 %v1827_v23, %v15273_v43  ;;  %v10268_v43 = vor.u32 %v13776_v48, %v10265_v49  ;;  %v10668_v23 = vor.u32 %v13878_v34, %v10665_v14  ;;  %v10633_v48 = vld [vmem:[#allocation8 + $0xba8] sm:$0xf0]  ;;  %v13850_v34 = vld [vmem:[#allocation8 + $0xae4] sm:$0xf0] }
 0x1fa   :  { %2855 = vmatpush.bf16.msrb.mxu1 %v10384_v0  ;;  %2868 = vmatpush.bf16.msrb.mxu2 %v10388_v53  ;;  %v1816_v53 = vpop.f32.mrf.mxu1  ;;  %v13846_v14 = vld [vmem:[#allocation8 + $0xacc] sm:$0xf] }
 0x1fb   :  { %2881 = vmatpush.bf16.msrb.mxu3 %v10392_v56  ;;  %2894 = vmatpush.bf16.msra.mxu0 %v10396_v57  ;;  %v1840_v44 = vpop.f32.mrf.mxu3  ;;  %v10260_v56 = vor.u32 %v13775_v1, %v10257_v3  ;;  %v10223_v57 = vld [vmem:[#allocation8 + $0x850] sm:$0xf]  ;;  %v13869_v1 = vld [vmem:[#allocation8 + $0xb84] sm:$0xf] }
 0x1fc   :  { %v15311_v0 = vadd.f32 %v1840_v44, %v15276_v50  ;;  %v10191_v50 = vld [vmem:[#allocation8 + $0x810] sm:$0xf]  ;;  %v10224_v32 = vor.u32 %v13771_v24, %v10223_v57  ;;  %v10625_v3 = vld [vmem:[#allocation8 + $0xba0] sm:$0xf0]  ;;  %v13874_v44 = vld [vmem:[#allocation8 + $0xba4] sm:$0xf0]  ;;  %v10636_v57 = vor.u32 %v13870_v46, %v10633_v48 }
 0x1fd   :  { %v1855_v54 = vpop.f32.mrf.mxu0  ;;  %v10628_v53 = vor.u32 %v13869_v1, %v10625_v3  ;;  %v13861_v24 = vld [vmem:[#allocation8 + $0xb44] sm:$0xf]  ;;  %v10503_v1 = vld [vmem:[#allocation8 + $0xa88] sm:$0xf]  ;;  %v13838_v46 = vld [vmem:[#allocation8 + $0xa8c] sm:$0xf] }
 0x1fe   :  { %2856 = vmatpush.bf16.msrb.mxu1 %v10352_v62  ;;  %2869 = vmatpush.bf16.msrb.mxu2 %v10356_v63  ;;  %v13768_v62 = vld [vmem:[#allocation8 + $0x85c] sm:$0xf]  ;;  %v10591_v54 = vld [vmem:[#allocation8 + $0xb40] sm:$0xf]  ;;  %v10505_v48 = vld [vmem:[#allocation8 + $0xaa8] sm:$0xf0] }
 0x1ff   :  { %2882 = vmatpush.bf16.msrb.mxu3 %v10360_v2  ;;  %2895 = vmatpush.bf16.msra.mxu0 %v10364_v4  ;;  %v10233_v63 = vld [vmem:[#allocation8 + $0x878] sm:$0xf0]  ;;  %v13763_v2 = vld [vmem:[#allocation8 + $0x82c] sm:$0xf0]  ;;  %v13759_v4 = vld [vmem:[#allocation8 + $0x814] sm:$0xf] }
 0x200   :  { %v10236_v9 = vor.u32 %v13768_v62, %v10233_v63  ;;  %v1829_v10 = vpop.f32.mrf.mxu2  ;;  %v10192_v30 = vor.u32 %v13763_v2, %v10191_v50  ;;  %v10196_v31 = vor.u32 %v13759_v4, %v10193_v5  ;;  %v10559_v63 = vld [vmem:[#allocation8 + $0xb00] sm:$0xf]  ;;  %v13853_v2 = vld [vmem:[#allocation8 + $0xb04] sm:$0xf]  ;;  %v10567_v5 = vld [vmem:[#allocation8 + $0xb08] sm:$0xf] }
 0x201   :  { %v13857_v50 = vld [vmem:[#allocation8 + $0xb1c] sm:$0xf0]  ;;  %v10561_v4 = vld [vmem:[#allocation8 + $0xb20] sm:$0xf0]  ;;  %v10569_v10 = vld [vmem:[#allocation8 + $0xb28] sm:$0xf0] }
 0x202   :  { %2857 = vmatpush.bf16.msrb.mxu1 %v10320_v19  ;;  %2870 = vmatpush.bf16.msrb.mxu2 %v10324_v20  ;;  %v10201_v19 = vld [vmem:[#allocation8 + $0x838] sm:$0xf0]  ;;  %v10655_v20 = vld [vmem:[#allocation8 + $0xbc0] sm:$0xf] }
 0x203   :  { %2883 = vmatpush.bf16.msrb.mxu3 %v10328_v11  ;;  %2896 = vmatpush.bf16.msra.mxu0 %v10332_v28  ;;  %v1842_v18 = vpop.f32.mrf.mxu3  ;;  %v10657_v11 = vld [vmem:[#allocation8 + $0xbe0] sm:$0xf0]  ;;  %v10663_v28 = vld [vmem:[#allocation8 + $0xbc8] sm:$0xf] }
 0x204   :  { %v10660_v36 = vor.u32 %v13877_v22, %v10657_v11  ;;  %v10560_v18 = vor.u32 %v13857_v50, %v10559_v63 }
 0x206   :  { %2858 = vmatpush.bf16.msrb.mxu1 %v10288_v13  ;;  %2871 = vmatpush.bf16.msrb.mxu2 %v10292_v35  ;;  %v10204_v13 = vor.u32 %v13760_v16, %v10201_v19  ;;  %v10656_v35 = vor.u32 %v13881_v21, %v10655_v20  ;;  %v10564_v19 = vor.u32 %v13853_v2, %v10561_v4  ;;  %v10527_v20 = vld [vmem:[#allocation8 + $0xac0] sm:$0xf]  ;;  %v10433_v2 = vld [vmem:[#allocation8 + $0xa20] sm:$0xf0] }
 0x207   :  { %2884 = vmatpush.bf16.msrb.mxu3 %v10296_v39  ;;  %2897 = vmatpush.bf16.msra.mxu0 %v10300_v40  ;;  %v13873_v39 = vld [vmem:[#allocation8 + $0xb9c] sm:$0xf0]  ;;  %v10664_v40 = vor.u32 %v13882_v33, %v10663_v28  ;;  %v10535_v33 = vld [vmem:[#allocation8 + $0xac8] sm:$0xf] }
 0x208   :  { %v10624_v49 = vor.u32 %v13873_v39, %v10623_v37  ;;  %v13849_v21 = vld [vmem:[#allocation8 + $0xadc] sm:$0xf0]  ;;  %v10536_v37 = vor.u32 %v13850_v34, %v10535_v33  ;;  %v13884_v33 = vld [vmem:[#allocation8 + $0xbf4] sm:$0xf0]  ;;  %v13880_v34 = vld [vmem:[#allocation8 + $0xbdc] sm:$0xf] }
 0x20a   :  { %2859 = vmatpush.bf16.msrb.mxu1 %v10256_v55  ;;  %2872 = vmatpush.bf16.msrb.mxu2 %v10260_v56  ;;  %v13865_v55 = vld [vmem:[#allocation8 + $0xb5c] sm:$0xf0]  ;;  %v10632_v56 = vor.u32 %v13874_v44, %v10631_v41  ;;  %v13842_v44 = vld [vmem:[#allocation8 + $0xaa4] sm:$0xf0] }
 0x20b   :  { %2885 = vmatpush.bf16.msrb.mxu3 %v10264_v29  ;;  %2898 = vmatpush.bf16.msra.mxu0 %v10268_v43  ;;  %v10593_v29 = vld [vmem:[#allocation8 + $0xb60] sm:$0xf0]  ;;  %v10599_v43 = vld [vmem:[#allocation8 + $0xb48] sm:$0xf]  ;;  %v10592_v61 = vor.u32 %v13865_v55, %v10591_v54 }
 0x20c   :  { %v10596_v62 = vor.u32 %v13861_v24, %v10593_v29  ;;  %v13833_v24 = vld [vmem:[#allocation8 + $0xa5c] sm:$0xf0]  ;;  %v10504_v29 = vor.u32 %v13842_v44, %v10503_v1  ;;  %v10647_v1 = vld [vmem:[#allocation8 + $0xb98] sm:$0xf]  ;;  %v13872_v44 = vld [vmem:[#allocation8 + $0xb9c] sm:$0xf] }
 0x20e   :  { %2860 = vmatpush.bf16.msrb.mxu1 %v10224_v32  ;;  %2873 = vmatpush.bf16.msrb.mxu2 %v10228_v27  ;;  %v10600_v32 = vor.u32 %v13866_v58, %v10599_v43  ;;  %v10604_v27 = vor.u32 %v13862_v6, %v10601_v59  ;;  %v13829_v43 = vld [vmem:[#allocation8 + $0xa44] sm:$0xf]  ;;  %v10471_v6 = vld [vmem:[#allocation8 + $0xa48] sm:$0xf] }
 0x20f   :  { %2886 = vmatpush.bf16.msrb.mxu3 %v10232_v7  ;;  %2899 = vmatpush.bf16.msra.mxu0 %v10236_v9  ;;  %v13858_v7 = vld [vmem:[#allocation8 + $0xb24] sm:$0xf0]  ;;  %v13854_v9 = vld [vmem:[#allocation8 + $0xb0c] sm:$0xf]  ;;  %v10465_v58 = vld [vmem:[#allocation8 + $0xa60] sm:$0xf0] }
 0x210   :  { %v10568_v11 = vor.u32 %v13858_v7, %v10567_v5  ;;  %v10572_v28 = vor.u32 %v13854_v9, %v10569_v10  ;;  %v13834_v59 = vld [vmem:[#allocation8 + $0xa64] sm:$0xf0]  ;;  %v10468_v50 = vor.u32 %v13829_v43, %v10465_v58  ;;  %v10615_v43 = vld [vmem:[#allocation8 + $0xb58] sm:$0xf] }
 0x211   :  { %v10472_v4 = vor.u32 %v13834_v59, %v10471_v6  ;;  %v10439_v9 = vld [vmem:[#allocation8 + $0xa08] sm:$0xf]  ;;  %v13868_v58 = vld [vmem:[#allocation8 + $0xb74] sm:$0xf0]  ;;  %v13864_v6 = vld [vmem:[#allocation8 + $0xb5c] sm:$0xf] }
 0x212   :  { %2861 = vmatpush.bf16.msrb.mxu1 %v10192_v30  ;;  %2874 = vmatpush.bf16.msrb.mxu2 %v10196_v31  ;;  %v1866_v12 = vpop.f32.mrf.mxu1  ;;  %v13845_v30 = vld [vmem:[#allocation8 + $0xac4] sm:$0xf]  ;;  %v13826_v10 = vld [vmem:[#allocation8 + $0xa24] sm:$0xf0]  ;;  %v10617_v59 = vld [vmem:[#allocation8 + $0xb78] sm:$0xf0] }
 0x213   :  { %2887 = vmatpush.bf16.msrb.mxu3 %v10200_v60  ;;  %2900 = vmatpush.bf16.msra.mxu0 %v10204_v13  ;;  %v15318_v15 = vadd.f32 %v1866_v12, %v15283_v45  ;;  %v10529_v31 = vld [vmem:[#allocation8 + $0xae0] sm:$0xf0]  ;;  %v10537_v60 = vld [vmem:[#allocation8 + $0xae8] sm:$0xf0]  ;;  %v10528_v45 = vor.u32 %v13849_v21, %v10527_v20  ;;  %v13883_v20 = vld [vmem:[#allocation8 + $0xbec] sm:$0xf0] }
 0x214   :  { %v10532_v13 = vor.u32 %v13845_v30, %v10529_v31  ;;  %v10540_v39 = vor.u32 %v13846_v14, %v10537_v60  ;;  %v13822_v12 = vld [vmem:[#allocation8 + $0xa0c] sm:$0xf]  ;;  %v13879_v21 = vld [vmem:[#allocation8 + $0xbd4] sm:$0xf]  ;;  %v10681_v14 = vld [vmem:[#allocation8 + $0xbf8] sm:$0xf0]  ;;  %v10440_v60 = vor.u32 %v13826_v10, %v10439_v9 }
 0x215   :  { %2862 = vmatmul.bf16.vlgmr.msrb.gmra.mxu1 %v15295_v52  ;;  %2875 = vmatmul.bf16.vlgmr.msrb.gmra.mxu2 %v15295_v52  ;;  %v1905_v16 = vpop.f32.mrf.mxu0  ;;  %v10585_v9 = vld [vmem:[#allocation8 + $0xb38] sm:$0xf0] }
 0x216   :  { %3302 = vmatpush.bf16.msra.mxu1 %v10656_v35  ;;  %3315 = vmatpush.bf16.msra.mxu2 %v10660_v36  ;;  %v15321_v22 = vadd.f32 %v1905_v16, %v15286_v25  ;;  %v10495_v35 = vld [vmem:[#allocation8 + $0xa80] sm:$0xf] }
 0x217   :  { %3328 = vmatpush.bf16.msra.mxu3 %v10664_v40  ;;  %3341 = vmatpush.bf16.msrb.mxu0 %v10668_v23  ;;  %v13841_v36 = vld [vmem:[#allocation8 + $0xa9c] sm:$0xf0]  ;;  %v13837_v40 = vld [vmem:[#allocation8 + $0xa84] sm:$0xf] }
 0x218   :  { %2888 = vmatmul.bf16.vlgmr.msrb.gmra.mxu3 %v15295_v52  ;;  %2901 = vmatmul.bf16.vlgmr.msra.gmra.mxu0 %v15295_v52  ;;  %v1879_v25 = vpop.f32.mrf.mxu2  ;;  %v10497_v23 = vld [vmem:[#allocation8 + $0xaa0] sm:$0xf0]  ;;  %v10496_v55 = vor.u32 %v13841_v36, %v10495_v35  ;;  %v10639_v36 = vld [vmem:[#allocation8 + $0xb90] sm:$0xf] }
 0x219   :  { %v15324_v3 = vadd.f32 %v1879_v25, %v15289_v38  ;;  %v10508_v38 = vor.u32 %v13838_v46, %v10505_v48  ;;  %v10684_v25 = vor.u32 %v13880_v34, %v10681_v14  ;;  %v10649_v46 = vld [vmem:[#allocation8 + $0xbb8] sm:$0xf0]  ;;  %v15330_v48 = vrot.slane %v15295_v52, 1  ;;  %v10551_v34 = vld [vmem:[#allocation8 + $0xad8] sm:$0xf] }
 0x21a   :  { %3303 = vmatpush.bf16.msra.mxu1 %v10624_v49  ;;  %3316 = vmatpush.bf16.msra.mxu2 %v10628_v53  ;;  %v1868_v53 = vpop.f32.mrf.mxu1  ;;  %v13852_v14 = vld [vmem:[#allocation8 + $0xaf4] sm:$0xf0] }
 0x21b   :  { %3329 = vmatpush.bf16.msra.mxu3 %v10632_v56  ;;  %3342 = vmatpush.bf16.msrb.mxu0 %v10636_v57  ;;  %v1892_v41 = vpop.f32.mrf.mxu3  ;;  %v10500_v56 = vor.u32 %v13837_v40, %v10497_v23  ;;  %v10463_v57 = vld [vmem:[#allocation8 + $0xa40] sm:$0xf]  ;;  %v13871_v40 = vld [vmem:[#allocation8 + $0xb94] sm:$0xf] }
 0x21c   :  { %v15327_v49 = vadd.f32 %v1892_v41, %v15292_v51  ;;  %v10431_v51 = vld [vmem:[#allocation8 + $0xa00] sm:$0xf]  ;;  %v10464_v63 = vor.u32 %v13833_v24, %v10463_v57  ;;  %v10641_v23 = vld [vmem:[#allocation8 + $0xbb0] sm:$0xf0]  ;;  %v13876_v41 = vld [vmem:[#allocation8 + $0xbb4] sm:$0xf0]  ;;  %v10652_v24 = vor.u32 %v13872_v44, %v10649_v46 }
 0x21d   :  { %v1907_v54 = vpop.f32.mrf.mxu0  ;;  %v10648_v57 = vor.u32 %v13876_v41, %v10647_v1  ;;  %v13844_v44 = vld [vmem:[#allocation8 + $0xab4] sm:$0xf0]  ;;  %v13840_v46 = vld [vmem:[#allocation8 + $0xa9c] sm:$0xf] }
 0x21e   :  { %3304 = vmatpush.bf16.msra.mxu1 %v10592_v61  ;;  %3317 = vmatpush.bf16.msra.mxu2 %v10596_v62  ;;  %v13830_v61 = vld [vmem:[#allocation8 + $0xa4c] sm:$0xf]  ;;  %v10644_v54 = vor.u32 %v13871_v40, %v10641_v23  ;;  %v10513_v40 = vld [vmem:[#allocation8 + $0xab0] sm:$0xf0]  ;;  %v10519_v23 = vld [vmem:[#allocation8 + $0xa98] sm:$0xf] }
 0x21f   :  { %3330 = vmatpush.bf16.msra.mxu3 %v10600_v32  ;;  %3343 = vmatpush.bf16.msrb.mxu0 %v10604_v27  ;;  %v10473_v62 = vld [vmem:[#allocation8 + $0xa68] sm:$0xf0]  ;;  %v13825_v32 = vld [vmem:[#allocation8 + $0xa1c] sm:$0xf0]  ;;  %v13821_v27 = vld [vmem:[#allocation8 + $0xa04] sm:$0xf] }
 0x220   :  { %v10476_v5 = vor.u32 %v13830_v61, %v10473_v62  ;;  %v1881_v7 = vpop.f32.mrf.mxu2  ;;  %v10432_v30 = vor.u32 %v13825_v32, %v10431_v51  ;;  %v10436_v31 = vor.u32 %v13821_v27, %v10433_v2  ;;  %v10575_v51 = vld [vmem:[#allocation8 + $0xb10] sm:$0xf]  ;;  %v10620_v32 = vor.u32 %v13864_v6, %v10617_v59  ;;  %v13855_v27 = vld [vmem:[#allocation8 + $0xb14] sm:$0xf]  ;;  %v10487_v59 = vld [vmem:[#allocation8 + $0xa58] sm:$0xf] }
 0x221   :  { %v10577_v2 = vld [vmem:[#allocation8 + $0xb30] sm:$0xf0]  ;;  %v13856_v7 = vld [vmem:[#allocation8 + $0xb1c] sm:$0xf] }
 0x222   :  { %3305 = vmatpush.bf16.msra.mxu1 %v10560_v18  ;;  %3318 = vmatpush.bf16.msra.mxu2 %v10564_v19  ;;  %v10441_v18 = vld [vmem:[#allocation8 + $0xa28] sm:$0xf0]  ;;  %v10671_v19 = vld [vmem:[#allocation8 + $0xbd0] sm:$0xf]  ;;  %v10481_v6 = vld [vmem:[#allocation8 + $0xa70] sm:$0xf0] }
 0x223   :  { %3331 = vmatpush.bf16.msra.mxu3 %v10568_v11  ;;  %3344 = vmatpush.bf16.msrb.mxu0 %v10572_v28  ;;  %v1894_v16 = vpop.f32.mrf.mxu3  ;;  %v10673_v11 = vld [vmem:[#allocation8 + $0xbf0] sm:$0xf0]  ;;  %v10679_v28 = vld [vmem:[#allocation8 + $0xbd8] sm:$0xf] }
 0x224   :  { %v10676_v35 = vor.u32 %v13879_v21, %v10673_v11  ;;  %v13851_v21 = vld [vmem:[#allocation8 + $0xaec] sm:$0xf0] }
 0x226   :  { %3306 = vmatpush.bf16.msra.mxu1 %v10528_v45  ;;  %3319 = vmatpush.bf16.msra.mxu2 %v10532_v13  ;;  %v10444_v45 = vor.u32 %v13822_v12, %v10441_v18  ;;  %v10672_v13 = vor.u32 %v13883_v20, %v10671_v19  ;;  %v10580_v19 = vor.u32 %v13855_v27, %v10577_v2  ;;  %v10543_v20 = vld [vmem:[#allocation8 + $0xad0] sm:$0xf]  ;;  %v13823_v27 = vld [vmem:[#allocation8 + $0xa14] sm:$0xf] }
 0x227   :  { %3332 = vmatpush.bf16.msra.mxu3 %v10536_v37  ;;  %3345 = vmatpush.bf16.msrb.mxu0 %v10540_v39  ;;  %v13875_v37 = vld [vmem:[#allocation8 + $0xbac] sm:$0xf0]  ;;  %v10680_v39 = vor.u32 %v13884_v33, %v10679_v28  ;;  %v10545_v33 = vld [vmem:[#allocation8 + $0xaf0] sm:$0xf0] }
 0x228   :  { %v10640_v53 = vor.u32 %v13875_v37, %v10639_v36  ;;  %v13843_v36 = vld [vmem:[#allocation8 + $0xaac] sm:$0xf0]  ;;  %v10552_v37 = vor.u32 %v13852_v14, %v10551_v34  ;;  %v10449_v2 = vld [vmem:[#allocation8 + $0xa30] sm:$0xf0]  ;;  %v13946_v14 = vld [vmem:[#allocation8 + $0xde4] sm:$0xf0] }
 0x229   :  { %v10452_v34 = vor.u32 %v13823_v27, %v10449_v2  ;;  %v13917_v27 = vld [vmem:[#allocation8 + $0xd04] sm:$0xf] }
 0x22a   :  { %3307 = vmatpush.bf16.msra.mxu1 %v10496_v55  ;;  %3320 = vmatpush.bf16.msra.mxu2 %v10500_v56  ;;  %v10607_v55 = vld [vmem:[#allocation8 + $0xb50] sm:$0xf]  ;;  %v10817_v2 = vld [vmem:[#allocation8 + $0xd20] sm:$0xf0] }
 0x22b   :  { %3333 = vmatpush.bf16.msra.mxu3 %v10504_v29  ;;  %3346 = vmatpush.bf16.msrb.mxu0 %v10508_v38  ;;  %v13867_v56 = vld [vmem:[#allocation8 + $0xb6c] sm:$0xf0]  ;;  %v13863_v29 = vld [vmem:[#allocation8 + $0xb54] sm:$0xf] }
 0x22c   :  { %v10609_v38 = vld [vmem:[#allocation8 + $0xb70] sm:$0xf0]  ;;  %v10608_v61 = vor.u32 %v13867_v56, %v10607_v55 }
 0x22d   :  { %v10612_v62 = vor.u32 %v13863_v29, %v10609_v38  ;;  %v10479_v29 = vld [vmem:[#allocation8 + $0xa50] sm:$0xf] }
 0x22e   :  { %3308 = vmatpush.bf16.msra.mxu1 %v10464_v63  ;;  %3321 = vmatpush.bf16.msra.mxu2 %v10468_v50  ;;  %v13859_v63 = vld [vmem:[#allocation8 + $0xb2c] sm:$0xf0]  ;;  %v10616_v50 = vor.u32 %v13868_v58, %v10615_v43  ;;  %v10520_v43 = vor.u32 %v13844_v44, %v10519_v23  ;;  %v13831_v58 = vld [vmem:[#allocation8 + $0xa54] sm:$0xf]  ;;  %v10881_v23 = vld [vmem:[#allocation8 + $0xda0] sm:$0xf0] }
 0x22f   :  { %3334 = vmatpush.bf16.msra.mxu3 %v10472_v4  ;;  %3347 = vmatpush.bf16.msrb.mxu0 %v10476_v5  ;;  %v10583_v4 = vld [vmem:[#allocation8 + $0xb18] sm:$0xf]  ;;  %v10576_v18 = vor.u32 %v13859_v63, %v10575_v51  ;;  %v13835_v38 = vld [vmem:[#allocation8 + $0xa6c] sm:$0xf0]  ;;  %v10489_v51 = vld [vmem:[#allocation8 + $0xa78] sm:$0xf0] }
 0x230   :  { %v13860_v5 = vld [vmem:[#allocation8 + $0xb34] sm:$0xf0]  ;;  %v10480_v63 = vor.u32 %v13835_v38, %v10479_v29  ;;  %v13938_v44 = vld [vmem:[#allocation8 + $0xda4] sm:$0xf0] }
 0x231   :  { %v10584_v28 = vor.u32 %v13860_v5, %v10583_v4 }
 0x232   :  { %3309 = vmatpush.bf16.msra.mxu1 %v10432_v30  ;;  %3322 = vmatpush.bf16.msra.mxu2 %v10436_v31  ;;  %v2313_v10 = vpop.f32.mrf.mxu1  ;;  %v10588_v30 = vor.u32 %v13856_v7, %v10585_v9  ;;  %v13847_v31 = vld [vmem:[#allocation8 + $0xad4] sm:$0xf]  ;;  %v10455_v9 = vld [vmem:[#allocation8 + $0xa18] sm:$0xf] }
 0x233   :  { %3335 = vmatpush.bf16.msra.mxu3 %v10440_v60  ;;  %3348 = vmatpush.bf16.msrb.mxu0 %v10444_v45  ;;  %v15337_v12 = vadd.f32 %v2313_v10, %v15302_v17  ;;  %v13848_v60 = vld [vmem:[#allocation8 + $0xadc] sm:$0xf]  ;;  %v10544_v17 = vor.u32 %v13851_v21, %v10543_v20  ;;  %v13828_v10 = vld [vmem:[#allocation8 + $0xa34] sm:$0xf0]  ;;  %v10911_v20 = vld [vmem:[#allocation8 + $0xdc0] sm:$0xf] }
 0x234   :  { %v10553_v45 = vld [vmem:[#allocation8 + $0xaf8] sm:$0xf0]  ;;  %v13945_v21 = vld [vmem:[#allocation8 + $0xddc] sm:$0xf0] }
 0x235   :  { %3310 = vmatmul.bf16.vlgmr.msra.gmra.mxu1 %v15330_v48  ;;  %3323 = vmatmul.bf16.vlgmr.msra.gmra.mxu2 %v15330_v48  ;;  %v2352_v16 = vpop.f32.mrf.mxu0 }
 0x236   :  { %3354 = vmatpush.bf16.msrb.mxu1 %v10672_v13  ;;  %3367 = vmatpush.bf16.msrb.mxu2 %v10676_v35  ;;  %v15340_v11 = vadd.f32 %v2352_v16, %v15305_v26  ;;  %v10548_v13 = vor.u32 %v13847_v31, %v10545_v33  ;;  %v10511_v35 = vld [vmem:[#allocation8 + $0xa90] sm:$0xf]  ;;  %v13824_v16 = vld [vmem:[#allocation8 + $0xa1c] sm:$0xf]  ;;  %v10919_v31 = vld [vmem:[#allocation8 + $0xdc8] sm:$0xf] }
 0x237   :  { %3380 = vmatpush.bf16.msrb.mxu3 %v10680_v39  ;;  %3393 = vmatpush.bf16.msra.mxu0 %v10684_v25  ;;  %v10556_v39 = vor.u32 %v13848_v60, %v10553_v45  ;;  %v13839_v25 = vld [vmem:[#allocation8 + $0xa94] sm:$0xf]  ;;  %v13942_v60 = vld [vmem:[#allocation8 + $0xdcc] sm:$0xf] }
 0x238   :  { %3336 = vmatmul.bf16.vlgmr.msra.gmra.mxu3 %v15330_v48  ;;  %3349 = vmatmul.bf16.vlgmr.msrb.gmra.mxu0 %v15330_v48  ;;  %v2326_v26 = vpop.f32.mrf.mxu2  ;;  %v10921_v45 = vld [vmem:[#allocation8 + $0xde8] sm:$0xf0] }
 0x239   :  { %v15343_v1 = vadd.f32 %v2326_v26, %v15308_v42  ;;  %v10920_v26 = vor.u32 %v13946_v14, %v10919_v31  ;;  %v10791_v14 = vld [vmem:[#allocation8 + $0xcc8] sm:$0xf] }
 0x23a   :  { %3355 = vmatpush.bf16.msrb.mxu1 %v10640_v53  ;;  %3368 = vmatpush.bf16.msrb.mxu2 %v10644_v54  ;;  %v10521_v53 = vld [vmem:[#allocation8 + $0xab8] sm:$0xf0]  ;;  %v2315_v55 = vpop.f32.mrf.mxu1 }
 0x23b   :  { %3381 = vmatpush.bf16.msrb.mxu3 %v10648_v57  ;;  %3394 = vmatpush.bf16.msra.mxu0 %v10652_v24  ;;  %v2339_v41 = vpop.f32.mrf.mxu3  ;;  %v10512_v57 = vor.u32 %v13843_v36, %v10511_v35  ;;  %v10516_v24 = vor.u32 %v13839_v25, %v10513_v40  ;;  %v10524_v42 = vor.u32 %v13840_v46, %v10521_v53  ;;  %v13933_v40 = vld [vmem:[#allocation8 + $0xd84] sm:$0xf]  ;;  %v13934_v46 = vld [vmem:[#allocation8 + $0xd8c] sm:$0xf] }
 0x23c   :  { %v15346_v54 = vadd.f32 %v2339_v41, %v15311_v0  ;;  %v10447_v0 = vld [vmem:[#allocation8 + $0xa10] sm:$0xf]  ;;  %v10912_v35 = vor.u32 %v13945_v21, %v10911_v20  ;;  %v10924_v25 = vor.u32 %v13942_v60, %v10921_v45  ;;  %v10887_v41 = vld [vmem:[#allocation8 + $0xd88] sm:$0xf]  ;;  %v10889_v53 = vld [vmem:[#allocation8 + $0xda8] sm:$0xf0] }
 0x23d   :  { %v2354_v56 = vpop.f32.mrf.mxu0  ;;  %v10888_v29 = vor.u32 %v13938_v44, %v10887_v41  ;;  %v10892_v38 = vor.u32 %v13934_v46, %v10889_v53  ;;  %v10783_v20 = vld [vmem:[#allocation8 + $0xcc0] sm:$0xf]  ;;  %v13914_v60 = vld [vmem:[#allocation8 + $0xce4] sm:$0xf0]  ;;  %v13910_v45 = vld [vmem:[#allocation8 + $0xccc] sm:$0xf] }
 0x23e   :  { %3356 = vmatpush.bf16.msrb.mxu1 %v10608_v61  ;;  %3369 = vmatpush.bf16.msrb.mxu2 %v10612_v62  ;;  %v13836_v61 = vld [vmem:[#allocation8 + $0xa74] sm:$0xf0]  ;;  %v13832_v62 = vld [vmem:[#allocation8 + $0xa5c] sm:$0xf]  ;;  %v10884_v56 = vor.u32 %v13933_v40, %v10881_v23  ;;  %v13913_v21 = vld [vmem:[#allocation8 + $0xcdc] sm:$0xf0] }
 0x23f   :  { %3382 = vmatpush.bf16.msrb.mxu3 %v10616_v50  ;;  %3395 = vmatpush.bf16.msra.mxu0 %v10620_v32  ;;  %v10484_v50 = vor.u32 %v13831_v58, %v10481_v6  ;;  %v13827_v32 = vld [vmem:[#allocation8 + $0xa2c] sm:$0xf0]  ;;  %v10488_v4 = vor.u32 %v13836_v61, %v10487_v59  ;;  %v10492_v5 = vor.u32 %v13832_v62, %v10489_v51  ;;  %v10855_v58 = vld [vmem:[#allocation8 + $0xd48] sm:$0xf]  ;;  %v13926_v59 = vld [vmem:[#allocation8 + $0xd4c] sm:$0xf] }
 0x240   :  { %v2328_v7 = vpop.f32.mrf.mxu2  ;;  %v10448_v33 = vor.u32 %v13827_v32, %v10447_v0  ;;  %v13930_v6 = vld [vmem:[#allocation8 + $0xd64] sm:$0xf0]  ;;  %v10857_v61 = vld [vmem:[#allocation8 + $0xd68] sm:$0xf0]  ;;  %v10815_v0 = vld [vmem:[#allocation8 + $0xd00] sm:$0xf] }
 0x241   :  { %v10860_v32 = vor.u32 %v13926_v59, %v10857_v61  ;;  %v13918_v7 = vld [vmem:[#allocation8 + $0xd0c] sm:$0xf]  ;;  %v10759_v40 = vld [vmem:[#allocation8 + $0xc88] sm:$0xf] }
 0x242   :  { %3357 = vmatpush.bf16.msrb.mxu1 %v10576_v18  ;;  %3370 = vmatpush.bf16.msrb.mxu2 %v10580_v19  ;;  %v10457_v19 = vld [vmem:[#allocation8 + $0xa38] sm:$0xf0]  ;;  %v13906_v44 = vld [vmem:[#allocation8 + $0xca4] sm:$0xf0]  ;;  %v13902_v46 = vld [vmem:[#allocation8 + $0xc8c] sm:$0xf] }
 0x243   :  { %3383 = vmatpush.bf16.msrb.mxu3 %v10584_v28  ;;  %3396 = vmatpush.bf16.msra.mxu0 %v10588_v30  ;;  %v2341_v18 = vpop.f32.mrf.mxu3  ;;  %v13941_v28 = vld [vmem:[#allocation8 + $0xdc4] sm:$0xf]  ;;  %v10761_v53 = vld [vmem:[#allocation8 + $0xca8] sm:$0xf0]  ;;  %v10727_v59 = vld [vmem:[#allocation8 + $0xc48] sm:$0xf] }
 0x244   :  { %v10913_v30 = vld [vmem:[#allocation8 + $0xde0] sm:$0xf0]  ;;  %v13898_v61 = vld [vmem:[#allocation8 + $0xc64] sm:$0xf0] }
 0x245   :  { %v10916_v36 = vor.u32 %v13941_v28, %v10913_v30 }
 0x246   :  { %3358 = vmatpush.bf16.msrb.mxu1 %v10544_v17  ;;  %3371 = vmatpush.bf16.msrb.mxu2 %v10548_v13  ;;  %v10456_v17 = vor.u32 %v13828_v10, %v10455_v9  ;;  %v10460_v13 = vor.u32 %v13824_v16, %v10457_v19  ;;  %v10825_v9 = vld [vmem:[#allocation8 + $0xd28] sm:$0xf0]  ;;  %v10820_v19 = vor.u32 %v13917_v27, %v10817_v2  ;;  %v10689_v27 = vld [vmem:[#allocation8 + $0xc20] sm:$0xf0] }
 0x247   :  { %3384 = vmatpush.bf16.msrb.mxu3 %v10552_v37  ;;  %3397 = vmatpush.bf16.msra.mxu0 %v10556_v39  ;;  %v10879_v37 = vld [vmem:[#allocation8 + $0xd80] sm:$0xf]  ;;  %v10828_v31 = vor.u32 %v13918_v7, %v10825_v9  ;;  %v10728_v2 = vor.u32 %v13898_v61, %v10727_v59  ;;  %v10695_v7 = vld [vmem:[#allocation8 + $0xc08] sm:$0xf]  ;;  %v13928_v59 = vld [vmem:[#allocation8 + $0xd5c] sm:$0xf] }
 0x248   :  { %v13937_v39 = vld [vmem:[#allocation8 + $0xd9c] sm:$0xf0]  ;;  %v13890_v9 = vld [vmem:[#allocation8 + $0xc24] sm:$0xf0]  ;;  %v10873_v61 = vld [vmem:[#allocation8 + $0xd78] sm:$0xf0] }
 0x249   :  { %v10880_v55 = vor.u32 %v13937_v39, %v10879_v37  ;;  %v10792_v37 = vor.u32 %v13914_v60, %v10791_v14  ;;  %v13948_v14 = vld [vmem:[#allocation8 + $0xdf4] sm:$0xf0]  ;;  %v13944_v60 = vld [vmem:[#allocation8 + $0xddc] sm:$0xf] }
 0x24a   :  { %3359 = vmatpush.bf16.msrb.mxu1 %v10512_v57  ;;  %3372 = vmatpush.bf16.msrb.mxu2 %v10516_v24  ;;  %v10847_v57 = vld [vmem:[#allocation8 + $0xd40] sm:$0xf] }
 0x24b   :  { %3385 = vmatpush.bf16.msrb.mxu3 %v10520_v43  ;;  %3398 = vmatpush.bf16.msra.mxu0 %v10524_v42  ;;  %v13929_v24 = vld [vmem:[#allocation8 + $0xd5c] sm:$0xf0]  ;;  %v13925_v43 = vld [vmem:[#allocation8 + $0xd44] sm:$0xf] }
 0x24c   :  { %v10849_v42 = vld [vmem:[#allocation8 + $0xd60] sm:$0xf0]  ;;  %v10848_v62 = vor.u32 %v13929_v24, %v10847_v57 }
 0x24d   :  { %v10852_v51 = vor.u32 %v13925_v43, %v10849_v42  ;;  %v13897_v43 = vld [vmem:[#allocation8 + $0xc5c] sm:$0xf0]  ;;  %v10760_v42 = vor.u32 %v13906_v44, %v10759_v40  ;;  %v10903_v40 = vld [vmem:[#allocation8 + $0xd98] sm:$0xf]  ;;  %v13936_v44 = vld [vmem:[#allocation8 + $0xd9c] sm:$0xf] }
 0x24e   :  { %3360 = vmatpush.bf16.msrb.mxu1 %v10480_v63  ;;  %3373 = vmatpush.bf16.msrb.mxu2 %v10484_v50  ;;  %v13921_v63 = vld [vmem:[#allocation8 + $0xd1c] sm:$0xf0]  ;;  %v10856_v50 = vor.u32 %v13930_v6, %v10855_v58  ;;  %v13893_v58 = vld [vmem:[#allocation8 + $0xc44] sm:$0xf] }
 0x24f   :  { %3386 = vmatpush.bf16.msrb.mxu3 %v10488_v4  ;;  %3399 = vmatpush.bf16.msra.mxu0 %v10492_v5  ;;  %v10823_v4 = vld [vmem:[#allocation8 + $0xd08] sm:$0xf]  ;;  %v10816_v18 = vor.u32 %v13921_v63, %v10815_v0  ;;  %v10721_v6 = vld [vmem:[#allocation8 + $0xc60] sm:$0xf0] }
 0x250   :  { %v13922_v5 = vld [vmem:[#allocation8 + $0xd24] sm:$0xf0]  ;;  %v10724_v63 = vor.u32 %v13893_v58, %v10721_v6  ;;  %v10871_v58 = vld [vmem:[#allocation8 + $0xd58] sm:$0xf] }
 0x251   :  { %v10824_v30 = vor.u32 %v13922_v5, %v10823_v4  ;;  %v13932_v6 = vld [vmem:[#allocation8 + $0xd74] sm:$0xf0] }
 0x252   :  { %3361 = vmatpush.bf16.msrb.mxu1 %v10448_v33  ;;  %3374 = vmatpush.bf16.msrb.mxu2 %v10452_v34  ;;  %v2365_v10 = vpop.f32.mrf.mxu1  ;;  %v13909_v33 = vld [vmem:[#allocation8 + $0xcc4] sm:$0xf] }
 0x253   :  { %3387 = vmatpush.bf16.msrb.mxu3 %v10456_v17  ;;  %3400 = vmatpush.bf16.msra.mxu0 %v10460_v13  ;;  %v10785_v34 = vld [vmem:[#allocation8 + $0xce0] sm:$0xf0]  ;;  %v10793_v17 = vld [vmem:[#allocation8 + $0xce8] sm:$0xf0] }
 0x254   :  { %v10788_v13 = vor.u32 %v13909_v33, %v10785_v34  ;;  %v10796_v39 = vor.u32 %v13910_v45, %v10793_v17  ;;  %v10937_v45 = vld [vmem:[#allocation8 + $0xdf8] sm:$0xf0]  ;;  %v10696_v17 = vor.u32 %v13890_v9, %v10695_v7 }
 0x255   :  { %3362 = vmatmul.bf16.vlgmr.msrb.gmra.mxu1 %v15330_v48  ;;  %3375 = vmatmul.bf16.vlgmr.msrb.gmra.mxu2 %v15330_v48  ;;  %v2404_v16 = vpop.f32.mrf.mxu0  ;;  %v10841_v7 = vld [vmem:[#allocation8 + $0xd38] sm:$0xf0] }
 0x256   :  { %3801 = vmatpush.bf16.msra.mxu1 %v10912_v35  ;;  %3814 = vmatpush.bf16.msra.mxu2 %v10916_v36  ;;  %v15356_v28 = vadd.f32 %v2404_v16, %v15321_v22  ;;  %v10751_v35 = vld [vmem:[#allocation8 + $0xc80] sm:$0xf] }
 0x257   :  { %3827 = vmatpush.bf16.msra.mxu3 %v10920_v26  ;;  %3840 = vmatpush.bf16.msrb.mxu0 %v10924_v25  ;;  %v13905_v36 = vld [vmem:[#allocation8 + $0xc9c] sm:$0xf0]  ;;  %v13901_v26 = vld [vmem:[#allocation8 + $0xc84] sm:$0xf] }
 0x258   :  { %3388 = vmatmul.bf16.vlgmr.msrb.gmra.mxu3 %v15330_v48  ;;  %3401 = vmatmul.bf16.vlgmr.msra.gmra.mxu0 %v15330_v48  ;;  %v15353_v48 = vadd.f32 %v2365_v10, %v15318_v15  ;;  %v10784_v15 = vor.u32 %v13913_v21, %v10783_v20  ;;  %v2378_v22 = vpop.f32.mrf.mxu2  ;;  %v10753_v25 = vld [vmem:[#allocation8 + $0xca0] sm:$0xf0]  ;;  %v10752_v24 = vor.u32 %v13905_v36, %v10751_v35  ;;  %v13886_v10 = vld [vmem:[#allocation8 + $0xc0c] sm:$0xf]  ;;  %v13947_v20 = vld [vmem:[#allocation8 + $0xdec] sm:$0xf0] }
 0x259   :  { %v15359_v23 = vadd.f32 %v2378_v22, %v15324_v3  ;;  %v10764_v3 = vor.u32 %v13902_v46, %v10761_v53  ;;  %v13943_v21 = vld [vmem:[#allocation8 + $0xdd4] sm:$0xf]  ;;  %v10895_v36 = vld [vmem:[#allocation8 + $0xd90] sm:$0xf]  ;;  %v10940_v22 = vor.u32 %v13944_v60, %v10937_v45  ;;  %v10905_v46 = vld [vmem:[#allocation8 + $0xdb8] sm:$0xf0] }
 0x25a   :  { %3802 = vmatpush.bf16.msra.mxu1 %v10880_v55  ;;  %3815 = vmatpush.bf16.msra.mxu2 %v10884_v56  ;;  %v2367_v56 = vpop.f32.mrf.mxu1  ;;  %v15365_v53 = vrot.slane %v15295_v52, 2  ;;  %v10807_v60 = vld [vmem:[#allocation8 + $0xcd8] sm:$0xf] }
 0x25b   :  { %3828 = vmatpush.bf16.msra.mxu3 %v10888_v29  ;;  %3841 = vmatpush.bf16.msrb.mxu0 %v10892_v38  ;;  %v2391_v41 = vpop.f32.mrf.mxu3  ;;  %v10756_v29 = vor.u32 %v13901_v26, %v10753_v25  ;;  %v10719_v38 = vld [vmem:[#allocation8 + $0xc40] sm:$0xf]  ;;  %v13935_v26 = vld [vmem:[#allocation8 + $0xd94] sm:$0xf]  ;;  %v13916_v45 = vld [vmem:[#allocation8 + $0xcf4] sm:$0xf0] }
 0x25c   :  { %v15362_v55 = vadd.f32 %v2391_v41, %v15327_v49  ;;  %v10687_v49 = vld [vmem:[#allocation8 + $0xc00] sm:$0xf]  ;;  %v10720_v0 = vor.u32 %v13897_v43, %v10719_v38  ;;  %v10897_v25 = vld [vmem:[#allocation8 + $0xdb0] sm:$0xf0]  ;;  %v13940_v41 = vld [vmem:[#allocation8 + $0xdb4] sm:$0xf0]  ;;  %v10908_v43 = vor.u32 %v13936_v44, %v10905_v46 }
 0x25d   :  { %v2406_v57 = vpop.f32.mrf.mxu0  ;;  %v10904_v38 = vor.u32 %v13940_v41, %v10903_v40  ;;  %v13908_v44 = vld [vmem:[#allocation8 + $0xcb4] sm:$0xf0]  ;;  %v13904_v46 = vld [vmem:[#allocation8 + $0xc9c] sm:$0xf] }
 0x25e   :  { %3803 = vmatpush.bf16.msra.mxu1 %v10848_v62  ;;  %3816 = vmatpush.bf16.msra.mxu2 %v10852_v51  ;;  %v13894_v62 = vld [vmem:[#allocation8 + $0xc4c] sm:$0xf]  ;;  %v10900_v57 = vor.u32 %v13935_v26, %v10897_v25  ;;  %v10769_v26 = vld [vmem:[#allocation8 + $0xcb0] sm:$0xf0]  ;;  %v10775_v25 = vld [vmem:[#allocation8 + $0xc98] sm:$0xf] }
 0x25f   :  { %3829 = vmatpush.bf16.msra.mxu3 %v10856_v50  ;;  %3842 = vmatpush.bf16.msrb.mxu0 %v10860_v32  ;;  %v10729_v51 = vld [vmem:[#allocation8 + $0xc68] sm:$0xf0]  ;;  %v13889_v50 = vld [vmem:[#allocation8 + $0xc1c] sm:$0xf0]  ;;  %v13885_v32 = vld [vmem:[#allocation8 + $0xc04] sm:$0xf] }
 0x260   :  { %v10732_v4 = vor.u32 %v13894_v62, %v10729_v51  ;;  %v2380_v5 = vpop.f32.mrf.mxu2  ;;  %v10688_v33 = vor.u32 %v13889_v50, %v10687_v49  ;;  %v10692_v34 = vor.u32 %v13885_v32, %v10689_v27  ;;  %v10831_v49 = vld [vmem:[#allocation8 + $0xd10] sm:$0xf]  ;;  %v10876_v50 = vor.u32 %v13928_v59, %v10873_v61  ;;  %v13919_v32 = vld [vmem:[#allocation8 + $0xd14] sm:$0xf]  ;;  %v10743_v61 = vld [vmem:[#allocation8 + $0xc58] sm:$0xf] }
 0x261   :  { %v10833_v27 = vld [vmem:[#allocation8 + $0xd30] sm:$0xf0]  ;;  %v13920_v5 = vld [vmem:[#allocation8 + $0xd1c] sm:$0xf] }
 0x262   :  { %3804 = vmatpush.bf16.msra.mxu1 %v10816_v18  ;;  %3817 = vmatpush.bf16.msra.mxu2 %v10820_v19  ;;  %v10697_v18 = vld [vmem:[#allocation8 + $0xc28] sm:$0xf0]  ;;  %v10927_v19 = vld [vmem:[#allocation8 + $0xdd0] sm:$0xf]  ;;  %v10737_v59 = vld [vmem:[#allocation8 + $0xc70] sm:$0xf0] }
 0x263   :  { %3830 = vmatpush.bf16.msra.mxu3 %v10824_v30  ;;  %3843 = vmatpush.bf16.msrb.mxu0 %v10828_v31  ;;  %v2393_v16 = vpop.f32.mrf.mxu3  ;;  %v10929_v30 = vld [vmem:[#allocation8 + $0xdf0] sm:$0xf0]  ;;  %v10935_v31 = vld [vmem:[#allocation8 + $0xdd8] sm:$0xf] }
 0x264   :  { %v10932_v35 = vor.u32 %v13943_v21, %v10929_v30  ;;  %v13915_v21 = vld [vmem:[#allocation8 + $0xcec] sm:$0xf0] }
 0x266   :  { %3805 = vmatpush.bf16.msra.mxu1 %v10784_v15  ;;  %3818 = vmatpush.bf16.msra.mxu2 %v10788_v13  ;;  %v10700_v15 = vor.u32 %v13886_v10, %v10697_v18  ;;  %v10928_v13 = vor.u32 %v13947_v20, %v10927_v19  ;;  %v10836_v19 = vor.u32 %v13919_v32, %v10833_v27  ;;  %v10799_v20 = vld [vmem:[#allocation8 + $0xcd0] sm:$0xf]  ;;  %v13887_v32 = vld [vmem:[#allocation8 + $0xc14] sm:$0xf] }
 0x267   :  { %3831 = vmatpush.bf16.msra.mxu3 %v10792_v37  ;;  %3844 = vmatpush.bf16.msrb.mxu0 %v10796_v39  ;;  %v13939_v37 = vld [vmem:[#allocation8 + $0xdac] sm:$0xf0]  ;;  %v10936_v39 = vor.u32 %v13948_v14, %v10935_v31  ;;  %v10801_v14 = vld [vmem:[#allocation8 + $0xcf0] sm:$0xf0] }
 0x268   :  { %v10896_v56 = vor.u32 %v13939_v37, %v10895_v36  ;;  %v13907_v36 = vld [vmem:[#allocation8 + $0xcac] sm:$0xf0]  ;;  %v10808_v37 = vor.u32 %v13916_v45, %v10807_v60  ;;  %v10705_v27 = vld [vmem:[#allocation8 + $0xc30] sm:$0xf0]  ;;  %v14010_v45 = vld [vmem:[#allocation8 + $0xfe4] sm:$0xf0] }
 0x269   :  { %v10708_v60 = vor.u32 %v13887_v32, %v10705_v27  ;;  %v13981_v32 = vld [vmem:[#allocation8 + $0xf04] sm:$0xf] }
 0x26a   :  { %3806 = vmatpush.bf16.msra.mxu1 %v10752_v24  ;;  %3819 = vmatpush.bf16.msra.mxu2 %v10756_v29  ;;  %v10863_v24 = vld [vmem:[#allocation8 + $0xd50] sm:$0xf]  ;;  %v11073_v27 = vld [vmem:[#allocation8 + $0xf20] sm:$0xf0] }
 0x26b   :  { %3832 = vmatpush.bf16.msra.mxu3 %v10760_v42  ;;  %3845 = vmatpush.bf16.msrb.mxu0 %v10764_v3  ;;  %v13931_v29 = vld [vmem:[#allocation8 + $0xd6c] sm:$0xf0]  ;;  %v13927_v42 = vld [vmem:[#allocation8 + $0xd54] sm:$0xf] }
 0x26c   :  { %v10865_v3 = vld [vmem:[#allocation8 + $0xd70] sm:$0xf0]  ;;  %v10864_v62 = vor.u32 %v13931_v29, %v10863_v24 }
 0x26d   :  { %v10868_v51 = vor.u32 %v13927_v42, %v10865_v3  ;;  %v10735_v42 = vld [vmem:[#allocation8 + $0xc50] sm:$0xf] }
 0x26e   :  { %3807 = vmatpush.bf16.msra.mxu1 %v10720_v0  ;;  %3820 = vmatpush.bf16.msra.mxu2 %v10724_v63  ;;  %v13923_v0 = vld [vmem:[#allocation8 + $0xd2c] sm:$0xf0]  ;;  %v10872_v63 = vor.u32 %v13932_v6, %v10871_v58  ;;  %v10776_v58 = vor.u32 %v13908_v44, %v10775_v25  ;;  %v13895_v6 = vld [vmem:[#allocation8 + $0xc54] sm:$0xf]  ;;  %v11137_v25 = vld [vmem:[#allocation8 + $0xfa0] sm:$0xf0] }
 0x26f   :  { %3833 = vmatpush.bf16.msra.mxu3 %v10728_v2  ;;  %3846 = vmatpush.bf16.msrb.mxu0 %v10732_v4  ;;  %v10839_v2 = vld [vmem:[#allocation8 + $0xd18] sm:$0xf]  ;;  %v10832_v18 = vor.u32 %v13923_v0, %v10831_v49  ;;  %v13899_v3 = vld [vmem:[#allocation8 + $0xc6c] sm:$0xf0]  ;;  %v10745_v49 = vld [vmem:[#allocation8 + $0xc78] sm:$0xf0] }
 0x270   :  { %v13924_v4 = vld [vmem:[#allocation8 + $0xd34] sm:$0xf0]  ;;  %v10736_v0 = vor.u32 %v13899_v3, %v10735_v42  ;;  %v14002_v44 = vld [vmem:[#allocation8 + $0xfa4] sm:$0xf0] }
 0x271   :  { %v10840_v31 = vor.u32 %v13924_v4, %v10839_v2 }
 0x272   :  { %3808 = vmatpush.bf16.msra.mxu1 %v10688_v33  ;;  %3821 = vmatpush.bf16.msra.mxu2 %v10692_v34  ;;  %v2811_v9 = vpop.f32.mrf.mxu1  ;;  %v10844_v33 = vor.u32 %v13920_v5, %v10841_v7  ;;  %v13911_v34 = vld [vmem:[#allocation8 + $0xcd4] sm:$0xf]  ;;  %v10711_v7 = vld [vmem:[#allocation8 + $0xc18] sm:$0xf] }
 0x273   :  { %3834 = vmatpush.bf16.msra.mxu3 %v10696_v17  ;;  %3847 = vmatpush.bf16.msrb.mxu0 %v10700_v15  ;;  %v15372_v10 = vadd.f32 %v2811_v9, %v15337_v12  ;;  %v13912_v17 = vld [vmem:[#allocation8 + $0xcdc] sm:$0xf]  ;;  %v10800_v12 = vor.u32 %v13915_v21, %v10799_v20  ;;  %v13892_v9 = vld [vmem:[#allocation8 + $0xc34] sm:$0xf0]  ;;  %v11167_v20 = vld [vmem:[#allocation8 + $0xfc0] sm:$0xf] }
 0x274   :  { %v10809_v15 = vld [vmem:[#allocation8 + $0xcf8] sm:$0xf0]  ;;  %v14009_v21 = vld [vmem:[#allocation8 + $0xfdc] sm:$0xf0] }
 0x275   :  { %3809 = vmatmul.bf16.vlgmr.msra.gmra.mxu1 %v15365_v53  ;;  %3822 = vmatmul.bf16.vlgmr.msra.gmra.mxu2 %v15365_v53  ;;  %v2850_v16 = vpop.f32.mrf.mxu0 }
 0x276   :  { %3853 = vmatpush.bf16.msrb.mxu1 %v10928_v13  ;;  %3866 = vmatpush.bf16.msrb.mxu2 %v10932_v35  ;;  %v15375_v30 = vadd.f32 %v2850_v16, %v15340_v11  ;;  %v10804_v13 = vor.u32 %v13911_v34, %v10801_v14  ;;  %v10767_v35 = vld [vmem:[#allocation8 + $0xc90] sm:$0xf]  ;;  %v13888_v16 = vld [vmem:[#allocation8 + $0xc1c] sm:$0xf]  ;;  %v11175_v34 = vld [vmem:[#allocation8 + $0xfc8] sm:$0xf] }
 0x277   :  { %3879 = vmatpush.bf16.msrb.mxu3 %v10936_v39  ;;  %3892 = vmatpush.bf16.msra.mxu0 %v10940_v22  ;;  %v10812_v39 = vor.u32 %v13912_v17, %v10809_v15  ;;  %v13903_v22 = vld [vmem:[#allocation8 + $0xc94] sm:$0xf]  ;;  %v14006_v17 = vld [vmem:[#allocation8 + $0xfcc] sm:$0xf] }
 0x278   :  { %3835 = vmatmul.bf16.vlgmr.msra.gmra.mxu3 %v15365_v53  ;;  %3848 = vmatmul.bf16.vlgmr.msrb.gmra.mxu0 %v15365_v53  ;;  %v2824_v11 = vpop.f32.mrf.mxu2  ;;  %v11177_v15 = vld [vmem:[#allocation8 + $0xfe8] sm:$0xf0] }
 0x279   :  { %v15378_v40 = vadd.f32 %v2824_v11, %v15343_v1  ;;  %v11176_v11 = vor.u32 %v14010_v45, %v11175_v34  ;;  %v11047_v45 = vld [vmem:[#allocation8 + $0xec8] sm:$0xf] }
 0x27a   :  { %3854 = vmatpush.bf16.msrb.mxu1 %v10896_v56  ;;  %3867 = vmatpush.bf16.msrb.mxu2 %v10900_v57  ;;  %v10777_v56 = vld [vmem:[#allocation8 + $0xcb8] sm:$0xf0]  ;;  %v2813_v24 = vpop.f32.mrf.mxu1 }
 0x27b   :  { %3880 = vmatpush.bf16.msrb.mxu3 %v10904_v38  ;;  %3893 = vmatpush.bf16.msra.mxu0 %v10908_v43  ;;  %v2837_v41 = vpop.f32.mrf.mxu3  ;;  %v10768_v38 = vor.u32 %v13907_v36, %v10767_v35  ;;  %v10772_v43 = vor.u32 %v13903_v22, %v10769_v26  ;;  %v10780_v1 = vor.u32 %v13904_v46, %v10777_v56  ;;  %v13997_v26 = vld [vmem:[#allocation8 + $0xf84] sm:$0xf]  ;;  %v13998_v46 = vld [vmem:[#allocation8 + $0xf8c] sm:$0xf] }
 0x27c   :  { %v15381_v57 = vadd.f32 %v2837_v41, %v15346_v54  ;;  %v10703_v54 = vld [vmem:[#allocation8 + $0xc10] sm:$0xf]  ;;  %v11168_v35 = vor.u32 %v14009_v21, %v11167_v20  ;;  %v11180_v22 = vor.u32 %v14006_v17, %v11177_v15  ;;  %v11143_v41 = vld [vmem:[#allocation8 + $0xf88] sm:$0xf]  ;;  %v11145_v56 = vld [vmem:[#allocation8 + $0xfa8] sm:$0xf0] }
 0x27d   :  { %v2852_v29 = vpop.f32.mrf.mxu0  ;;  %v11144_v42 = vor.u32 %v14002_v44, %v11143_v41  ;;  %v11148_v3 = vor.u32 %v13998_v46, %v11145_v56  ;;  %v11039_v20 = vld [vmem:[#allocation8 + $0xec0] sm:$0xf]  ;;  %v13978_v17 = vld [vmem:[#allocation8 + $0xee4] sm:$0xf0]  ;;  %v13974_v15 = vld [vmem:[#allocation8 + $0xecc] sm:$0xf] }
 0x27e   :  { %3855 = vmatpush.bf16.msrb.mxu1 %v10864_v62  ;;  %3868 = vmatpush.bf16.msrb.mxu2 %v10868_v51  ;;  %v13900_v62 = vld [vmem:[#allocation8 + $0xc74] sm:$0xf0]  ;;  %v13896_v51 = vld [vmem:[#allocation8 + $0xc5c] sm:$0xf]  ;;  %v11140_v29 = vor.u32 %v13997_v26, %v11137_v25  ;;  %v13977_v21 = vld [vmem:[#allocation8 + $0xedc] sm:$0xf0] }
 0x27f   :  { %3881 = vmatpush.bf16.msrb.mxu3 %v10872_v63  ;;  %3894 = vmatpush.bf16.msra.mxu0 %v10876_v50  ;;  %v10740_v63 = vor.u32 %v13895_v6, %v10737_v59  ;;  %v13891_v50 = vld [vmem:[#allocation8 + $0xc2c] sm:$0xf0]  ;;  %v10744_v2 = vor.u32 %v13900_v62, %v10743_v61  ;;  %v10748_v4 = vor.u32 %v13896_v51, %v10745_v49  ;;  %v11111_v6 = vld [vmem:[#allocation8 + $0xf48] sm:$0xf]  ;;  %v13990_v61 = vld [vmem:[#allocation8 + $0xf4c] sm:$0xf] }
 0x280   :  { %v2826_v5 = vpop.f32.mrf.mxu2  ;;  %v10704_v14 = vor.u32 %v13891_v50, %v10703_v54  ;;  %v13994_v59 = vld [vmem:[#allocation8 + $0xf64] sm:$0xf0]  ;;  %v11113_v62 = vld [vmem:[#allocation8 + $0xf68] sm:$0xf0]  ;;  %v11071_v54 = vld [vmem:[#allocation8 + $0xf00] sm:$0xf] }
 0x281   :  { %v11116_v50 = vor.u32 %v13990_v61, %v11113_v62  ;;  %v13982_v5 = vld [vmem:[#allocation8 + $0xf0c] sm:$0xf]  ;;  %v11015_v26 = vld [vmem:[#allocation8 + $0xe88] sm:$0xf] }
 0x282   :  { %3856 = vmatpush.bf16.msrb.mxu1 %v10832_v18  ;;  %3869 = vmatpush.bf16.msrb.mxu2 %v10836_v19  ;;  %v10713_v19 = vld [vmem:[#allocation8 + $0xc38] sm:$0xf0]  ;;  %v13970_v44 = vld [vmem:[#allocation8 + $0xea4] sm:$0xf0]  ;;  %v13966_v46 = vld [vmem:[#allocation8 + $0xe8c] sm:$0xf] }
 0x283   :  { %3882 = vmatpush.bf16.msrb.mxu3 %v10840_v31  ;;  %3895 = vmatpush.bf16.msra.mxu0 %v10844_v33  ;;  %v2839_v18 = vpop.f32.mrf.mxu3  ;;  %v14005_v31 = vld [vmem:[#allocation8 + $0xfc4] sm:$0xf]  ;;  %v11017_v56 = vld [vmem:[#allocation8 + $0xea8] sm:$0xf0]  ;;  %v10983_v61 = vld [vmem:[#allocation8 + $0xe48] sm:$0xf] }
 0x284   :  { %v11169_v33 = vld [vmem:[#allocation8 + $0xfe0] sm:$0xf0]  ;;  %v13962_v62 = vld [vmem:[#allocation8 + $0xe64] sm:$0xf0] }
 0x285   :  { %v11172_v36 = vor.u32 %v14005_v31, %v11169_v33 }
 0x286   :  { %3857 = vmatpush.bf16.msrb.mxu1 %v10800_v12  ;;  %3870 = vmatpush.bf16.msrb.mxu2 %v10804_v13  ;;  %v10712_v12 = vor.u32 %v13892_v9, %v10711_v7  ;;  %v10716_v13 = vor.u32 %v13888_v16, %v10713_v19  ;;  %v11081_v7 = vld [vmem:[#allocation8 + $0xf28] sm:$0xf0]  ;;  %v11076_v19 = vor.u32 %v13981_v32, %v11073_v27  ;;  %v10945_v32 = vld [vmem:[#allocation8 + $0xe20] sm:$0xf0] }
 0x287   :  { %3883 = vmatpush.bf16.msrb.mxu3 %v10808_v37  ;;  %3896 = vmatpush.bf16.msra.mxu0 %v10812_v39  ;;  %v11135_v37 = vld [vmem:[#allocation8 + $0xf80] sm:$0xf]  ;;  %v11084_v34 = vor.u32 %v13982_v5, %v11081_v7  ;;  %v10984_v27 = vor.u32 %v13962_v62, %v10983_v61  ;;  %v10951_v5 = vld [vmem:[#allocation8 + $0xe08] sm:$0xf]  ;;  %v13992_v61 = vld [vmem:[#allocation8 + $0xf5c] sm:$0xf] }
 0x288   :  { %v14001_v39 = vld [vmem:[#allocation8 + $0xf9c] sm:$0xf0]  ;;  %v13954_v7 = vld [vmem:[#allocation8 + $0xe24] sm:$0xf0]  ;;  %v11129_v62 = vld [vmem:[#allocation8 + $0xf78] sm:$0xf0] }
 0x289   :  { %v11136_v24 = vor.u32 %v14001_v39, %v11135_v37  ;;  %v11048_v37 = vor.u32 %v13978_v17, %v11047_v45  ;;  %v14012_v45 = vld [vmem:[#allocation8 + $0xff4] sm:$0xf0]  ;;  %v14008_v17 = vld [vmem:[#allocation8 + $0xfdc] sm:$0xf] }
 0x28a   :  { %3858 = vmatpush.bf16.msrb.mxu1 %v10768_v38  ;;  %3871 = vmatpush.bf16.msrb.mxu2 %v10772_v43  ;;  %v11103_v38 = vld [vmem:[#allocation8 + $0xf40] sm:$0xf] }
 0x28b   :  { %3884 = vmatpush.bf16.msrb.mxu3 %v10776_v58  ;;  %3897 = vmatpush.bf16.msra.mxu0 %v10780_v1  ;;  %v13993_v43 = vld [vmem:[#allocation8 + $0xf5c] sm:$0xf0]  ;;  %v13989_v58 = vld [vmem:[#allocation8 + $0xf44] sm:$0xf] }
 0x28c   :  { %v11105_v1 = vld [vmem:[#allocation8 + $0xf60] sm:$0xf0]  ;;  %v11104_v51 = vor.u32 %v13993_v43, %v11103_v38 }
 0x28d   :  { %v11108_v49 = vor.u32 %v13989_v58, %v11105_v1  ;;  %v13961_v58 = vld [vmem:[#allocation8 + $0xe5c] sm:$0xf0]  ;;  %v11016_v1 = vor.u32 %v13970_v44, %v11015_v26  ;;  %v11159_v26 = vld [vmem:[#allocation8 + $0xf98] sm:$0xf]  ;;  %v14000_v44 = vld [vmem:[#allocation8 + $0xf9c] sm:$0xf] }
 0x28e   :  { %3859 = vmatpush.bf16.msrb.mxu1 %v10736_v0  ;;  %3872 = vmatpush.bf16.msrb.mxu2 %v10740_v63  ;;  %v13985_v0 = vld [vmem:[#allocation8 + $0xf1c] sm:$0xf0]  ;;  %v11112_v63 = vor.u32 %v13994_v59, %v11111_v6  ;;  %v13957_v6 = vld [vmem:[#allocation8 + $0xe44] sm:$0xf] }
 0x28f   :  { %3885 = vmatpush.bf16.msrb.mxu3 %v10744_v2  ;;  %3898 = vmatpush.bf16.msra.mxu0 %v10748_v4  ;;  %v11079_v2 = vld [vmem:[#allocation8 + $0xf08] sm:$0xf]  ;;  %v11072_v18 = vor.u32 %v13985_v0, %v11071_v54  ;;  %v10977_v59 = vld [vmem:[#allocation8 + $0xe60] sm:$0xf0] }
 0x290   :  { %v13986_v4 = vld [vmem:[#allocation8 + $0xf24] sm:$0xf0]  ;;  %v10980_v0 = vor.u32 %v13957_v6, %v10977_v59  ;;  %v11127_v6 = vld [vmem:[#allocation8 + $0xf58] sm:$0xf] }
 0x291   :  { %v11080_v33 = vor.u32 %v13986_v4, %v11079_v2  ;;  %v13996_v59 = vld [vmem:[#allocation8 + $0xf74] sm:$0xf0] }
 0x292   :  { %3860 = vmatpush.bf16.msrb.mxu1 %v10704_v14  ;;  %3873 = vmatpush.bf16.msrb.mxu2 %v10708_v60  ;;  %v2863_v9 = vpop.f32.mrf.mxu1  ;;  %v13973_v14 = vld [vmem:[#allocation8 + $0xec4] sm:$0xf] }
 0x293   :  { %3886 = vmatpush.bf16.msrb.mxu3 %v10712_v12  ;;  %3899 = vmatpush.bf16.msra.mxu0 %v10716_v13  ;;  %v11041_v60 = vld [vmem:[#allocation8 + $0xee0] sm:$0xf0]  ;;  %v11049_v12 = vld [vmem:[#allocation8 + $0xee8] sm:$0xf0] }
 0x294   :  { %v11044_v13 = vor.u32 %v13973_v14, %v11041_v60  ;;  %v11052_v39 = vor.u32 %v13974_v15, %v11049_v12  ;;  %v11193_v15 = vld [vmem:[#allocation8 + $0xff8] sm:$0xf0]  ;;  %v10952_v12 = vor.u32 %v13954_v7, %v10951_v5 }
 0x295   :  { %3861 = vmatmul.bf16.vlgmr.msrb.gmra.mxu1 %v15365_v53  ;;  %3874 = vmatmul.bf16.vlgmr.msrb.gmra.mxu2 %v15365_v53  ;;  %v2902_v16 = vpop.f32.mrf.mxu0 }
 0x296   :  { %4300 = vmatpush.bf16.msra.mxu1 %v11168_v35  ;;  %4313 = vmatpush.bf16.msra.mxu2 %v11172_v36  ;;  %v15391_v31 = vadd.f32 %v2902_v16, %v15356_v28  ;;  %v11007_v35 = vld [vmem:[#allocation8 + $0xe80] sm:$0xf] }
 0x297   :  { %4326 = vmatpush.bf16.msra.mxu3 %v11176_v11  ;;  %4339 = vmatpush.bf16.msrb.mxu0 %v11180_v22  ;;  %v13969_v36 = vld [vmem:[#allocation8 + $0xe9c] sm:$0xf0]  ;;  %v13965_v11 = vld [vmem:[#allocation8 + $0xe84] sm:$0xf] }
 0x298   :  { %3887 = vmatmul.bf16.vlgmr.msrb.gmra.mxu3 %v15365_v53  ;;  %3900 = vmatmul.bf16.vlgmr.msra.gmra.mxu0 %v15365_v53  ;;  %v15388_v53 = vadd.f32 %v2863_v9, %v15353_v48  ;;  %v11040_v48 = vor.u32 %v13977_v21, %v11039_v20  ;;  %v2876_v28 = vpop.f32.mrf.mxu2  ;;  %v11009_v22 = vld [vmem:[#allocation8 + $0xea0] sm:$0xf0]  ;;  %v11008_v43 = vor.u32 %v13969_v36, %v11007_v35  ;;  %v13950_v9 = vld [vmem:[#allocation8 + $0xe0c] sm:$0xf]  ;;  %v14011_v20 = vld [vmem:[#allocation8 + $0xfec] sm:$0xf0] }
 0x299   :  { %v15394_v25 = vadd.f32 %v2876_v28, %v15359_v23  ;;  %v11020_v23 = vor.u32 %v13966_v46, %v11017_v56  ;;  %v14007_v21 = vld [vmem:[#allocation8 + $0xfd4] sm:$0xf]  ;;  %v11151_v36 = vld [vmem:[#allocation8 + $0xf90] sm:$0xf]  ;;  %v11196_v28 = vor.u32 %v14008_v17, %v11193_v15  ;;  %v11161_v46 = vld [vmem:[#allocation8 + $0xfb8] sm:$0xf0] }
 0x29a   :  { %4301 = vmatpush.bf16.msra.mxu1 %v11136_v24  ;;  %4314 = vmatpush.bf16.msra.mxu2 %v11140_v29  ;;  %v2865_v29 = vpop.f32.mrf.mxu1  ;;  %v15400_v56 = vrot.slane %v15295_v52, 3  ;;  %v13980_v17 = vld [vmem:[#allocation8 + $0xef4] sm:$0xf0]  ;;  %v13976_v15 = vld [vmem:[#allocation8 + $0xedc] sm:$0xf] }
 0x29b   :  { %4327 = vmatpush.bf16.msra.mxu3 %v11144_v42  ;;  %4340 = vmatpush.bf16.msrb.mxu0 %v11148_v3  ;;  %v2889_v41 = vpop.f32.mrf.mxu3  ;;  %v11012_v42 = vor.u32 %v13965_v11, %v11009_v22  ;;  %v10975_v3 = vld [vmem:[#allocation8 + $0xe40] sm:$0xf]  ;;  %v13999_v11 = vld [vmem:[#allocation8 + $0xf94] sm:$0xf] }
 0x29c   :  { %v15397_v24 = vadd.f32 %v2889_v41, %v15362_v55  ;;  %v10943_v55 = vld [vmem:[#allocation8 + $0xe00] sm:$0xf]  ;;  %v10976_v54 = vor.u32 %v13961_v58, %v10975_v3  ;;  %v11153_v22 = vld [vmem:[#allocation8 + $0xfb0] sm:$0xf0]  ;;  %v14004_v41 = vld [vmem:[#allocation8 + $0xfb4] sm:$0xf0]  ;;  %v11164_v58 = vor.u32 %v14000_v44, %v11161_v46 }
 0x29d   :  { %v2904_v38 = vpop.f32.mrf.mxu0  ;;  %v11160_v3 = vor.u32 %v14004_v41, %v11159_v26  ;;  %v13972_v41 = vld [vmem:[#allocation8 + $0xeb4] sm:$0xf0]  ;;  %v13968_v44 = vld [vmem:[#allocation8 + $0xe9c] sm:$0xf] }
 0x29e   :  { %4302 = vmatpush.bf16.msra.mxu1 %v11104_v51  ;;  %4315 = vmatpush.bf16.msra.mxu2 %v11108_v49  ;;  %v13958_v51 = vld [vmem:[#allocation8 + $0xe4c] sm:$0xf]  ;;  %v11156_v38 = vor.u32 %v13999_v11, %v11153_v22  ;;  %v11031_v11 = vld [vmem:[#allocation8 + $0xe98] sm:$0xf]  ;;  %v11033_v46 = vld [vmem:[#allocation8 + $0xeb8] sm:$0xf0] }
 0x29f   :  { %4328 = vmatpush.bf16.msra.mxu3 %v11112_v63  ;;  %4341 = vmatpush.bf16.msrb.mxu0 %v11116_v50  ;;  %v10985_v49 = vld [vmem:[#allocation8 + $0xe68] sm:$0xf0]  ;;  %v13953_v63 = vld [vmem:[#allocation8 + $0xe1c] sm:$0xf0]  ;;  %v13949_v50 = vld [vmem:[#allocation8 + $0xe04] sm:$0xf] }
 0x2a0   :  { %v10988_v2 = vor.u32 %v13958_v51, %v10985_v49  ;;  %v2878_v4 = vpop.f32.mrf.mxu2  ;;  %v10944_v14 = vor.u32 %v13953_v63, %v10943_v55  ;;  %v10948_v60 = vor.u32 %v13949_v50, %v10945_v32  ;;  %v11087_v49 = vld [vmem:[#allocation8 + $0xf10] sm:$0xf]  ;;  %v13983_v63 = vld [vmem:[#allocation8 + $0xf14] sm:$0xf]  ;;  %v11095_v32 = vld [vmem:[#allocation8 + $0xf18] sm:$0xf] }
 0x2a1   :  { %v13987_v55 = vld [vmem:[#allocation8 + $0xf2c] sm:$0xf0]  ;;  %v11089_v50 = vld [vmem:[#allocation8 + $0xf30] sm:$0xf0]  ;;  %v11097_v4 = vld [vmem:[#allocation8 + $0xf38] sm:$0xf0] }
 0x2a2   :  { %4303 = vmatpush.bf16.msra.mxu1 %v11072_v18  ;;  %4316 = vmatpush.bf16.msra.mxu2 %v11076_v19  ;;  %v10953_v18 = vld [vmem:[#allocation8 + $0xe28] sm:$0xf0]  ;;  %v11183_v19 = vld [vmem:[#allocation8 + $0xfd0] sm:$0xf] }
 0x2a3   :  { %4329 = vmatpush.bf16.msra.mxu3 %v11080_v33  ;;  %4342 = vmatpush.bf16.msrb.mxu0 %v11084_v34  ;;  %v2891_v16 = vpop.f32.mrf.mxu3  ;;  %v11185_v33 = vld [vmem:[#allocation8 + $0xff0] sm:$0xf0]  ;;  %v11191_v34 = vld [vmem:[#allocation8 + $0xfd8] sm:$0xf] }
 0x2a4   :  { %v11188_v35 = vor.u32 %v14007_v21, %v11185_v33  ;;  %v11088_v16 = vor.u32 %v13987_v55, %v11087_v49 }
 0x2a6   :  { %4304 = vmatpush.bf16.msra.mxu1 %v11040_v48  ;;  %4317 = vmatpush.bf16.msra.mxu2 %v11044_v13  ;;  %v10956_v48 = vor.u32 %v13950_v9, %v10953_v18  ;;  %v11184_v13 = vor.u32 %v14011_v20, %v11183_v19  ;;  %v11092_v18 = vor.u32 %v13983_v63, %v11089_v50  ;;  %v11055_v19 = vld [vmem:[#allocation8 + $0xed0] sm:$0xf]  ;;  %v10961_v63 = vld [vmem:[#allocation8 + $0xe30] sm:$0xf0] }
 0x2a7   :  { %4330 = vmatpush.bf16.msra.mxu3 %v11048_v37  ;;  %4343 = vmatpush.bf16.msrb.mxu0 %v11052_v39  ;;  %v14003_v37 = vld [vmem:[#allocation8 + $0xfac] sm:$0xf0]  ;;  %v11192_v39 = vor.u32 %v14012_v45, %v11191_v34  ;;  %v11063_v45 = vld [vmem:[#allocation8 + $0xed8] sm:$0xf] }
 0x2a8   :  { %v11152_v29 = vor.u32 %v14003_v37, %v11151_v36  ;;  %v13979_v20 = vld [vmem:[#allocation8 + $0xeec] sm:$0xf0]  ;;  %v11064_v36 = vor.u32 %v13980_v17, %v11063_v45  ;;  %v14074_v45 = vld [vmem:[#allocation8 + $0x11e4] sm:$0xf0]  ;;  %v14070_v17 = vld [vmem:[#allocation8 + $0x11cc] sm:$0xf] }
 0x2aa   :  { %4305 = vmatpush.bf16.msra.mxu1 %v11008_v43  ;;  %4318 = vmatpush.bf16.msra.mxu2 %v11012_v42  ;;  %v11119_v43 = vld [vmem:[#allocation8 + $0xf50] sm:$0xf] }
 0x2ab   :  { %4331 = vmatpush.bf16.msra.mxu3 %v11016_v1  ;;  %4344 = vmatpush.bf16.msrb.mxu0 %v11020_v23  ;;  %v13995_v42 = vld [vmem:[#allocation8 + $0xf6c] sm:$0xf0]  ;;  %v13991_v1 = vld [vmem:[#allocation8 + $0xf54] sm:$0xf] }
 0x2ac   :  { %v11121_v23 = vld [vmem:[#allocation8 + $0xf70] sm:$0xf0]  ;;  %v11120_v52 = vor.u32 %v13995_v42, %v11119_v43 }
 0x2ad   :  { %v11124_v51 = vor.u32 %v13991_v1, %v11121_v23  ;;  %v13963_v1 = vld [vmem:[#allocation8 + $0xe6c] sm:$0xf0]  ;;  %v11032_v23 = vor.u32 %v13972_v41, %v11031_v11  ;;  %v11399_v11 = vld [vmem:[#allocation8 + $0x1188] sm:$0xf]  ;;  %v14062_v41 = vld [vmem:[#allocation8 + $0x118c] sm:$0xf] }
 0x2ae   :  { %4306 = vmatpush.bf16.msra.mxu1 %v10976_v54  ;;  %4319 = vmatpush.bf16.msra.mxu2 %v10980_v0  ;;  %v11128_v54 = vor.u32 %v13996_v59, %v11127_v6  ;;  %v11132_v0 = vor.u32 %v13992_v61, %v11129_v62  ;;  %v13959_v6 = vld [vmem:[#allocation8 + $0xe54] sm:$0xf]  ;;  %v10999_v61 = vld [vmem:[#allocation8 + $0xe58] sm:$0xf] }
 0x2af   :  { %4332 = vmatpush.bf16.msra.mxu3 %v10984_v27  ;;  %4345 = vmatpush.bf16.msrb.mxu0 %v10988_v2  ;;  %v13988_v27 = vld [vmem:[#allocation8 + $0xf34] sm:$0xf0]  ;;  %v13984_v2 = vld [vmem:[#allocation8 + $0xf1c] sm:$0xf]  ;;  %v10993_v59 = vld [vmem:[#allocation8 + $0xe70] sm:$0xf0] }
 0x2b0   :  { %v11096_v33 = vor.u32 %v13988_v27, %v11095_v32  ;;  %v11100_v34 = vor.u32 %v13984_v2, %v11097_v4  ;;  %v13964_v62 = vld [vmem:[#allocation8 + $0xe74] sm:$0xf0]  ;;  %v10996_v55 = vor.u32 %v13959_v6, %v10993_v59  ;;  %v14058_v6 = vld [vmem:[#allocation8 + $0x1164] sm:$0xf0]  ;;  %v14054_v59 = vld [vmem:[#allocation8 + $0x114c] sm:$0xf] }
 0x2b1   :  { %v11000_v50 = vor.u32 %v13964_v62, %v10999_v61  ;;  %v10967_v2 = vld [vmem:[#allocation8 + $0xe18] sm:$0xf]  ;;  %v11369_v61 = vld [vmem:[#allocation8 + $0x1168] sm:$0xf0] }
 0x2b2   :  { %4307 = vmatpush.bf16.msra.mxu1 %v10944_v14  ;;  %4320 = vmatpush.bf16.msra.mxu2 %v10948_v60  ;;  %v3311_v5 = vpop.f32.mrf.mxu1  ;;  %v13975_v14 = vld [vmem:[#allocation8 + $0xed4] sm:$0xf]  ;;  %v13956_v4 = vld [vmem:[#allocation8 + $0xe34] sm:$0xf0] }
 0x2b3   :  { %4333 = vmatpush.bf16.msra.mxu3 %v10952_v12  ;;  %4346 = vmatpush.bf16.msrb.mxu0 %v10956_v48  ;;  %v15407_v7 = vadd.f32 %v3311_v5, %v15372_v10  ;;  %v11057_v60 = vld [vmem:[#allocation8 + $0xef0] sm:$0xf0]  ;;  %v11065_v12 = vld [vmem:[#allocation8 + $0xef8] sm:$0xf0]  ;;  %v11056_v10 = vor.u32 %v13979_v20, %v11055_v19  ;;  %v14073_v19 = vld [vmem:[#allocation8 + $0x11dc] sm:$0xf0] }
 0x2b4   :  { %v11060_v48 = vor.u32 %v13975_v14, %v11057_v60  ;;  %v11068_v37 = vor.u32 %v13976_v15, %v11065_v12  ;;  %v13952_v5 = vld [vmem:[#allocation8 + $0xe1c] sm:$0xf]  ;;  %v14069_v20 = vld [vmem:[#allocation8 + $0x11c4] sm:$0xf]  ;;  %v11433_v15 = vld [vmem:[#allocation8 + $0x11e8] sm:$0xf0]  ;;  %v10968_v12 = vor.u32 %v13956_v4, %v10967_v2 }
 0x2b5   :  { %4308 = vmatmul.bf16.vlgmr.msra.gmra.mxu1 %v15400_v56  ;;  %4321 = vmatmul.bf16.vlgmr.msra.gmra.mxu2 %v15400_v56  ;;  %v3350_v9 = vpop.f32.mrf.mxu0 }
 0x2b6   :  { %4352 = vmatpush.bf16.msrb.mxu1 %v11184_v13  ;;  %4365 = vmatpush.bf16.msrb.mxu2 %v11188_v35  ;;  %v15410_v21 = vadd.f32 %v3350_v9, %v15375_v30  ;;  %v11023_v13 = vld [vmem:[#allocation8 + $0xe90] sm:$0xf] }
 0x2b7   :  { %4378 = vmatpush.bf16.msrb.mxu3 %v11192_v39  ;;  %4391 = vmatpush.bf16.msra.mxu0 %v11196_v28  ;;  %v13971_v35 = vld [vmem:[#allocation8 + $0xeac] sm:$0xf0]  ;;  %v13967_v39 = vld [vmem:[#allocation8 + $0xe94] sm:$0xf] }
 0x2b8   :  { %4334 = vmatmul.bf16.vlgmr.msra.gmra.mxu3 %v15400_v56  ;;  %4347 = vmatmul.bf16.vlgmr.msrb.gmra.mxu0 %v15400_v56  ;;  %v3324_v30 = vpop.f32.mrf.mxu2  ;;  %v11025_v28 = vld [vmem:[#allocation8 + $0xeb0] sm:$0xf0]  ;;  %v11024_v42 = vor.u32 %v13971_v35, %v11023_v13  ;;  %v11391_v35 = vld [vmem:[#allocation8 + $0x1180] sm:$0xf] }
 0x2b9   :  { %v15413_v22 = vadd.f32 %v3324_v30, %v15378_v40  ;;  %v11036_v40 = vor.u32 %v13968_v44, %v11033_v46  ;;  %v11436_v30 = vor.u32 %v14070_v17, %v11433_v15  ;;  %v11401_v44 = vld [vmem:[#allocation8 + $0x11a8] sm:$0xf0] }
 0x2ba   :  { %4353 = vmatpush.bf16.msrb.mxu1 %v11152_v29  ;;  %4366 = vmatpush.bf16.msrb.mxu2 %v11156_v38  ;;  %v3313_v38 = vpop.f32.mrf.mxu1  ;;  %v14038_v17 = vld [vmem:[#allocation8 + $0x10cc] sm:$0xf] }
 0x2bb   :  { %4379 = vmatpush.bf16.msrb.mxu3 %v11160_v3  ;;  %4392 = vmatpush.bf16.msra.mxu0 %v11164_v58  ;;  %v3337_v26 = vpop.f32.mrf.mxu3  ;;  %v11028_v3 = vor.u32 %v13967_v39, %v11025_v28  ;;  %v10991_v58 = vld [vmem:[#allocation8 + $0xe50] sm:$0xf]  ;;  %v14061_v39 = vld [vmem:[#allocation8 + $0x1184] sm:$0xf]  ;;  %v11305_v15 = vld [vmem:[#allocation8 + $0x10e8] sm:$0xf0] }
 0x2bc   :  { %v15416_v29 = vadd.f32 %v3337_v26, %v15381_v57  ;;  %v10959_v57 = vld [vmem:[#allocation8 + $0xe10] sm:$0xf]  ;;  %v10992_v49 = vor.u32 %v13963_v1, %v10991_v58  ;;  %v11393_v28 = vld [vmem:[#allocation8 + $0x11a0] sm:$0xf0]  ;;  %v14066_v26 = vld [vmem:[#allocation8 + $0x11a4] sm:$0xf0]  ;;  %v11404_v58 = vor.u32 %v14062_v41, %v11401_v44 }
 0x2bd   :  { %v3352_v43 = vpop.f32.mrf.mxu0  ;;  %v11396_v38 = vor.u32 %v14061_v39, %v11393_v28  ;;  %v14053_v1 = vld [vmem:[#allocation8 + $0x1144] sm:$0xf]  ;;  %v11273_v41 = vld [vmem:[#allocation8 + $0x10a8] sm:$0xf0] }
 0x2be   :  { %4354 = vmatpush.bf16.msrb.mxu1 %v11120_v52  ;;  %4367 = vmatpush.bf16.msrb.mxu2 %v11124_v51  ;;  %v13960_v52 = vld [vmem:[#allocation8 + $0xe5c] sm:$0xf]  ;;  %v11359_v43 = vld [vmem:[#allocation8 + $0x1140] sm:$0xf] }
 0x2bf   :  { %4380 = vmatpush.bf16.msrb.mxu3 %v11128_v54  ;;  %4393 = vmatpush.bf16.msra.mxu0 %v11132_v0  ;;  %v11001_v51 = vld [vmem:[#allocation8 + $0xe78] sm:$0xf0]  ;;  %v13955_v54 = vld [vmem:[#allocation8 + $0xe2c] sm:$0xf0]  ;;  %v13951_v0 = vld [vmem:[#allocation8 + $0xe14] sm:$0xf] }
 0x2c0   :  { %v11004_v32 = vor.u32 %v13960_v52, %v11001_v51  ;;  %v3326_v27 = vpop.f32.mrf.mxu2  ;;  %v10960_v14 = vor.u32 %v13955_v54, %v10959_v57  ;;  %v10964_v60 = vor.u32 %v13951_v0, %v10961_v63  ;;  %v11327_v51 = vld [vmem:[#allocation8 + $0x1100] sm:$0xf]  ;;  %v14045_v54 = vld [vmem:[#allocation8 + $0x1104] sm:$0xf]  ;;  %v11335_v63 = vld [vmem:[#allocation8 + $0x1108] sm:$0xf] }
 0x2c1   :  { %v14049_v57 = vld [vmem:[#allocation8 + $0x111c] sm:$0xf0]  ;;  %v11329_v0 = vld [vmem:[#allocation8 + $0x1120] sm:$0xf0]  ;;  %v11337_v27 = vld [vmem:[#allocation8 + $0x1128] sm:$0xf0] }
 0x2c2   :  { %4355 = vmatpush.bf16.msrb.mxu1 %v11088_v16  ;;  %4368 = vmatpush.bf16.msrb.mxu2 %v11092_v18  ;;  %v10969_v16 = vld [vmem:[#allocation8 + $0xe38] sm:$0xf0]  ;;  %v11423_v18 = vld [vmem:[#allocation8 + $0x11c0] sm:$0xf] }
 0x2c3   :  { %4381 = vmatpush.bf16.msrb.mxu3 %v11096_v33  ;;  %4394 = vmatpush.bf16.msra.mxu0 %v11100_v34  ;;  %v3339_v9 = vpop.f32.mrf.mxu3  ;;  %v11425_v33 = vld [vmem:[#allocation8 + $0x11e0] sm:$0xf0]  ;;  %v11431_v34 = vld [vmem:[#allocation8 + $0x11c8] sm:$0xf] }
 0x2c4   :  { %v11428_v13 = vor.u32 %v14069_v20, %v11425_v33  ;;  %v11332_v9 = vor.u32 %v14045_v54, %v11329_v0 }
 0x2c6   :  { %4356 = vmatpush.bf16.msrb.mxu1 %v11056_v10  ;;  %4369 = vmatpush.bf16.msrb.mxu2 %v11060_v48  ;;  %v10972_v10 = vor.u32 %v13952_v5, %v10969_v16  ;;  %v11424_v48 = vor.u32 %v14073_v19, %v11423_v18  ;;  %v11328_v5 = vor.u32 %v14049_v57, %v11327_v51  ;;  %v11295_v16 = vld [vmem:[#allocation8 + $0x10c0] sm:$0xf] }
 0x2c7   :  { %4382 = vmatpush.bf16.msrb.mxu3 %v11064_v36  ;;  %4395 = vmatpush.bf16.msra.mxu0 %v11068_v37  ;;  %v14065_v36 = vld [vmem:[#allocation8 + $0x119c] sm:$0xf0]  ;;  %v11432_v37 = vor.u32 %v14074_v45, %v11431_v34  ;;  %v14037_v34 = vld [vmem:[#allocation8 + $0x10c4] sm:$0xf]  ;;  %v14042_v45 = vld [vmem:[#allocation8 + $0x10e4] sm:$0xf0] }
 0x2c8   :  { %v11392_v46 = vor.u32 %v14065_v36, %v11391_v35  ;;  %v14041_v18 = vld [vmem:[#allocation8 + $0x10dc] sm:$0xf0]  ;;  %v11308_v35 = vor.u32 %v14038_v17, %v11305_v15  ;;  %v14029_v36 = vld [vmem:[#allocation8 + $0x1084] sm:$0xf] }
 0x2c9   :  { %v14017_v57 = vld [vmem:[#allocation8 + $0x101c] sm:$0xf0] }
 0x2ca   :  { %4357 = vmatpush.bf16.msrb.mxu1 %v11024_v42  ;;  %4370 = vmatpush.bf16.msrb.mxu2 %v11028_v3  ;;  %v14057_v42 = vld [vmem:[#allocation8 + $0x115c] sm:$0xf0]  ;;  %v11400_v3 = vor.u32 %v14066_v26, %v11399_v11  ;;  %v14034_v11 = vld [vmem:[#allocation8 + $0x10a4] sm:$0xf0]  ;;  %v14030_v26 = vld [vmem:[#allocation8 + $0x108c] sm:$0xf] }
 0x2cb   :  { %4383 = vmatpush.bf16.msrb.mxu3 %v11032_v23  ;;  %4396 = vmatpush.bf16.msra.mxu0 %v11036_v40  ;;  %v11361_v23 = vld [vmem:[#allocation8 + $0x1160] sm:$0xf0]  ;;  %v11367_v40 = vld [vmem:[#allocation8 + $0x1148] sm:$0xf]  ;;  %v11360_v62 = vor.u32 %v14057_v42, %v11359_v43 }
 0x2cc   :  { %v11364_v52 = vor.u32 %v14053_v1, %v11361_v23  ;;  %v14021_v23 = vld [vmem:[#allocation8 + $0x1044] sm:$0xf] }
 0x2ce   :  { %4358 = vmatpush.bf16.msrb.mxu1 %v10992_v49  ;;  %4371 = vmatpush.bf16.msrb.mxu2 %v10996_v55  ;;  %v11368_v49 = vor.u32 %v14058_v6, %v11367_v40  ;;  %v11372_v55 = vor.u32 %v14054_v59, %v11369_v61  ;;  %v11233_v40 = vld [vmem:[#allocation8 + $0x1060] sm:$0xf0]  ;;  %v11239_v6 = vld [vmem:[#allocation8 + $0x1048] sm:$0xf]  ;;  %v14022_v61 = vld [vmem:[#allocation8 + $0x104c] sm:$0xf] }
 0x2cf   :  { %4384 = vmatpush.bf16.msrb.mxu3 %v11000_v50  ;;  %4397 = vmatpush.bf16.msra.mxu0 %v11004_v32  ;;  %v14050_v50 = vld [vmem:[#allocation8 + $0x1124] sm:$0xf0]  ;;  %v14046_v32 = vld [vmem:[#allocation8 + $0x110c] sm:$0xf]  ;;  %v11236_v51 = vor.u32 %v14021_v23, %v11233_v40  ;;  %v14060_v23 = vld [vmem:[#allocation8 + $0x1174] sm:$0xf0] }
 0x2d0   :  { %v11336_v20 = vor.u32 %v14050_v50, %v11335_v63  ;;  %v11340_v33 = vor.u32 %v14046_v32, %v11337_v27  ;;  %v14026_v59 = vld [vmem:[#allocation8 + $0x1064] sm:$0xf0]  ;;  %v14014_v27 = vld [vmem:[#allocation8 + $0x100c] sm:$0xf]  ;;  %v14056_v40 = vld [vmem:[#allocation8 + $0x115c] sm:$0xf] }
 0x2d1   :  { %v11240_v54 = vor.u32 %v14026_v59, %v11239_v6  ;;  %v11207_v50 = vld [vmem:[#allocation8 + $0x1008] sm:$0xf]  ;;  %v11385_v6 = vld [vmem:[#allocation8 + $0x1178] sm:$0xf0] }
 0x2d2   :  { %4359 = vmatpush.bf16.msrb.mxu1 %v10960_v14  ;;  %4372 = vmatpush.bf16.msrb.mxu2 %v10964_v60  ;;  %v3363_v2 = vpop.f32.mrf.mxu1  ;;  %v11297_v14 = vld [vmem:[#allocation8 + $0x10e0] sm:$0xf0]  ;;  %v11303_v60 = vld [vmem:[#allocation8 + $0x10c8] sm:$0xf] }
 0x2d3   :  { %4385 = vmatpush.bf16.msrb.mxu3 %v10968_v12  ;;  %4398 = vmatpush.bf16.msra.mxu0 %v10972_v10  ;;  %v11300_v12 = vor.u32 %v14037_v34, %v11297_v14  ;;  %v11263_v10 = vld [vmem:[#allocation8 + $0x1080] sm:$0xf]  ;;  %v14018_v32 = vld [vmem:[#allocation8 + $0x1024] sm:$0xf0]  ;;  %v14076_v14 = vld [vmem:[#allocation8 + $0x11f4] sm:$0xf0] }
 0x2d4   :  { %v11208_v17 = vor.u32 %v14018_v32, %v11207_v50 }
 0x2d5   :  { %4360 = vmatmul.bf16.vlgmr.msrb.gmra.mxu1 %v15400_v56  ;;  %4373 = vmatmul.bf16.vlgmr.msrb.gmra.mxu2 %v15400_v56  ;;  %v3402_v4 = vpop.f32.mrf.mxu0 }
 0x2d6   :  { %4798 = vmatpush.bf16.msra.mxu1 %v11424_v48  ;;  %4811 = vmatpush.bf16.msra.mxu2 %v11428_v13  ;;  %v15426_v19 = vadd.f32 %v3402_v4, %v15391_v31  ;;  %v14033_v48 = vld [vmem:[#allocation8 + $0x109c] sm:$0xf0]  ;;  %v11304_v13 = vor.u32 %v14042_v45, %v11303_v60  ;;  %v11209_v4 = vld [vmem:[#allocation8 + $0x1028] sm:$0xf0]  ;;  %v14072_v60 = vld [vmem:[#allocation8 + $0x11dc] sm:$0xf] }
 0x2d7   :  { %4824 = vmatpush.bf16.msra.mxu3 %v11432_v37  ;;  %4837 = vmatpush.bf16.msrb.mxu0 %v11436_v30  ;;  %v11265_v37 = vld [vmem:[#allocation8 + $0x10a0] sm:$0xf0]  ;;  %v11271_v30 = vld [vmem:[#allocation8 + $0x1088] sm:$0xf]  ;;  %v11264_v43 = vor.u32 %v14033_v48, %v11263_v10  ;;  %v11449_v45 = vld [vmem:[#allocation8 + $0x11f8] sm:$0xf0]  ;;  %v11212_v15 = vor.u32 %v14014_v27, %v11209_v4 }
 0x2d8   :  { %4386 = vmatmul.bf16.vlgmr.msrb.gmra.mxu3 %v15400_v56  ;;  %4399 = vmatmul.bf16.vlgmr.msra.gmra.mxu0 %v15400_v56  ;;  %v15423_v56 = vadd.f32 %v3363_v2, %v15388_v53  ;;  %v11296_v53 = vor.u32 %v14041_v18, %v11295_v16  ;;  %v3376_v31 = vpop.f32.mrf.mxu2  ;;  %v11268_v42 = vor.u32 %v14029_v36, %v11265_v37  ;;  %v14071_v16 = vld [vmem:[#allocation8 + $0x11d4] sm:$0xf]  ;;  %v11407_v48 = vld [vmem:[#allocation8 + $0x1190] sm:$0xf] }
 0x2d9   :  { %v15429_v39 = vadd.f32 %v3376_v31, %v15394_v25  ;;  %v11272_v1 = vor.u32 %v14034_v11, %v11271_v30  ;;  %v11276_v25 = vor.u32 %v14030_v26, %v11273_v41  ;;  %v11441_v18 = vld [vmem:[#allocation8 + $0x11f0] sm:$0xf0]  ;;  %v11452_v31 = vor.u32 %v14072_v60, %v11449_v45  ;;  %v11415_v30 = vld [vmem:[#allocation8 + $0x1198] sm:$0xf]  ;;  %v14064_v11 = vld [vmem:[#allocation8 + $0x119c] sm:$0xf] }
 0x2da   :  { %4799 = vmatpush.bf16.msra.mxu1 %v11392_v46  ;;  %4812 = vmatpush.bf16.msra.mxu2 %v11396_v38  ;;  %v3365_v46 = vpop.f32.mrf.mxu1  ;;  %v11444_v10 = vor.u32 %v14071_v16, %v11441_v18  ;;  %v14063_v36 = vld [vmem:[#allocation8 + $0x1194] sm:$0xf]  ;;  %v11417_v26 = vld [vmem:[#allocation8 + $0x11b8] sm:$0xf0]  ;;  %v14044_v60 = vld [vmem:[#allocation8 + $0x10f4] sm:$0xf0] }
 0x2db   :  { %4825 = vmatpush.bf16.msra.mxu3 %v11400_v3  ;;  %4838 = vmatpush.bf16.msrb.mxu0 %v11404_v58  ;;  %v3389_v28 = vpop.f32.mrf.mxu3  ;;  %v11231_v3 = vld [vmem:[#allocation8 + $0x1040] sm:$0xf]  ;;  %v11409_v37 = vld [vmem:[#allocation8 + $0x11b0] sm:$0xf0]  ;;  %v14040_v45 = vld [vmem:[#allocation8 + $0x10dc] sm:$0xf] }
 0x2dc   :  { %v15432_v44 = vadd.f32 %v3389_v28, %v15397_v24  ;;  %v14025_v58 = vld [vmem:[#allocation8 + $0x105c] sm:$0xf0]  ;;  %v14068_v28 = vld [vmem:[#allocation8 + $0x11b4] sm:$0xf0]  ;;  %v11412_v46 = vor.u32 %v14063_v36, %v11409_v37 }
 0x2dd   :  { %v3404_v38 = vpop.f32.mrf.mxu0  ;;  %v11199_v24 = vld [vmem:[#allocation8 + $0x1000] sm:$0xf] }
 0x2de   :  { %4800 = vmatpush.bf16.msra.mxu1 %v11360_v62  ;;  %4813 = vmatpush.bf16.msra.mxu2 %v11364_v52  ;;  %v11241_v62 = vld [vmem:[#allocation8 + $0x1068] sm:$0xf0]  ;;  %v11232_v52 = vor.u32 %v14025_v58, %v11231_v3  ;;  %v11375_v38 = vld [vmem:[#allocation8 + $0x1150] sm:$0xf]  ;;  %v11420_v3 = vor.u32 %v14064_v11, %v11417_v26  ;;  %v14055_v58 = vld [vmem:[#allocation8 + $0x1154] sm:$0xf] }
 0x2df   :  { %4826 = vmatpush.bf16.msra.mxu3 %v11368_v49  ;;  %4839 = vmatpush.bf16.msrb.mxu0 %v11372_v55  ;;  %v14013_v49 = vld [vmem:[#allocation8 + $0x1004] sm:$0xf]  ;;  %v11244_v0 = vor.u32 %v14022_v61, %v11241_v62  ;;  %v11343_v62 = vld [vmem:[#allocation8 + $0x1110] sm:$0xf]  ;;  %v11289_v11 = vld [vmem:[#allocation8 + $0x10b8] sm:$0xf0] }
 0x2e0   :  { %v11201_v55 = vld [vmem:[#allocation8 + $0x1020] sm:$0xf0]  ;;  %v3378_v63 = vpop.f32.mrf.mxu2 }
 0x2e1   :  { %v11204_v34 = vor.u32 %v14013_v49, %v11201_v55  ;;  %v11345_v49 = vld [vmem:[#allocation8 + $0x1130] sm:$0xf0]  ;;  %v11351_v55 = vld [vmem:[#allocation8 + $0x1118] sm:$0xf]  ;;  %v11353_v63 = vld [vmem:[#allocation8 + $0x1138] sm:$0xf0] }
 0x2e2   :  { %4801 = vmatpush.bf16.msra.mxu1 %v11328_v5  ;;  %4814 = vmatpush.bf16.msra.mxu2 %v11332_v9  ;;  %v11439_v5 = vld [vmem:[#allocation8 + $0x11d0] sm:$0xf] }
 0x2e3   :  { %4827 = vmatpush.bf16.msra.mxu3 %v11336_v20  ;;  %4840 = vmatpush.bf16.msrb.mxu0 %v11340_v33  ;;  %v3391_v2 = vpop.f32.mrf.mxu3  ;;  %v14075_v9 = vld [vmem:[#allocation8 + $0x11ec] sm:$0xf0]  ;;  %v11447_v20 = vld [vmem:[#allocation8 + $0x11d8] sm:$0xf]  ;;  %v11200_v33 = vor.u32 %v14017_v57, %v11199_v24  ;;  %v14047_v57 = vld [vmem:[#allocation8 + $0x1114] sm:$0xf] }
 0x2e4   :  { %v14051_v24 = vld [vmem:[#allocation8 + $0x112c] sm:$0xf0]  ;;  %v11348_v4 = vor.u32 %v14047_v57, %v11345_v49 }
 0x2e5   :  { %v11344_v2 = vor.u32 %v14051_v24, %v11343_v62  ;;  %v14019_v24 = vld [vmem:[#allocation8 + $0x102c] sm:$0xf0] }
 0x2e6   :  { %4802 = vmatpush.bf16.msra.mxu1 %v11296_v53  ;;  %4815 = vmatpush.bf16.msra.mxu2 %v11300_v12  ;;  %v435_v53 = vmax.f32 %v15207_v47, 0.0  ;;  %v11440_v12 = vor.u32 %v14075_v9, %v11439_v5  ;;  %v11311_v5 = vld [vmem:[#allocation8 + $0x10d0] sm:$0xf] }
 0x2e7   :  { %4828 = vmatpush.bf16.msra.mxu3 %v11304_v13  ;;  %4841 = vmatpush.bf16.msrb.mxu0 %v11308_v35  ;;  %v14067_v13 = vld [vmem:[#allocation8 + $0x11ac] sm:$0xf0]  ;;  %v11448_v35 = vor.u32 %v14076_v14, %v11447_v20  ;;  %v11319_v14 = vld [vmem:[#allocation8 + $0x10d8] sm:$0xf] }
 0x2e8   :  { %v15435_v41 = vpack.c.bf16 %v435_v53, %v435_v53  ;;  %v11408_v47 = vor.u32 %v14067_v13, %v11407_v48  ;;  %v14043_v9 = vld [vmem:[#allocation8 + $0x10ec] sm:$0xf0]  ;;  %v14031_v13 = vld [vmem:[#allocation8 + $0x1094] sm:$0xf] }
 0x2e9   :  { %v11279_v53 = vld [vmem:[#allocation8 + $0x1090] sm:$0xf] }
 0x2ea   :  { %4803 = vmatpush.bf16.msra.mxu1 %v11264_v43  ;;  %4816 = vmatpush.bf16.msra.mxu2 %v11268_v42  ;;  %v14059_v43 = vld [vmem:[#allocation8 + $0x116c] sm:$0xf0]  ;;  %v11416_v42 = vor.u32 %v14068_v28, %v11415_v30  ;;  %v14036_v30 = vld [vmem:[#allocation8 + $0x10b4] sm:$0xf0]  ;;  %v14032_v28 = vld [vmem:[#allocation8 + $0x109c] sm:$0xf] }
 0x2eb   :  { %4829 = vmatpush.bf16.msra.mxu3 %v11272_v1  ;;  %4842 = vmatpush.bf16.msrb.mxu0 %v11276_v25  ;;  %v11377_v1 = vld [vmem:[#allocation8 + $0x1170] sm:$0xf0]  ;;  %v11383_v25 = vld [vmem:[#allocation8 + $0x1158] sm:$0xf]  ;;  %v11376_v59 = vor.u32 %v14059_v43, %v11375_v38 }
 0x2ec   :  { %v11380_v61 = vor.u32 %v14055_v58, %v11377_v1  ;;  %v14023_v1 = vld [vmem:[#allocation8 + $0x1054] sm:$0xf] }
 0x2ee   :  { %4804 = vmatpush.bf16.msra.mxu1 %v11232_v52  ;;  %4817 = vmatpush.bf16.msra.mxu2 %v11236_v51  ;;  %v11384_v52 = vor.u32 %v14060_v23, %v11383_v25  ;;  %v11388_v51 = vor.u32 %v14056_v40, %v11385_v6  ;;  %v11249_v25 = vld [vmem:[#allocation8 + $0x1070] sm:$0xf0]  ;;  %v11255_v23 = vld [vmem:[#allocation8 + $0x1058] sm:$0xf]  ;;  %v14024_v6 = vld [vmem:[#allocation8 + $0x105c] sm:$0xf] }
 0x2ef   :  { %4830 = vmatpush.bf16.msra.mxu3 %v11240_v54  ;;  %4843 = vmatpush.bf16.msrb.mxu0 %v11244_v0  ;;  %v14052_v54 = vld [vmem:[#allocation8 + $0x1134] sm:$0xf0]  ;;  %v14048_v0 = vld [vmem:[#allocation8 + $0x111c] sm:$0xf]  ;;  %v11252_v62 = vor.u32 %v14023_v1, %v11249_v25  ;;  %v14118_v1 = vld [vmem:[#allocation8 + $0x134c] sm:$0xf] }
 0x2f0   :  { %v11352_v18 = vor.u32 %v14052_v54, %v11351_v55  ;;  %v11356_v20 = vor.u32 %v14048_v0, %v11353_v63  ;;  %v14028_v40 = vld [vmem:[#allocation8 + $0x1074] sm:$0xf0]  ;;  %v14016_v63 = vld [vmem:[#allocation8 + $0x101c] sm:$0xf]  ;;  %v11625_v25 = vld [vmem:[#allocation8 + $0x1368] sm:$0xf0] }
 0x2f1   :  { %v11256_v57 = vor.u32 %v14028_v40, %v11255_v23  ;;  %v11223_v54 = vld [vmem:[#allocation8 + $0x1018] sm:$0xf] }
 0x2f2   :  { %4805 = vmatpush.bf16.msra.mxu1 %v11200_v33  ;;  %4818 = vmatpush.bf16.msra.mxu2 %v11204_v34  ;;  %v3810_v50 = vpop.f32.mrf.mxu1  ;;  %v14039_v33 = vld [vmem:[#allocation8 + $0x10d4] sm:$0xf]  ;;  %v14020_v0 = vld [vmem:[#allocation8 + $0x1034] sm:$0xf0] }
 0x2f3   :  { %4831 = vmatpush.bf16.msra.mxu3 %v11208_v17  ;;  %4844 = vmatpush.bf16.msrb.mxu0 %v11212_v15  ;;  %v15442_v32 = vadd.f32 %v3810_v50, %v15407_v7  ;;  %v11313_v34 = vld [vmem:[#allocation8 + $0x10f0] sm:$0xf0]  ;;  %v11321_v17 = vld [vmem:[#allocation8 + $0x10f8] sm:$0xf0]  ;;  %v11312_v7 = vor.u32 %v14043_v9, %v11311_v5  ;;  %v14133_v5 = vld [vmem:[#allocation8 + $0x13c4] sm:$0xf] }
 0x2f4   :  { %v11316_v15 = vor.u32 %v14039_v33, %v11313_v34  ;;  %v11324_v48 = vor.u32 %v14040_v45, %v11321_v17  ;;  %v11681_v9 = vld [vmem:[#allocation8 + $0x13e0] sm:$0xf0]  ;;  %v14138_v34 = vld [vmem:[#allocation8 + $0x13e4] sm:$0xf0]  ;;  %v11224_v45 = vor.u32 %v14020_v0, %v11223_v54 }
 0x2f5   :  { %4806 = vmatmul.bf16.vlgmr.msra.gmra.mxu1 %v15435_v41  ;;  %4819 = vmatmul.bf16.vlgmr.msra.gmra.mxu2 %v15435_v41  ;;  %v3849_v27 = vpop.f32.mrf.mxu0 }
 0x2f6   :  { %4850 = vmatpush.bf16.msrb.mxu1 %v11440_v12  ;;  %4863 = vmatpush.bf16.msrb.mxu2 %v11444_v10  ;;  %v15445_v16 = vadd.f32 %v3849_v27, %v15410_v21  ;;  %v14035_v12 = vld [vmem:[#allocation8 + $0x10ac] sm:$0xf0]  ;;  %v11320_v10 = vor.u32 %v14044_v60, %v11319_v14  ;;  %v11225_v27 = vld [vmem:[#allocation8 + $0x1038] sm:$0xf0]  ;;  %v14134_v14 = vld [vmem:[#allocation8 + $0x13cc] sm:$0xf] }
 0x2f7   :  { %4876 = vmatpush.bf16.msrb.mxu3 %v11448_v35  ;;  %4889 = vmatpush.bf16.msra.mxu0 %v11452_v31  ;;  %v11281_v35 = vld [vmem:[#allocation8 + $0x10b0] sm:$0xf0]  ;;  %v11287_v31 = vld [vmem:[#allocation8 + $0x1098] sm:$0xf]  ;;  %v11280_v38 = vor.u32 %v14035_v12, %v11279_v53  ;;  %v11689_v60 = vld [vmem:[#allocation8 + $0x13e8] sm:$0xf0]  ;;  %v11228_v17 = vor.u32 %v14016_v63, %v11225_v27 }
 0x2f8   :  { %4832 = vmatmul.bf16.vlgmr.msra.gmra.mxu3 %v15435_v41  ;;  %4845 = vmatmul.bf16.vlgmr.msrb.gmra.mxu0 %v15435_v41  ;;  %v3823_v21 = vpop.f32.mrf.mxu2  ;;  %v11284_v43 = vor.u32 %v14031_v13, %v11281_v35  ;;  %v11288_v58 = vor.u32 %v14036_v30, %v11287_v31  ;;  %v11647_v53 = vld [vmem:[#allocation8 + $0x1380] sm:$0xf]  ;;  %v11649_v13 = vld [vmem:[#allocation8 + $0x13a0] sm:$0xf0]  ;;  %v11655_v35 = vld [vmem:[#allocation8 + $0x1388] sm:$0xf] }
 0x2f9   :  { %v15448_v36 = vadd.f32 %v3823_v21, %v15413_v22  ;;  %v11292_v22 = vor.u32 %v14032_v28, %v11289_v11  ;;  %v14129_v12 = vld [vmem:[#allocation8 + $0x139c] sm:$0xf0]  ;;  %v14125_v21 = vld [vmem:[#allocation8 + $0x1384] sm:$0xf]  ;;  %v14130_v31 = vld [vmem:[#allocation8 + $0x13a4] sm:$0xf0] }
 0x2fa   :  { %4851 = vmatpush.bf16.msrb.mxu1 %v11408_v47  ;;  %4864 = vmatpush.bf16.msrb.mxu2 %v11412_v46  ;;  %v3812_v47 = vpop.f32.mrf.mxu1  ;;  %v11657_v30 = vld [vmem:[#allocation8 + $0x13a8] sm:$0xf0]  ;;  %v11648_v28 = vor.u32 %v14129_v12, %v11647_v53  ;;  %v11652_v11 = vor.u32 %v14125_v21, %v11649_v13  ;;  %v11551_v27 = vld [vmem:[#allocation8 + $0x12c0] sm:$0xf]  ;;  %v14093_v12 = vld [vmem:[#allocation8 + $0x1284] sm:$0xf] }
 0x2fb   :  { %4877 = vmatpush.bf16.msrb.mxu3 %v11416_v42  ;;  %4890 = vmatpush.bf16.msra.mxu0 %v11420_v3  ;;  %v3836_v37 = vpop.f32.mrf.mxu3  ;;  %v11247_v42 = vld [vmem:[#allocation8 + $0x1050] sm:$0xf]  ;;  %v11615_v47 = vld [vmem:[#allocation8 + $0x1340] sm:$0xf] }
 0x2fc   :  { %v15451_v26 = vadd.f32 %v3836_v37, %v15416_v29  ;;  %v14027_v3 = vld [vmem:[#allocation8 + $0x106c] sm:$0xf0]  ;;  %v14126_v37 = vld [vmem:[#allocation8 + $0x138c] sm:$0xf] }
 0x2fd   :  { %v3851_v46 = vpop.f32.mrf.mxu0  ;;  %v11215_v29 = vld [vmem:[#allocation8 + $0x1010] sm:$0xf] }
 0x2fe   :  { %4852 = vmatpush.bf16.msrb.mxu1 %v11376_v59  ;;  %4865 = vmatpush.bf16.msrb.mxu2 %v11380_v61  ;;  %v11257_v59 = vld [vmem:[#allocation8 + $0x1078] sm:$0xf0]  ;;  %v11248_v61 = vor.u32 %v14027_v3, %v11247_v42  ;;  %v14121_v46 = vld [vmem:[#allocation8 + $0x135c] sm:$0xf0]  ;;  %v14117_v42 = vld [vmem:[#allocation8 + $0x1344] sm:$0xf] }
 0x2ff   :  { %4878 = vmatpush.bf16.msrb.mxu3 %v11384_v52  ;;  %4891 = vmatpush.bf16.msra.mxu0 %v11388_v51  ;;  %v14015_v52 = vld [vmem:[#allocation8 + $0x1014] sm:$0xf]  ;;  %v11260_v49 = vor.u32 %v14024_v6, %v11257_v59  ;;  %v11617_v3 = vld [vmem:[#allocation8 + $0x1360] sm:$0xf0]  ;;  %v11616_v23 = vor.u32 %v14121_v46, %v11615_v47  ;;  %v11583_v6 = vld [vmem:[#allocation8 + $0x1300] sm:$0xf] }
 0x300   :  { %v11217_v51 = vld [vmem:[#allocation8 + $0x1030] sm:$0xf0]  ;;  %v3825_v55 = vpop.f32.mrf.mxu2  ;;  %v11620_v40 = vor.u32 %v14117_v42, %v11617_v3  ;;  %v14113_v59 = vld [vmem:[#allocation8 + $0x131c] sm:$0xf0]  ;;  %v14085_v3 = vld [vmem:[#allocation8 + $0x1244] sm:$0xf] }
 0x301   :  { %v11220_v33 = vor.u32 %v14015_v52, %v11217_v51  ;;  %v11591_v52 = vld [vmem:[#allocation8 + $0x1308] sm:$0xf]  ;;  %v11584_v63 = vor.u32 %v14113_v59, %v11583_v6  ;;  %v14081_v59 = vld [vmem:[#allocation8 + $0x121c] sm:$0xf0] }
 0x302   :  { %4853 = vmatpush.bf16.msrb.mxu1 %v11344_v2  ;;  %4866 = vmatpush.bf16.msrb.mxu2 %v11348_v4  ;;  %v11679_v2 = vld [vmem:[#allocation8 + $0x13c0] sm:$0xf]  ;;  %v14114_v51 = vld [vmem:[#allocation8 + $0x1324] sm:$0xf0] }
 0x303   :  { %4879 = vmatpush.bf16.msrb.mxu3 %v11352_v18  ;;  %4892 = vmatpush.bf16.msra.mxu0 %v11356_v20  ;;  %v3838_v50 = vpop.f32.mrf.mxu3  ;;  %v14137_v4 = vld [vmem:[#allocation8 + $0x13dc] sm:$0xf0]  ;;  %v11687_v18 = vld [vmem:[#allocation8 + $0x13c8] sm:$0xf]  ;;  %v11216_v20 = vor.u32 %v14019_v24, %v11215_v29  ;;  %v11585_v24 = vld [vmem:[#allocation8 + $0x1320] sm:$0xf0] }
 0x306   :  { %4854 = vmatpush.bf16.msrb.mxu1 %v11312_v7  ;;  %4867 = vmatpush.bf16.msrb.mxu2 %v11316_v15  ;;  %v11680_v7 = vor.u32 %v14137_v4, %v11679_v2  ;;  %v11684_v15 = vor.u32 %v14133_v5, %v11681_v9  ;;  %v14105_v2 = vld [vmem:[#allocation8 + $0x12dc] sm:$0xf0]  ;;  %v11592_v5 = vor.u32 %v14114_v51, %v11591_v52  ;;  %v11463_v51 = vld [vmem:[#allocation8 + $0x1208] sm:$0xf] }
 0x307   :  { %4880 = vmatpush.bf16.msrb.mxu3 %v11320_v10  ;;  %4893 = vmatpush.bf16.msra.mxu0 %v11324_v48  ;;  %v11688_v10 = vor.u32 %v14138_v34, %v11687_v18  ;;  %v11692_v48 = vor.u32 %v14134_v14, %v11689_v60  ;;  %v14101_v18 = vld [vmem:[#allocation8 + $0x12c4] sm:$0xf]  ;;  %v14106_v34 = vld [vmem:[#allocation8 + $0x12e4] sm:$0xf0]  ;;  %v14102_v14 = vld [vmem:[#allocation8 + $0x12cc] sm:$0xf] }
 0x308   :  { %v11561_v60 = vld [vmem:[#allocation8 + $0x12e8] sm:$0xf0] }
 0x309   :  { %v11564_v53 = vor.u32 %v14102_v14, %v11561_v60 }
 0x30a   :  { %4855 = vmatpush.bf16.msrb.mxu1 %v11280_v38  ;;  %4868 = vmatpush.bf16.msrb.mxu2 %v11284_v43  ;;  %v11656_v38 = vor.u32 %v14130_v31, %v11655_v35  ;;  %v11660_v43 = vor.u32 %v14126_v37, %v11657_v30  ;;  %v14098_v35 = vld [vmem:[#allocation8 + $0x12a4] sm:$0xf0]  ;;  %v14094_v31 = vld [vmem:[#allocation8 + $0x128c] sm:$0xf] }
 0x30b   :  { %4881 = vmatpush.bf16.msrb.mxu3 %v11288_v58  ;;  %4894 = vmatpush.bf16.msra.mxu0 %v11292_v22  ;;  %v11623_v58 = vld [vmem:[#allocation8 + $0x1348] sm:$0xf]  ;;  %v11529_v37 = vld [vmem:[#allocation8 + $0x12a8] sm:$0xf0] }
 0x30c   :  { %v14122_v22 = vld [vmem:[#allocation8 + $0x1364] sm:$0xf0] }
 0x30d   :  { %v11624_v29 = vor.u32 %v14122_v22, %v11623_v58  ;;  %v11489_v58 = vld [vmem:[#allocation8 + $0x1260] sm:$0xf0]  ;;  %v11495_v22 = vld [vmem:[#allocation8 + $0x1248] sm:$0xf] }
 0x30e   :  { %4856 = vmatpush.bf16.msrb.mxu1 %v11248_v61  ;;  %4869 = vmatpush.bf16.msrb.mxu2 %v11252_v62  ;;  %v11628_v61 = vor.u32 %v14118_v1, %v11625_v25  ;;  %v14109_v62 = vld [vmem:[#allocation8 + $0x1304] sm:$0xf]  ;;  %v14090_v1 = vld [vmem:[#allocation8 + $0x1264] sm:$0xf0]  ;;  %v14086_v25 = vld [vmem:[#allocation8 + $0x124c] sm:$0xf]  ;;  %v11492_v6 = vor.u32 %v14085_v3, %v11489_v58 }
 0x30f   :  { %4882 = vmatpush.bf16.msrb.mxu3 %v11256_v57  ;;  %4895 = vmatpush.bf16.msra.mxu0 %v11260_v49  ;;  %v14110_v57 = vld [vmem:[#allocation8 + $0x130c] sm:$0xf]  ;;  %v11588_v50 = vor.u32 %v14109_v62, %v11585_v24  ;;  %v11496_v62 = vor.u32 %v14090_v1, %v11495_v22  ;;  %v14124_v3 = vld [vmem:[#allocation8 + $0x1374] sm:$0xf0]  ;;  %v14120_v58 = vld [vmem:[#allocation8 + $0x135c] sm:$0xf] }
 0x310   :  { %v11593_v49 = vld [vmem:[#allocation8 + $0x1328] sm:$0xf0]  ;;  %v11641_v22 = vld [vmem:[#allocation8 + $0x1378] sm:$0xf0] }
 0x311   :  { %v11596_v9 = vor.u32 %v14110_v57, %v11593_v49  ;;  %v14082_v57 = vld [vmem:[#allocation8 + $0x1224] sm:$0xf0]  ;;  %v14078_v49 = vld [vmem:[#allocation8 + $0x120c] sm:$0xf] }
 0x312   :  { %4857 = vmatpush.bf16.msrb.mxu1 %v11216_v20  ;;  %4870 = vmatpush.bf16.msrb.mxu2 %v11220_v33  ;;  %v3862_v55 = vpop.f32.mrf.mxu1  ;;  %v11553_v20 = vld [vmem:[#allocation8 + $0x12e0] sm:$0xf0]  ;;  %v11559_v33 = vld [vmem:[#allocation8 + $0x12c8] sm:$0xf]  ;;  %v11464_v14 = vor.u32 %v14082_v57, %v11463_v51 }
 0x313   :  { %4883 = vmatpush.bf16.msrb.mxu3 %v11224_v45  ;;  %4896 = vmatpush.bf16.msra.mxu0 %v11228_v17  ;;  %v15458_v54 = vadd.f32 %v3862_v55, %v15423_v56  ;;  %v11552_v56 = vor.u32 %v14105_v2, %v11551_v27  ;;  %v11556_v45 = vor.u32 %v14101_v18, %v11553_v20  ;;  %v11519_v17 = vld [vmem:[#allocation8 + $0x1280] sm:$0xf]  ;;  %v14135_v27 = vld [vmem:[#allocation8 + $0x13d4] sm:$0xf]  ;;  %v14140_v20 = vld [vmem:[#allocation8 + $0x13f4] sm:$0xf0] }
 0x314   :  { %v11697_v2 = vld [vmem:[#allocation8 + $0x13f0] sm:$0xf0] }
 0x315   :  { %4858 = vmatmul.bf16.vlgmr.msrb.gmra.mxu1 %v15435_v41  ;;  %4871 = vmatmul.bf16.vlgmr.msrb.gmra.mxu2 %v15435_v41  ;;  %v3901_v0 = vpop.f32.mrf.mxu0 }
 0x316   :  { %5298 = vmatpush.bf16.msra.mxu1 %v11680_v7  ;;  %5311 = vmatpush.bf16.msra.mxu2 %v11684_v15  ;;  %v15461_v4 = vadd.f32 %v3901_v0, %v15426_v19  ;;  %v14097_v7 = vld [vmem:[#allocation8 + $0x129c] sm:$0xf0]  ;;  %v11560_v15 = vor.u32 %v14106_v34, %v11559_v33  ;;  %v11465_v0 = vld [vmem:[#allocation8 + $0x1228] sm:$0xf0]  ;;  %v14136_v33 = vld [vmem:[#allocation8 + $0x13dc] sm:$0xf] }
 0x317   :  { %5324 = vmatpush.bf16.msra.mxu3 %v11688_v10  ;;  %5337 = vmatpush.bf16.msrb.mxu0 %v11692_v48  ;;  %v11521_v10 = vld [vmem:[#allocation8 + $0x12a0] sm:$0xf0]  ;;  %v11527_v48 = vld [vmem:[#allocation8 + $0x1288] sm:$0xf]  ;;  %v11520_v47 = vor.u32 %v14097_v7, %v11519_v17  ;;  %v11705_v34 = vld [vmem:[#allocation8 + $0x13f8] sm:$0xf0]  ;;  %v11468_v60 = vor.u32 %v14078_v49, %v11465_v0 }
 0x318   :  { %4884 = vmatmul.bf16.vlgmr.msrb.gmra.mxu3 %v15435_v41  ;;  %4897 = vmatmul.bf16.vlgmr.msra.gmra.mxu0 %v15435_v41  ;;  %v3875_v19 = vpop.f32.mrf.mxu2  ;;  %v11524_v46 = vor.u32 %v14093_v12, %v11521_v10  ;;  %v11528_v42 = vor.u32 %v14098_v35, %v11527_v48  ;;  %v11663_v17 = vld [vmem:[#allocation8 + $0x1390] sm:$0xf]  ;;  %v11665_v12 = vld [vmem:[#allocation8 + $0x13b0] sm:$0xf0]  ;;  %v11671_v10 = vld [vmem:[#allocation8 + $0x1398] sm:$0xf] }
 0x319   :  { %v15464_v21 = vadd.f32 %v3875_v19, %v15429_v39  ;;  %v11532_v39 = vor.u32 %v14094_v31, %v11529_v37  ;;  %v14131_v7 = vld [vmem:[#allocation8 + $0x13ac] sm:$0xf0]  ;;  %v14127_v19 = vld [vmem:[#allocation8 + $0x1394] sm:$0xf]  ;;  %v14132_v48 = vld [vmem:[#allocation8 + $0x13b4] sm:$0xf0] }
 0x31a   :  { %5299 = vmatpush.bf16.msra.mxu1 %v11648_v28  ;;  %5312 = vmatpush.bf16.msra.mxu2 %v11652_v11  ;;  %v3864_v28 = vpop.f32.mrf.mxu1  ;;  %v11673_v35 = vld [vmem:[#allocation8 + $0x13b8] sm:$0xf0]  ;;  %v15470_v31 = vrot.slane %v15435_v41, 1  ;;  %v11664_v37 = vor.u32 %v14131_v7, %v11663_v17 }
 0x31b   :  { %5325 = vmatpush.bf16.msra.mxu3 %v11656_v38  ;;  %5338 = vmatpush.bf16.msrb.mxu0 %v11660_v43  ;;  %v3888_v13 = vpop.f32.mrf.mxu3  ;;  %v11487_v38 = vld [vmem:[#allocation8 + $0x1240] sm:$0xf]  ;;  %v11668_v28 = vor.u32 %v14127_v19, %v11665_v12  ;;  %v11543_v19 = vld [vmem:[#allocation8 + $0x1298] sm:$0xf] }
 0x31c   :  { %v15467_v30 = vadd.f32 %v3888_v13, %v15432_v44  ;;  %v14089_v43 = vld [vmem:[#allocation8 + $0x125c] sm:$0xf0]  ;;  %v14128_v13 = vld [vmem:[#allocation8 + $0x139c] sm:$0xf] }
 0x31d   :  { %v3903_v11 = vpop.f32.mrf.mxu0  ;;  %v11455_v44 = vld [vmem:[#allocation8 + $0x1200] sm:$0xf] }
 0x31e   :  { %5300 = vmatpush.bf16.msra.mxu1 %v11616_v23  ;;  %5313 = vmatpush.bf16.msra.mxu2 %v11620_v40  ;;  %v11497_v23 = vld [vmem:[#allocation8 + $0x1268] sm:$0xf0]  ;;  %v11488_v40 = vor.u32 %v14089_v43, %v11487_v38  ;;  %v11631_v11 = vld [vmem:[#allocation8 + $0x1350] sm:$0xf]  ;;  %v11676_v38 = vor.u32 %v14128_v13, %v11673_v35  ;;  %v14119_v43 = vld [vmem:[#allocation8 + $0x1354] sm:$0xf] }
 0x31f   :  { %5326 = vmatpush.bf16.msra.mxu3 %v11624_v29  ;;  %5339 = vmatpush.bf16.msrb.mxu0 %v11628_v61  ;;  %v14077_v29 = vld [vmem:[#allocation8 + $0x1204] sm:$0xf]  ;;  %v11500_v24 = vor.u32 %v14086_v25, %v11497_v23  ;;  %v11599_v23 = vld [vmem:[#allocation8 + $0x1310] sm:$0xf]  ;;  %v14096_v13 = vld [vmem:[#allocation8 + $0x129c] sm:$0xf] }
 0x320   :  { %v11457_v61 = vld [vmem:[#allocation8 + $0x1220] sm:$0xf0]  ;;  %v3877_v52 = vpop.f32.mrf.mxu2  ;;  %v11545_v35 = vld [vmem:[#allocation8 + $0x12b8] sm:$0xf0] }
 0x321   :  { %v11460_v18 = vor.u32 %v14077_v29, %v11457_v61  ;;  %v11601_v29 = vld [vmem:[#allocation8 + $0x1330] sm:$0xf0]  ;;  %v11607_v61 = vld [vmem:[#allocation8 + $0x1318] sm:$0xf]  ;;  %v11609_v52 = vld [vmem:[#allocation8 + $0x1338] sm:$0xf0] }
 0x322   :  { %5301 = vmatpush.bf16.msra.mxu1 %v11584_v63  ;;  %5314 = vmatpush.bf16.msra.mxu2 %v11588_v50  ;;  %v11695_v63 = vld [vmem:[#allocation8 + $0x13d0] sm:$0xf] }
 0x323   :  { %5327 = vmatpush.bf16.msra.mxu3 %v11592_v5  ;;  %5340 = vmatpush.bf16.msrb.mxu0 %v11596_v9  ;;  %v3890_v55 = vpop.f32.mrf.mxu3  ;;  %v14139_v50 = vld [vmem:[#allocation8 + $0x13ec] sm:$0xf0]  ;;  %v11703_v5 = vld [vmem:[#allocation8 + $0x13d8] sm:$0xf]  ;;  %v11456_v9 = vor.u32 %v14081_v59, %v11455_v44  ;;  %v14111_v59 = vld [vmem:[#allocation8 + $0x1314] sm:$0xf] }
 0x324   :  { %v14115_v44 = vld [vmem:[#allocation8 + $0x132c] sm:$0xf0]  ;;  %v11604_v0 = vor.u32 %v14111_v59, %v11601_v29  ;;  %v11473_v59 = vld [vmem:[#allocation8 + $0x1230] sm:$0xf0] }
 0x325   :  { %v11600_v55 = vor.u32 %v14115_v44, %v11599_v23 }
 0x326   :  { %5302 = vmatpush.bf16.msra.mxu1 %v11552_v56  ;;  %5315 = vmatpush.bf16.msra.mxu2 %v11556_v45  ;;  %v11696_v56 = vor.u32 %v14139_v50, %v11695_v63  ;;  %v11700_v45 = vor.u32 %v14135_v27, %v11697_v2  ;;  %v11567_v63 = vld [vmem:[#allocation8 + $0x12d0] sm:$0xf] }
 0x327   :  { %5328 = vmatpush.bf16.msra.mxu3 %v11560_v15  ;;  %5341 = vmatpush.bf16.msrb.mxu0 %v11564_v53  ;;  %v11704_v15 = vor.u32 %v14140_v20, %v11703_v5  ;;  %v11708_v53 = vor.u32 %v14136_v33, %v11705_v34  ;;  %v14107_v50 = vld [vmem:[#allocation8 + $0x12ec] sm:$0xf0]  ;;  %v11575_v20 = vld [vmem:[#allocation8 + $0x12d8] sm:$0xf]  ;;  %v14104_v34 = vld [vmem:[#allocation8 + $0x12dc] sm:$0xf] }
 0x328   :  { %v14108_v33 = vld [vmem:[#allocation8 + $0x12f4] sm:$0xf0] }
 0x329   :  { %v11576_v17 = vor.u32 %v14108_v33, %v11575_v20  ;;  %v14202_v20 = vld [vmem:[#allocation8 + $0x15e4] sm:$0xf0]  ;;  %v14198_v33 = vld [vmem:[#allocation8 + $0x15cc] sm:$0xf] }
 0x32a   :  { %5303 = vmatpush.bf16.msra.mxu1 %v11520_v47  ;;  %5316 = vmatpush.bf16.msra.mxu2 %v11524_v46  ;;  %v14123_v47 = vld [vmem:[#allocation8 + $0x136c] sm:$0xf0]  ;;  %v11672_v46 = vor.u32 %v14132_v48, %v11671_v10  ;;  %v14100_v48 = vld [vmem:[#allocation8 + $0x12b4] sm:$0xf0] }
 0x32b   :  { %5329 = vmatpush.bf16.msra.mxu3 %v11528_v42  ;;  %5342 = vmatpush.bf16.msrb.mxu0 %v11532_v39  ;;  %v11633_v42 = vld [vmem:[#allocation8 + $0x1370] sm:$0xf0]  ;;  %v11639_v39 = vld [vmem:[#allocation8 + $0x1358] sm:$0xf]  ;;  %v11632_v1 = vor.u32 %v14123_v47, %v11631_v11 }
 0x32c   :  { %v11636_v25 = vor.u32 %v14119_v43, %v11633_v42  ;;  %v14091_v43 = vld [vmem:[#allocation8 + $0x126c] sm:$0xf0]  ;;  %v11544_v42 = vor.u32 %v14100_v48, %v11543_v19  ;;  %v11911_v19 = vld [vmem:[#allocation8 + $0x1588] sm:$0xf]  ;;  %v14190_v48 = vld [vmem:[#allocation8 + $0x158c] sm:$0xf] }
 0x32e   :  { %5304 = vmatpush.bf16.msra.mxu1 %v11488_v40  ;;  %5317 = vmatpush.bf16.msra.mxu2 %v11492_v6  ;;  %v11640_v40 = vor.u32 %v14124_v3, %v11639_v39  ;;  %v11644_v6 = vor.u32 %v14120_v58, %v11641_v22  ;;  %v14087_v39 = vld [vmem:[#allocation8 + $0x1254] sm:$0xf]  ;;  %v11511_v58 = vld [vmem:[#allocation8 + $0x1258] sm:$0xf] }
 0x32f   :  { %5330 = vmatpush.bf16.msra.mxu3 %v11496_v62  ;;  %5343 = vmatpush.bf16.msrb.mxu0 %v11500_v24  ;;  %v14116_v62 = vld [vmem:[#allocation8 + $0x1334] sm:$0xf0]  ;;  %v14112_v24 = vld [vmem:[#allocation8 + $0x131c] sm:$0xf]  ;;  %v11505_v3 = vld [vmem:[#allocation8 + $0x1270] sm:$0xf0] }
 0x330   :  { %v11608_v2 = vor.u32 %v14116_v62, %v11607_v61  ;;  %v11612_v5 = vor.u32 %v14112_v24, %v11609_v52  ;;  %v14092_v22 = vld [vmem:[#allocation8 + $0x1274] sm:$0xf0]  ;;  %v11508_v44 = vor.u32 %v14087_v39, %v11505_v3  ;;  %v14186_v39 = vld [vmem:[#allocation8 + $0x1564] sm:$0xf0]  ;;  %v14182_v3 = vld [vmem:[#allocation8 + $0x154c] sm:$0xf] }
 0x331   :  { %v11512_v29 = vor.u32 %v14092_v22, %v11511_v58  ;;  %v11479_v24 = vld [vmem:[#allocation8 + $0x1218] sm:$0xf]  ;;  %v11881_v58 = vld [vmem:[#allocation8 + $0x1568] sm:$0xf0] }
 0x332   :  { %5305 = vmatpush.bf16.msra.mxu1 %v11456_v9  ;;  %5318 = vmatpush.bf16.msra.mxu2 %v11460_v18  ;;  %v4309_v51 = vpop.f32.mrf.mxu1  ;;  %v14103_v9 = vld [vmem:[#allocation8 + $0x12d4] sm:$0xf]  ;;  %v14084_v52 = vld [vmem:[#allocation8 + $0x1234] sm:$0xf0] }
 0x333   :  { %5331 = vmatpush.bf16.msra.mxu3 %v11464_v14  ;;  %5344 = vmatpush.bf16.msrb.mxu0 %v11468_v60  ;;  %v15477_v57 = vadd.f32 %v4309_v51, %v15442_v32  ;;  %v11569_v18 = vld [vmem:[#allocation8 + $0x12f0] sm:$0xf0]  ;;  %v11577_v14 = vld [vmem:[#allocation8 + $0x12f8] sm:$0xf0]  ;;  %v11568_v32 = vor.u32 %v14107_v50, %v11567_v63  ;;  %v14201_v63 = vld [vmem:[#allocation8 + $0x15dc] sm:$0xf0] }
 0x334   :  { %v11572_v60 = vor.u32 %v14103_v9, %v11569_v18  ;;  %v11580_v7 = vor.u32 %v14104_v34, %v11577_v14  ;;  %v14080_v51 = vld [vmem:[#allocation8 + $0x121c] sm:$0xf]  ;;  %v14197_v50 = vld [vmem:[#allocation8 + $0x15c4] sm:$0xf]  ;;  %v11945_v34 = vld [vmem:[#allocation8 + $0x15e8] sm:$0xf0]  ;;  %v11480_v14 = vor.u32 %v14084_v52, %v11479_v24 }
 0x335   :  { %5306 = vmatmul.bf16.vlgmr.msra.gmra.mxu1 %v15470_v31  ;;  %5319 = vmatmul.bf16.vlgmr.msra.gmra.mxu2 %v15470_v31  ;;  %v4348_v49 = vpop.f32.mrf.mxu0 }
 0x336   :  { %5350 = vmatpush.bf16.msrb.mxu1 %v11696_v56  ;;  %5363 = vmatpush.bf16.msrb.mxu2 %v11700_v45  ;;  %v15480_v27 = vadd.f32 %v4348_v49, %v15445_v16  ;;  %v11535_v56 = vld [vmem:[#allocation8 + $0x1290] sm:$0xf] }
 0x337   :  { %5376 = vmatpush.bf16.msrb.mxu3 %v11704_v15  ;;  %5389 = vmatpush.bf16.msra.mxu0 %v11708_v53  ;;  %v14099_v45 = vld [vmem:[#allocation8 + $0x12ac] sm:$0xf0]  ;;  %v14095_v15 = vld [vmem:[#allocation8 + $0x1294] sm:$0xf] }
 0x338   :  { %5332 = vmatmul.bf16.vlgmr.msra.gmra.mxu3 %v15470_v31  ;;  %5345 = vmatmul.bf16.vlgmr.msrb.gmra.mxu0 %v15470_v31  ;;  %v4322_v16 = vpop.f32.mrf.mxu2  ;;  %v11537_v53 = vld [vmem:[#allocation8 + $0x12b0] sm:$0xf0]  ;;  %v11536_v47 = vor.u32 %v14099_v45, %v11535_v56  ;;  %v11903_v45 = vld [vmem:[#allocation8 + $0x1580] sm:$0xf] }
 0x339   :  { %v15483_v12 = vadd.f32 %v4322_v16, %v15448_v36  ;;  %v11548_v36 = vor.u32 %v14096_v13, %v11545_v35  ;;  %v11948_v16 = vor.u32 %v14198_v33, %v11945_v34  ;;  %v11913_v13 = vld [vmem:[#allocation8 + $0x15a8] sm:$0xf0] }
 0x33a   :  { %5351 = vmatpush.bf16.msrb.mxu1 %v11664_v37  ;;  %5364 = vmatpush.bf16.msrb.mxu2 %v11668_v28  ;;  %v4311_v28 = vpop.f32.mrf.mxu1  ;;  %v14166_v33 = vld [vmem:[#allocation8 + $0x14cc] sm:$0xf] }
 0x33b   :  { %5377 = vmatpush.bf16.msrb.mxu3 %v11672_v46  ;;  %5390 = vmatpush.bf16.msra.mxu0 %v11676_v38  ;;  %v4335_v10 = vpop.f32.mrf.mxu3  ;;  %v11540_v46 = vor.u32 %v14095_v15, %v11537_v53  ;;  %v11503_v38 = vld [vmem:[#allocation8 + $0x1250] sm:$0xf]  ;;  %v14189_v15 = vld [vmem:[#allocation8 + $0x1584] sm:$0xf]  ;;  %v11817_v34 = vld [vmem:[#allocation8 + $0x14e8] sm:$0xf0] }
 0x33c   :  { %v15486_v37 = vadd.f32 %v4335_v10, %v15451_v26  ;;  %v11471_v26 = vld [vmem:[#allocation8 + $0x1210] sm:$0xf]  ;;  %v11504_v23 = vor.u32 %v14091_v43, %v11503_v38  ;;  %v11905_v53 = vld [vmem:[#allocation8 + $0x15a0] sm:$0xf0]  ;;  %v14194_v10 = vld [vmem:[#allocation8 + $0x15a4] sm:$0xf0]  ;;  %v11916_v38 = vor.u32 %v14190_v48, %v11913_v13 }
 0x33d   :  { %v4350_v11 = vpop.f32.mrf.mxu0  ;;  %v11908_v28 = vor.u32 %v14189_v15, %v11905_v53  ;;  %v14181_v43 = vld [vmem:[#allocation8 + $0x1544] sm:$0xf]  ;;  %v11785_v48 = vld [vmem:[#allocation8 + $0x14a8] sm:$0xf0] }
 0x33e   :  { %5352 = vmatpush.bf16.msrb.mxu1 %v11632_v1  ;;  %5365 = vmatpush.bf16.msrb.mxu2 %v11636_v25  ;;  %v14088_v1 = vld [vmem:[#allocation8 + $0x125c] sm:$0xf]  ;;  %v11871_v11 = vld [vmem:[#allocation8 + $0x1540] sm:$0xf] }
 0x33f   :  { %5378 = vmatpush.bf16.msrb.mxu3 %v11640_v40  ;;  %5391 = vmatpush.bf16.msra.mxu0 %v11644_v6  ;;  %v11513_v25 = vld [vmem:[#allocation8 + $0x1278] sm:$0xf0]  ;;  %v14083_v40 = vld [vmem:[#allocation8 + $0x122c] sm:$0xf0]  ;;  %v14079_v6 = vld [vmem:[#allocation8 + $0x1214] sm:$0xf] }
 0x340   :  { %v11516_v61 = vor.u32 %v14088_v1, %v11513_v25  ;;  %v4324_v62 = vpop.f32.mrf.mxu2  ;;  %v11472_v9 = vor.u32 %v14083_v40, %v11471_v26  ;;  %v11476_v18 = vor.u32 %v14079_v6, %v11473_v59  ;;  %v11839_v25 = vld [vmem:[#allocation8 + $0x1500] sm:$0xf]  ;;  %v14173_v40 = vld [vmem:[#allocation8 + $0x1504] sm:$0xf]  ;;  %v11847_v59 = vld [vmem:[#allocation8 + $0x1508] sm:$0xf] }
 0x341   :  { %v14177_v26 = vld [vmem:[#allocation8 + $0x151c] sm:$0xf0]  ;;  %v11841_v6 = vld [vmem:[#allocation8 + $0x1520] sm:$0xf0]  ;;  %v11849_v62 = vld [vmem:[#allocation8 + $0x1528] sm:$0xf0] }
 0x342   :  { %5353 = vmatpush.bf16.msrb.mxu1 %v11600_v55  ;;  %5366 = vmatpush.bf16.msrb.mxu2 %v11604_v0  ;;  %v11481_v55 = vld [vmem:[#allocation8 + $0x1238] sm:$0xf0]  ;;  %v11935_v0 = vld [vmem:[#allocation8 + $0x15c0] sm:$0xf] }
 0x343   :  { %5379 = vmatpush.bf16.msrb.mxu3 %v11608_v2  ;;  %5392 = vmatpush.bf16.msra.mxu0 %v11612_v5  ;;  %v4337_v49 = vpop.f32.mrf.mxu3  ;;  %v11937_v2 = vld [vmem:[#allocation8 + $0x15e0] sm:$0xf0]  ;;  %v11943_v5 = vld [vmem:[#allocation8 + $0x15c8] sm:$0xf] }
 0x344   :  { %v11940_v56 = vor.u32 %v14197_v50, %v11937_v2  ;;  %v11844_v49 = vor.u32 %v14173_v40, %v11841_v6 }
 0x346   :  { %5354 = vmatpush.bf16.msrb.mxu1 %v11568_v32  ;;  %5367 = vmatpush.bf16.msrb.mxu2 %v11572_v60  ;;  %v11484_v32 = vor.u32 %v14080_v51, %v11481_v55  ;;  %v11936_v60 = vor.u32 %v14201_v63, %v11935_v0  ;;  %v11840_v51 = vor.u32 %v14177_v26, %v11839_v25  ;;  %v11807_v55 = vld [vmem:[#allocation8 + $0x14c0] sm:$0xf] }
 0x347   :  { %5380 = vmatpush.bf16.msrb.mxu3 %v11576_v17  ;;  %5393 = vmatpush.bf16.msra.mxu0 %v11580_v7  ;;  %v14193_v17 = vld [vmem:[#allocation8 + $0x159c] sm:$0xf0]  ;;  %v11944_v7 = vor.u32 %v14202_v20, %v11943_v5  ;;  %v14165_v5 = vld [vmem:[#allocation8 + $0x14c4] sm:$0xf]  ;;  %v14170_v20 = vld [vmem:[#allocation8 + $0x14e4] sm:$0xf0] }
 0x348   :  { %v11904_v35 = vor.u32 %v14193_v17, %v11903_v45  ;;  %v14169_v0 = vld [vmem:[#allocation8 + $0x14dc] sm:$0xf0]  ;;  %v11820_v45 = vor.u32 %v14166_v33, %v11817_v34  ;;  %v14157_v17 = vld [vmem:[#allocation8 + $0x1484] sm:$0xf] }
 0x349   :  { %v14145_v26 = vld [vmem:[#allocation8 + $0x141c] sm:$0xf0] }
 0x34a   :  { %5355 = vmatpush.bf16.msrb.mxu1 %v11536_v47  ;;  %5368 = vmatpush.bf16.msrb.mxu2 %v11540_v46  ;;  %v14185_v47 = vld [vmem:[#allocation8 + $0x155c] sm:$0xf0]  ;;  %v11912_v46 = vor.u32 %v14194_v10, %v11911_v19  ;;  %v14162_v19 = vld [vmem:[#allocation8 + $0x14a4] sm:$0xf0]  ;;  %v14158_v10 = vld [vmem:[#allocation8 + $0x148c] sm:$0xf] }
 0x34b   :  { %5381 = vmatpush.bf16.msrb.mxu3 %v11544_v42  ;;  %5394 = vmatpush.bf16.msra.mxu0 %v11548_v36  ;;  %v11873_v42 = vld [vmem:[#allocation8 + $0x1560] sm:$0xf0]  ;;  %v11879_v36 = vld [vmem:[#allocation8 + $0x1548] sm:$0xf]  ;;  %v11872_v22 = vor.u32 %v14185_v47, %v11871_v11 }
 0x34c   :  { %v11876_v1 = vor.u32 %v14181_v43, %v11873_v42  ;;  %v14149_v42 = vld [vmem:[#allocation8 + $0x1444] sm:$0xf] }
 0x34e   :  { %5356 = vmatpush.bf16.msrb.mxu1 %v11504_v23  ;;  %5369 = vmatpush.bf16.msrb.mxu2 %v11508_v44  ;;  %v11880_v23 = vor.u32 %v14186_v39, %v11879_v36  ;;  %v11884_v44 = vor.u32 %v14182_v3, %v11881_v58  ;;  %v11745_v36 = vld [vmem:[#allocation8 + $0x1460] sm:$0xf0]  ;;  %v11751_v39 = vld [vmem:[#allocation8 + $0x1448] sm:$0xf]  ;;  %v14150_v58 = vld [vmem:[#allocation8 + $0x144c] sm:$0xf] }
 0x34f   :  { %5382 = vmatpush.bf16.msrb.mxu3 %v11512_v29  ;;  %5395 = vmatpush.bf16.msra.mxu0 %v11516_v61  ;;  %v14178_v29 = vld [vmem:[#allocation8 + $0x1524] sm:$0xf0]  ;;  %v14174_v61 = vld [vmem:[#allocation8 + $0x150c] sm:$0xf]  ;;  %v11748_v25 = vor.u32 %v14149_v42, %v11745_v36  ;;  %v14188_v42 = vld [vmem:[#allocation8 + $0x1574] sm:$0xf0] }
 0x350   :  { %v11848_v50 = vor.u32 %v14178_v29, %v11847_v59  ;;  %v11852_v2 = vor.u32 %v14174_v61, %v11849_v62  ;;  %v14154_v3 = vld [vmem:[#allocation8 + $0x1464] sm:$0xf0]  ;;  %v14142_v62 = vld [vmem:[#allocation8 + $0x140c] sm:$0xf]  ;;  %v14184_v36 = vld [vmem:[#allocation8 + $0x155c] sm:$0xf] }
 0x351   :  { %v11752_v40 = vor.u32 %v14154_v3, %v11751_v39  ;;  %v11719_v29 = vld [vmem:[#allocation8 + $0x1408] sm:$0xf]  ;;  %v11897_v39 = vld [vmem:[#allocation8 + $0x1578] sm:$0xf0] }
 0x352   :  { %5357 = vmatpush.bf16.msrb.mxu1 %v11472_v9  ;;  %5370 = vmatpush.bf16.msrb.mxu2 %v11476_v18  ;;  %v4361_v24 = vpop.f32.mrf.mxu1  ;;  %v11809_v9 = vld [vmem:[#allocation8 + $0x14e0] sm:$0xf0]  ;;  %v11815_v18 = vld [vmem:[#allocation8 + $0x14c8] sm:$0xf] }
 0x353   :  { %5383 = vmatpush.bf16.msrb.mxu3 %v11480_v14  ;;  %5396 = vmatpush.bf16.msra.mxu0 %v11484_v32  ;;  %v11812_v14 = vor.u32 %v14165_v5, %v11809_v9  ;;  %v11775_v32 = vld [vmem:[#allocation8 + $0x1480] sm:$0xf]  ;;  %v14146_v61 = vld [vmem:[#allocation8 + $0x1424] sm:$0xf0]  ;;  %v14204_v9 = vld [vmem:[#allocation8 + $0x15f4] sm:$0xf0] }
 0x354   :  { %v11720_v33 = vor.u32 %v14146_v61, %v11719_v29 }
 0x355   :  { %5358 = vmatmul.bf16.vlgmr.msrb.gmra.mxu1 %v15470_v31  ;;  %5371 = vmatmul.bf16.vlgmr.msrb.gmra.mxu2 %v15470_v31  ;;  %v4400_v52 = vpop.f32.mrf.mxu0 }
 0x356   :  { %5797 = vmatpush.bf16.msra.mxu1 %v11936_v60  ;;  %5810 = vmatpush.bf16.msra.mxu2 %v11940_v56  ;;  %v15496_v63 = vadd.f32 %v4400_v52, %v15461_v4  ;;  %v14161_v60 = vld [vmem:[#allocation8 + $0x149c] sm:$0xf0]  ;;  %v11816_v56 = vor.u32 %v14170_v20, %v11815_v18  ;;  %v11721_v52 = vld [vmem:[#allocation8 + $0x1428] sm:$0xf0]  ;;  %v14200_v18 = vld [vmem:[#allocation8 + $0x15dc] sm:$0xf] }
 0x357   :  { %5823 = vmatpush.bf16.msra.mxu3 %v11944_v7  ;;  %5836 = vmatpush.bf16.msrb.mxu0 %v11948_v16  ;;  %v11777_v7 = vld [vmem:[#allocation8 + $0x14a0] sm:$0xf0]  ;;  %v11783_v16 = vld [vmem:[#allocation8 + $0x1488] sm:$0xf]  ;;  %v11776_v11 = vor.u32 %v14161_v60, %v11775_v32  ;;  %v11961_v20 = vld [vmem:[#allocation8 + $0x15f8] sm:$0xf0]  ;;  %v11724_v34 = vor.u32 %v14142_v62, %v11721_v52 }
 0x358   :  { %5384 = vmatmul.bf16.vlgmr.msrb.gmra.mxu3 %v15470_v31  ;;  %5397 = vmatmul.bf16.vlgmr.msra.gmra.mxu0 %v15470_v31  ;;  %v15493_v31 = vadd.f32 %v4361_v24, %v15458_v54  ;;  %v11808_v54 = vor.u32 %v14169_v0, %v11807_v55  ;;  %v4374_v4 = vpop.f32.mrf.mxu2  ;;  %v11780_v47 = vor.u32 %v14157_v17, %v11777_v7  ;;  %v14199_v55 = vld [vmem:[#allocation8 + $0x15d4] sm:$0xf]  ;;  %v11919_v32 = vld [vmem:[#allocation8 + $0x1590] sm:$0xf]  ;;  %v11927_v7 = vld [vmem:[#allocation8 + $0x1598] sm:$0xf] }
 0x359   :  { %v15499_v15 = vadd.f32 %v4374_v4, %v15464_v21  ;;  %v11784_v43 = vor.u32 %v14162_v19, %v11783_v16  ;;  %v11788_v21 = vor.u32 %v14158_v10, %v11785_v48  ;;  %v11953_v0 = vld [vmem:[#allocation8 + $0x15f0] sm:$0xf0]  ;;  %v14195_v60 = vld [vmem:[#allocation8 + $0x15ac] sm:$0xf0]  ;;  %v14196_v16 = vld [vmem:[#allocation8 + $0x15b4] sm:$0xf0] }
 0x35a   :  { %5798 = vmatpush.bf16.msra.mxu1 %v11904_v35  ;;  %5811 = vmatpush.bf16.msra.mxu2 %v11908_v28  ;;  %v4363_v35 = vpop.f32.mrf.mxu1  ;;  %v14191_v4 = vld [vmem:[#allocation8 + $0x1594] sm:$0xf]  ;;  %v11929_v19 = vld [vmem:[#allocation8 + $0x15b8] sm:$0xf0]  ;;  %v15505_v10 = vrot.slane %v15435_v41, 2  ;;  %v11920_v48 = vor.u32 %v14195_v60, %v11919_v32 }
 0x35b   :  { %5824 = vmatpush.bf16.msra.mxu3 %v11912_v46  ;;  %5837 = vmatpush.bf16.msrb.mxu0 %v11916_v38  ;;  %v4387_v53 = vpop.f32.mrf.mxu3  ;;  %v11743_v46 = vld [vmem:[#allocation8 + $0x1440] sm:$0xf]  ;;  %v11921_v17 = vld [vmem:[#allocation8 + $0x15b0] sm:$0xf0] }
 0x35c   :  { %v15502_v13 = vadd.f32 %v4387_v53, %v15467_v30  ;;  %v14153_v38 = vld [vmem:[#allocation8 + $0x145c] sm:$0xf0]  ;;  %v14192_v53 = vld [vmem:[#allocation8 + $0x159c] sm:$0xf]  ;;  %v11924_v35 = vor.u32 %v14191_v4, %v11921_v17  ;;  %v11799_v4 = vld [vmem:[#allocation8 + $0x1498] sm:$0xf] }
 0x35d   :  { %v4402_v28 = vpop.f32.mrf.mxu0  ;;  %v11711_v30 = vld [vmem:[#allocation8 + $0x1400] sm:$0xf] }
 0x35e   :  { %5799 = vmatpush.bf16.msra.mxu1 %v11872_v22  ;;  %5812 = vmatpush.bf16.msra.mxu2 %v11876_v1  ;;  %v11753_v22 = vld [vmem:[#allocation8 + $0x1468] sm:$0xf0]  ;;  %v11744_v1 = vor.u32 %v14153_v38, %v11743_v46  ;;  %v11887_v28 = vld [vmem:[#allocation8 + $0x1550] sm:$0xf]  ;;  %v11932_v46 = vor.u32 %v14192_v53, %v11929_v19  ;;  %v14183_v38 = vld [vmem:[#allocation8 + $0x1554] sm:$0xf] }
 0x35f   :  { %5825 = vmatpush.bf16.msra.mxu3 %v11880_v23  ;;  %5838 = vmatpush.bf16.msrb.mxu0 %v11884_v44  ;;  %v14141_v23 = vld [vmem:[#allocation8 + $0x1404] sm:$0xf]  ;;  %v11756_v6 = vor.u32 %v14150_v58, %v11753_v22  ;;  %v11855_v22 = vld [vmem:[#allocation8 + $0x1510] sm:$0xf]  ;;  %v14160_v53 = vld [vmem:[#allocation8 + $0x149c] sm:$0xf] }
 0x360   :  { %v11713_v44 = vld [vmem:[#allocation8 + $0x1420] sm:$0xf0]  ;;  %v4376_v59 = vpop.f32.mrf.mxu2  ;;  %v11801_v19 = vld [vmem:[#allocation8 + $0x14b8] sm:$0xf0] }
 0x361   :  { %v11716_v5 = vor.u32 %v14141_v23, %v11713_v44  ;;  %v11857_v23 = vld [vmem:[#allocation8 + $0x1530] sm:$0xf0]  ;;  %v11863_v44 = vld [vmem:[#allocation8 + $0x1518] sm:$0xf]  ;;  %v11865_v59 = vld [vmem:[#allocation8 + $0x1538] sm:$0xf0] }
 0x362   :  { %5800 = vmatpush.bf16.msra.mxu1 %v11840_v51  ;;  %5813 = vmatpush.bf16.msra.mxu2 %v11844_v49  ;;  %v11951_v51 = vld [vmem:[#allocation8 + $0x15d0] sm:$0xf] }
 0x363   :  { %5826 = vmatpush.bf16.msra.mxu3 %v11848_v50  ;;  %5839 = vmatpush.bf16.msrb.mxu0 %v11852_v2  ;;  %v4389_v24 = vpop.f32.mrf.mxu3  ;;  %v14203_v49 = vld [vmem:[#allocation8 + $0x15ec] sm:$0xf0]  ;;  %v11959_v50 = vld [vmem:[#allocation8 + $0x15d8] sm:$0xf]  ;;  %v11712_v2 = vor.u32 %v14145_v26, %v11711_v30  ;;  %v14175_v26 = vld [vmem:[#allocation8 + $0x1514] sm:$0xf] }
 0x364   :  { %v14179_v30 = vld [vmem:[#allocation8 + $0x152c] sm:$0xf0]  ;;  %v11860_v52 = vor.u32 %v14175_v26, %v11857_v23  ;;  %v11729_v26 = vld [vmem:[#allocation8 + $0x1430] sm:$0xf0] }
 0x365   :  { %v11856_v24 = vor.u32 %v14179_v30, %v11855_v22 }
 0x366   :  { %5801 = vmatpush.bf16.msra.mxu1 %v11808_v54  ;;  %5814 = vmatpush.bf16.msra.mxu2 %v11812_v14  ;;  %v11952_v54 = vor.u32 %v14203_v49, %v11951_v51  ;;  %v11956_v14 = vor.u32 %v14199_v55, %v11953_v0  ;;  %v11823_v51 = vld [vmem:[#allocation8 + $0x14d0] sm:$0xf] }
 0x367   :  { %5827 = vmatpush.bf16.msra.mxu3 %v11816_v56  ;;  %5840 = vmatpush.bf16.msrb.mxu0 %v11820_v45  ;;  %v11960_v56 = vor.u32 %v14204_v9, %v11959_v50  ;;  %v11964_v45 = vor.u32 %v14200_v18, %v11961_v20  ;;  %v14171_v49 = vld [vmem:[#allocation8 + $0x14ec] sm:$0xf0]  ;;  %v11831_v9 = vld [vmem:[#allocation8 + $0x14d8] sm:$0xf]  ;;  %v14168_v20 = vld [vmem:[#allocation8 + $0x14dc] sm:$0xf] }
 0x368   :  { %v14172_v18 = vld [vmem:[#allocation8 + $0x14f4] sm:$0xf0] }
 0x369   :  { %v11832_v32 = vor.u32 %v14172_v18, %v11831_v9  ;;  %v14266_v9 = vld [vmem:[#allocation8 + $0x17e4] sm:$0xf0]  ;;  %v14262_v18 = vld [vmem:[#allocation8 + $0x17cc] sm:$0xf] }
 0x36a   :  { %5802 = vmatpush.bf16.msra.mxu1 %v11776_v11  ;;  %5815 = vmatpush.bf16.msra.mxu2 %v11780_v47  ;;  %v14187_v11 = vld [vmem:[#allocation8 + $0x156c] sm:$0xf0]  ;;  %v11928_v47 = vor.u32 %v14196_v16, %v11927_v7  ;;  %v14164_v16 = vld [vmem:[#allocation8 + $0x14b4] sm:$0xf0] }
 0x36b   :  { %5828 = vmatpush.bf16.msra.mxu3 %v11784_v43  ;;  %5841 = vmatpush.bf16.msrb.mxu0 %v11788_v21  ;;  %v11889_v43 = vld [vmem:[#allocation8 + $0x1570] sm:$0xf0]  ;;  %v11895_v21 = vld [vmem:[#allocation8 + $0x1558] sm:$0xf]  ;;  %v11888_v3 = vor.u32 %v14187_v11, %v11887_v28 }
 0x36c   :  { %v11892_v58 = vor.u32 %v14183_v38, %v11889_v43  ;;  %v14155_v38 = vld [vmem:[#allocation8 + $0x146c] sm:$0xf0]  ;;  %v11800_v43 = vor.u32 %v14164_v16, %v11799_v4  ;;  %v12167_v4 = vld [vmem:[#allocation8 + $0x1788] sm:$0xf]  ;;  %v14254_v16 = vld [vmem:[#allocation8 + $0x178c] sm:$0xf] }
 0x36e   :  { %5803 = vmatpush.bf16.msra.mxu1 %v11744_v1  ;;  %5816 = vmatpush.bf16.msra.mxu2 %v11748_v25  ;;  %v11896_v1 = vor.u32 %v14188_v42, %v11895_v21  ;;  %v11900_v25 = vor.u32 %v14184_v36, %v11897_v39  ;;  %v14151_v21 = vld [vmem:[#allocation8 + $0x1454] sm:$0xf]  ;;  %v11767_v36 = vld [vmem:[#allocation8 + $0x1458] sm:$0xf] }
 0x36f   :  { %5829 = vmatpush.bf16.msra.mxu3 %v11752_v40  ;;  %5842 = vmatpush.bf16.msrb.mxu0 %v11756_v6  ;;  %v14180_v40 = vld [vmem:[#allocation8 + $0x1534] sm:$0xf0]  ;;  %v14176_v6 = vld [vmem:[#allocation8 + $0x151c] sm:$0xf]  ;;  %v11761_v42 = vld [vmem:[#allocation8 + $0x1470] sm:$0xf0] }
 0x370   :  { %v11864_v0 = vor.u32 %v14180_v40, %v11863_v44  ;;  %v11868_v50 = vor.u32 %v14176_v6, %v11865_v59  ;;  %v14156_v39 = vld [vmem:[#allocation8 + $0x1474] sm:$0xf0]  ;;  %v11764_v30 = vor.u32 %v14151_v21, %v11761_v42  ;;  %v14250_v21 = vld [vmem:[#allocation8 + $0x1764] sm:$0xf0]  ;;  %v14246_v42 = vld [vmem:[#allocation8 + $0x174c] sm:$0xf] }
 0x371   :  { %v11768_v23 = vor.u32 %v14156_v39, %v11767_v36  ;;  %v11735_v6 = vld [vmem:[#allocation8 + $0x1418] sm:$0xf]  ;;  %v12137_v36 = vld [vmem:[#allocation8 + $0x1768] sm:$0xf0] }
 0x372   :  { %5804 = vmatpush.bf16.msra.mxu1 %v11712_v2  ;;  %5817 = vmatpush.bf16.msra.mxu2 %v11716_v5  ;;  %v4807_v29 = vpop.f32.mrf.mxu1  ;;  %v14167_v2 = vld [vmem:[#allocation8 + $0x14d4] sm:$0xf]  ;;  %v14148_v59 = vld [vmem:[#allocation8 + $0x1434] sm:$0xf0] }
 0x373   :  { %5830 = vmatpush.bf16.msra.mxu3 %v11720_v33  ;;  %5843 = vmatpush.bf16.msrb.mxu0 %v11724_v34  ;;  %v15512_v61 = vadd.f32 %v4807_v29, %v15477_v57  ;;  %v11825_v5 = vld [vmem:[#allocation8 + $0x14f0] sm:$0xf0]  ;;  %v11833_v33 = vld [vmem:[#allocation8 + $0x14f8] sm:$0xf0]  ;;  %v11824_v57 = vor.u32 %v14171_v49, %v11823_v51  ;;  %v14265_v51 = vld [vmem:[#allocation8 + $0x17dc] sm:$0xf0] }
 0x374   :  { %v11828_v34 = vor.u32 %v14167_v2, %v11825_v5  ;;  %v11836_v60 = vor.u32 %v14168_v20, %v11833_v33  ;;  %v14144_v29 = vld [vmem:[#allocation8 + $0x141c] sm:$0xf]  ;;  %v14261_v49 = vld [vmem:[#allocation8 + $0x17c4] sm:$0xf]  ;;  %v12201_v20 = vld [vmem:[#allocation8 + $0x17e8] sm:$0xf0]  ;;  %v11736_v33 = vor.u32 %v14148_v59, %v11735_v6 }
 0x375   :  { %5805 = vmatmul.bf16.vlgmr.msra.gmra.mxu1 %v15505_v10  ;;  %5818 = vmatmul.bf16.vlgmr.msra.gmra.mxu2 %v15505_v10  ;;  %v4846_v62 = vpop.f32.mrf.mxu0 }
 0x376   :  { %5849 = vmatpush.bf16.msrb.mxu1 %v11952_v54  ;;  %5862 = vmatpush.bf16.msrb.mxu2 %v11956_v14  ;;  %v15515_v55 = vadd.f32 %v4846_v62, %v15480_v27  ;;  %v11791_v54 = vld [vmem:[#allocation8 + $0x1490] sm:$0xf] }
 0x377   :  { %5875 = vmatpush.bf16.msrb.mxu3 %v11960_v56  ;;  %5888 = vmatpush.bf16.msra.mxu0 %v11964_v45  ;;  %v14163_v14 = vld [vmem:[#allocation8 + $0x14ac] sm:$0xf0]  ;;  %v14159_v56 = vld [vmem:[#allocation8 + $0x1494] sm:$0xf] }
 0x378   :  { %5831 = vmatmul.bf16.vlgmr.msra.gmra.mxu3 %v15505_v10  ;;  %5844 = vmatmul.bf16.vlgmr.msrb.gmra.mxu0 %v15505_v10  ;;  %v4820_v27 = vpop.f32.mrf.mxu2  ;;  %v11793_v45 = vld [vmem:[#allocation8 + $0x14b0] sm:$0xf0]  ;;  %v11792_v11 = vor.u32 %v14163_v14, %v11791_v54  ;;  %v12159_v14 = vld [vmem:[#allocation8 + $0x1780] sm:$0xf] }
 0x379   :  { %v15518_v17 = vadd.f32 %v4820_v27, %v15483_v12  ;;  %v11804_v12 = vor.u32 %v14160_v53, %v11801_v19  ;;  %v12204_v27 = vor.u32 %v14262_v18, %v12201_v20  ;;  %v12169_v53 = vld [vmem:[#allocation8 + $0x17a8] sm:$0xf0] }
 0x37a   :  { %5850 = vmatpush.bf16.msrb.mxu1 %v11920_v48  ;;  %5863 = vmatpush.bf16.msrb.mxu2 %v11924_v35  ;;  %v4809_v35 = vpop.f32.mrf.mxu1  ;;  %v14230_v18 = vld [vmem:[#allocation8 + $0x16cc] sm:$0xf] }
 0x37b   :  { %5876 = vmatpush.bf16.msrb.mxu3 %v11928_v47  ;;  %5889 = vmatpush.bf16.msra.mxu0 %v11932_v46  ;;  %v4833_v7 = vpop.f32.mrf.mxu3  ;;  %v11796_v47 = vor.u32 %v14159_v56, %v11793_v45  ;;  %v11759_v46 = vld [vmem:[#allocation8 + $0x1450] sm:$0xf]  ;;  %v14253_v56 = vld [vmem:[#allocation8 + $0x1784] sm:$0xf]  ;;  %v12073_v20 = vld [vmem:[#allocation8 + $0x16e8] sm:$0xf0] }
 0x37c   :  { %v15521_v48 = vadd.f32 %v4833_v7, %v15486_v37  ;;  %v11727_v37 = vld [vmem:[#allocation8 + $0x1410] sm:$0xf]  ;;  %v11760_v22 = vor.u32 %v14155_v38, %v11759_v46  ;;  %v12161_v45 = vld [vmem:[#allocation8 + $0x17a0] sm:$0xf0]  ;;  %v14258_v7 = vld [vmem:[#allocation8 + $0x17a4] sm:$0xf0]  ;;  %v12172_v46 = vor.u32 %v14254_v16, %v12169_v53 }
 0x37d   :  { %v4848_v28 = vpop.f32.mrf.mxu0  ;;  %v12164_v35 = vor.u32 %v14253_v56, %v12161_v45  ;;  %v14245_v38 = vld [vmem:[#allocation8 + $0x1744] sm:$0xf]  ;;  %v12041_v16 = vld [vmem:[#allocation8 + $0x16a8] sm:$0xf0] }
 0x37e   :  { %5851 = vmatpush.bf16.msrb.mxu1 %v11888_v3  ;;  %5864 = vmatpush.bf16.msrb.mxu2 %v11892_v58  ;;  %v14152_v3 = vld [vmem:[#allocation8 + $0x145c] sm:$0xf]  ;;  %v12127_v28 = vld [vmem:[#allocation8 + $0x1740] sm:$0xf] }
 0x37f   :  { %5877 = vmatpush.bf16.msrb.mxu3 %v11896_v1  ;;  %5890 = vmatpush.bf16.msra.mxu0 %v11900_v25  ;;  %v11769_v58 = vld [vmem:[#allocation8 + $0x1478] sm:$0xf0]  ;;  %v14147_v1 = vld [vmem:[#allocation8 + $0x142c] sm:$0xf0]  ;;  %v14143_v25 = vld [vmem:[#allocation8 + $0x1414] sm:$0xf] }
 0x380   :  { %v11772_v44 = vor.u32 %v14152_v3, %v11769_v58  ;;  %v4822_v40 = vpop.f32.mrf.mxu2  ;;  %v11728_v2 = vor.u32 %v14147_v1, %v11727_v37  ;;  %v11732_v5 = vor.u32 %v14143_v25, %v11729_v26  ;;  %v12095_v58 = vld [vmem:[#allocation8 + $0x1700] sm:$0xf]  ;;  %v14237_v1 = vld [vmem:[#allocation8 + $0x1704] sm:$0xf]  ;;  %v12103_v26 = vld [vmem:[#allocation8 + $0x1708] sm:$0xf] }
 0x381   :  { %v14241_v37 = vld [vmem:[#allocation8 + $0x171c] sm:$0xf0]  ;;  %v12097_v25 = vld [vmem:[#allocation8 + $0x1720] sm:$0xf0]  ;;  %v12105_v40 = vld [vmem:[#allocation8 + $0x1728] sm:$0xf0] }
 0x382   :  { %5852 = vmatpush.bf16.msrb.mxu1 %v11856_v24  ;;  %5865 = vmatpush.bf16.msrb.mxu2 %v11860_v52  ;;  %v11737_v24 = vld [vmem:[#allocation8 + $0x1438] sm:$0xf0]  ;;  %v12191_v52 = vld [vmem:[#allocation8 + $0x17c0] sm:$0xf] }
 0x383   :  { %5878 = vmatpush.bf16.msrb.mxu3 %v11864_v0  ;;  %5891 = vmatpush.bf16.msra.mxu0 %v11868_v50  ;;  %v4835_v62 = vpop.f32.mrf.mxu3  ;;  %v12193_v0 = vld [vmem:[#allocation8 + $0x17e0] sm:$0xf0]  ;;  %v12199_v50 = vld [vmem:[#allocation8 + $0x17c8] sm:$0xf] }
 0x384   :  { %v12196_v54 = vor.u32 %v14261_v49, %v12193_v0  ;;  %v12100_v62 = vor.u32 %v14237_v1, %v12097_v25 }
 0x386   :  { %5853 = vmatpush.bf16.msrb.mxu1 %v11824_v57  ;;  %5866 = vmatpush.bf16.msrb.mxu2 %v11828_v34  ;;  %v11740_v57 = vor.u32 %v14144_v29, %v11737_v24  ;;  %v12192_v34 = vor.u32 %v14265_v51, %v12191_v52  ;;  %v12096_v29 = vor.u32 %v14241_v37, %v12095_v58  ;;  %v12063_v24 = vld [vmem:[#allocation8 + $0x16c0] sm:$0xf] }
 0x387   :  { %5879 = vmatpush.bf16.msrb.mxu3 %v11832_v32  ;;  %5892 = vmatpush.bf16.msra.mxu0 %v11836_v60  ;;  %v14257_v32 = vld [vmem:[#allocation8 + $0x179c] sm:$0xf0]  ;;  %v12200_v60 = vor.u32 %v14266_v9, %v12199_v50  ;;  %v14229_v50 = vld [vmem:[#allocation8 + $0x16c4] sm:$0xf]  ;;  %v14234_v9 = vld [vmem:[#allocation8 + $0x16e4] sm:$0xf0] }
 0x388   :  { %v12160_v19 = vor.u32 %v14257_v32, %v12159_v14  ;;  %v14233_v52 = vld [vmem:[#allocation8 + $0x16dc] sm:$0xf0]  ;;  %v12076_v14 = vor.u32 %v14230_v18, %v12073_v20  ;;  %v14221_v32 = vld [vmem:[#allocation8 + $0x1684] sm:$0xf] }
 0x389   :  { %v14209_v37 = vld [vmem:[#allocation8 + $0x161c] sm:$0xf0] }
 0x38a   :  { %5854 = vmatpush.bf16.msrb.mxu1 %v11792_v11  ;;  %5867 = vmatpush.bf16.msrb.mxu2 %v11796_v47  ;;  %v14249_v11 = vld [vmem:[#allocation8 + $0x175c] sm:$0xf0]  ;;  %v12168_v47 = vor.u32 %v14258_v7, %v12167_v4  ;;  %v14226_v4 = vld [vmem:[#allocation8 + $0x16a4] sm:$0xf0]  ;;  %v14222_v7 = vld [vmem:[#allocation8 + $0x168c] sm:$0xf] }
 0x38b   :  { %5880 = vmatpush.bf16.msrb.mxu3 %v11800_v43  ;;  %5893 = vmatpush.bf16.msra.mxu0 %v11804_v12  ;;  %v12129_v43 = vld [vmem:[#allocation8 + $0x1760] sm:$0xf0]  ;;  %v12135_v12 = vld [vmem:[#allocation8 + $0x1748] sm:$0xf]  ;;  %v12128_v39 = vor.u32 %v14249_v11, %v12127_v28 }
 0x38c   :  { %v12132_v3 = vor.u32 %v14245_v38, %v12129_v43  ;;  %v14213_v43 = vld [vmem:[#allocation8 + $0x1644] sm:$0xf] }
 0x38e   :  { %5855 = vmatpush.bf16.msrb.mxu1 %v11760_v22  ;;  %5868 = vmatpush.bf16.msrb.mxu2 %v11764_v30  ;;  %v12136_v22 = vor.u32 %v14250_v21, %v12135_v12  ;;  %v12140_v30 = vor.u32 %v14246_v42, %v12137_v36  ;;  %v12001_v12 = vld [vmem:[#allocation8 + $0x1660] sm:$0xf0]  ;;  %v12007_v21 = vld [vmem:[#allocation8 + $0x1648] sm:$0xf]  ;;  %v14214_v36 = vld [vmem:[#allocation8 + $0x164c] sm:$0xf] }
 0x38f   :  { %5881 = vmatpush.bf16.msrb.mxu3 %v11768_v23  ;;  %5894 = vmatpush.bf16.msra.mxu0 %v11772_v44  ;;  %v14242_v23 = vld [vmem:[#allocation8 + $0x1724] sm:$0xf0]  ;;  %v14238_v44 = vld [vmem:[#allocation8 + $0x170c] sm:$0xf]  ;;  %v12004_v58 = vor.u32 %v14213_v43, %v12001_v12  ;;  %v14252_v43 = vld [vmem:[#allocation8 + $0x1774] sm:$0xf0] }
 0x390   :  { %v12104_v49 = vor.u32 %v14242_v23, %v12103_v26  ;;  %v12108_v0 = vor.u32 %v14238_v44, %v12105_v40  ;;  %v14218_v42 = vld [vmem:[#allocation8 + $0x1664] sm:$0xf0]  ;;  %v14206_v40 = vld [vmem:[#allocation8 + $0x160c] sm:$0xf]  ;;  %v14248_v12 = vld [vmem:[#allocation8 + $0x175c] sm:$0xf] }
 0x391   :  { %v12008_v1 = vor.u32 %v14218_v42, %v12007_v21  ;;  %v11975_v23 = vld [vmem:[#allocation8 + $0x1608] sm:$0xf]  ;;  %v12153_v21 = vld [vmem:[#allocation8 + $0x1778] sm:$0xf0] }
 0x392   :  { %5856 = vmatpush.bf16.msrb.mxu1 %v11728_v2  ;;  %5869 = vmatpush.bf16.msrb.mxu2 %v11732_v5  ;;  %v4859_v6 = vpop.f32.mrf.mxu1  ;;  %v12065_v2 = vld [vmem:[#allocation8 + $0x16e0] sm:$0xf0]  ;;  %v12071_v5 = vld [vmem:[#allocation8 + $0x16c8] sm:$0xf] }
 0x393   :  { %5882 = vmatpush.bf16.msrb.mxu3 %v11736_v33  ;;  %5895 = vmatpush.bf16.msra.mxu0 %v11740_v57  ;;  %v12068_v33 = vor.u32 %v14229_v50, %v12065_v2  ;;  %v12031_v57 = vld [vmem:[#allocation8 + $0x1680] sm:$0xf]  ;;  %v14210_v44 = vld [vmem:[#allocation8 + $0x1624] sm:$0xf0]  ;;  %v14268_v2 = vld [vmem:[#allocation8 + $0x17f4] sm:$0xf0] }
 0x394   :  { %v11976_v18 = vor.u32 %v14210_v44, %v11975_v23 }
 0x395   :  { %5857 = vmatmul.bf16.vlgmr.msrb.gmra.mxu1 %v15505_v10  ;;  %5870 = vmatmul.bf16.vlgmr.msrb.gmra.mxu2 %v15505_v10  ;;  %v4898_v59 = vpop.f32.mrf.mxu0 }
 0x396   :  { %6296 = vmatpush.bf16.msra.mxu1 %v12192_v34  ;;  %6309 = vmatpush.bf16.msra.mxu2 %v12196_v54  ;;  %v15531_v51 = vadd.f32 %v4898_v59, %v15496_v63  ;;  %v14225_v34 = vld [vmem:[#allocation8 + $0x169c] sm:$0xf0]  ;;  %v12072_v54 = vor.u32 %v14234_v9, %v12071_v5  ;;  %v11977_v59 = vld [vmem:[#allocation8 + $0x1628] sm:$0xf0]  ;;  %v14264_v5 = vld [vmem:[#allocation8 + $0x17dc] sm:$0xf] }
 0x397   :  { %6322 = vmatpush.bf16.msra.mxu3 %v12200_v60  ;;  %6335 = vmatpush.bf16.msrb.mxu0 %v12204_v27  ;;  %v12033_v60 = vld [vmem:[#allocation8 + $0x16a0] sm:$0xf0]  ;;  %v12039_v27 = vld [vmem:[#allocation8 + $0x1688] sm:$0xf]  ;;  %v12032_v28 = vor.u32 %v14225_v34, %v12031_v57  ;;  %v12217_v9 = vld [vmem:[#allocation8 + $0x17f8] sm:$0xf0]  ;;  %v11980_v20 = vor.u32 %v14206_v40, %v11977_v59 }
 0x398   :  { %5883 = vmatmul.bf16.vlgmr.msrb.gmra.mxu3 %v15505_v10  ;;  %5896 = vmatmul.bf16.vlgmr.msra.gmra.mxu0 %v15505_v10  ;;  %v15528_v10 = vadd.f32 %v4859_v6, %v15493_v31  ;;  %v12064_v31 = vor.u32 %v14233_v52, %v12063_v24  ;;  %v4872_v63 = vpop.f32.mrf.mxu2  ;;  %v12036_v11 = vor.u32 %v14221_v32, %v12033_v60  ;;  %v14263_v24 = vld [vmem:[#allocation8 + $0x17d4] sm:$0xf]  ;;  %v12175_v57 = vld [vmem:[#allocation8 + $0x1790] sm:$0xf]  ;;  %v12183_v60 = vld [vmem:[#allocation8 + $0x1798] sm:$0xf] }
 0x399   :  { %v15534_v56 = vadd.f32 %v4872_v63, %v15499_v15  ;;  %v12040_v38 = vor.u32 %v14226_v4, %v12039_v27  ;;  %v12044_v15 = vor.u32 %v14222_v7, %v12041_v16  ;;  %v12209_v52 = vld [vmem:[#allocation8 + $0x17f0] sm:$0xf0]  ;;  %v14259_v34 = vld [vmem:[#allocation8 + $0x17ac] sm:$0xf0]  ;;  %v14260_v27 = vld [vmem:[#allocation8 + $0x17b4] sm:$0xf0] }
 0x39a   :  { %6297 = vmatpush.bf16.msra.mxu1 %v12160_v19  ;;  %6310 = vmatpush.bf16.msra.mxu2 %v12164_v35  ;;  %v4861_v19 = vpop.f32.mrf.mxu1  ;;  %v14255_v63 = vld [vmem:[#allocation8 + $0x1794] sm:$0xf]  ;;  %v12185_v4 = vld [vmem:[#allocation8 + $0x17b8] sm:$0xf0]  ;;  %v15540_v7 = vrot.slane %v15435_v41, 3  ;;  %v12176_v16 = vor.u32 %v14259_v34, %v12175_v57 }
 0x39b   :  { %6323 = vmatpush.bf16.msra.mxu3 %v12168_v47  ;;  %6336 = vmatpush.bf16.msrb.mxu0 %v12172_v46  ;;  %v4885_v45 = vpop.f32.mrf.mxu3  ;;  %v11999_v47 = vld [vmem:[#allocation8 + $0x1640] sm:$0xf]  ;;  %v12177_v32 = vld [vmem:[#allocation8 + $0x17b0] sm:$0xf0]  ;;  %v12079_v59 = vld [vmem:[#allocation8 + $0x16d0] sm:$0xf] }
 0x39c   :  { %v15537_v53 = vadd.f32 %v4885_v45, %v15502_v13  ;;  %v14217_v46 = vld [vmem:[#allocation8 + $0x165c] sm:$0xf0]  ;;  %v14256_v45 = vld [vmem:[#allocation8 + $0x179c] sm:$0xf]  ;;  %v12180_v19 = vor.u32 %v14255_v63, %v12177_v32  ;;  %v14223_v34 = vld [vmem:[#allocation8 + $0x1694] sm:$0xf] }
 0x39d   :  { %v4900_v35 = vpop.f32.mrf.mxu0  ;;  %v11967_v13 = vld [vmem:[#allocation8 + $0x1600] sm:$0xf] }
 0x39e   :  { %6298 = vmatpush.bf16.msra.mxu1 %v12128_v39  ;;  %6311 = vmatpush.bf16.msra.mxu2 %v12132_v3  ;;  %v12009_v39 = vld [vmem:[#allocation8 + $0x1668] sm:$0xf0]  ;;  %v12000_v3 = vor.u32 %v14217_v46, %v11999_v47  ;;  %v12143_v35 = vld [vmem:[#allocation8 + $0x1750] sm:$0xf]  ;;  %v12188_v47 = vor.u32 %v14256_v45, %v12185_v4  ;;  %v14247_v46 = vld [vmem:[#allocation8 + $0x1754] sm:$0xf] }
 0x39f   :  { %6324 = vmatpush.bf16.msra.mxu3 %v12136_v22  ;;  %6337 = vmatpush.bf16.msrb.mxu0 %v12140_v30  ;;  %v14205_v22 = vld [vmem:[#allocation8 + $0x1604] sm:$0xf]  ;;  %v12012_v25 = vor.u32 %v14214_v36, %v12009_v39  ;;  %v12111_v36 = vld [vmem:[#allocation8 + $0x1710] sm:$0xf]  ;;  %v12057_v45 = vld [vmem:[#allocation8 + $0x16b8] sm:$0xf0] }
 0x3a0   :  { %v11969_v30 = vld [vmem:[#allocation8 + $0x1620] sm:$0xf0]  ;;  %v4874_v26 = vpop.f32.mrf.mxu2  ;;  %v14243_v39 = vld [vmem:[#allocation8 + $0x172c] sm:$0xf0] }
 0x3a1   :  { %v11972_v50 = vor.u32 %v14205_v22, %v11969_v30  ;;  %v12119_v22 = vld [vmem:[#allocation8 + $0x1718] sm:$0xf]  ;;  %v12112_v40 = vor.u32 %v14243_v39, %v12111_v36  ;;  %v14211_v39 = vld [vmem:[#allocation8 + $0x162c] sm:$0xf0] }
 0x3a2   :  { %6299 = vmatpush.bf16.msra.mxu1 %v12096_v29  ;;  %6312 = vmatpush.bf16.msra.mxu2 %v12100_v62  ;;  %v12207_v29 = vld [vmem:[#allocation8 + $0x17d0] sm:$0xf]  ;;  %v14244_v30 = vld [vmem:[#allocation8 + $0x1734] sm:$0xf0] }
 0x3a3   :  { %6325 = vmatpush.bf16.msra.mxu3 %v12104_v49  ;;  %6338 = vmatpush.bf16.msrb.mxu0 %v12108_v0  ;;  %v4887_v6 = vpop.f32.mrf.mxu3  ;;  %v14267_v62 = vld [vmem:[#allocation8 + $0x17ec] sm:$0xf0]  ;;  %v12215_v49 = vld [vmem:[#allocation8 + $0x17d8] sm:$0xf]  ;;  %v11968_v0 = vor.u32 %v14209_v37, %v11967_v13  ;;  %v12113_v37 = vld [vmem:[#allocation8 + $0x1730] sm:$0xf0] }
 0x3a6   :  { %6300 = vmatpush.bf16.msra.mxu1 %v12064_v31  ;;  %6313 = vmatpush.bf16.msra.mxu2 %v12068_v33  ;;  %v12208_v31 = vor.u32 %v14267_v62, %v12207_v29  ;;  %v12212_v33 = vor.u32 %v14263_v24, %v12209_v52  ;;  %v14235_v29 = vld [vmem:[#allocation8 + $0x16ec] sm:$0xf0]  ;;  %v12120_v24 = vor.u32 %v14244_v30, %v12119_v22  ;;  %v11991_v30 = vld [vmem:[#allocation8 + $0x1618] sm:$0xf] }
 0x3a7   :  { %6326 = vmatpush.bf16.msra.mxu3 %v12072_v54  ;;  %6339 = vmatpush.bf16.msrb.mxu0 %v12076_v14  ;;  %v12216_v54 = vor.u32 %v14268_v2, %v12215_v49  ;;  %v12220_v14 = vor.u32 %v14264_v5, %v12217_v9  ;;  %v14231_v49 = vld [vmem:[#allocation8 + $0x16d4] sm:$0xf]  ;;  %v14236_v2 = vld [vmem:[#allocation8 + $0x16f4] sm:$0xf0]  ;;  %v14232_v5 = vld [vmem:[#allocation8 + $0x16dc] sm:$0xf] }
 0x3a8   :  { %v12089_v9 = vld [vmem:[#allocation8 + $0x16f8] sm:$0xf0] }
 0x3a9   :  { %v12092_v57 = vor.u32 %v14232_v5, %v12089_v9 }
 0x3aa   :  { %6301 = vmatpush.bf16.msra.mxu1 %v12032_v28  ;;  %6314 = vmatpush.bf16.msra.mxu2 %v12036_v11  ;;  %v14251_v28 = vld [vmem:[#allocation8 + $0x176c] sm:$0xf0]  ;;  %v12184_v11 = vor.u32 %v14260_v27, %v12183_v60  ;;  %v14228_v60 = vld [vmem:[#allocation8 + $0x16b4] sm:$0xf0]  ;;  %v14224_v27 = vld [vmem:[#allocation8 + $0x169c] sm:$0xf] }
 0x3ab   :  { %6327 = vmatpush.bf16.msra.mxu3 %v12040_v38  ;;  %6340 = vmatpush.bf16.msrb.mxu0 %v12044_v15  ;;  %v12145_v38 = vld [vmem:[#allocation8 + $0x1770] sm:$0xf0]  ;;  %v12151_v15 = vld [vmem:[#allocation8 + $0x1758] sm:$0xf]  ;;  %v12144_v41 = vor.u32 %v14251_v28, %v12143_v35 }
 0x3ac   :  { %v12148_v42 = vor.u32 %v14247_v46, %v12145_v38  ;;  %v12152_v13 = vor.u32 %v14252_v43, %v12151_v15  ;;  %v14215_v38 = vld [vmem:[#allocation8 + $0x1654] sm:$0xf]  ;;  %v12023_v43 = vld [vmem:[#allocation8 + $0x1658] sm:$0xf] }
 0x3ad   :  { %v12017_v15 = vld [vmem:[#allocation8 + $0x1670] sm:$0xf0] }
 0x3ae   :  { %6302 = vmatpush.bf16.msra.mxu1 %v12000_v3  ;;  %6315 = vmatpush.bf16.msra.mxu2 %v12004_v58  ;;  %v12156_v3 = vor.u32 %v14248_v12, %v12153_v21  ;;  %v14239_v58 = vld [vmem:[#allocation8 + $0x1714] sm:$0xf]  ;;  %v14220_v12 = vld [vmem:[#allocation8 + $0x1674] sm:$0xf0]  ;;  %v14216_v21 = vld [vmem:[#allocation8 + $0x165c] sm:$0xf]  ;;  %v12020_v36 = vor.u32 %v14215_v38, %v12017_v15 }
 0x3af   :  { %6328 = vmatpush.bf16.msra.mxu3 %v12008_v1  ;;  %6341 = vmatpush.bf16.msrb.mxu0 %v12012_v25  ;;  %v14240_v1 = vld [vmem:[#allocation8 + $0x171c] sm:$0xf]  ;;  %v12116_v6 = vor.u32 %v14239_v58, %v12113_v37  ;;  %v12024_v58 = vor.u32 %v14220_v12, %v12023_v43  ;;  %v14310_v38 = vld [vmem:[#allocation8 + $0x194c] sm:$0xf] }
 0x3b0   :  { %v12121_v25 = vld [vmem:[#allocation8 + $0x1738] sm:$0xf0]  ;;  %v12393_v15 = vld [vmem:[#allocation8 + $0x1968] sm:$0xf0] }
 0x3b1   :  { %v12124_v52 = vor.u32 %v14240_v1, %v12121_v25  ;;  %v14212_v1 = vld [vmem:[#allocation8 + $0x1634] sm:$0xf0]  ;;  %v14208_v25 = vld [vmem:[#allocation8 + $0x161c] sm:$0xf] }
 0x3b2   :  { %6303 = vmatpush.bf16.msra.mxu1 %v11968_v0  ;;  %6316 = vmatpush.bf16.msra.mxu2 %v11972_v50  ;;  %v5307_v26 = vpop.f32.mrf.mxu1  ;;  %v12081_v0 = vld [vmem:[#allocation8 + $0x16f0] sm:$0xf0]  ;;  %v12087_v50 = vld [vmem:[#allocation8 + $0x16d8] sm:$0xf]  ;;  %v11992_v5 = vor.u32 %v14212_v1, %v11991_v30 }
 0x3b3   :  { %6329 = vmatpush.bf16.msra.mxu3 %v11976_v18  ;;  %6342 = vmatpush.bf16.msrb.mxu0 %v11980_v20  ;;  %v15547_v23 = vadd.f32 %v5307_v26, %v15512_v61  ;;  %v12080_v61 = vor.u32 %v14235_v29, %v12079_v59  ;;  %v12084_v18 = vor.u32 %v14231_v49, %v12081_v0  ;;  %v12047_v20 = vld [vmem:[#allocation8 + $0x1690] sm:$0xf]  ;;  %v14325_v59 = vld [vmem:[#allocation8 + $0x19c4] sm:$0xf]  ;;  %v14330_v0 = vld [vmem:[#allocation8 + $0x19e4] sm:$0xf0] }
 0x3b4   :  { %v12449_v29 = vld [vmem:[#allocation8 + $0x19e0] sm:$0xf0] }
 0x3b5   :  { %6304 = vmatmul.bf16.vlgmr.msra.gmra.mxu1 %v15540_v7  ;;  %6317 = vmatmul.bf16.vlgmr.msra.gmra.mxu2 %v15540_v7  ;;  %v5346_v44 = vpop.f32.mrf.mxu0 }
 0x3b6   :  { %6348 = vmatpush.bf16.msrb.mxu1 %v12208_v31  ;;  %6361 = vmatpush.bf16.msrb.mxu2 %v12212_v33  ;;  %v15550_v62 = vadd.f32 %v5346_v44, %v15515_v55  ;;  %v14227_v31 = vld [vmem:[#allocation8 + $0x16ac] sm:$0xf0]  ;;  %v12088_v33 = vor.u32 %v14236_v2, %v12087_v50  ;;  %v11993_v44 = vld [vmem:[#allocation8 + $0x1638] sm:$0xf0]  ;;  %v14326_v50 = vld [vmem:[#allocation8 + $0x19cc] sm:$0xf] }
 0x3b7   :  { %6374 = vmatpush.bf16.msrb.mxu3 %v12216_v54  ;;  %6387 = vmatpush.bf16.msra.mxu0 %v12220_v14  ;;  %v12049_v54 = vld [vmem:[#allocation8 + $0x16b0] sm:$0xf0]  ;;  %v12055_v14 = vld [vmem:[#allocation8 + $0x1698] sm:$0xf]  ;;  %v12048_v35 = vor.u32 %v14227_v31, %v12047_v20  ;;  %v12457_v2 = vld [vmem:[#allocation8 + $0x19e8] sm:$0xf0]  ;;  %v11996_v9 = vor.u32 %v14208_v25, %v11993_v44 }
 0x3b8   :  { %6330 = vmatmul.bf16.vlgmr.msra.gmra.mxu3 %v15540_v7  ;;  %6343 = vmatmul.bf16.vlgmr.msrb.gmra.mxu0 %v15540_v7  ;;  %v5320_v55 = vpop.f32.mrf.mxu2  ;;  %v12052_v28 = vor.u32 %v14223_v34, %v12049_v54  ;;  %v12056_v46 = vor.u32 %v14228_v60, %v12055_v14  ;;  %v12415_v20 = vld [vmem:[#allocation8 + $0x1980] sm:$0xf]  ;;  %v12417_v34 = vld [vmem:[#allocation8 + $0x19a0] sm:$0xf0]  ;;  %v12423_v54 = vld [vmem:[#allocation8 + $0x1988] sm:$0xf] }
 0x3b9   :  { %v15553_v63 = vadd.f32 %v5320_v55, %v15518_v17  ;;  %v12060_v17 = vor.u32 %v14224_v27, %v12057_v45  ;;  %v14321_v31 = vld [vmem:[#allocation8 + $0x199c] sm:$0xf0]  ;;  %v14317_v55 = vld [vmem:[#allocation8 + $0x1984] sm:$0xf]  ;;  %v14322_v14 = vld [vmem:[#allocation8 + $0x19a4] sm:$0xf0] }
 0x3ba   :  { %6349 = vmatpush.bf16.msrb.mxu1 %v12176_v16  ;;  %6362 = vmatpush.bf16.msrb.mxu2 %v12180_v19  ;;  %v5309_v16 = vpop.f32.mrf.mxu1  ;;  %v12425_v60 = vld [vmem:[#allocation8 + $0x19a8] sm:$0xf0]  ;;  %v12416_v27 = vor.u32 %v14321_v31, %v12415_v20  ;;  %v12420_v45 = vor.u32 %v14317_v55, %v12417_v34  ;;  %v14297_v44 = vld [vmem:[#allocation8 + $0x18dc] sm:$0xf0]  ;;  %v14285_v20 = vld [vmem:[#allocation8 + $0x1884] sm:$0xf] }
 0x3bb   :  { %6375 = vmatpush.bf16.msrb.mxu3 %v12184_v11  ;;  %6388 = vmatpush.bf16.msra.mxu0 %v12188_v47  ;;  %v5333_v32 = vpop.f32.mrf.mxu3  ;;  %v12015_v11 = vld [vmem:[#allocation8 + $0x1650] sm:$0xf]  ;;  %v12383_v16 = vld [vmem:[#allocation8 + $0x1940] sm:$0xf]  ;;  %v12289_v31 = vld [vmem:[#allocation8 + $0x18a0] sm:$0xf0] }
 0x3bc   :  { %v15556_v4 = vadd.f32 %v5333_v32, %v15521_v48  ;;  %v14219_v47 = vld [vmem:[#allocation8 + $0x166c] sm:$0xf0]  ;;  %v14318_v32 = vld [vmem:[#allocation8 + $0x198c] sm:$0xf]  ;;  %v14290_v34 = vld [vmem:[#allocation8 + $0x18a4] sm:$0xf0] }
 0x3bd   :  { %v5348_v19 = vpop.f32.mrf.mxu0  ;;  %v11983_v48 = vld [vmem:[#allocation8 + $0x1610] sm:$0xf] }
 0x3be   :  { %6350 = vmatpush.bf16.msrb.mxu1 %v12144_v41  ;;  %6363 = vmatpush.bf16.msrb.mxu2 %v12148_v42  ;;  %v12025_v41 = vld [vmem:[#allocation8 + $0x1678] sm:$0xf0]  ;;  %v12016_v42 = vor.u32 %v14219_v47, %v12015_v11  ;;  %v14313_v19 = vld [vmem:[#allocation8 + $0x195c] sm:$0xf0]  ;;  %v14309_v11 = vld [vmem:[#allocation8 + $0x1944] sm:$0xf] }
 0x3bf   :  { %6376 = vmatpush.bf16.msrb.mxu3 %v12152_v13  ;;  %6389 = vmatpush.bf16.msra.mxu0 %v12156_v3  ;;  %v14207_v13 = vld [vmem:[#allocation8 + $0x1614] sm:$0xf]  ;;  %v12028_v37 = vor.u32 %v14216_v21, %v12025_v41  ;;  %v12385_v47 = vld [vmem:[#allocation8 + $0x1960] sm:$0xf0]  ;;  %v12384_v43 = vor.u32 %v14313_v19, %v12383_v16  ;;  %v12351_v21 = vld [vmem:[#allocation8 + $0x1900] sm:$0xf]  ;;  %v12292_v16 = vor.u32 %v14285_v20, %v12289_v31 }
 0x3c0   :  { %v11985_v3 = vld [vmem:[#allocation8 + $0x1630] sm:$0xf0]  ;;  %v5322_v22 = vpop.f32.mrf.mxu2  ;;  %v12388_v12 = vor.u32 %v14309_v11, %v12385_v47  ;;  %v14305_v41 = vld [vmem:[#allocation8 + $0x191c] sm:$0xf0]  ;;  %v14277_v11 = vld [vmem:[#allocation8 + $0x1844] sm:$0xf] }
 0x3c1   :  { %v11988_v49 = vor.u32 %v14207_v13, %v11985_v3  ;;  %v12359_v13 = vld [vmem:[#allocation8 + $0x1908] sm:$0xf]  ;;  %v12352_v1 = vor.u32 %v14305_v41, %v12351_v21  ;;  %v12255_v19 = vld [vmem:[#allocation8 + $0x1840] sm:$0xf]  ;;  %v12257_v47 = vld [vmem:[#allocation8 + $0x1860] sm:$0xf0] }
 0x3c2   :  { %6351 = vmatpush.bf16.msrb.mxu1 %v12112_v40  ;;  %6364 = vmatpush.bf16.msrb.mxu2 %v12116_v6  ;;  %v12447_v40 = vld [vmem:[#allocation8 + $0x19c0] sm:$0xf]  ;;  %v14306_v3 = vld [vmem:[#allocation8 + $0x1924] sm:$0xf0]  ;;  %v14269_v41 = vld [vmem:[#allocation8 + $0x1804] sm:$0xf] }
 0x3c3   :  { %6377 = vmatpush.bf16.msrb.mxu3 %v12120_v24  ;;  %6390 = vmatpush.bf16.msra.mxu0 %v12124_v52  ;;  %v5335_v26 = vpop.f32.mrf.mxu3  ;;  %v14329_v6 = vld [vmem:[#allocation8 + $0x19dc] sm:$0xf0]  ;;  %v12455_v24 = vld [vmem:[#allocation8 + $0x19c8] sm:$0xf]  ;;  %v11984_v52 = vor.u32 %v14211_v39, %v11983_v48  ;;  %v12353_v39 = vld [vmem:[#allocation8 + $0x1920] sm:$0xf0] }
 0x3c4   :  { %v12319_v26 = vld [vmem:[#allocation8 + $0x18c0] sm:$0xf]  ;;  %v12433_v20 = vld [vmem:[#allocation8 + $0x19b0] sm:$0xf0]  ;;  %v12439_v31 = vld [vmem:[#allocation8 + $0x1998] sm:$0xf] }
 0x3c5   :  { %v14273_v21 = vld [vmem:[#allocation8 + $0x181c] sm:$0xf0] }
 0x3c6   :  { %6352 = vmatpush.bf16.msrb.mxu1 %v12080_v61  ;;  %6365 = vmatpush.bf16.msrb.mxu2 %v12084_v18  ;;  %v12448_v61 = vor.u32 %v14329_v6, %v12447_v40  ;;  %v12452_v18 = vor.u32 %v14325_v59, %v12449_v29  ;;  %v12360_v6 = vor.u32 %v14306_v3, %v12359_v13  ;;  %v14293_v29 = vld [vmem:[#allocation8 + $0x18c4] sm:$0xf]  ;;  %v12231_v13 = vld [vmem:[#allocation8 + $0x1808] sm:$0xf] }
 0x3c7   :  { %6378 = vmatpush.bf16.msrb.mxu3 %v12088_v33  ;;  %6391 = vmatpush.bf16.msra.mxu0 %v12092_v57  ;;  %v12456_v33 = vor.u32 %v14330_v0, %v12455_v24  ;;  %v12460_v57 = vor.u32 %v14326_v50, %v12457_v2  ;;  %v12321_v24 = vld [vmem:[#allocation8 + $0x18e0] sm:$0xf0]  ;;  %v14294_v0 = vld [vmem:[#allocation8 + $0x18cc] sm:$0xf]  ;;  %v14274_v3 = vld [vmem:[#allocation8 + $0x1824] sm:$0xf0] }
 0x3c8   :  { %v12329_v50 = vld [vmem:[#allocation8 + $0x18e8] sm:$0xf0]  ;;  %v12324_v2 = vor.u32 %v14293_v29, %v12321_v24  ;;  %v14332_v29 = vld [vmem:[#allocation8 + $0x19f4] sm:$0xf0]  ;;  %v14328_v24 = vld [vmem:[#allocation8 + $0x19dc] sm:$0xf] }
 0x3ca   :  { %6353 = vmatpush.bf16.msrb.mxu1 %v12048_v35  ;;  %6366 = vmatpush.bf16.msrb.mxu2 %v12052_v28  ;;  %v12424_v35 = vor.u32 %v14322_v14, %v12423_v54  ;;  %v12428_v28 = vor.u32 %v14318_v32, %v12425_v60  ;;  %v14286_v54 = vld [vmem:[#allocation8 + $0x188c] sm:$0xf] }
 0x3cb   :  { %6379 = vmatpush.bf16.msrb.mxu3 %v12056_v46  ;;  %6392 = vmatpush.bf16.msra.mxu0 %v12060_v17  ;;  %v12391_v46 = vld [vmem:[#allocation8 + $0x1948] sm:$0xf]  ;;  %v12297_v14 = vld [vmem:[#allocation8 + $0x18a8] sm:$0xf0] }
 0x3cc   :  { %v14314_v17 = vld [vmem:[#allocation8 + $0x1964] sm:$0xf0] }
 0x3cd   :  { %v12392_v48 = vor.u32 %v14314_v17, %v12391_v46  ;;  %v12263_v46 = vld [vmem:[#allocation8 + $0x1848] sm:$0xf] }
 0x3ce   :  { %6354 = vmatpush.bf16.msrb.mxu1 %v12016_v42  ;;  %6367 = vmatpush.bf16.msrb.mxu2 %v12020_v36  ;;  %v12396_v42 = vor.u32 %v14310_v38, %v12393_v15  ;;  %v14301_v36 = vld [vmem:[#allocation8 + $0x1904] sm:$0xf]  ;;  %v14282_v17 = vld [vmem:[#allocation8 + $0x1864] sm:$0xf0]  ;;  %v14278_v38 = vld [vmem:[#allocation8 + $0x184c] sm:$0xf] }
 0x3cf   :  { %6380 = vmatpush.bf16.msrb.mxu3 %v12024_v58  ;;  %6393 = vmatpush.bf16.msra.mxu0 %v12028_v37  ;;  %v14302_v58 = vld [vmem:[#allocation8 + $0x190c] sm:$0xf]  ;;  %v12356_v25 = vor.u32 %v14301_v36, %v12353_v39 }
 0x3d0   :  { %v12361_v37 = vld [vmem:[#allocation8 + $0x1928] sm:$0xf0] }
 0x3d1   :  { %v12364_v59 = vor.u32 %v14302_v58, %v12361_v37  ;;  %v12265_v15 = vld [vmem:[#allocation8 + $0x1868] sm:$0xf0] }
 0x3d2   :  { %6355 = vmatpush.bf16.msrb.mxu1 %v11984_v52  ;;  %6368 = vmatpush.bf16.msrb.mxu2 %v11988_v49  ;;  %v5359_v22 = vpop.f32.mrf.mxu1  ;;  %v12327_v52 = vld [vmem:[#allocation8 + $0x18c8] sm:$0xf]  ;;  %v12268_v36 = vor.u32 %v14278_v38, %v12265_v15  ;;  %v14270_v58 = vld [vmem:[#allocation8 + $0x180c] sm:$0xf]  ;;  %v12367_v38 = vld [vmem:[#allocation8 + $0x1910] sm:$0xf] }
 0x3d3   :  { %6381 = vmatpush.bf16.msrb.mxu3 %v11992_v5  ;;  %6394 = vmatpush.bf16.msra.mxu0 %v11996_v9  ;;  %v14298_v49 = vld [vmem:[#allocation8 + $0x18e4] sm:$0xf0]  ;;  %v12287_v5 = vld [vmem:[#allocation8 + $0x1880] sm:$0xf]  ;;  %v14307_v15 = vld [vmem:[#allocation8 + $0x192c] sm:$0xf0] }
 0x3d4   :  { %v14289_v9 = vld [vmem:[#allocation8 + $0x189c] sm:$0xf0] }
 0x3d5   :  { %6356 = vmatmul.bf16.vlgmr.msrb.gmra.mxu1 %v15540_v7  ;;  %6369 = vmatmul.bf16.vlgmr.msrb.gmra.mxu2 %v15540_v7  ;;  %v5398_v30 = vpop.f32.mrf.mxu0 }
 0x3d6   :  { %6794 = vmatpush.bf16.msra.mxu1 %v12448_v61  ;;  %6807 = vmatpush.bf16.msra.mxu2 %v12452_v18  ;;  %v15566_v40 = vadd.f32 %v5398_v30, %v15531_v51  ;;  %v12328_v61 = vor.u32 %v14298_v49, %v12327_v52  ;;  %v12332_v18 = vor.u32 %v14294_v0, %v12329_v50  ;;  %v12463_v30 = vld [vmem:[#allocation8 + $0x19d0] sm:$0xf]  ;;  %v12473_v52 = vld [vmem:[#allocation8 + $0x19f8] sm:$0xf0]  ;;  %v436_v50 = vmax.f32 %v15209_v8, 0.0 }
 0x3d7   :  { %6820 = vmatpush.bf16.msra.mxu3 %v12456_v33  ;;  %6833 = vmatpush.bf16.msrb.mxu0 %v12460_v57  ;;  %v12295_v33 = vld [vmem:[#allocation8 + $0x1888] sm:$0xf]  ;;  %v12232_v49 = vor.u32 %v14274_v3, %v12231_v13 }
 0x3d8   :  { %6382 = vmatmul.bf16.vlgmr.msrb.gmra.mxu3 %v15540_v7  ;;  %6395 = vmatmul.bf16.vlgmr.msra.gmra.mxu0 %v15540_v7  ;;  %v15563_v7 = vadd.f32 %v5359_v22, %v15528_v10  ;;  %v12320_v10 = vor.u32 %v14297_v44, %v12319_v26  ;;  %v5372_v51 = vpop.f32.mrf.mxu2  ;;  %v12233_v22 = vld [vmem:[#allocation8 + $0x1828] sm:$0xf0]  ;;  %v12465_v26 = vld [vmem:[#allocation8 + $0x19f0] sm:$0xf0]  ;;  %v12471_v44 = vld [vmem:[#allocation8 + $0x19d8] sm:$0xf] }
 0x3d9   :  { %v15569_v57 = vadd.f32 %v5372_v51, %v15534_v56  ;;  %v12300_v56 = vor.u32 %v14286_v54, %v12297_v14  ;;  %v12236_v0 = vor.u32 %v14270_v58, %v12233_v22  ;;  %v14319_v51 = vld [vmem:[#allocation8 + $0x1994] sm:$0xf]  ;;  %v15575_v54 = vpack.c.bf16 %v436_v50, %v436_v50  ;;  %v12335_v22 = vld [vmem:[#allocation8 + $0x18d0] sm:$0xf] }
 0x3da   :  { %6795 = vmatpush.bf16.msra.mxu1 %v12416_v27  ;;  %6808 = vmatpush.bf16.msra.mxu2 %v12420_v45  ;;  %v5361_v60 = vpop.f32.mrf.mxu1  ;;  %v12288_v45 = vor.u32 %v14289_v9, %v12287_v5  ;;  %v12431_v5 = vld [vmem:[#allocation8 + $0x1990] sm:$0xf]  ;;  %v12436_v14 = vor.u32 %v14319_v51, %v12433_v20  ;;  %v12368_v58 = vor.u32 %v14307_v15, %v12367_v38  ;;  %v14292_v20 = vld [vmem:[#allocation8 + $0x18b4] sm:$0xf0]  ;;  %v14271_v15 = vld [vmem:[#allocation8 + $0x1814] sm:$0xf] }
 0x3db   :  { %6821 = vmatpush.bf16.msra.mxu3 %v12424_v35  ;;  %6834 = vmatpush.bf16.msrb.mxu0 %v12428_v28  ;;  %v5385_v55 = vpop.f32.mrf.mxu3  ;;  %v14281_v35 = vld [vmem:[#allocation8 + $0x185c] sm:$0xf0]  ;;  %v12296_v28 = vor.u32 %v14290_v34, %v12295_v33  ;;  %v14323_v9 = vld [vmem:[#allocation8 + $0x19ac] sm:$0xf0]  ;;  %v14324_v33 = vld [vmem:[#allocation8 + $0x19b4] sm:$0xf0] }
 0x3dc   :  { %v15572_v32 = vadd.f32 %v5385_v55, %v15537_v53  ;;  %v12223_v53 = vld [vmem:[#allocation8 + $0x1800] sm:$0xf]  ;;  %v14320_v55 = vld [vmem:[#allocation8 + $0x199c] sm:$0xf]  ;;  %v12432_v8 = vor.u32 %v14323_v9, %v12431_v5  ;;  %v12399_v60 = vld [vmem:[#allocation8 + $0x1950] sm:$0xf] }
 0x3dd   :  { %v5400_v27 = vpop.f32.mrf.mxu0  ;;  %v12441_v34 = vld [vmem:[#allocation8 + $0x19b8] sm:$0xf0]  ;;  %v14291_v50 = vld [vmem:[#allocation8 + $0x18ac] sm:$0xf0]  ;;  %v14287_v5 = vld [vmem:[#allocation8 + $0x1894] sm:$0xf] }
 0x3de   :  { %6796 = vmatpush.bf16.msra.mxu1 %v12384_v43  ;;  %6809 = vmatpush.bf16.msra.mxu2 %v12388_v12  ;;  %v12256_v43 = vor.u32 %v14281_v35, %v12255_v19  ;;  %v12260_v12 = vor.u32 %v14277_v11, %v12257_v47  ;;  %v14315_v27 = vld [vmem:[#allocation8 + $0x196c] sm:$0xf0]  ;;  %v14311_v19 = vld [vmem:[#allocation8 + $0x1954] sm:$0xf]  ;;  %v14312_v11 = vld [vmem:[#allocation8 + $0x195c] sm:$0xf] }
 0x3df   :  { %6822 = vmatpush.bf16.msra.mxu3 %v12392_v48  ;;  %6835 = vmatpush.bf16.msrb.mxu0 %v12396_v42  ;;  %v12225_v48 = vld [vmem:[#allocation8 + $0x1820] sm:$0xf0]  ;;  %v12264_v42 = vor.u32 %v14282_v17, %v12263_v46  ;;  %v12401_v35 = vld [vmem:[#allocation8 + $0x1970] sm:$0xf0]  ;;  %v12409_v47 = vld [vmem:[#allocation8 + $0x1978] sm:$0xf0]  ;;  %v12400_v46 = vor.u32 %v14315_v27, %v12399_v60 }
 0x3e0   :  { %v5374_v39 = vpop.f32.mrf.mxu2  ;;  %v12404_v17 = vor.u32 %v14311_v19, %v12401_v35  ;;  %v12305_v9 = vld [vmem:[#allocation8 + $0x18b0] sm:$0xf0]  ;;  %v12271_v27 = vld [vmem:[#allocation8 + $0x1850] sm:$0xf] }
 0x3e1   :  { %v12308_v60 = vor.u32 %v14287_v5, %v12305_v9  ;;  %v14279_v19 = vld [vmem:[#allocation8 + $0x1854] sm:$0xf]  ;;  %v14275_v38 = vld [vmem:[#allocation8 + $0x182c] sm:$0xf0]  ;;  %v12679_v5 = vld [vmem:[#allocation8 + $0x1b88] sm:$0xf] }
 0x3e2   :  { %6797 = vmatpush.bf16.msra.mxu1 %v12352_v1  ;;  %6810 = vmatpush.bf16.msra.mxu2 %v12356_v25  ;;  %v14331_v1 = vld [vmem:[#allocation8 + $0x19ec] sm:$0xf0]  ;;  %v14327_v25 = vld [vmem:[#allocation8 + $0x19d4] sm:$0xf]  ;;  %v14386_v9 = vld [vmem:[#allocation8 + $0x1ba4] sm:$0xf0] }
 0x3e3   :  { %6823 = vmatpush.bf16.msra.mxu3 %v12360_v6  ;;  %6836 = vmatpush.bf16.msrb.mxu0 %v12364_v59  ;;  %v5387_v37 = vpop.f32.mrf.mxu3  ;;  %v12224_v6 = vor.u32 %v14273_v21, %v12223_v53  ;;  %v12228_v59 = vor.u32 %v14269_v41, %v12225_v48  ;;  %v12369_v21 = vld [vmem:[#allocation8 + $0x1930] sm:$0xf0]  ;;  %v12375_v41 = vld [vmem:[#allocation8 + $0x1918] sm:$0xf] }
 0x3e4   :  { %v14308_v48 = vld [vmem:[#allocation8 + $0x1934] sm:$0xf0]  ;;  %v12273_v35 = vld [vmem:[#allocation8 + $0x1870] sm:$0xf0] }
 0x3e6   :  { %6798 = vmatpush.bf16.msra.mxu1 %v12320_v10  ;;  %6811 = vmatpush.bf16.msra.mxu2 %v12324_v2  ;;  %v12464_v10 = vor.u32 %v14331_v1, %v12463_v30  ;;  %v12468_v2 = vor.u32 %v14327_v25, %v12465_v26  ;;  %v14299_v30 = vld [vmem:[#allocation8 + $0x18ec] sm:$0xf0]  ;;  %v12376_v25 = vor.u32 %v14308_v48, %v12375_v41  ;;  %v12247_v41 = vld [vmem:[#allocation8 + $0x1818] sm:$0xf] }
 0x3e7   :  { %6824 = vmatpush.bf16.msra.mxu3 %v12328_v61  ;;  %6837 = vmatpush.bf16.msrb.mxu0 %v12332_v18  ;;  %v12472_v61 = vor.u32 %v14332_v29, %v12471_v44  ;;  %v12476_v18 = vor.u32 %v14328_v24, %v12473_v52  ;;  %v14295_v44 = vld [vmem:[#allocation8 + $0x18d4] sm:$0xf]  ;;  %v14300_v29 = vld [vmem:[#allocation8 + $0x18f4] sm:$0xf0]  ;;  %v14296_v24 = vld [vmem:[#allocation8 + $0x18dc] sm:$0xf] }
 0x3e8   :  { %v12345_v52 = vld [vmem:[#allocation8 + $0x18f8] sm:$0xf0]  ;;  %v14276_v48 = vld [vmem:[#allocation8 + $0x1834] sm:$0xf0] }
 0x3ea   :  { %6799 = vmatpush.bf16.msra.mxu1 %v12288_v45  ;;  %6812 = vmatpush.bf16.msra.mxu2 %v12292_v16  ;;  %v12440_v45 = vor.u32 %v14324_v33, %v12439_v31  ;;  %v12444_v16 = vor.u32 %v14320_v55, %v12441_v34  ;;  %v14288_v31 = vld [vmem:[#allocation8 + $0x189c] sm:$0xf] }
 0x3eb   :  { %6825 = vmatpush.bf16.msra.mxu3 %v12296_v28  ;;  %6838 = vmatpush.bf16.msrb.mxu0 %v12300_v56  ;;  %v12407_v28 = vld [vmem:[#allocation8 + $0x1958] sm:$0xf]  ;;  %v12313_v33 = vld [vmem:[#allocation8 + $0x18b8] sm:$0xf0] }
 0x3ec   :  { %v14316_v56 = vld [vmem:[#allocation8 + $0x1974] sm:$0xf0] }
 0x3ed   :  { %v12408_v53 = vor.u32 %v14316_v56, %v12407_v28  ;;  %v12279_v28 = vld [vmem:[#allocation8 + $0x1858] sm:$0xf] }
 0x3ee   :  { %6800 = vmatpush.bf16.msra.mxu1 %v12256_v43  ;;  %6813 = vmatpush.bf16.msra.mxu2 %v12260_v12  ;;  %v12412_v43 = vor.u32 %v14312_v11, %v12409_v47  ;;  %v14303_v12 = vld [vmem:[#allocation8 + $0x1914] sm:$0xf]  ;;  %v14284_v56 = vld [vmem:[#allocation8 + $0x1874] sm:$0xf0]  ;;  %v14280_v11 = vld [vmem:[#allocation8 + $0x185c] sm:$0xf] }
 0x3ef   :  { %6826 = vmatpush.bf16.msra.mxu3 %v12264_v42  ;;  %6839 = vmatpush.bf16.msrb.mxu0 %v12268_v36  ;;  %v14304_v42 = vld [vmem:[#allocation8 + $0x191c] sm:$0xf]  ;;  %v12372_v37 = vor.u32 %v14303_v12, %v12369_v21 }
 0x3f0   :  { %v12377_v36 = vld [vmem:[#allocation8 + $0x1938] sm:$0xf0] }
 0x3f1   :  { %v12380_v26 = vor.u32 %v14304_v42, %v12377_v36  ;;  %v12281_v47 = vld [vmem:[#allocation8 + $0x1878] sm:$0xf0] }
 0x3f2   :  { %6801 = vmatpush.bf16.msra.mxu1 %v12224_v6  ;;  %6814 = vmatpush.bf16.msra.mxu2 %v12228_v59  ;;  %v5806_v39 = vpop.f32.mrf.mxu1  ;;  %v12337_v6 = vld [vmem:[#allocation8 + $0x18f0] sm:$0xf0]  ;;  %v12343_v59 = vld [vmem:[#allocation8 + $0x18d8] sm:$0xf]  ;;  %v12284_v12 = vor.u32 %v14280_v11, %v12281_v47  ;;  %v14272_v42 = vld [vmem:[#allocation8 + $0x181c] sm:$0xf] }
 0x3f3   :  { %6827 = vmatpush.bf16.msra.mxu3 %v12232_v49  ;;  %6840 = vmatpush.bf16.msrb.mxu0 %v12236_v0  ;;  %v15582_v13 = vadd.f32 %v5806_v39, %v15547_v23  ;;  %v12336_v23 = vor.u32 %v14299_v30, %v12335_v22  ;;  %v12340_v49 = vor.u32 %v14295_v44, %v12337_v6  ;;  %v12303_v0 = vld [vmem:[#allocation8 + $0x1890] sm:$0xf]  ;;  %v12249_v39 = vld [vmem:[#allocation8 + $0x1838] sm:$0xf0]  ;;  %v12705_v22 = vld [vmem:[#allocation8 + $0x1be0] sm:$0xf0] }
 0x3f4   :  { %v12711_v30 = vld [vmem:[#allocation8 + $0x1bc8] sm:$0xf]  ;;  %v14390_v6 = vld [vmem:[#allocation8 + $0x1bcc] sm:$0xf]  ;;  %v14369_v11 = vld [vmem:[#allocation8 + $0x1b1c] sm:$0xf0] }
 0x3f5   :  { %6802 = vmatmul.bf16.vlgmr.msra.gmra.mxu1 %v15575_v54  ;;  %6815 = vmatmul.bf16.vlgmr.msra.gmra.mxu2 %v15575_v54  ;;  %v5845_v3 = vpop.f32.mrf.mxu0  ;;  %v14394_v44 = vld [vmem:[#allocation8 + $0x1be4] sm:$0xf0] }
 0x3f6   :  { %6846 = vmatpush.bf16.msrb.mxu1 %v12464_v10  ;;  %6859 = vmatpush.bf16.msrb.mxu2 %v12468_v2  ;;  %v15585_v1 = vadd.f32 %v5845_v3, %v15550_v62  ;;  %v12344_v10 = vor.u32 %v14300_v29, %v12343_v59  ;;  %v12348_v2 = vor.u32 %v14296_v24, %v12345_v52  ;;  %v12703_v3 = vld [vmem:[#allocation8 + $0x1bc0] sm:$0xf]  ;;  %v12713_v59 = vld [vmem:[#allocation8 + $0x1be8] sm:$0xf0] }
 0x3f7   :  { %6872 = vmatpush.bf16.msrb.mxu3 %v12472_v61  ;;  %6885 = vmatpush.bf16.msra.mxu0 %v12476_v18  ;;  %v12311_v61 = vld [vmem:[#allocation8 + $0x1898] sm:$0xf]  ;;  %v12248_v29 = vor.u32 %v14276_v48, %v12247_v41  ;;  %v12252_v24 = vor.u32 %v14272_v42, %v12249_v39  ;;  %v14361_v39 = vld [vmem:[#allocation8 + $0x1adc] sm:$0xf0] }
 0x3f8   :  { %6828 = vmatmul.bf16.vlgmr.msra.gmra.mxu3 %v15575_v54  ;;  %6841 = vmatmul.bf16.vlgmr.msrb.gmra.mxu0 %v15575_v54  ;;  %v5819_v62 = vpop.f32.mrf.mxu2 }
 0x3f9   :  { %v15588_v18 = vadd.f32 %v5819_v62, %v15553_v63  ;;  %v12316_v63 = vor.u32 %v14288_v31, %v12313_v33  ;;  %v12673_v62 = vld [vmem:[#allocation8 + $0x1ba0] sm:$0xf0]  ;;  %v12639_v33 = vld [vmem:[#allocation8 + $0x1b40] sm:$0xf] }
 0x3fa   :  { %6847 = vmatpush.bf16.msrb.mxu1 %v12432_v8  ;;  %6860 = vmatpush.bf16.msrb.mxu2 %v12436_v14  ;;  %v5808_v34 = vpop.f32.mrf.mxu1  ;;  %v12304_v14 = vor.u32 %v14291_v50, %v12303_v0  ;;  %v14385_v0 = vld [vmem:[#allocation8 + $0x1b9c] sm:$0xf0]  ;;  %v12712_v50 = vor.u32 %v14394_v44, %v12711_v30  ;;  %v12577_v30 = vld [vmem:[#allocation8 + $0x1ae0] sm:$0xf0]  ;;  %v14358_v44 = vld [vmem:[#allocation8 + $0x1acc] sm:$0xf] }
 0x3fb   :  { %6873 = vmatpush.bf16.msrb.mxu3 %v12440_v45  ;;  %6886 = vmatpush.bf16.msra.mxu0 %v12444_v16  ;;  %v5832_v51 = vpop.f32.mrf.mxu3  ;;  %v14283_v45 = vld [vmem:[#allocation8 + $0x186c] sm:$0xf0]  ;;  %v12312_v16 = vor.u32 %v14292_v20, %v12311_v61  ;;  %v14382_v61 = vld [vmem:[#allocation8 + $0x1b8c] sm:$0xf]  ;;  %v14377_v34 = vld [vmem:[#allocation8 + $0x1b5c] sm:$0xf0] }
 0x3fc   :  { %v15591_v55 = vadd.f32 %v5832_v51, %v15556_v4  ;;  %v12239_v4 = vld [vmem:[#allocation8 + $0x1810] sm:$0xf]  ;;  %v12681_v51 = vld [vmem:[#allocation8 + $0x1ba8] sm:$0xf0] }
 0x3fd   :  { %v5847_v8 = vpop.f32.mrf.mxu0 }
 0x3fe   :  { %6848 = vmatpush.bf16.msrb.mxu1 %v12400_v46  ;;  %6861 = vmatpush.bf16.msrb.mxu2 %v12404_v17  ;;  %v12272_v46 = vor.u32 %v14283_v45, %v12271_v27  ;;  %v12276_v17 = vor.u32 %v14279_v19, %v12273_v35  ;;  %v12680_v8 = vor.u32 %v14386_v9, %v12679_v5  ;;  %v12641_v27 = vld [vmem:[#allocation8 + $0x1b60] sm:$0xf0]  ;;  %v12647_v45 = vld [vmem:[#allocation8 + $0x1b48] sm:$0xf]  ;;  %v12649_v19 = vld [vmem:[#allocation8 + $0x1b68] sm:$0xf0] }
 0x3ff   :  { %6874 = vmatpush.bf16.msrb.mxu3 %v12408_v53  ;;  %6887 = vmatpush.bf16.msra.mxu0 %v12412_v43  ;;  %v12241_v53 = vld [vmem:[#allocation8 + $0x1830] sm:$0xf0]  ;;  %v12280_v43 = vor.u32 %v14284_v56, %v12279_v28  ;;  %v12640_v35 = vor.u32 %v14377_v34, %v12639_v33  ;;  %v12607_v56 = vld [vmem:[#allocation8 + $0x1b00] sm:$0xf]  ;;  %v14350_v5 = vld [vmem:[#allocation8 + $0x1a8c] sm:$0xf] }
 0x400   :  { %v5821_v21 = vpop.f32.mrf.mxu2  ;;  %v12608_v48 = vor.u32 %v14369_v11, %v12607_v56  ;;  %v12553_v9 = vld [vmem:[#allocation8 + $0x1aa8] sm:$0xf0]  ;;  %v12511_v34 = vld [vmem:[#allocation8 + $0x1a40] sm:$0xf]  ;;  %v14333_v11 = vld [vmem:[#allocation8 + $0x1a04] sm:$0xf] }
 0x401   :  { %v14337_v56 = vld [vmem:[#allocation8 + $0x1a1c] sm:$0xf0] }
 0x402   :  { %6849 = vmatpush.bf16.msrb.mxu1 %v12368_v58  ;;  %6862 = vmatpush.bf16.msrb.mxu2 %v12372_v37  ;;  %v14393_v58 = vld [vmem:[#allocation8 + $0x1bdc] sm:$0xf0]  ;;  %v14389_v37 = vld [vmem:[#allocation8 + $0x1bc4] sm:$0xf] }
 0x403   :  { %6875 = vmatpush.bf16.msrb.mxu3 %v12376_v25  ;;  %6888 = vmatpush.bf16.msra.mxu0 %v12380_v26  ;;  %v5834_v36 = vpop.f32.mrf.mxu3  ;;  %v12240_v25 = vor.u32 %v14275_v38, %v12239_v4  ;;  %v12244_v26 = vor.u32 %v14271_v15, %v12241_v53  ;;  %v12704_v52 = vor.u32 %v14393_v58, %v12703_v3  ;;  %v12615_v38 = vld [vmem:[#allocation8 + $0x1b08] sm:$0xf]  ;;  %v14366_v53 = vld [vmem:[#allocation8 + $0x1b0c] sm:$0xf] }
 0x404   :  { %v14370_v15 = vld [vmem:[#allocation8 + $0x1b24] sm:$0xf0]  ;;  %v12575_v36 = vld [vmem:[#allocation8 + $0x1ac0] sm:$0xf] }
 0x405   :  { %v12616_v58 = vor.u32 %v14370_v15, %v12615_v38  ;;  %v12487_v38 = vld [vmem:[#allocation8 + $0x1a08] sm:$0xf] }
 0x406   :  { %6850 = vmatpush.bf16.msrb.mxu1 %v12336_v23  ;;  %6863 = vmatpush.bf16.msrb.mxu2 %v12340_v49  ;;  %v12708_v23 = vor.u32 %v14389_v37, %v12705_v22  ;;  %v12671_v49 = vld [vmem:[#allocation8 + $0x1b80] sm:$0xf]  ;;  %v14357_v22 = vld [vmem:[#allocation8 + $0x1ac4] sm:$0xf]  ;;  %v14338_v15 = vld [vmem:[#allocation8 + $0x1a24] sm:$0xf0] }
 0x407   :  { %6876 = vmatpush.bf16.msrb.mxu3 %v12344_v10  ;;  %6889 = vmatpush.bf16.msra.mxu0 %v12348_v2  ;;  %v12716_v10 = vor.u32 %v14390_v6, %v12713_v59  ;;  %v14381_v2 = vld [vmem:[#allocation8 + $0x1b84] sm:$0xf]  ;;  %v12672_v20 = vor.u32 %v14385_v0, %v12671_v49  ;;  %v12585_v6 = vld [vmem:[#allocation8 + $0x1ae8] sm:$0xf0]  ;;  %v12580_v59 = vor.u32 %v14357_v22, %v12577_v30  ;;  %v14396_v22 = vld [vmem:[#allocation8 + $0x1bf4] sm:$0xf0] }
 0x408   :  { %v12676_v31 = vor.u32 %v14381_v2, %v12673_v62  ;;  %v14349_v49 = vld [vmem:[#allocation8 + $0x1a84] sm:$0xf]  ;;  %v14354_v62 = vld [vmem:[#allocation8 + $0x1aa4] sm:$0xf0]  ;;  %v14392_v30 = vld [vmem:[#allocation8 + $0x1bdc] sm:$0xf] }
 0x409   :  { %v12545_v0 = vld [vmem:[#allocation8 + $0x1aa0] sm:$0xf0] }
 0x40a   :  { %6851 = vmatpush.bf16.msrb.mxu1 %v12304_v14  ;;  %6864 = vmatpush.bf16.msrb.mxu2 %v12308_v60  ;;  %v12684_v14 = vor.u32 %v14382_v61, %v12681_v51  ;;  %v14373_v60 = vld [vmem:[#allocation8 + $0x1b44] sm:$0xf]  ;;  %v12548_v33 = vor.u32 %v14349_v49, %v12545_v0  ;;  %v12695_v49 = vld [vmem:[#allocation8 + $0x1b98] sm:$0xf] }
 0x40b   :  { %6877 = vmatpush.bf16.msrb.mxu3 %v12312_v16  ;;  %6890 = vmatpush.bf16.msra.mxu0 %v12316_v63  ;;  %v14378_v16 = vld [vmem:[#allocation8 + $0x1b64] sm:$0xf0]  ;;  %v14374_v63 = vld [vmem:[#allocation8 + $0x1b4c] sm:$0xf]  ;;  %v12644_v28 = vor.u32 %v14373_v60, %v12641_v27  ;;  %v14341_v60 = vld [vmem:[#allocation8 + $0x1a44] sm:$0xf] }
 0x40c   :  { %v12648_v47 = vor.u32 %v14378_v16, %v12647_v45  ;;  %v12652_v4 = vor.u32 %v14374_v63, %v12649_v19  ;;  %v12513_v27 = vld [vmem:[#allocation8 + $0x1a60] sm:$0xf0]  ;;  %v12519_v45 = vld [vmem:[#allocation8 + $0x1a48] sm:$0xf]  ;;  %v14342_v63 = vld [vmem:[#allocation8 + $0x1a4c] sm:$0xf] }
 0x40d   :  { %v14346_v16 = vld [vmem:[#allocation8 + $0x1a64] sm:$0xf0]  ;;  %v12521_v19 = vld [vmem:[#allocation8 + $0x1a68] sm:$0xf0]  ;;  %v14388_v0 = vld [vmem:[#allocation8 + $0x1bb4] sm:$0xf0] }
 0x40e   :  { %6852 = vmatpush.bf16.msrb.mxu1 %v12272_v46  ;;  %6865 = vmatpush.bf16.msrb.mxu2 %v12276_v17  ;;  %v14365_v46 = vld [vmem:[#allocation8 + $0x1b04] sm:$0xf] }
 0x40f   :  { %6878 = vmatpush.bf16.msrb.mxu3 %v12280_v43  ;;  %6891 = vmatpush.bf16.msra.mxu0 %v12284_v12  ;;  %v12609_v17 = vld [vmem:[#allocation8 + $0x1b20] sm:$0xf0]  ;;  %v12617_v43 = vld [vmem:[#allocation8 + $0x1b28] sm:$0xf0] }
 0x410   :  { %v12612_v42 = vor.u32 %v14365_v46, %v12609_v17  ;;  %v12620_v37 = vor.u32 %v14366_v53, %v12617_v43  ;;  %v12524_v46 = vor.u32 %v14342_v63, %v12521_v19  ;;  %v14334_v53 = vld [vmem:[#allocation8 + $0x1a0c] sm:$0xf]  ;;  %v12623_v63 = vld [vmem:[#allocation8 + $0x1b10] sm:$0xf] }
 0x411   :  { %v14371_v19 = vld [vmem:[#allocation8 + $0x1b2c] sm:$0xf0] }
 0x412   :  { %6853 = vmatpush.bf16.msrb.mxu1 %v12240_v25  ;;  %6866 = vmatpush.bf16.msrb.mxu2 %v12244_v26  ;;  %v5858_v12 = vpop.f32.mrf.mxu1  ;;  %v12583_v25 = vld [vmem:[#allocation8 + $0x1ac8] sm:$0xf] }
 0x413   :  { %6879 = vmatpush.bf16.msrb.mxu3 %v12248_v29  ;;  %6892 = vmatpush.bf16.msra.mxu0 %v12252_v24  ;;  %v15598_v21 = vadd.f32 %v5858_v12, %v15563_v7  ;;  %v14362_v26 = vld [vmem:[#allocation8 + $0x1ae4] sm:$0xf0]  ;;  %v12576_v7 = vor.u32 %v14361_v39, %v12575_v36  ;;  %v12543_v29 = vld [vmem:[#allocation8 + $0x1a80] sm:$0xf]  ;;  %v12489_v12 = vld [vmem:[#allocation8 + $0x1a28] sm:$0xf0] }
 0x414   :  { %v14353_v24 = vld [vmem:[#allocation8 + $0x1a9c] sm:$0xf0]  ;;  %v12721_v36 = vld [vmem:[#allocation8 + $0x1bf0] sm:$0xf0]  ;;  %v12727_v39 = vld [vmem:[#allocation8 + $0x1bd8] sm:$0xf] }
 0x415   :  { %6854 = vmatmul.bf16.vlgmr.msrb.gmra.mxu1 %v15575_v54  ;;  %6867 = vmatmul.bf16.vlgmr.msrb.gmra.mxu2 %v15575_v54  ;;  %v5897_v41 = vpop.f32.mrf.mxu0 }
 0x416   :  { %7294 = vmatpush.bf16.msra.mxu1 %v12704_v52  ;;  %7307 = vmatpush.bf16.msra.mxu2 %v12708_v23  ;;  %v15601_v3 = vadd.f32 %v5897_v41, %v15566_v40  ;;  %v12584_v52 = vor.u32 %v14362_v26, %v12583_v25  ;;  %v12588_v23 = vor.u32 %v14358_v44, %v12585_v6  ;;  %v12719_v41 = vld [vmem:[#allocation8 + $0x1bd0] sm:$0xf]  ;;  %v12729_v25 = vld [vmem:[#allocation8 + $0x1bf8] sm:$0xf0] }
 0x417   :  { %7320 = vmatpush.bf16.msra.mxu3 %v12712_v50  ;;  %7333 = vmatpush.bf16.msrb.mxu0 %v12716_v10  ;;  %v12551_v50 = vld [vmem:[#allocation8 + $0x1a88] sm:$0xf]  ;;  %v12488_v26 = vor.u32 %v14338_v15, %v12487_v38  ;;  %v12492_v44 = vor.u32 %v14334_v53, %v12489_v12  ;;  %v12624_v53 = vor.u32 %v14371_v19, %v12623_v63  ;;  %v12591_v12 = vld [vmem:[#allocation8 + $0x1ad0] sm:$0xf] }
 0x418   :  { %6880 = vmatmul.bf16.vlgmr.msrb.gmra.mxu3 %v15575_v54  ;;  %6893 = vmatmul.bf16.vlgmr.msra.gmra.mxu0 %v15575_v54  ;;  %v5871_v40 = vpop.f32.mrf.mxu2  ;;  %v14339_v19 = vld [vmem:[#allocation8 + $0x1a2c] sm:$0xf0] }
 0x419   :  { %v15604_v10 = vadd.f32 %v5871_v40, %v15569_v57  ;;  %v12556_v57 = vor.u32 %v14350_v5, %v12553_v9  ;;  %v12689_v40 = vld [vmem:[#allocation8 + $0x1bb0] sm:$0xf0] }
 0x41a   :  { %7295 = vmatpush.bf16.msra.mxu1 %v12672_v20  ;;  %7308 = vmatpush.bf16.msra.mxu2 %v12676_v31  ;;  %v5860_v51 = vpop.f32.mrf.mxu1  ;;  %v12544_v31 = vor.u32 %v14353_v24, %v12543_v29  ;;  %v14387_v29 = vld [vmem:[#allocation8 + $0x1bac] sm:$0xf0]  ;;  %v12728_v24 = vor.u32 %v14396_v22, %v12727_v39  ;;  %v14359_v39 = vld [vmem:[#allocation8 + $0x1ad4] sm:$0xf]  ;;  %v14364_v22 = vld [vmem:[#allocation8 + $0x1af4] sm:$0xf0] }
 0x41b   :  { %7321 = vmatpush.bf16.msra.mxu3 %v12680_v8  ;;  %7334 = vmatpush.bf16.msrb.mxu0 %v12684_v14  ;;  %v5884_v2 = vpop.f32.mrf.mxu3  ;;  %v14345_v8 = vld [vmem:[#allocation8 + $0x1a5c] sm:$0xf0]  ;;  %v12552_v14 = vor.u32 %v14354_v62, %v12551_v50  ;;  %v14384_v50 = vld [vmem:[#allocation8 + $0x1b9c] sm:$0xf]  ;;  %v15610_v62 = vrot.slane %v15575_v54, 1 }
 0x41c   :  { %v15607_v61 = vadd.f32 %v5884_v2, %v15572_v32  ;;  %v12479_v32 = vld [vmem:[#allocation8 + $0x1a00] sm:$0xf]  ;;  %v12697_v2 = vld [vmem:[#allocation8 + $0x1bb8] sm:$0xf0]  ;;  %v12655_v51 = vld [vmem:[#allocation8 + $0x1b50] sm:$0xf] }
 0x41d   :  { %v5899_v20 = vpop.f32.mrf.mxu0 }
 0x41e   :  { %7296 = vmatpush.bf16.msra.mxu1 %v12640_v35  ;;  %7309 = vmatpush.bf16.msra.mxu2 %v12644_v28  ;;  %v12512_v35 = vor.u32 %v14345_v8, %v12511_v34  ;;  %v12516_v28 = vor.u32 %v14341_v60, %v12513_v27  ;;  %v14379_v20 = vld [vmem:[#allocation8 + $0x1b6c] sm:$0xf0]  ;;  %v14375_v34 = vld [vmem:[#allocation8 + $0x1b54] sm:$0xf]  ;;  %v14376_v60 = vld [vmem:[#allocation8 + $0x1b5c] sm:$0xf] }
 0x41f   :  { %7322 = vmatpush.bf16.msra.mxu3 %v12648_v47  ;;  %7335 = vmatpush.bf16.msrb.mxu0 %v12652_v4  ;;  %v12481_v47 = vld [vmem:[#allocation8 + $0x1a20] sm:$0xf0]  ;;  %v12520_v4 = vor.u32 %v14346_v16, %v12519_v45  ;;  %v12657_v8 = vld [vmem:[#allocation8 + $0x1b70] sm:$0xf0]  ;;  %v12665_v27 = vld [vmem:[#allocation8 + $0x1b78] sm:$0xf0]  ;;  %v12656_v45 = vor.u32 %v14379_v20, %v12655_v51 }
 0x420   :  { %v5873_v17 = vpop.f32.mrf.mxu2  ;;  %v12660_v16 = vor.u32 %v14375_v34, %v12657_v8  ;;  %v14343_v8 = vld [vmem:[#allocation8 + $0x1a54] sm:$0xf] }
 0x422   :  { %7297 = vmatpush.bf16.msra.mxu1 %v12608_v48  ;;  %7310 = vmatpush.bf16.msra.mxu2 %v12612_v42  ;;  %v14395_v48 = vld [vmem:[#allocation8 + $0x1bec] sm:$0xf0]  ;;  %v14391_v42 = vld [vmem:[#allocation8 + $0x1bd4] sm:$0xf] }
 0x423   :  { %7323 = vmatpush.bf16.msra.mxu3 %v12616_v58  ;;  %7336 = vmatpush.bf16.msrb.mxu0 %v12620_v37  ;;  %v5886_v43 = vpop.f32.mrf.mxu3  ;;  %v12480_v58 = vor.u32 %v14337_v56, %v12479_v32  ;;  %v12484_v37 = vor.u32 %v14333_v11, %v12481_v47  ;;  %v12720_v6 = vor.u32 %v14395_v48, %v12719_v41  ;;  %v12625_v56 = vld [vmem:[#allocation8 + $0x1b30] sm:$0xf0]  ;;  %v12631_v11 = vld [vmem:[#allocation8 + $0x1b18] sm:$0xf]  ;;  %v14363_v41 = vld [vmem:[#allocation8 + $0x1aec] sm:$0xf0] }
 0x424   :  { %v14372_v47 = vld [vmem:[#allocation8 + $0x1b34] sm:$0xf0] }
 0x426   :  { %7298 = vmatpush.bf16.msra.mxu1 %v12576_v7  ;;  %7311 = vmatpush.bf16.msra.mxu2 %v12580_v59  ;;  %v12724_v7 = vor.u32 %v14391_v42, %v12721_v36  ;;  %v12687_v59 = vld [vmem:[#allocation8 + $0x1b90] sm:$0xf]  ;;  %v12632_v42 = vor.u32 %v14372_v47, %v12631_v11  ;;  %v12503_v47 = vld [vmem:[#allocation8 + $0x1a18] sm:$0xf] }
 0x427   :  { %7324 = vmatpush.bf16.msra.mxu3 %v12584_v52  ;;  %7337 = vmatpush.bf16.msrb.mxu0 %v12588_v23  ;;  %v12732_v52 = vor.u32 %v14392_v30, %v12729_v25  ;;  %v14383_v23 = vld [vmem:[#allocation8 + $0x1b94] sm:$0xf]  ;;  %v12688_v5 = vor.u32 %v14387_v29, %v12687_v59  ;;  %v14360_v30 = vld [vmem:[#allocation8 + $0x1adc] sm:$0xf] }
 0x428   :  { %v12692_v9 = vor.u32 %v14383_v23, %v12689_v40  ;;  %v12601_v25 = vld [vmem:[#allocation8 + $0x1af8] sm:$0xf0]  ;;  %v14351_v29 = vld [vmem:[#allocation8 + $0x1a94] sm:$0xf] }
 0x429   :  { %v12604_v59 = vor.u32 %v14360_v30, %v12601_v25 }
 0x42a   :  { %7299 = vmatpush.bf16.msra.mxu1 %v12544_v31  ;;  %7312 = vmatpush.bf16.msra.mxu2 %v12548_v33  ;;  %v12696_v31 = vor.u32 %v14388_v0, %v12695_v49  ;;  %v12700_v33 = vor.u32 %v14384_v50, %v12697_v2  ;;  %v14356_v49 = vld [vmem:[#allocation8 + $0x1ab4] sm:$0xf0]  ;;  %v14352_v0 = vld [vmem:[#allocation8 + $0x1a9c] sm:$0xf] }
 0x42b   :  { %7325 = vmatpush.bf16.msra.mxu3 %v12552_v14  ;;  %7338 = vmatpush.bf16.msrb.mxu0 %v12556_v57  ;;  %v12663_v14 = vld [vmem:[#allocation8 + $0x1b58] sm:$0xf]  ;;  %v12569_v50 = vld [vmem:[#allocation8 + $0x1ab8] sm:$0xf0] }
 0x42c   :  { %v14380_v57 = vld [vmem:[#allocation8 + $0x1b74] sm:$0xf0] }
 0x42d   :  { %v12664_v32 = vor.u32 %v14380_v57, %v12663_v14  ;;  %v12529_v14 = vld [vmem:[#allocation8 + $0x1a70] sm:$0xf0]  ;;  %v12535_v57 = vld [vmem:[#allocation8 + $0x1a58] sm:$0xf] }
 0x42e   :  { %7300 = vmatpush.bf16.msra.mxu1 %v12512_v35  ;;  %7313 = vmatpush.bf16.msra.mxu2 %v12516_v28  ;;  %v12668_v35 = vor.u32 %v14376_v60, %v12665_v27  ;;  %v14367_v28 = vld [vmem:[#allocation8 + $0x1b14] sm:$0xf]  ;;  %v14348_v60 = vld [vmem:[#allocation8 + $0x1a74] sm:$0xf0]  ;;  %v14344_v27 = vld [vmem:[#allocation8 + $0x1a5c] sm:$0xf]  ;;  %v12532_v63 = vor.u32 %v14343_v8, %v12529_v14 }
 0x42f   :  { %7326 = vmatpush.bf16.msra.mxu3 %v12520_v4  ;;  %7339 = vmatpush.bf16.msrb.mxu0 %v12524_v46  ;;  %v14368_v4 = vld [vmem:[#allocation8 + $0x1b1c] sm:$0xf]  ;;  %v12628_v43 = vor.u32 %v14367_v28, %v12625_v56  ;;  %v12536_v28 = vor.u32 %v14348_v60, %v12535_v57  ;;  %v14438_v8 = vld [vmem:[#allocation8 + $0x1d4c] sm:$0xf] }
 0x430   :  { %v12633_v46 = vld [vmem:[#allocation8 + $0x1b38] sm:$0xf0]  ;;  %v12905_v14 = vld [vmem:[#allocation8 + $0x1d68] sm:$0xf0] }
 0x431   :  { %v12636_v36 = vor.u32 %v14368_v4, %v12633_v46  ;;  %v14340_v4 = vld [vmem:[#allocation8 + $0x1a34] sm:$0xf0]  ;;  %v14336_v46 = vld [vmem:[#allocation8 + $0x1a1c] sm:$0xf] }
 0x432   :  { %7301 = vmatpush.bf16.msra.mxu1 %v12480_v58  ;;  %7314 = vmatpush.bf16.msra.mxu2 %v12484_v37  ;;  %v6305_v17 = vpop.f32.mrf.mxu1  ;;  %v12593_v58 = vld [vmem:[#allocation8 + $0x1af0] sm:$0xf0]  ;;  %v12599_v37 = vld [vmem:[#allocation8 + $0x1ad8] sm:$0xf]  ;;  %v12504_v30 = vor.u32 %v14340_v4, %v12503_v47 }
 0x433   :  { %7327 = vmatpush.bf16.msra.mxu3 %v12488_v26  ;;  %7340 = vmatpush.bf16.msrb.mxu0 %v12492_v44  ;;  %v15617_v38 = vadd.f32 %v6305_v17, %v15582_v13  ;;  %v12592_v13 = vor.u32 %v14363_v41, %v12591_v12  ;;  %v12596_v26 = vor.u32 %v14359_v39, %v12593_v58  ;;  %v12559_v44 = vld [vmem:[#allocation8 + $0x1a90] sm:$0xf]  ;;  %v14453_v12 = vld [vmem:[#allocation8 + $0x1dc4] sm:$0xf]  ;;  %v14458_v58 = vld [vmem:[#allocation8 + $0x1de4] sm:$0xf0] }
 0x434   :  { %v12961_v41 = vld [vmem:[#allocation8 + $0x1de0] sm:$0xf0] }
 0x435   :  { %7302 = vmatmul.bf16.vlgmr.msra.gmra.mxu1 %v15610_v62  ;;  %7315 = vmatmul.bf16.vlgmr.msra.gmra.mxu2 %v15610_v62  ;;  %v6344_v15 = vpop.f32.mrf.mxu0 }
 0x436   :  { %7346 = vmatpush.bf16.msrb.mxu1 %v12720_v6  ;;  %7359 = vmatpush.bf16.msrb.mxu2 %v12724_v7  ;;  %v15620_v48 = vadd.f32 %v6344_v15, %v15585_v1  ;;  %v14355_v6 = vld [vmem:[#allocation8 + $0x1aac] sm:$0xf0]  ;;  %v12600_v7 = vor.u32 %v14364_v22, %v12599_v37  ;;  %v12505_v15 = vld [vmem:[#allocation8 + $0x1a38] sm:$0xf0]  ;;  %v14454_v37 = vld [vmem:[#allocation8 + $0x1dcc] sm:$0xf] }
 0x437   :  { %7372 = vmatpush.bf16.msrb.mxu3 %v12728_v24  ;;  %7385 = vmatpush.bf16.msra.mxu0 %v12732_v52  ;;  %v12561_v24 = vld [vmem:[#allocation8 + $0x1ab0] sm:$0xf0]  ;;  %v12567_v52 = vld [vmem:[#allocation8 + $0x1a98] sm:$0xf]  ;;  %v12560_v51 = vor.u32 %v14355_v6, %v12559_v44  ;;  %v12969_v22 = vld [vmem:[#allocation8 + $0x1de8] sm:$0xf0]  ;;  %v12508_v25 = vor.u32 %v14336_v46, %v12505_v15 }
 0x438   :  { %7328 = vmatmul.bf16.vlgmr.msra.gmra.mxu3 %v15610_v62  ;;  %7341 = vmatmul.bf16.vlgmr.msrb.gmra.mxu0 %v15610_v62  ;;  %v6318_v1 = vpop.f32.mrf.mxu2  ;;  %v12564_v20 = vor.u32 %v14351_v29, %v12561_v24  ;;  %v12568_v34 = vor.u32 %v14356_v49, %v12567_v52  ;;  %v12927_v44 = vld [vmem:[#allocation8 + $0x1d80] sm:$0xf]  ;;  %v12929_v29 = vld [vmem:[#allocation8 + $0x1da0] sm:$0xf0]  ;;  %v12935_v24 = vld [vmem:[#allocation8 + $0x1d88] sm:$0xf] }
 0x439   :  { %v15623_v23 = vadd.f32 %v6318_v1, %v15588_v18  ;;  %v12572_v18 = vor.u32 %v14352_v0, %v12569_v50  ;;  %v14449_v6 = vld [vmem:[#allocation8 + $0x1d9c] sm:$0xf0]  ;;  %v14445_v1 = vld [vmem:[#allocation8 + $0x1d84] sm:$0xf]  ;;  %v14450_v52 = vld [vmem:[#allocation8 + $0x1da4] sm:$0xf0] }
 0x43a   :  { %7347 = vmatpush.bf16.msrb.mxu1 %v12688_v5  ;;  %7360 = vmatpush.bf16.msrb.mxu2 %v12692_v9  ;;  %v6307_v5 = vpop.f32.mrf.mxu1  ;;  %v12937_v49 = vld [vmem:[#allocation8 + $0x1da8] sm:$0xf0]  ;;  %v12928_v0 = vor.u32 %v14449_v6, %v12927_v44  ;;  %v12932_v50 = vor.u32 %v14445_v1, %v12929_v29  ;;  %v14425_v15 = vld [vmem:[#allocation8 + $0x1cdc] sm:$0xf0]  ;;  %v14413_v44 = vld [vmem:[#allocation8 + $0x1c84] sm:$0xf] }
 0x43b   :  { %7373 = vmatpush.bf16.msrb.mxu3 %v12696_v31  ;;  %7386 = vmatpush.bf16.msra.mxu0 %v12700_v33  ;;  %v6331_v40 = vpop.f32.mrf.mxu3  ;;  %v12527_v31 = vld [vmem:[#allocation8 + $0x1a50] sm:$0xf]  ;;  %v12895_v5 = vld [vmem:[#allocation8 + $0x1d40] sm:$0xf]  ;;  %v12801_v6 = vld [vmem:[#allocation8 + $0x1ca0] sm:$0xf0] }
 0x43c   :  { %v15626_v2 = vadd.f32 %v6331_v40, %v15591_v55  ;;  %v14347_v33 = vld [vmem:[#allocation8 + $0x1a6c] sm:$0xf0]  ;;  %v14446_v40 = vld [vmem:[#allocation8 + $0x1d8c] sm:$0xf]  ;;  %v14418_v29 = vld [vmem:[#allocation8 + $0x1ca4] sm:$0xf0] }
 0x43d   :  { %v6346_v9 = vpop.f32.mrf.mxu0  ;;  %v12495_v55 = vld [vmem:[#allocation8 + $0x1a10] sm:$0xf] }
 0x43e   :  { %7348 = vmatpush.bf16.msrb.mxu1 %v12656_v45  ;;  %7361 = vmatpush.bf16.msrb.mxu2 %v12660_v16  ;;  %v12537_v45 = vld [vmem:[#allocation8 + $0x1a78] sm:$0xf0]  ;;  %v12528_v16 = vor.u32 %v14347_v33, %v12527_v31  ;;  %v14441_v9 = vld [vmem:[#allocation8 + $0x1d5c] sm:$0xf0]  ;;  %v14437_v31 = vld [vmem:[#allocation8 + $0x1d44] sm:$0xf] }
 0x43f   :  { %7374 = vmatpush.bf16.msrb.mxu3 %v12664_v32  ;;  %7387 = vmatpush.bf16.msra.mxu0 %v12668_v35  ;;  %v14335_v32 = vld [vmem:[#allocation8 + $0x1a14] sm:$0xf]  ;;  %v12540_v56 = vor.u32 %v14344_v27, %v12537_v45  ;;  %v12897_v33 = vld [vmem:[#allocation8 + $0x1d60] sm:$0xf0]  ;;  %v12896_v57 = vor.u32 %v14441_v9, %v12895_v5  ;;  %v12863_v27 = vld [vmem:[#allocation8 + $0x1d00] sm:$0xf]  ;;  %v12804_v5 = vor.u32 %v14413_v44, %v12801_v6 }
 0x440   :  { %v12497_v35 = vld [vmem:[#allocation8 + $0x1a30] sm:$0xf0]  ;;  %v6320_v11 = vpop.f32.mrf.mxu2  ;;  %v12900_v60 = vor.u32 %v14437_v31, %v12897_v33  ;;  %v14433_v45 = vld [vmem:[#allocation8 + $0x1d1c] sm:$0xf0]  ;;  %v14405_v31 = vld [vmem:[#allocation8 + $0x1c44] sm:$0xf] }
 0x441   :  { %v12500_v39 = vor.u32 %v14335_v32, %v12497_v35  ;;  %v12871_v32 = vld [vmem:[#allocation8 + $0x1d08] sm:$0xf]  ;;  %v12864_v4 = vor.u32 %v14433_v45, %v12863_v27  ;;  %v12767_v9 = vld [vmem:[#allocation8 + $0x1c40] sm:$0xf]  ;;  %v12769_v33 = vld [vmem:[#allocation8 + $0x1c60] sm:$0xf0] }
 0x442   :  { %7349 = vmatpush.bf16.msrb.mxu1 %v12624_v53  ;;  %7362 = vmatpush.bf16.msrb.mxu2 %v12628_v43  ;;  %v12959_v53 = vld [vmem:[#allocation8 + $0x1dc0] sm:$0xf]  ;;  %v14434_v35 = vld [vmem:[#allocation8 + $0x1d24] sm:$0xf0]  ;;  %v14397_v45 = vld [vmem:[#allocation8 + $0x1c04] sm:$0xf] }
 0x443   :  { %7375 = vmatpush.bf16.msrb.mxu3 %v12632_v42  ;;  %7388 = vmatpush.bf16.msra.mxu0 %v12636_v36  ;;  %v6333_v17 = vpop.f32.mrf.mxu3  ;;  %v14457_v43 = vld [vmem:[#allocation8 + $0x1ddc] sm:$0xf0]  ;;  %v12967_v42 = vld [vmem:[#allocation8 + $0x1dc8] sm:$0xf]  ;;  %v12496_v36 = vor.u32 %v14339_v19, %v12495_v55  ;;  %v12865_v19 = vld [vmem:[#allocation8 + $0x1d20] sm:$0xf0] }
 0x444   :  { %v12831_v17 = vld [vmem:[#allocation8 + $0x1cc0] sm:$0xf]  ;;  %v12951_v44 = vld [vmem:[#allocation8 + $0x1d98] sm:$0xf] }
 0x445   :  { %v14401_v27 = vld [vmem:[#allocation8 + $0x1c1c] sm:$0xf0]  ;;  %v14452_v6 = vld [vmem:[#allocation8 + $0x1db4] sm:$0xf0] }
 0x446   :  { %7350 = vmatpush.bf16.msrb.mxu1 %v12592_v13  ;;  %7363 = vmatpush.bf16.msrb.mxu2 %v12596_v26  ;;  %v12960_v13 = vor.u32 %v14457_v43, %v12959_v53  ;;  %v12964_v26 = vor.u32 %v14453_v12, %v12961_v41  ;;  %v12872_v43 = vor.u32 %v14434_v35, %v12871_v32  ;;  %v14421_v41 = vld [vmem:[#allocation8 + $0x1cc4] sm:$0xf]  ;;  %v12743_v32 = vld [vmem:[#allocation8 + $0x1c08] sm:$0xf] }
 0x447   :  { %7376 = vmatpush.bf16.msrb.mxu3 %v12600_v7  ;;  %7389 = vmatpush.bf16.msra.mxu0 %v12604_v59  ;;  %v12968_v7 = vor.u32 %v14458_v58, %v12967_v42  ;;  %v12972_v59 = vor.u32 %v14454_v37, %v12969_v22  ;;  %v12833_v42 = vld [vmem:[#allocation8 + $0x1ce0] sm:$0xf0]  ;;  %v14422_v58 = vld [vmem:[#allocation8 + $0x1ccc] sm:$0xf]  ;;  %v14402_v35 = vld [vmem:[#allocation8 + $0x1c24] sm:$0xf0] }
 0x448   :  { %v12841_v37 = vld [vmem:[#allocation8 + $0x1ce8] sm:$0xf0]  ;;  %v12836_v22 = vor.u32 %v14421_v41, %v12833_v42  ;;  %v14460_v41 = vld [vmem:[#allocation8 + $0x1df4] sm:$0xf0]  ;;  %v14456_v42 = vld [vmem:[#allocation8 + $0x1ddc] sm:$0xf] }
 0x44a   :  { %7351 = vmatpush.bf16.msrb.mxu1 %v12560_v51  ;;  %7364 = vmatpush.bf16.msrb.mxu2 %v12564_v20  ;;  %v12936_v51 = vor.u32 %v14450_v52, %v12935_v24  ;;  %v12940_v20 = vor.u32 %v14446_v40, %v12937_v49  ;;  %v14414_v24 = vld [vmem:[#allocation8 + $0x1c8c] sm:$0xf] }
 0x44b   :  { %7377 = vmatpush.bf16.msrb.mxu3 %v12568_v34  ;;  %7390 = vmatpush.bf16.msra.mxu0 %v12572_v18  ;;  %v12903_v34 = vld [vmem:[#allocation8 + $0x1d48] sm:$0xf]  ;;  %v12809_v52 = vld [vmem:[#allocation8 + $0x1ca8] sm:$0xf0] }
 0x44c   :  { %v14442_v18 = vld [vmem:[#allocation8 + $0x1d64] sm:$0xf0] }
 0x44d   :  { %v12904_v55 = vor.u32 %v14442_v18, %v12903_v34  ;;  %v12775_v34 = vld [vmem:[#allocation8 + $0x1c48] sm:$0xf] }
 0x44e   :  { %7352 = vmatpush.bf16.msrb.mxu1 %v12528_v16  ;;  %7365 = vmatpush.bf16.msrb.mxu2 %v12532_v63  ;;  %v12908_v16 = vor.u32 %v14438_v8, %v12905_v14  ;;  %v14429_v63 = vld [vmem:[#allocation8 + $0x1d04] sm:$0xf]  ;;  %v14410_v18 = vld [vmem:[#allocation8 + $0x1c64] sm:$0xf0]  ;;  %v14406_v8 = vld [vmem:[#allocation8 + $0x1c4c] sm:$0xf] }
 0x44f   :  { %7378 = vmatpush.bf16.msrb.mxu3 %v12536_v28  ;;  %7391 = vmatpush.bf16.msra.mxu0 %v12540_v56  ;;  %v14430_v28 = vld [vmem:[#allocation8 + $0x1d0c] sm:$0xf]  ;;  %v12868_v46 = vor.u32 %v14429_v63, %v12865_v19 }
 0x450   :  { %v12873_v56 = vld [vmem:[#allocation8 + $0x1d28] sm:$0xf0] }
 0x451   :  { %v12876_v12 = vor.u32 %v14430_v28, %v12873_v56  ;;  %v12777_v14 = vld [vmem:[#allocation8 + $0x1c68] sm:$0xf0] }
 0x452   :  { %7353 = vmatpush.bf16.msrb.mxu1 %v12496_v36  ;;  %7366 = vmatpush.bf16.msrb.mxu2 %v12500_v39  ;;  %v6357_v11 = vpop.f32.mrf.mxu1  ;;  %v12839_v36 = vld [vmem:[#allocation8 + $0x1cc8] sm:$0xf]  ;;  %v12780_v63 = vor.u32 %v14406_v8, %v12777_v14  ;;  %v14398_v28 = vld [vmem:[#allocation8 + $0x1c0c] sm:$0xf]  ;;  %v12879_v8 = vld [vmem:[#allocation8 + $0x1d10] sm:$0xf] }
 0x453   :  { %7379 = vmatpush.bf16.msrb.mxu3 %v12504_v30  ;;  %7392 = vmatpush.bf16.msra.mxu0 %v12508_v25  ;;  %v14426_v39 = vld [vmem:[#allocation8 + $0x1ce4] sm:$0xf0]  ;;  %v12799_v30 = vld [vmem:[#allocation8 + $0x1c80] sm:$0xf]  ;;  %v14435_v14 = vld [vmem:[#allocation8 + $0x1d2c] sm:$0xf0] }
 0x454   :  { %v14417_v25 = vld [vmem:[#allocation8 + $0x1c9c] sm:$0xf0] }
 0x455   :  { %7354 = vmatmul.bf16.vlgmr.msrb.gmra.mxu1 %v15610_v62  ;;  %7367 = vmatmul.bf16.vlgmr.msrb.gmra.mxu2 %v15610_v62  ;;  %v6396_v47 = vpop.f32.mrf.mxu0 }
 0x456   :  { %7793 = vmatpush.bf16.msra.mxu1 %v12960_v13  ;;  %7806 = vmatpush.bf16.msra.mxu2 %v12964_v26  ;;  %v15636_v53 = vadd.f32 %v6396_v47, %v15601_v3  ;;  %v12840_v13 = vor.u32 %v14426_v39, %v12839_v36  ;;  %v12844_v26 = vor.u32 %v14422_v58, %v12841_v37  ;;  %v12975_v47 = vld [vmem:[#allocation8 + $0x1dd0] sm:$0xf]  ;;  %v12985_v36 = vld [vmem:[#allocation8 + $0x1df8] sm:$0xf0] }
 0x457   :  { %7819 = vmatpush.bf16.msra.mxu3 %v12968_v7  ;;  %7832 = vmatpush.bf16.msrb.mxu0 %v12972_v59  ;;  %v12807_v7 = vld [vmem:[#allocation8 + $0x1c88] sm:$0xf]  ;;  %v12744_v39 = vor.u32 %v14402_v35, %v12743_v32 }
 0x458   :  { %7380 = vmatmul.bf16.vlgmr.msrb.gmra.mxu3 %v15610_v62  ;;  %7393 = vmatmul.bf16.vlgmr.msra.gmra.mxu0 %v15610_v62  ;;  %v15633_v62 = vadd.f32 %v6357_v11, %v15598_v21  ;;  %v12832_v21 = vor.u32 %v14425_v15, %v12831_v17  ;;  %v6370_v3 = vpop.f32.mrf.mxu2  ;;  %v12745_v11 = vld [vmem:[#allocation8 + $0x1c28] sm:$0xf0]  ;;  %v12977_v17 = vld [vmem:[#allocation8 + $0x1df0] sm:$0xf0]  ;;  %v12983_v15 = vld [vmem:[#allocation8 + $0x1dd8] sm:$0xf] }
 0x459   :  { %v15639_v59 = vadd.f32 %v6370_v3, %v15604_v10  ;;  %v12812_v10 = vor.u32 %v14414_v24, %v12809_v52  ;;  %v12748_v58 = vor.u32 %v14398_v28, %v12745_v11  ;;  %v12945_v3 = vld [vmem:[#allocation8 + $0x1db0] sm:$0xf0]  ;;  %v12880_v28 = vor.u32 %v14435_v14, %v12879_v8  ;;  %v12847_v11 = vld [vmem:[#allocation8 + $0x1cd0] sm:$0xf] }
 0x45a   :  { %7794 = vmatpush.bf16.msra.mxu1 %v12928_v0  ;;  %7807 = vmatpush.bf16.msra.mxu2 %v12932_v50  ;;  %v6359_v49 = vpop.f32.mrf.mxu1  ;;  %v12800_v50 = vor.u32 %v14417_v25, %v12799_v30  ;;  %v14451_v30 = vld [vmem:[#allocation8 + $0x1dac] sm:$0xf0]  ;;  %v12984_v25 = vor.u32 %v14460_v41, %v12983_v15  ;;  %v14423_v15 = vld [vmem:[#allocation8 + $0x1cd4] sm:$0xf]  ;;  %v14428_v41 = vld [vmem:[#allocation8 + $0x1cf4] sm:$0xf0] }
 0x45b   :  { %7820 = vmatpush.bf16.msra.mxu3 %v12936_v51  ;;  %7833 = vmatpush.bf16.msrb.mxu0 %v12940_v20  ;;  %v6383_v1 = vpop.f32.mrf.mxu3  ;;  %v14409_v51 = vld [vmem:[#allocation8 + $0x1c5c] sm:$0xf0]  ;;  %v12808_v20 = vor.u32 %v14418_v29, %v12807_v7  ;;  %v14448_v7 = vld [vmem:[#allocation8 + $0x1d9c] sm:$0xf]  ;;  %v15645_v29 = vrot.slane %v15575_v54, 2 }
 0x45c   :  { %v15642_v40 = vadd.f32 %v6383_v1, %v15607_v61  ;;  %v12735_v61 = vld [vmem:[#allocation8 + $0x1c00] sm:$0xf]  ;;  %v12953_v1 = vld [vmem:[#allocation8 + $0x1db8] sm:$0xf0]  ;;  %v12911_v49 = vld [vmem:[#allocation8 + $0x1d50] sm:$0xf] }
 0x45d   :  { %v6398_v0 = vpop.f32.mrf.mxu0  ;;  %v14403_v14 = vld [vmem:[#allocation8 + $0x1c2c] sm:$0xf0] }
 0x45e   :  { %7795 = vmatpush.bf16.msra.mxu1 %v12896_v57  ;;  %7808 = vmatpush.bf16.msra.mxu2 %v12900_v60  ;;  %v12768_v57 = vor.u32 %v14409_v51, %v12767_v9  ;;  %v12772_v60 = vor.u32 %v14405_v31, %v12769_v33  ;;  %v14443_v0 = vld [vmem:[#allocation8 + $0x1d6c] sm:$0xf0]  ;;  %v14439_v9 = vld [vmem:[#allocation8 + $0x1d54] sm:$0xf]  ;;  %v14440_v31 = vld [vmem:[#allocation8 + $0x1d5c] sm:$0xf] }
 0x45f   :  { %7821 = vmatpush.bf16.msra.mxu3 %v12904_v55  ;;  %7834 = vmatpush.bf16.msrb.mxu0 %v12908_v16  ;;  %v12737_v55 = vld [vmem:[#allocation8 + $0x1c20] sm:$0xf0]  ;;  %v12776_v16 = vor.u32 %v14410_v18, %v12775_v34  ;;  %v12913_v51 = vld [vmem:[#allocation8 + $0x1d70] sm:$0xf0]  ;;  %v12921_v33 = vld [vmem:[#allocation8 + $0x1d78] sm:$0xf0]  ;;  %v12912_v34 = vor.u32 %v14443_v0, %v12911_v49 }
 0x460   :  { %v6372_v19 = vpop.f32.mrf.mxu2  ;;  %v12916_v18 = vor.u32 %v14439_v9, %v12913_v51  ;;  %v14407_v51 = vld [vmem:[#allocation8 + $0x1c54] sm:$0xf] }
 0x462   :  { %7796 = vmatpush.bf16.msra.mxu1 %v12864_v4  ;;  %7809 = vmatpush.bf16.msra.mxu2 %v12868_v46  ;;  %v14459_v4 = vld [vmem:[#allocation8 + $0x1dec] sm:$0xf0]  ;;  %v14455_v46 = vld [vmem:[#allocation8 + $0x1dd4] sm:$0xf] }
 0x463   :  { %7822 = vmatpush.bf16.msra.mxu3 %v12872_v43  ;;  %7835 = vmatpush.bf16.msrb.mxu0 %v12876_v12  ;;  %v6385_v56 = vpop.f32.mrf.mxu3  ;;  %v12736_v43 = vor.u32 %v14401_v27, %v12735_v61  ;;  %v12740_v12 = vor.u32 %v14397_v45, %v12737_v55  ;;  %v12976_v37 = vor.u32 %v14459_v4, %v12975_v47  ;;  %v12881_v27 = vld [vmem:[#allocation8 + $0x1d30] sm:$0xf0]  ;;  %v12887_v45 = vld [vmem:[#allocation8 + $0x1d18] sm:$0xf]  ;;  %v14427_v47 = vld [vmem:[#allocation8 + $0x1cec] sm:$0xf0] }
 0x464   :  { %v14436_v55 = vld [vmem:[#allocation8 + $0x1d34] sm:$0xf0] }
 0x466   :  { %7797 = vmatpush.bf16.msra.mxu1 %v12832_v21  ;;  %7810 = vmatpush.bf16.msra.mxu2 %v12836_v22  ;;  %v12980_v21 = vor.u32 %v14455_v46, %v12977_v17  ;;  %v12943_v22 = vld [vmem:[#allocation8 + $0x1d90] sm:$0xf]  ;;  %v12888_v46 = vor.u32 %v14436_v55, %v12887_v45  ;;  %v12759_v55 = vld [vmem:[#allocation8 + $0x1c18] sm:$0xf] }
 0x467   :  { %7823 = vmatpush.bf16.msra.mxu3 %v12840_v13  ;;  %7836 = vmatpush.bf16.msrb.mxu0 %v12844_v26  ;;  %v12988_v13 = vor.u32 %v14456_v42, %v12985_v36  ;;  %v14447_v26 = vld [vmem:[#allocation8 + $0x1d94] sm:$0xf]  ;;  %v12944_v24 = vor.u32 %v14451_v30, %v12943_v22  ;;  %v14424_v42 = vld [vmem:[#allocation8 + $0x1cdc] sm:$0xf] }
 0x468   :  { %v12948_v52 = vor.u32 %v14447_v26, %v12945_v3  ;;  %v12857_v36 = vld [vmem:[#allocation8 + $0x1cf8] sm:$0xf0]  ;;  %v14415_v30 = vld [vmem:[#allocation8 + $0x1c94] sm:$0xf] }
 0x469   :  { %v12860_v22 = vor.u32 %v14424_v42, %v12857_v36 }
 0x46a   :  { %7798 = vmatpush.bf16.msra.mxu1 %v12800_v50  ;;  %7811 = vmatpush.bf16.msra.mxu2 %v12804_v5  ;;  %v12952_v50 = vor.u32 %v14452_v6, %v12951_v44  ;;  %v12956_v5 = vor.u32 %v14448_v7, %v12953_v1  ;;  %v14420_v44 = vld [vmem:[#allocation8 + $0x1cb4] sm:$0xf0]  ;;  %v14416_v6 = vld [vmem:[#allocation8 + $0x1c9c] sm:$0xf] }
 0x46b   :  { %7824 = vmatpush.bf16.msra.mxu3 %v12808_v20  ;;  %7837 = vmatpush.bf16.msrb.mxu0 %v12812_v10  ;;  %v12919_v20 = vld [vmem:[#allocation8 + $0x1d58] sm:$0xf]  ;;  %v12825_v7 = vld [vmem:[#allocation8 + $0x1cb8] sm:$0xf0] }
 0x46c   :  { %v14444_v10 = vld [vmem:[#allocation8 + $0x1d74] sm:$0xf0] }
 0x46d   :  { %v12920_v61 = vor.u32 %v14444_v10, %v12919_v20  ;;  %v12785_v20 = vld [vmem:[#allocation8 + $0x1c70] sm:$0xf0]  ;;  %v12791_v10 = vld [vmem:[#allocation8 + $0x1c58] sm:$0xf] }
 0x46e   :  { %7799 = vmatpush.bf16.msra.mxu1 %v12768_v57  ;;  %7812 = vmatpush.bf16.msra.mxu2 %v12772_v60  ;;  %v12924_v57 = vor.u32 %v14440_v31, %v12921_v33  ;;  %v14431_v60 = vld [vmem:[#allocation8 + $0x1d14] sm:$0xf]  ;;  %v14412_v31 = vld [vmem:[#allocation8 + $0x1c74] sm:$0xf0]  ;;  %v14408_v33 = vld [vmem:[#allocation8 + $0x1c5c] sm:$0xf]  ;;  %v12788_v8 = vor.u32 %v14407_v51, %v12785_v20 }
 0x46f   :  { %7825 = vmatpush.bf16.msra.mxu3 %v12776_v16  ;;  %7838 = vmatpush.bf16.msrb.mxu0 %v12780_v63  ;;  %v14432_v16 = vld [vmem:[#allocation8 + $0x1d1c] sm:$0xf]  ;;  %v12884_v56 = vor.u32 %v14431_v60, %v12881_v27  ;;  %v12792_v60 = vor.u32 %v14412_v31, %v12791_v10  ;;  %v14502_v51 = vld [vmem:[#allocation8 + $0x1f4c] sm:$0xf] }
 0x470   :  { %v12889_v63 = vld [vmem:[#allocation8 + $0x1d38] sm:$0xf0]  ;;  %v13161_v20 = vld [vmem:[#allocation8 + $0x1f68] sm:$0xf0] }
 0x471   :  { %v12892_v17 = vor.u32 %v14432_v16, %v12889_v63  ;;  %v14404_v16 = vld [vmem:[#allocation8 + $0x1c34] sm:$0xf0]  ;;  %v14400_v63 = vld [vmem:[#allocation8 + $0x1c1c] sm:$0xf] }
 0x472   :  { %7800 = vmatpush.bf16.msra.mxu1 %v12736_v43  ;;  %7813 = vmatpush.bf16.msra.mxu2 %v12740_v12  ;;  %v6803_v19 = vpop.f32.mrf.mxu1  ;;  %v12849_v43 = vld [vmem:[#allocation8 + $0x1cf0] sm:$0xf0]  ;;  %v12855_v12 = vld [vmem:[#allocation8 + $0x1cd8] sm:$0xf]  ;;  %v12760_v42 = vor.u32 %v14404_v16, %v12759_v55 }
 0x473   :  { %7826 = vmatpush.bf16.msra.mxu3 %v12744_v39  ;;  %7839 = vmatpush.bf16.msrb.mxu0 %v12748_v58  ;;  %v15652_v32 = vadd.f32 %v6803_v19, %v15617_v38  ;;  %v12848_v38 = vor.u32 %v14427_v47, %v12847_v11  ;;  %v12852_v39 = vor.u32 %v14423_v15, %v12849_v43  ;;  %v12815_v58 = vld [vmem:[#allocation8 + $0x1c90] sm:$0xf]  ;;  %v14517_v11 = vld [vmem:[#allocation8 + $0x1fc4] sm:$0xf]  ;;  %v14522_v43 = vld [vmem:[#allocation8 + $0x1fe4] sm:$0xf0] }
 0x474   :  { %v13217_v47 = vld [vmem:[#allocation8 + $0x1fe0] sm:$0xf0] }
 0x475   :  { %7801 = vmatmul.bf16.vlgmr.msra.gmra.mxu1 %v15645_v29  ;;  %7814 = vmatmul.bf16.vlgmr.msra.gmra.mxu2 %v15645_v29  ;;  %v6842_v35 = vpop.f32.mrf.mxu0 }
 0x476   :  { %7845 = vmatpush.bf16.msrb.mxu1 %v12976_v37  ;;  %7858 = vmatpush.bf16.msrb.mxu2 %v12980_v21  ;;  %v15655_v4 = vadd.f32 %v6842_v35, %v15620_v48  ;;  %v14419_v37 = vld [vmem:[#allocation8 + $0x1cac] sm:$0xf0]  ;;  %v12856_v21 = vor.u32 %v14428_v41, %v12855_v12  ;;  %v12761_v35 = vld [vmem:[#allocation8 + $0x1c38] sm:$0xf0]  ;;  %v14518_v12 = vld [vmem:[#allocation8 + $0x1fcc] sm:$0xf] }
 0x477   :  { %7871 = vmatpush.bf16.msrb.mxu3 %v12984_v25  ;;  %7884 = vmatpush.bf16.msra.mxu0 %v12988_v13  ;;  %v12817_v25 = vld [vmem:[#allocation8 + $0x1cb0] sm:$0xf0]  ;;  %v12823_v13 = vld [vmem:[#allocation8 + $0x1c98] sm:$0xf]  ;;  %v12816_v49 = vor.u32 %v14419_v37, %v12815_v58  ;;  %v13225_v41 = vld [vmem:[#allocation8 + $0x1fe8] sm:$0xf0]  ;;  %v12764_v36 = vor.u32 %v14400_v63, %v12761_v35 }
 0x478   :  { %7827 = vmatmul.bf16.vlgmr.msra.gmra.mxu3 %v15645_v29  ;;  %7840 = vmatmul.bf16.vlgmr.msrb.gmra.mxu0 %v15645_v29  ;;  %v6816_v48 = vpop.f32.mrf.mxu2  ;;  %v12820_v0 = vor.u32 %v14415_v30, %v12817_v25  ;;  %v12824_v9 = vor.u32 %v14420_v44, %v12823_v13  ;;  %v13183_v58 = vld [vmem:[#allocation8 + $0x1f80] sm:$0xf]  ;;  %v13185_v30 = vld [vmem:[#allocation8 + $0x1fa0] sm:$0xf0]  ;;  %v13191_v25 = vld [vmem:[#allocation8 + $0x1f88] sm:$0xf] }
 0x479   :  { %v15658_v26 = vadd.f32 %v6816_v48, %v15623_v23  ;;  %v12828_v23 = vor.u32 %v14416_v6, %v12825_v7  ;;  %v14513_v37 = vld [vmem:[#allocation8 + $0x1f9c] sm:$0xf0]  ;;  %v14509_v48 = vld [vmem:[#allocation8 + $0x1f84] sm:$0xf]  ;;  %v14514_v13 = vld [vmem:[#allocation8 + $0x1fa4] sm:$0xf0] }
 0x47a   :  { %7846 = vmatpush.bf16.msrb.mxu1 %v12944_v24  ;;  %7859 = vmatpush.bf16.msrb.mxu2 %v12948_v52  ;;  %v6805_v24 = vpop.f32.mrf.mxu1  ;;  %v13193_v44 = vld [vmem:[#allocation8 + $0x1fa8] sm:$0xf0]  ;;  %v13184_v6 = vor.u32 %v14513_v37, %v13183_v58  ;;  %v13188_v7 = vor.u32 %v14509_v48, %v13185_v30  ;;  %v14489_v35 = vld [vmem:[#allocation8 + $0x1edc] sm:$0xf0]  ;;  %v14477_v58 = vld [vmem:[#allocation8 + $0x1e84] sm:$0xf] }
 0x47b   :  { %7872 = vmatpush.bf16.msrb.mxu3 %v12952_v50  ;;  %7885 = vmatpush.bf16.msra.mxu0 %v12956_v5  ;;  %v6829_v3 = vpop.f32.mrf.mxu3  ;;  %v12783_v50 = vld [vmem:[#allocation8 + $0x1c50] sm:$0xf]  ;;  %v13151_v24 = vld [vmem:[#allocation8 + $0x1f40] sm:$0xf]  ;;  %v13057_v37 = vld [vmem:[#allocation8 + $0x1ea0] sm:$0xf0] }
 0x47c   :  { %v15661_v1 = vadd.f32 %v6829_v3, %v15626_v2  ;;  %v14411_v5 = vld [vmem:[#allocation8 + $0x1c6c] sm:$0xf0]  ;;  %v14510_v3 = vld [vmem:[#allocation8 + $0x1f8c] sm:$0xf]  ;;  %v14482_v30 = vld [vmem:[#allocation8 + $0x1ea4] sm:$0xf0] }
 0x47d   :  { %v6844_v52 = vpop.f32.mrf.mxu0  ;;  %v12751_v2 = vld [vmem:[#allocation8 + $0x1c10] sm:$0xf] }
 0x47e   :  { %7847 = vmatpush.bf16.msrb.mxu1 %v12912_v34  ;;  %7860 = vmatpush.bf16.msrb.mxu2 %v12916_v18  ;;  %v12793_v34 = vld [vmem:[#allocation8 + $0x1c78] sm:$0xf0]  ;;  %v12784_v18 = vor.u32 %v14411_v5, %v12783_v50  ;;  %v14505_v52 = vld [vmem:[#allocation8 + $0x1f5c] sm:$0xf0]  ;;  %v14501_v50 = vld [vmem:[#allocation8 + $0x1f44] sm:$0xf] }
 0x47f   :  { %7873 = vmatpush.bf16.msrb.mxu3 %v12920_v61  ;;  %7886 = vmatpush.bf16.msra.mxu0 %v12924_v57  ;;  %v14399_v61 = vld [vmem:[#allocation8 + $0x1c14] sm:$0xf]  ;;  %v12796_v27 = vor.u32 %v14408_v33, %v12793_v34  ;;  %v13153_v5 = vld [vmem:[#allocation8 + $0x1f60] sm:$0xf0]  ;;  %v13152_v10 = vor.u32 %v14505_v52, %v13151_v24  ;;  %v13119_v33 = vld [vmem:[#allocation8 + $0x1f00] sm:$0xf]  ;;  %v13060_v24 = vor.u32 %v14477_v58, %v13057_v37 }
 0x480   :  { %v12753_v57 = vld [vmem:[#allocation8 + $0x1c30] sm:$0xf0]  ;;  %v6818_v45 = vpop.f32.mrf.mxu2  ;;  %v13156_v31 = vor.u32 %v14501_v50, %v13153_v5  ;;  %v14497_v34 = vld [vmem:[#allocation8 + $0x1f1c] sm:$0xf0]  ;;  %v14469_v50 = vld [vmem:[#allocation8 + $0x1e44] sm:$0xf] }
 0x481   :  { %v12756_v15 = vor.u32 %v14399_v61, %v12753_v57  ;;  %v13127_v61 = vld [vmem:[#allocation8 + $0x1f08] sm:$0xf]  ;;  %v13120_v16 = vor.u32 %v14497_v34, %v13119_v33  ;;  %v13023_v52 = vld [vmem:[#allocation8 + $0x1e40] sm:$0xf]  ;;  %v13025_v5 = vld [vmem:[#allocation8 + $0x1e60] sm:$0xf0] }
 0x482   :  { %7848 = vmatpush.bf16.msrb.mxu1 %v12880_v28  ;;  %7861 = vmatpush.bf16.msrb.mxu2 %v12884_v56  ;;  %v13215_v28 = vld [vmem:[#allocation8 + $0x1fc0] sm:$0xf]  ;;  %v14498_v57 = vld [vmem:[#allocation8 + $0x1f24] sm:$0xf0]  ;;  %v14461_v34 = vld [vmem:[#allocation8 + $0x1e04] sm:$0xf] }
 0x483   :  { %7874 = vmatpush.bf16.msrb.mxu3 %v12888_v46  ;;  %7887 = vmatpush.bf16.msra.mxu0 %v12892_v17  ;;  %v6831_v19 = vpop.f32.mrf.mxu3  ;;  %v14521_v56 = vld [vmem:[#allocation8 + $0x1fdc] sm:$0xf0]  ;;  %v13223_v46 = vld [vmem:[#allocation8 + $0x1fc8] sm:$0xf]  ;;  %v12752_v17 = vor.u32 %v14403_v14, %v12751_v2  ;;  %v13121_v14 = vld [vmem:[#allocation8 + $0x1f20] sm:$0xf0] }
 0x484   :  { %v13087_v19 = vld [vmem:[#allocation8 + $0x1ec0] sm:$0xf]  ;;  %v13207_v58 = vld [vmem:[#allocation8 + $0x1f98] sm:$0xf] }
 0x485   :  { %v14465_v33 = vld [vmem:[#allocation8 + $0x1e1c] sm:$0xf0]  ;;  %v14516_v37 = vld [vmem:[#allocation8 + $0x1fb4] sm:$0xf0] }
 0x486   :  { %7849 = vmatpush.bf16.msrb.mxu1 %v12848_v38  ;;  %7862 = vmatpush.bf16.msrb.mxu2 %v12852_v39  ;;  %v13216_v38 = vor.u32 %v14521_v56, %v13215_v28  ;;  %v13220_v39 = vor.u32 %v14517_v11, %v13217_v47  ;;  %v13128_v56 = vor.u32 %v14498_v57, %v13127_v61  ;;  %v14485_v47 = vld [vmem:[#allocation8 + $0x1ec4] sm:$0xf]  ;;  %v12999_v61 = vld [vmem:[#allocation8 + $0x1e08] sm:$0xf] }
 0x487   :  { %7875 = vmatpush.bf16.msrb.mxu3 %v12856_v21  ;;  %7888 = vmatpush.bf16.msra.mxu0 %v12860_v22  ;;  %v13224_v21 = vor.u32 %v14522_v43, %v13223_v46  ;;  %v13228_v22 = vor.u32 %v14518_v12, %v13225_v41  ;;  %v13089_v46 = vld [vmem:[#allocation8 + $0x1ee0] sm:$0xf0]  ;;  %v14486_v43 = vld [vmem:[#allocation8 + $0x1ecc] sm:$0xf]  ;;  %v14466_v57 = vld [vmem:[#allocation8 + $0x1e24] sm:$0xf0] }
 0x488   :  { %v13097_v12 = vld [vmem:[#allocation8 + $0x1ee8] sm:$0xf0]  ;;  %v13092_v41 = vor.u32 %v14485_v47, %v13089_v46  ;;  %v14524_v47 = vld [vmem:[#allocation8 + $0x1ff4] sm:$0xf0]  ;;  %v14520_v46 = vld [vmem:[#allocation8 + $0x1fdc] sm:$0xf] }
 0x48a   :  { %7850 = vmatpush.bf16.msrb.mxu1 %v12816_v49  ;;  %7863 = vmatpush.bf16.msrb.mxu2 %v12820_v0  ;;  %v13192_v49 = vor.u32 %v14514_v13, %v13191_v25  ;;  %v13196_v0 = vor.u32 %v14510_v3, %v13193_v44  ;;  %v14478_v25 = vld [vmem:[#allocation8 + $0x1e8c] sm:$0xf] }
 0x48b   :  { %7876 = vmatpush.bf16.msrb.mxu3 %v12824_v9  ;;  %7889 = vmatpush.bf16.msra.mxu0 %v12828_v23  ;;  %v13159_v9 = vld [vmem:[#allocation8 + $0x1f48] sm:$0xf]  ;;  %v13065_v13 = vld [vmem:[#allocation8 + $0x1ea8] sm:$0xf0] }
 0x48c   :  { %v14506_v23 = vld [vmem:[#allocation8 + $0x1f64] sm:$0xf0] }
 0x48d   :  { %v13160_v2 = vor.u32 %v14506_v23, %v13159_v9  ;;  %v13031_v9 = vld [vmem:[#allocation8 + $0x1e48] sm:$0xf] }
 0x48e   :  { %7851 = vmatpush.bf16.msrb.mxu1 %v12784_v18  ;;  %7864 = vmatpush.bf16.msrb.mxu2 %v12788_v8  ;;  %v13164_v18 = vor.u32 %v14502_v51, %v13161_v20  ;;  %v14493_v8 = vld [vmem:[#allocation8 + $0x1f04] sm:$0xf]  ;;  %v14474_v23 = vld [vmem:[#allocation8 + $0x1e64] sm:$0xf0]  ;;  %v14470_v51 = vld [vmem:[#allocation8 + $0x1e4c] sm:$0xf] }
 0x48f   :  { %7877 = vmatpush.bf16.msrb.mxu3 %v12792_v60  ;;  %7890 = vmatpush.bf16.msra.mxu0 %v12796_v27  ;;  %v14494_v60 = vld [vmem:[#allocation8 + $0x1f0c] sm:$0xf]  ;;  %v13124_v63 = vor.u32 %v14493_v8, %v13121_v14 }
 0x490   :  { %v13129_v27 = vld [vmem:[#allocation8 + $0x1f28] sm:$0xf0] }
 0x491   :  { %v13132_v11 = vor.u32 %v14494_v60, %v13129_v27  ;;  %v13033_v20 = vld [vmem:[#allocation8 + $0x1e68] sm:$0xf0] }
 0x492   :  { %7852 = vmatpush.bf16.msrb.mxu1 %v12752_v17  ;;  %7865 = vmatpush.bf16.msrb.mxu2 %v12756_v15  ;;  %v6855_v45 = vpop.f32.mrf.mxu1  ;;  %v13095_v17 = vld [vmem:[#allocation8 + $0x1ec8] sm:$0xf]  ;;  %v13036_v8 = vor.u32 %v14470_v51, %v13033_v20  ;;  %v14462_v60 = vld [vmem:[#allocation8 + $0x1e0c] sm:$0xf]  ;;  %v14499_v51 = vld [vmem:[#allocation8 + $0x1f2c] sm:$0xf0] }
 0x493   :  { %7878 = vmatpush.bf16.msrb.mxu3 %v12760_v42  ;;  %7891 = vmatpush.bf16.msra.mxu0 %v12764_v36  ;;  %v14490_v15 = vld [vmem:[#allocation8 + $0x1ee4] sm:$0xf0]  ;;  %v13055_v42 = vld [vmem:[#allocation8 + $0x1e80] sm:$0xf] }
 0x494   :  { %v14481_v36 = vld [vmem:[#allocation8 + $0x1e9c] sm:$0xf0] }
 0x495   :  { %7853 = vmatmul.bf16.vlgmr.msrb.gmra.mxu1 %v15645_v29  ;;  %7866 = vmatmul.bf16.vlgmr.msrb.gmra.mxu2 %v15645_v29  ;;  %v6894_v55 = vpop.f32.mrf.mxu0 }
 0x496   :  { %8292 = vmatpush.bf16.msra.mxu1 %v13216_v38  ;;  %8305 = vmatpush.bf16.msra.mxu2 %v13220_v39  ;;  %v15671_v28 = vadd.f32 %v6894_v55, %v15636_v53  ;;  %v13096_v38 = vor.u32 %v14490_v15, %v13095_v17  ;;  %v13100_v39 = vor.u32 %v14486_v43, %v13097_v12  ;;  %v13231_v55 = vld [vmem:[#allocation8 + $0x1fd0] sm:$0xf]  ;;  %v13241_v17 = vld [vmem:[#allocation8 + $0x1ff8] sm:$0xf0] }
 0x497   :  { %8318 = vmatpush.bf16.msra.mxu3 %v13224_v21  ;;  %8331 = vmatpush.bf16.msrb.mxu0 %v13228_v22  ;;  %v13063_v21 = vld [vmem:[#allocation8 + $0x1e88] sm:$0xf]  ;;  %v13000_v15 = vor.u32 %v14466_v57, %v12999_v61 }
 0x498   :  { %7879 = vmatmul.bf16.vlgmr.msrb.gmra.mxu3 %v15645_v29  ;;  %7892 = vmatmul.bf16.vlgmr.msra.gmra.mxu0 %v15645_v29  ;;  %v15668_v29 = vadd.f32 %v6855_v45, %v15633_v62  ;;  %v13088_v62 = vor.u32 %v14489_v35, %v13087_v19  ;;  %v6868_v53 = vpop.f32.mrf.mxu2  ;;  %v13001_v45 = vld [vmem:[#allocation8 + $0x1e28] sm:$0xf0]  ;;  %v13233_v19 = vld [vmem:[#allocation8 + $0x1ff0] sm:$0xf0]  ;;  %v13239_v35 = vld [vmem:[#allocation8 + $0x1fd8] sm:$0xf] }
 0x499   :  { %v15674_v22 = vadd.f32 %v6868_v53, %v15639_v59  ;;  %v13068_v59 = vor.u32 %v14478_v25, %v13065_v13  ;;  %v13004_v43 = vor.u32 %v14462_v60, %v13001_v45  ;;  %v13201_v53 = vld [vmem:[#allocation8 + $0x1fb0] sm:$0xf0]  ;;  %v14491_v45 = vld [vmem:[#allocation8 + $0x1eec] sm:$0xf0] }
 0x49a   :  { %8293 = vmatpush.bf16.msra.mxu1 %v13184_v6  ;;  %8306 = vmatpush.bf16.msra.mxu2 %v13188_v7  ;;  %v6857_v44 = vpop.f32.mrf.mxu1  ;;  %v13056_v7 = vor.u32 %v14481_v36, %v13055_v42  ;;  %v14515_v42 = vld [vmem:[#allocation8 + $0x1fac] sm:$0xf0]  ;;  %v13240_v36 = vor.u32 %v14524_v47, %v13239_v35  ;;  %v13105_v35 = vld [vmem:[#allocation8 + $0x1ef0] sm:$0xf0]  ;;  %v14488_v47 = vld [vmem:[#allocation8 + $0x1edc] sm:$0xf] }
 0x49b   :  { %8319 = vmatpush.bf16.msra.mxu3 %v13192_v49  ;;  %8332 = vmatpush.bf16.msrb.mxu0 %v13196_v0  ;;  %v6881_v48 = vpop.f32.mrf.mxu3  ;;  %v14473_v49 = vld [vmem:[#allocation8 + $0x1e5c] sm:$0xf0]  ;;  %v13064_v0 = vor.u32 %v14482_v30, %v13063_v21  ;;  %v14512_v21 = vld [vmem:[#allocation8 + $0x1f9c] sm:$0xf]  ;;  %v15680_v30 = vrot.slane %v15575_v54, 3 }
 0x49c   :  { %v15677_v3 = vadd.f32 %v6881_v48, %v15642_v40  ;;  %v12991_v40 = vld [vmem:[#allocation8 + $0x1e00] sm:$0xf]  ;;  %v13209_v48 = vld [vmem:[#allocation8 + $0x1fb8] sm:$0xf0]  ;;  %v13167_v44 = vld [vmem:[#allocation8 + $0x1f50] sm:$0xf] }
 0x49d   :  { %v6896_v6 = vpop.f32.mrf.mxu0 }
 0x49e   :  { %8294 = vmatpush.bf16.msra.mxu1 %v13152_v10  ;;  %8307 = vmatpush.bf16.msra.mxu2 %v13156_v31  ;;  %v13024_v10 = vor.u32 %v14473_v49, %v13023_v52  ;;  %v13028_v31 = vor.u32 %v14469_v50, %v13025_v5  ;;  %v14507_v6 = vld [vmem:[#allocation8 + $0x1f6c] sm:$0xf0]  ;;  %v14503_v52 = vld [vmem:[#allocation8 + $0x1f54] sm:$0xf]  ;;  %v14504_v50 = vld [vmem:[#allocation8 + $0x1f5c] sm:$0xf] }
 0x49f   :  { %8320 = vmatpush.bf16.msra.mxu3 %v13160_v2  ;;  %8333 = vmatpush.bf16.msrb.mxu0 %v13164_v18  ;;  %v12993_v2 = vld [vmem:[#allocation8 + $0x1e20] sm:$0xf0]  ;;  %v13032_v18 = vor.u32 %v14474_v23, %v13031_v9  ;;  %v13169_v49 = vld [vmem:[#allocation8 + $0x1f70] sm:$0xf0]  ;;  %v13177_v5 = vld [vmem:[#allocation8 + $0x1f78] sm:$0xf0]  ;;  %v13168_v54 = vor.u32 %v14507_v6, %v13167_v44 }
 0x4a0   :  { %v6870_v14 = vpop.f32.mrf.mxu2  ;;  %v13172_v9 = vor.u32 %v14503_v52, %v13169_v49  ;;  %v13135_v23 = vld [vmem:[#allocation8 + $0x1f10] sm:$0xf]  ;;  %v14471_v52 = vld [vmem:[#allocation8 + $0x1e54] sm:$0xf] }
 0x4a1   :  { %v13136_v57 = vor.u32 %v14499_v51, %v13135_v23  ;;  %v13039_v6 = vld [vmem:[#allocation8 + $0x1e50] sm:$0xf]  ;;  %v13041_v49 = vld [vmem:[#allocation8 + $0x1e70] sm:$0xf0] }
 0x4a2   :  { %8295 = vmatpush.bf16.msra.mxu1 %v13120_v16  ;;  %8308 = vmatpush.bf16.msra.mxu2 %v13124_v63  ;;  %v14523_v16 = vld [vmem:[#allocation8 + $0x1fec] sm:$0xf0]  ;;  %v14519_v63 = vld [vmem:[#allocation8 + $0x1fd4] sm:$0xf] }
 0x4a3   :  { %8321 = vmatpush.bf16.msra.mxu3 %v13128_v56  ;;  %8334 = vmatpush.bf16.msrb.mxu0 %v13132_v11  ;;  %v6883_v27 = vpop.f32.mrf.mxu3  ;;  %v12992_v56 = vor.u32 %v14465_v33, %v12991_v40  ;;  %v12996_v11 = vor.u32 %v14461_v34, %v12993_v2  ;;  %v13232_v12 = vor.u32 %v14523_v16, %v13231_v55  ;;  %v13143_v33 = vld [vmem:[#allocation8 + $0x1f18] sm:$0xf]  ;;  %v14496_v2 = vld [vmem:[#allocation8 + $0x1f1c] sm:$0xf]  ;;  %v14467_v23 = vld [vmem:[#allocation8 + $0x1e2c] sm:$0xf0] }
 0x4a4   :  { %v13180_v40 = vor.u32 %v14504_v50, %v13177_v5  ;;  %v14500_v34 = vld [vmem:[#allocation8 + $0x1f34] sm:$0xf0]  ;;  %v13103_v27 = vld [vmem:[#allocation8 + $0x1ed0] sm:$0xf]  ;;  %v14472_v50 = vld [vmem:[#allocation8 + $0x1e5c] sm:$0xf] }
 0x4a5   :  { %v13144_v16 = vor.u32 %v14500_v34, %v13143_v33  ;;  %v13049_v5 = vld [vmem:[#allocation8 + $0x1e78] sm:$0xf0]  ;;  %v13015_v33 = vld [vmem:[#allocation8 + $0x1e18] sm:$0xf] }
 0x4a6   :  { %8296 = vmatpush.bf16.msra.mxu1 %v13088_v62  ;;  %8309 = vmatpush.bf16.msra.mxu2 %v13092_v41  ;;  %v13236_v62 = vor.u32 %v14519_v63, %v13233_v19  ;;  %v13199_v41 = vld [vmem:[#allocation8 + $0x1f90] sm:$0xf]  ;;  %v14487_v19 = vld [vmem:[#allocation8 + $0x1ed4] sm:$0xf] }
 0x4a7   :  { %8322 = vmatpush.bf16.msra.mxu3 %v13096_v38  ;;  %8335 = vmatpush.bf16.msrb.mxu0 %v13100_v39  ;;  %v13244_v38 = vor.u32 %v14520_v46, %v13241_v17  ;;  %v14511_v39 = vld [vmem:[#allocation8 + $0x1f94] sm:$0xf]  ;;  %v13200_v25 = vor.u32 %v14515_v42, %v13199_v41  ;;  %v13113_v46 = vld [vmem:[#allocation8 + $0x1ef8] sm:$0xf0]  ;;  %v13108_v17 = vor.u32 %v14487_v19, %v13105_v35 }
 0x4a8   :  { %v13204_v13 = vor.u32 %v14511_v39, %v13201_v53  ;;  %v14479_v41 = vld [vmem:[#allocation8 + $0x1e94] sm:$0xf]  ;;  %v14484_v53 = vld [vmem:[#allocation8 + $0x1eb4] sm:$0xf0] }
 0x4a9   :  { %v13073_v42 = vld [vmem:[#allocation8 + $0x1eb0] sm:$0xf0] }
 0x4aa   :  { %8297 = vmatpush.bf16.msra.mxu1 %v13056_v7  ;;  %8310 = vmatpush.bf16.msra.mxu2 %v13060_v24  ;;  %v13208_v7 = vor.u32 %v14516_v37, %v13207_v58  ;;  %v13212_v24 = vor.u32 %v14512_v21, %v13209_v48  ;;  %v14480_v58 = vld [vmem:[#allocation8 + $0x1e9c] sm:$0xf]  ;;  %v13076_v44 = vor.u32 %v14479_v41, %v13073_v42  ;;  %v14540_v41 = vld [vmem:[#allocation13 + $0x78] sm:$0xff] }
 0x4ab   :  { %8323 = vmatpush.bf16.msra.mxu3 %v13064_v0  ;;  %8336 = vmatpush.bf16.msrb.mxu0 %v13068_v59  ;;  %v13175_v0 = vld [vmem:[#allocation8 + $0x1f58] sm:$0xf]  ;;  %v13081_v37 = vld [vmem:[#allocation8 + $0x1eb8] sm:$0xf0]  ;;  %v14548_v42 = vld [vmem:[#allocation13 + $0xb8] sm:$0xff] }
 0x4ac   :  { %v14508_v59 = vld [vmem:[#allocation8 + $0x1f74] sm:$0xf0] }
 0x4ad   :  { %v13176_v20 = vor.u32 %v14508_v59, %v13175_v0  ;;  %v13047_v0 = vld [vmem:[#allocation8 + $0x1e58] sm:$0xf] }
 0x4ae   :  { %8298 = vmatpush.bf16.msra.mxu1 %v13024_v10  ;;  %8311 = vmatpush.bf16.msra.mxu2 %v13028_v31  ;;  %v14495_v10 = vld [vmem:[#allocation8 + $0x1f14] sm:$0xf]  ;;  %v14476_v59 = vld [vmem:[#allocation8 + $0x1e74] sm:$0xf0] }
 0x4af   :  { %8324 = vmatpush.bf16.msra.mxu3 %v13032_v18  ;;  %8337 = vmatpush.bf16.msrb.mxu0 %v13036_v8  ;;  %v13137_v31 = vld [vmem:[#allocation8 + $0x1f30] sm:$0xf0]  ;;  %v13145_v18 = vld [vmem:[#allocation8 + $0x1f38] sm:$0xf0]  ;;  %v13048_v51 = vor.u32 %v14476_v59, %v13047_v0 }
 0x4b0   :  { %v13140_v60 = vor.u32 %v14495_v10, %v13137_v31  ;;  %v13148_v63 = vor.u32 %v14496_v2, %v13145_v18  ;;  %v14463_v10 = vld [vmem:[#allocation8 + $0x1e14] sm:$0xf]  ;;  %v14468_v2 = vld [vmem:[#allocation8 + $0x1e34] sm:$0xf0]  ;;  %v14464_v18 = vld [vmem:[#allocation8 + $0x1e1c] sm:$0xf] }
 0x4b1   :  { %v13009_v31 = vld [vmem:[#allocation8 + $0x1e30] sm:$0xf0]  ;;  %v14529_v0 = vld [vmem:[#allocation13 + $0x20] sm:$0xff] }
 0x4b2   :  { %8299 = vmatpush.bf16.msra.mxu1 %v12992_v56  ;;  %8312 = vmatpush.bf16.msra.mxu2 %v12996_v11  ;;  %v7303_v8 = vpop.f32.mrf.mxu1  ;;  %v13111_v56 = vld [vmem:[#allocation8 + $0x1ed8] sm:$0xf] }
 0x4b3   :  { %8325 = vmatpush.bf16.msra.mxu3 %v13000_v15  ;;  %8338 = vmatpush.bf16.msrb.mxu0 %v13004_v43  ;;  %v15687_v14 = vadd.f32 %v7303_v8, %v15652_v32  ;;  %v14492_v11 = vld [vmem:[#allocation8 + $0x1ef4] sm:$0xf0]  ;;  %v13104_v32 = vor.u32 %v14491_v45, %v13103_v27  ;;  %v13071_v15 = vld [vmem:[#allocation8 + $0x1e90] sm:$0xf]  ;;  %v13017_v8 = vld [vmem:[#allocation8 + $0x1e38] sm:$0xf0] }
 0x4b4   :  { %v14483_v43 = vld [vmem:[#allocation8 + $0x1eac] sm:$0xf0]  ;;  %v13020_v27 = vor.u32 %v14464_v18, %v13017_v8  ;;  %v14537_v59 = vld [vmem:[#allocation13 + $0x60] sm:$0xff]  ;;  %v14534_v18 = vld [vmem:[#allocation13 + $0x48] sm:$0xff] }
 0x4b5   :  { %8300 = vmatmul.bf16.vlgmr.msra.gmra.mxu1 %v15680_v30  ;;  %8313 = vmatmul.bf16.vlgmr.msra.gmra.mxu2 %v15680_v30  ;;  %v7342_v61 = vpop.f32.mrf.mxu0  ;;  %v14542_v8 = vld [vmem:[#allocation13 + $0x88] sm:$0xff] }
 0x4b6   :  { %8344 = vmatpush.bf16.msrb.mxu1 %v13232_v12  ;;  %8357 = vmatpush.bf16.msrb.mxu2 %v13236_v62  ;;  %v15690_v55 = vadd.f32 %v7342_v61, %v15655_v4  ;;  %v13112_v12 = vor.u32 %v14492_v11, %v13111_v56  ;;  %v13116_v62 = vor.u32 %v14488_v47, %v13113_v46 }
 0x4b7   :  { %8370 = vmatpush.bf16.msrb.mxu3 %v13240_v36  ;;  %8383 = vmatpush.bf16.msra.mxu0 %v13244_v38  ;;  %v13079_v36 = vld [vmem:[#allocation8 + $0x1e98] sm:$0xf] }
 0x4b8   :  { %8326 = vmatmul.bf16.vlgmr.msra.gmra.mxu3 %v15680_v30  ;;  %8339 = vmatmul.bf16.vlgmr.msrb.gmra.mxu0 %v15680_v30  ;;  %v7316_v4 = vpop.f32.mrf.mxu2 }
 0x4b9   :  { %v15693_v38 = vadd.f32 %v7316_v4, %v15658_v26  ;;  %v13084_v26 = vor.u32 %v14480_v58, %v13081_v37  ;;  %v14531_v58 = vld [vmem:[#allocation13 + $0x30] sm:$0xff] }
 0x4ba   :  { %8345 = vmatpush.bf16.msrb.mxu1 %v13200_v25  ;;  %8358 = vmatpush.bf16.msrb.mxu2 %v13204_v13  ;;  %v7305_v48 = vpop.f32.mrf.mxu1  ;;  %v13072_v13 = vor.u32 %v14483_v43, %v13071_v15  ;;  %v14547_v37 = vld [vmem:[#allocation13 + $0xb0] sm:$0xff] }
 0x4bb   :  { %8371 = vmatpush.bf16.msrb.mxu3 %v13208_v7  ;;  %8384 = vmatpush.bf16.msra.mxu0 %v13212_v24  ;;  %v7329_v39 = vpop.f32.mrf.mxu3  ;;  %v14475_v7 = vld [vmem:[#allocation8 + $0x1e6c] sm:$0xf0]  ;;  %v13080_v24 = vor.u32 %v14484_v53, %v13079_v36 }
 0x4bc   :  { %v15696_v21 = vadd.f32 %v7329_v39, %v15661_v1  ;;  %v13040_v1 = vor.u32 %v14475_v7, %v13039_v6  ;;  %v14556_v39 = vld [vmem:[#allocation13 + $0xf8] sm:$0xff]  ;;  %v14538_v6 = vld [vmem:[#allocation13 + $0x68] sm:$0xff] }
 0x4bd   :  { %v7344_v25 = vpop.f32.mrf.mxu0  ;;  %v14546_v7 = vld [vmem:[#allocation13 + $0xa8] sm:$0xff] }
 0x4be   :  { %8346 = vmatpush.bf16.msrb.mxu1 %v13168_v54  ;;  %8359 = vmatpush.bf16.msrb.mxu2 %v13172_v9  ;;  %v13044_v54 = vor.u32 %v14471_v52, %v13041_v49  ;;  %v13007_v9 = vld [vmem:[#allocation8 + $0x1e10] sm:$0xf] }
 0x4bf   :  { %8372 = vmatpush.bf16.msrb.mxu3 %v13176_v20  ;;  %8385 = vmatpush.bf16.msra.mxu0 %v13180_v40  ;;  %v13052_v20 = vor.u32 %v14472_v50, %v13049_v5  ;;  %v13008_v61 = vor.u32 %v14467_v23, %v13007_v9  ;;  %v14545_v50 = vld [vmem:[#allocation13 + $0xa0] sm:$0xff]  ;;  %v14536_v9 = vld [vmem:[#allocation13 + $0x58] sm:$0xff] }
 0x4c0   :  { %v7318_v40 = vpop.f32.mrf.mxu2  ;;  %v14544_v23 = vld [vmem:[#allocation13 + $0x98] sm:$0xff] }
 0x4c2   :  { %8347 = vmatpush.bf16.msrb.mxu1 %v13136_v57  ;;  %8360 = vmatpush.bf16.msrb.mxu2 %v13140_v60  ;;  %v13012_v57 = vor.u32 %v14463_v10, %v13009_v31  ;;  %v13016_v60 = vor.u32 %v14468_v2, %v13015_v33  ;;  %v14527_v10 = vld [vmem:[#allocation13 + $0x10] sm:$0xff]  ;;  %v14526_v2 = vld [vmem:[#allocation13 + $0x8] sm:$0xff] }
 0x4c3   :  { %8373 = vmatpush.bf16.msrb.mxu3 %v13144_v16  ;;  %8386 = vmatpush.bf16.msra.mxu0 %v13148_v63  ;;  %v7331_v34 = vpop.f32.mrf.mxu3  ;;  %v14535_v31 = vld [vmem:[#allocation13 + $0x50] sm:$0xff] }
 0x4c4   :  { %v14543_v33 = vld [vmem:[#allocation13 + $0x90] sm:$0xff] }
 0x4c5   :  { %v14551_v34 = vld [vmem:[#allocation13 + $0xd0] sm:$0xff] }
 0x4c6   :  { %8348 = vmatpush.bf16.msrb.mxu1 %v13104_v32  ;;  %8361 = vmatpush.bf16.msrb.mxu2 %v13108_v17 }
 0x4c7   :  { %8374 = vmatpush.bf16.msrb.mxu3 %v13112_v12  ;;  %8387 = vmatpush.bf16.msra.mxu0 %v13116_v62 }
 0x4ca   :  { %8349 = vmatpush.bf16.msrb.mxu1 %v13072_v13  ;;  %8362 = vmatpush.bf16.msrb.mxu2 %v13076_v44  ;;  %v14555_v13 = vld [vmem:[#allocation13 + $0xf0] sm:$0xff]  ;;  %v14530_v44 = vld [vmem:[#allocation13 + $0x28] sm:$0xff] }
 0x4cb   :  { %8375 = vmatpush.bf16.msrb.mxu3 %v13080_v24  ;;  %8388 = vmatpush.bf16.msra.mxu0 %v13084_v26  ;;  %v14554_v24 = vld [vmem:[#allocation13 + $0xe8] sm:$0xff] }
 0x4ce   :  { %8350 = vmatpush.bf16.msrb.mxu1 %v13040_v1  ;;  %8363 = vmatpush.bf16.msrb.mxu2 %v13044_v54  ;;  %v14553_v1 = vld [vmem:[#allocation13 + $0xe0] sm:$0xff]  ;;  %v14528_v54 = vld [vmem:[#allocation13 + $0x18] sm:$0xff] }
 0x4cf   :  { %8376 = vmatpush.bf16.msrb.mxu3 %v13048_v51  ;;  %8389 = vmatpush.bf16.msra.mxu0 %v13052_v20  ;;  %v14552_v51 = vld [vmem:[#allocation13 + $0xd8] sm:$0xff] }
 0x4d2   :  { %8351 = vmatpush.bf16.msrb.mxu1 %v13008_v61  ;;  %8364 = vmatpush.bf16.msrb.mxu2 %v13012_v57  ;;  %v7355_v45 = vpop.f32.mrf.mxu1  ;;  %v14550_v61 = vld [vmem:[#allocation13 + $0xc8] sm:$0xff]  ;;  %v14525_v57 = vld [vmem:[#allocation13] sm:$0xff] }
 0x4d3   :  { %8377 = vmatpush.bf16.msrb.mxu3 %v13016_v60  ;;  %8390 = vmatpush.bf16.msra.mxu0 %v13020_v27  ;;  %v7402_v16 = vadd.f32 %v7355_v45, %v15668_v29  ;;  %v14533_v60 = vld [vmem:[#allocation13 + $0x40] sm:$0xff] }
 0x4d4   :  { %v14541_v27 = vld [vmem:[#allocation13 + $0x80] sm:$0xff] }
 0x4d5   :  { %8352 = vmatmul.bf16.vlgmr.msrb.gmra.mxu1 %v15680_v30  ;;  %8365 = vmatmul.bf16.vlgmr.msrb.gmra.mxu2 %v15680_v30  ;;  %v7394_v63 = vpop.f32.mrf.mxu0  ;;  %v14549_v45 = vld [vmem:[#allocation13 + $0xc0] sm:$0xff] }
 0x4d6   :  { %8378 = vmatmul.bf16.vlgmr.msrb.gmra.mxu3 %v15680_v30  ;;  %8391 = vmatmul.bf16.vlgmr.msra.gmra.mxu0 %v15680_v30  ;;  %v15704_v19 = vadd.f32 %v7394_v63, %v15671_v28  ;;  %v14572_v63 = vld [vmem:[#allocation13 + $0x178] sm:$0xff] }
 0x4d7   :  { %9034 = vmatpush.bf16.msra.mxu2 %v14540_v41  ;;  %9047 = vmatpush.bf16.msra.mxu3 %v14548_v42 }
 0x4d8   :  { %v7368_v35 = vpop.f32.mrf.mxu2  ;;  %9060 = vmatpush.bf16.msrb.mxu0 %v14556_v39  ;;  %v14562_v39 = vld [vmem:[#allocation13 + $0x128] sm:$0xff] }
 0x4d9   :  { %v15707_v56 = vadd.f32 %v7368_v35, %v15674_v22  ;;  %v14580_v35 = vld [vmem:[#allocation13 + $0x1b8] sm:$0xff] }
 0x4da   :  { %v7357_v46 = vpop.f32.mrf.mxu1 }
 0x4db   :  { %v7381_v11 = vpop.f32.mrf.mxu3  ;;  %9048 = vmatpush.bf16.msra.mxu3 %v14547_v37  ;;  %v15730_v46 = vld [vmem:[#allocation10] sm:$0xff] }
 0x4dc   :  { %v15710_v47 = vadd.f32 %v7381_v11, %v15677_v3  ;;  %v14532_v3 = vld [vmem:[#allocation13 + $0x38] sm:$0xff]  ;;  %9061 = vmatpush.bf16.msrb.mxu0 %v14555_v13  ;;  %v8406_v42 = vperm.slane %v15730_v46, 0  ;;  %v14586_v37 = vld [vmem:[#allocation13 + $0x1e8] sm:$0xff] }
 0x4dd   :  { %v7396_v32 = vpop.f32.mrf.mxu0  ;;  %9021 = vmatpush.bf16.msra.mxu1 %v14532_v3  ;;  %v14588_v11 = vld [vmem:[#allocation13 + $0x1f8] sm:$0xff] }
 0x4df   :  { %9049 = vmatpush.bf16.msra.mxu3 %v14546_v7 }
 0x4e0   :  { %v7370_v17 = vpop.f32.mrf.mxu2  ;;  %9062 = vmatpush.bf16.msrb.mxu0 %v14554_v24 }
 0x4e1   :  { %9022 = vmatpush.bf16.msra.mxu1 %v14531_v58  ;;  %v8409_v17 = vperm.slane %v15730_v46, 3 }
 0x4e3   :  { %v7383_v15 = vpop.f32.mrf.mxu3  ;;  %9050 = vmatpush.bf16.msra.mxu3 %v14545_v50 }
 0x4e4   :  { %9063 = vmatpush.bf16.msrb.mxu0 %v14553_v1  ;;  %v14563_v15 = vld [vmem:[#allocation13 + $0x130] sm:$0xff]  ;;  %v14585_v1 = vld [vmem:[#allocation13 + $0x1e0] sm:$0xff] }
 0x4e5   :  { %9023 = vmatpush.bf16.msra.mxu1 %v14530_v44 }
 0x4e7   :  { %9051 = vmatpush.bf16.msra.mxu3 %v14544_v23 }
 0x4e8   :  { %9064 = vmatpush.bf16.msrb.mxu0 %v14552_v51  ;;  %v14560_v51 = vld [vmem:[#allocation13 + $0x118] sm:$0xff] }
 0x4e9   :  { %9024 = vmatpush.bf16.msra.mxu1 %v14529_v0 }
 0x4eb   :  { %9052 = vmatpush.bf16.msra.mxu3 %v14543_v33  ;;  %v8438_v33 = vld [vmem:[#allocation11] sm:$0xff] }
 0x4ec   :  { %9065 = vmatpush.bf16.msrb.mxu0 %v14551_v34  ;;  %vm8440_vm7 = vcmp.ge.f32.partialorder %v8438_v33, 0.7 }
 0x4ed   :  { %9025 = vmatpush.bf16.msra.mxu1 %v14528_v54 }
 0x4ef   :  { %9053 = vmatpush.bf16.msra.mxu3 %v14542_v8 }
 0x4f0   :  { %9066 = vmatpush.bf16.msrb.mxu0 %v14550_v61 }
 0x4f1   :  { %9026 = vmatpush.bf16.msra.mxu1 %v14527_v10 }
 0x4f2   :  { %v7802_v30 = vpop.f32.mrf.mxu1 }
 0x4f3   :  { %v15713_v43 = vadd.f32 %v7802_v30, %v15687_v14  ;;  %9054 = vmatpush.bf16.msra.mxu3 %v14541_v27  ;;  %v14571_v30 = vld [vmem:[#allocation13 + $0x170] sm:$0xff] }
 0x4f4   :  { %9067 = vmatpush.bf16.msrb.mxu0 %v14549_v45  ;;  %v14559_v27 = vld [vmem:[#allocation13 + $0x110] sm:$0xff] }
 0x4f5   :  { %v7841_v29 = vpop.f32.mrf.mxu0  ;;  %9027 = vmatpush.bf16.msra.mxu1 %v14526_v2  ;;  %v14567_v45 = vld [vmem:[#allocation13 + $0x150] sm:$0xff] }
 0x4f6   :  { %v15716_v28 = vadd.f32 %v7841_v29, %v15690_v55  ;;  %v14539_v55 = vld [vmem:[#allocation13 + $0x70] sm:$0xff] }
 0x4f7   :  { %9035 = vmatpush.bf16.msra.mxu2 %v14539_v55  ;;  %9099 = vmatpush.bf16.msrb.mxu3 %v14580_v35  ;;  %v14579_v29 = vld [vmem:[#allocation13 + $0x1b0] sm:$0xff]  ;;  %v8407_v55 = vperm.slane %v15730_v46, 1 }
 0x4f8   :  { %v15718_v12 = vpop.f32.mrf.mxu2  ;;  %9112 = vmatpush.bf16.msra.mxu0 %v14588_v11  ;;  %v14583_v35 = vld [vmem:[#allocation13 + $0x1d0] sm:$0xff] }
 0x4f9   :  { %9028 = vmatpush.bf16.msra.mxu1 %v14525_v57  ;;  %v7898_v58 = vadd.f32 %v15718_v12, %v15693_v38  ;;  %v14561_v38 = vld [vmem:[#allocation13 + $0x120] sm:$0xff] }
 0x4fa   :  { %v7804_v62 = vpop.f32.mrf.mxu1  ;;  %v14569_v12 = vld [vmem:[#allocation13 + $0x160] sm:$0xff] }
 0x4fb   :  { %v15720_v22 = vpop.f32.mrf.mxu3  ;;  %9036 = vmatpush.bf16.msra.mxu2 %v14538_v6  ;;  %9100 = vmatpush.bf16.msrb.mxu3 %v14579_v29  ;;  %v14582_v29 = vld [vmem:[#allocation13 + $0x1c8] sm:$0xff] }
 0x4fd   :  { %v7843_v4 = vpop.f32.mrf.mxu0 }
 0x4fe   :  { %v14587_v4 = vld [vmem:[#allocation13 + $0x1f0] sm:$0xff] }
 0x4ff   :  { %9037 = vmatpush.bf16.msra.mxu2 %v14537_v59  ;;  %9113 = vmatpush.bf16.msra.mxu0 %v14587_v4  ;;  %v14577_v59 = vld [vmem:[#allocation13 + $0x1a0] sm:$0xff] }
 0x500   :  { %v7817_v36 = vpop.f32.mrf.mxu2  ;;  %v14557_v4 = vld [vmem:[#allocation13 + $0x100] sm:$0xff] }
 0x503   :  { %v7830_v53 = vpop.f32.mrf.mxu3  ;;  %9038 = vmatpush.bf16.msra.mxu2 %v14536_v9  ;;  %9114 = vmatpush.bf16.msra.mxu0 %v14586_v37 }
 0x504   :  { %v14570_v53 = vld [vmem:[#allocation13 + $0x168] sm:$0xff] }
 0x507   :  { %9039 = vmatpush.bf16.msra.mxu2 %v14535_v31  ;;  %9115 = vmatpush.bf16.msra.mxu0 %v14585_v1  ;;  %v14584_v31 = vld [vmem:[#allocation13 + $0x1d8] sm:$0xff] }
 0x50b   :  { %9040 = vmatpush.bf16.msra.mxu2 %v14534_v18  ;;  %9116 = vmatpush.bf16.msra.mxu0 %v14584_v31 }
 0x50f   :  { %9041 = vmatpush.bf16.msra.mxu2 %v14533_v60  ;;  %9117 = vmatpush.bf16.msra.mxu0 %v14583_v35 }
 0x512   :  { %v7854_v14 = vpop.f32.mrf.mxu1 }
 0x513   :  { %v15722_v48 = vadd.f32 %v7854_v14, %v7402_v16  ;;  %v14564_v16 = vld [vmem:[#allocation13 + $0x138] sm:$0xff]  ;;  %9086 = vmatpush.bf16.msrb.mxu2 %v14572_v63  ;;  %v14578_v14 = vld [vmem:[#allocation13 + $0x1a8] sm:$0xff]  ;;  %9118 = vmatpush.bf16.msra.mxu0 %v14582_v29 }
 0x514   :  { %9073 = vmatpush.bf16.msrb.mxu1 %v14564_v16  ;;  %9101 = vmatpush.bf16.msrb.mxu3 %v14578_v14  ;;  %v14575_v16 = vld [vmem:[#allocation13 + $0x190] sm:$0xff] }
 0x515   :  { %v15724_v25 = vpop.f32.mrf.mxu0 }
 0x516   :  { %v7904_v14 = vadd.f32 %v15724_v25, %v15704_v19  ;;  %v8411_v25 = vperm.slane %v15730_v46, 5 }
 0x517   :  { %9087 = vmatpush.bf16.msrb.mxu2 %v14571_v30  ;;  %v14574_v30 = vld [vmem:[#allocation13 + $0x188] sm:$0xff] }
 0x518   :  { %v15726_v26 = vpop.f32.mrf.mxu2  ;;  %9074 = vmatpush.bf16.msrb.mxu1 %v14563_v15  ;;  %9102 = vmatpush.bf16.msrb.mxu3 %v14577_v59  ;;  %v8412_v59 = vperm.slane %v15730_v46, 6 }
 0x519   :  { %v7902_v19 = vadd.f32 %v15726_v26, %v15707_v56 }
 0x51a   :  { %v7856_v49 = vpop.f32.mrf.mxu1 }
 0x51b   :  { %v15728_v52 = vpop.f32.mrf.mxu3  ;;  %9088 = vmatpush.bf16.msrb.mxu2 %v14570_v53 }
 0x51c   :  { %9075 = vmatpush.bf16.msrb.mxu1 %v14562_v39 }
 0x51d   :  { %v7895_v5 = vpop.f32.mrf.mxu0 }
 0x51f   :  { %9089 = vmatpush.bf16.msrb.mxu2 %v14569_v12 }
 0x520   :  { %v7869_v20 = vpop.f32.mrf.mxu2  ;;  %9076 = vmatpush.bf16.msrb.mxu1 %v14561_v38  ;;  %v7903_v38 = vadd.f32 %v15728_v52, %v15710_v47 }
 0x521   :  { %v14568_v20 = vld [vmem:[#allocation13 + $0x158] sm:$0xff] }
 0x523   :  { %v7882_v40 = vpop.f32.mrf.mxu3  ;;  %9090 = vmatpush.bf16.msrb.mxu2 %v14568_v20 }
 0x524   :  { %v14576_v40 = vld [vmem:[#allocation13 + $0x198] sm:$0xff]  ;;  %9077 = vmatpush.bf16.msrb.mxu1 %v14560_v51 }
 0x525   :  { %9103 = vmatpush.bf16.msrb.mxu3 %v14576_v40 }
 0x527   :  { %9091 = vmatpush.bf16.msrb.mxu2 %v14567_v45 }
 0x528   :  { %9078 = vmatpush.bf16.msrb.mxu1 %v14559_v27 }
 0x529   :  { %9104 = vmatpush.bf16.msrb.mxu3 %v14575_v16 }
 0x52d   :  { %9105 = vmatpush.bf16.msrb.mxu3 %v14574_v30 }
 0x532   :  { %v8301_v32 = vpop.f32.mrf.mxu1 }
 0x533   :  { %v8396_v41 = vadd.f32 %v8301_v32, %v15713_v43  ;;  %v8408_v43 = vperm.slane %v15730_v46, 2  ;;  %v14558_v32 = vld [vmem:[#allocation13 + $0x108] sm:$0xff] }
 0x534   :  { %9079 = vmatpush.bf16.msrb.mxu1 %v14558_v32 }
 0x535   :  { %v8340_v62 = vpop.f32.mrf.mxu0  ;;  %v8422_v44 = vadd.f32 %v8406_v42, %v8396_v41  ;;  %v14573_v41 = vld [vmem:[#allocation13 + $0x180] sm:$0xff] }
 0x536   :  { %v8399_v3 = vadd.f32 %v8340_v62, %v15716_v28  ;;  %v7899_v28 = vadd.f32 %v15720_v22, %v15696_v21  ;;  %v14581_v42 = vld [vmem:[#allocation13 + $0x1c0] sm:$0xff]  ;;  %9106 = vmatpush.bf16.msrb.mxu3 %v14573_v41 }
 0x537   :  { %v8430_v22 = vmax.f32 %v8422_v44, 0.0  ;;  %9119 = vmatpush.bf16.msra.mxu0 %v14581_v42  ;;  %v14604_v42 = vld [vmem:[#allocation14] ss:$0 sm:$0xff] }
 0x538   :  { %v8425_v36 = vadd.f32 %v8409_v17, %v8399_v3  ;;  %v8314_v13 = vpop.f32.mrf.mxu2  ;;  %v14566_v17 = vld [vmem:[#allocation13 + $0x148] sm:$0xff]  ;;  %v14565_v3 = vld [vmem:[#allocation13 + $0x140] sm:$0xff]  ;;  %9080 = vmatpush.bf16.msrb.mxu1 %v14557_v4 }
 0x539   :  { %v8397_v6 = vadd.f32 %v8314_v13, %v7898_v58  ;;  %v8442_v18 = vmul.f32 3.3333333, %v8430_v22  ;;  %9092 = vmatpush.bf16.msrb.mxu2 %v14566_v17 }
 0x53a   :  { %v8433_v24 = vmax.f32 %v8425_v36, 0.0  ;;  %v8303_v0 = vpop.f32.mrf.mxu1  ;;  %v8413_v36 = vperm.slane %v15730_v46, 7 }
 0x53b   :  { %v8327_v7 = vpop.f32.mrf.mxu3  ;;  %v8423_v50 = vadd.f32 %v8407_v55, %v8397_v6 }
 0x53c   :  { %v8398_v49 = vadd.f32 %v8327_v7, %v7899_v28  ;;  %v8445_v9 = vmul.f32 3.3333333, %v8433_v24 }
 0x53d   :  { %v8342_v5 = vpop.f32.mrf.mxu0  ;;  %v8431_v54 = vmax.f32 %v8423_v50, 0.0  ;;  %9093 = vmatpush.bf16.msrb.mxu2 %v14565_v3 }
 0x53e   :  { %v8424_v21 = vadd.f32 %v8408_v43, %v8398_v49  ;;  %v8460_v57 = vrot.slane %v8445_v9, 2  ;;  %v8410_v49 = vperm.slane %v15730_v46, 4 }
 0x53f   :  { %v8443_v10 = vmul.f32 3.3333333, %v8431_v54 }
 0x540   :  { %v8432_v23 = vmax.f32 %v8424_v21, 0.0  ;;  %v8316_v2 = vpop.f32.mrf.mxu2 }
 0x541   :  { %v8458_v8 = vrot.slane %v8443_v10, 6  ;;  %v8439_v10 = vld [vmem:[#allocation11 + $0x8] sm:$0xff] }
 0x542   :  { %v8444_v34 = vmul.f32 3.3333333, %v8432_v23  ;;  %vm8441_vm8 = vcmp.ge.f32.partialorder %v8439_v10, 0.7 }
 0x543   :  { %v8329_v61 = vpop.f32.mrf.mxu3  ;;  %v8464_v63 = vsel %vm349_vm0, %v8442_v18, %v8458_v8 }
 0x544   :  { %v8459_v60 = vrot.slane %v8444_v34, 4 }
 0x546   :  { %v8466_v11 = vsel %vm8465_vm5, %v8459_v60, %v8460_v57 }
 0x547   :  { %v8468_v15 = vsel %vm8467_vm6, %v8464_v63, %v8466_v11 }
 0x548   :  { %v8474_v62 = vsel %vm8440_vm7, %v8468_v15, 0.0 }
 0x549   :  { %8478 = vst [vmem:[#allocation1] ss:$4 sm:$0xff] %v8474_v62 }
 0x550   :  { %v8481_v39 = vld.sshfl [vmem:[#allocation1] sm:$0xff pattern:$0x73625140]  ;;  %v8482_v53 = vld.sshfl [vmem:[#allocation1 + $0x8] sm:$0xff pattern:$0x73625140] }
 0x551   :  { %v8497_v55 = vpack.c.bf16 %v8481_v39, %v8481_v39  ;;  %v8498_v37 = vpack.c.bf16 %v8482_v53, %v8482_v53  ;;  %v8483_v28 = vld.sshfl [vmem:[#allocation1 + $0x10] sm:$0xff pattern:$0x73625140]  ;;  %v8484_v13 = vld.sshfl [vmem:[#allocation1 + $0x18] sm:$0xff pattern:$0x73625140] }
 0x552   :  { %v8353_v58 = vpop.f32.mrf.mxu1  ;;  %v8499_v44 = vpack.c.bf16 %v8483_v28, %v8483_v28  ;;  %v8500_v6 = vpack.c.bf16 %v8484_v13, %v8484_v13 }
 0x553   :  { %v8392_v43 = vpop.f32.mrf.mxu0  ;;  %9029 = vmatmul.bf16.vlgmr.msra.gmra.mxu1 %v8497_v55  ;;  %9042 = vmatmul.bf16.vlgmr.msra.gmra.mxu2 %v8498_v37  ;;  %v8400_v24 = vadd.f32 %v8353_v58, %v15722_v48 }
 0x554   :  { %v8403_v7 = vadd.f32 %v8392_v43, %v7904_v14  ;;  %9055 = vmatmul.bf16.vlgmr.msra.gmra.mxu3 %v8499_v44  ;;  %9068 = vmatmul.bf16.vlgmr.msrb.gmra.mxu0 %v8500_v6 }
 0x555   :  { %v8426_v50 = vadd.f32 %v8410_v49, %v8400_v24 }
 0x556   :  { %v8429_v0 = vadd.f32 %v8413_v36, %v8403_v7 }
 0x557   :  { %v8434_v51 = vmax.f32 %v8426_v50, 0.0 }
 0x558   :  { %v8366_v12 = vpop.f32.mrf.mxu2  ;;  %v8437_v48 = vmax.f32 %v8429_v0, 0.0 }
 0x559   :  { %v8401_v5 = vadd.f32 %v8366_v12, %v7902_v19  ;;  %v8379_v1 = vpop.f32.mrf.mxu3  ;;  %v8446_v52 = vmul.f32 3.3333333, %v8434_v51 }
 0x55a   :  { %v8402_v21 = vadd.f32 %v8379_v1, %v7903_v38  ;;  %v8355_v22 = vpop.f32.mrf.mxu1  ;;  %v8449_v56 = vmul.f32 3.3333333, %v8437_v48 }
 0x55b   :  { %v8427_v54 = vadd.f32 %v8411_v25, %v8401_v5  ;;  %v8394_v9 = vpop.f32.mrf.mxu0 }
 0x55c   :  { %v8428_v23 = vadd.f32 %v8412_v59, %v8402_v21  ;;  %v8463_v34 = vrot.slane %v8449_v56, 2 }
 0x55d   :  { %v8435_v20 = vmax.f32 %v8427_v54, 0.0 }
 0x55e   :  { %v8436_v26 = vmax.f32 %v8428_v23, 0.0 }
 0x55f   :  { %v8447_v40 = vmul.f32 3.3333333, %v8435_v20 }
 0x560   :  { %v8448_v31 = vmul.f32 3.3333333, %v8436_v26  ;;  %v8368_v47 = vpop.f32.mrf.mxu2 }
 0x561   :  { %v8461_v33 = vrot.slane %v8447_v40, 6  ;;  %v8381_v46 = vpop.f32.mrf.mxu3 }
 0x562   :  { %v8462_v2 = vrot.slane %v8448_v31, 4 }
 0x563   :  { %v8469_v18 = vsel %vm349_vm0, %v8446_v52, %v8461_v33 }
 0x564   :  { %v8470_v8 = vsel %vm8465_vm5, %v8462_v2, %v8463_v34 }
 0x565   :  { %v8471_v61 = vsel %vm8467_vm6, %v8469_v18, %v8470_v8 }
 0x566   :  { %v8475_v57 = vsel %vm8441_vm8, %v8471_v61, 0.0 }
 0x567   :  { %8480 = vst [vmem:[#allocation1 + $0x20] ss:$4 sm:$0xff] %v8475_v57 }
 0x56e   :  { %v8485_v60 = vld.sshfl [vmem:[#allocation1 + $0x20] sm:$0xff pattern:$0x73625140]  ;;  %v8486_v27 = vld.sshfl [vmem:[#allocation1 + $0x28] sm:$0xff pattern:$0x73625140] }
 0x56f   :  { %v8501_v45 = vpack.c.bf16 %v8485_v60, %v8485_v60  ;;  %v8502_v16 = vpack.c.bf16 %v8486_v27, %v8486_v27  ;;  %v8487_v63 = vld.sshfl [vmem:[#allocation1 + $0x30] sm:$0xff pattern:$0x73625140]  ;;  %v8488_v35 = vld.sshfl [vmem:[#allocation1 + $0x38] sm:$0xff pattern:$0x73625140] }
 0x570   :  { %v8503_v11 = vpack.c.bf16 %v8487_v63, %v8487_v63  ;;  %v8504_v32 = vpack.c.bf16 %v8488_v35, %v8488_v35 }
 0x571   :  { %9081 = vmatmul.bf16.vlgmr.msrb.gmra.mxu1 %v8501_v45  ;;  %9094 = vmatmul.bf16.vlgmr.msrb.gmra.mxu2 %v8502_v16 }
 0x572   :  { %9107 = vmatmul.bf16.vlgmr.msrb.gmra.mxu3 %v8503_v11  ;;  %9120 = vmatmul.bf16.vlgmr.msra.gmra.mxu0 %v8504_v32 }
 0x5d0   :  { %v9030_v17 = vpop.f32.mrf.mxu1 }
 0x5d1   :  { %v9069_v15 = vpop.f32.mrf.mxu0  ;;  %v9031_v36 = vadd.f32 %v14604_v42, %v9030_v17 }
 0x5d6   :  { %v9043_v30 = vpop.f32.mrf.mxu2 }
 0x5d7   :  { %v9056_v29 = vpop.f32.mrf.mxu3  ;;  %v9044_v39 = vadd.f32 %v9043_v30, %v9031_v36 }
 0x5d8   :  { %v9032_v62 = vpop.f32.mrf.mxu1 }
 0x5d9   :  { %v9071_v4 = vpop.f32.mrf.mxu0  ;;  %v9057_v53 = vadd.f32 %v9056_v29, %v9044_v39 }
 0x5db   :  { %v9070_v55 = vadd.f32 %v9069_v15, %v9057_v53 }
 0x5de   :  { %v9045_v3 = vpop.f32.mrf.mxu2 }
 0x5df   :  { %v9058_v41 = vpop.f32.mrf.mxu3 }
 0x5ee   :  { %v9082_v14 = vpop.f32.mrf.mxu1 }
 0x5ef   :  { %v9121_v58 = vpop.f32.mrf.mxu0  ;;  %v9083_v37 = vadd.f32 %v9082_v14, %v9070_v55 }
 0x5f4   :  { %v9095_v28 = vpop.f32.mrf.mxu2 }
 0x5f5   :  { %v9096_v13 = vadd.f32 %v9095_v28, %v9083_v37  ;;  %v9108_v43 = vpop.f32.mrf.mxu3 }
 0x5f6   :  { %v9084_v44 = vpop.f32.mrf.mxu1 }
 0x5f7   :  { %v9109_v6 = vadd.f32 %v9108_v43, %v9096_v13  ;;  %v9123_v7 = vpop.f32.mrf.mxu0 }
 0x5f9   :  { %v9122_v24 = vadd.f32 %v9121_v58, %v9109_v6 }
 0x5fb   :  { %9125 = vst [vmem:[#allocation16] sm:$0x3] %v9122_v24 }
 0x5fc   :  { %v9097_v49 = vpop.f32.mrf.mxu2  ;;  %9136 = dma.vmem_to_hbm [thread:$0]  %s9132_s12, 32, %s9134_s1, [#allocation4]  }
 0x5fd   :  { %v9110_v0 = vpop.f32.mrf.mxu3 }
 0x5fe   :  { %14833 = dma.done.wait [#allocation4], 32  }
 0x5ff   :  { %14834 = vsyncadd [#allocation4], 4294967264 }
 0x600   :  { %9141 = vsyncpa [#allocation3], 1 }
 0x601   :  { %9142 = vsyncpa [#allocation6], 1 }
 0x602   :  { %9143 = vsyncpa [#allocation9], 1 }
 0x603   :  { %9144 = vsyncpa [#allocation12], 1 }
 0x604   :  { %9145 = vsyncpa [#allocation15], 1 }
 0x605   :  { %9146 = vsyncpa [#allocation4], 1 }

</bundles_post_ra>
